<compile_context>
chip_gen: v7x
topology: tpu7x:2x2x1
jax: 0.10.0
libtpu: 0.0.40
codegen_flags: <defaults>
</compile_context>

<pallas_src>
import jax
import jax.numpy as jnp
from jax.experimental import pallas as pl
from jax.experimental.pallas import tpu as pltpu

BN_EPS = 1e-5   # nn.BatchNorm2d default eps
LANE = 128      # TPU lane width


def _round_up(x, m):
    return (x + m - 1) // m * m


def _im2col_valid(x_pad, K, stride, Ho, Wo):
    """(N, Hin, Win, Cin) zero-padded NHWC -> (N*Ho*Wo, K*K*Cin) patch matrix
    for the VALID Ho x Wo output grid.  No per-tap channel padding: the
    contraction axis is the real K*K*Cin (padded once by the caller)."""
    C = x_pad.shape[-1]
    taps = []
    for kh in range(K):
        for kw in range(K):
            taps.append(x_pad[:, kh:kh + (Ho - 1) * stride + 1:stride,
                                 kw:kw + (Wo - 1) * stride + 1:stride, :])
    return jnp.concatenate(taps, axis=-1).reshape(-1, K * K * C)


def _conv1_w_matrix(w_oikk, Kc_pad, Cp):
    """(Cout, Cin, K, K) torch weight -> (Kc_pad, Cp) bf16 matmul RHS with the
    real K*K*Cin contraction rows (zero-padded once) and lane-padded Cout."""
    co, ci, K, _ = w_oikk.shape
    w = jnp.transpose(w_oikk, (2, 3, 1, 0)).reshape(K * K * ci, co)
    w = jnp.pad(w, ((0, Kc_pad - K * K * ci), (0, Cp - co)))
    return w.astype(jnp.bfloat16)


def _conv2_w_stack(w_oikk, Cp):
    """(Cout, Cin, K, K) -> (K*K, Cp, Cp) bf16 per-tap weight slices for the
    shift-and-accumulate conv2."""
    co, ci, K, _ = w_oikk.shape
    w = jnp.transpose(w_oikk, (2, 3, 1, 0))                     # (K,K,Cin,Cout)
    w = jnp.pad(w, ((0, 0), (0, 0), (0, Cp - ci), (0, Cp - co)))
    return w.reshape(K * K, Cp, Cp).astype(jnp.bfloat16)


def _bn_vec(v, Cp):
    """Per-channel BN parameter -> (1, Cp) f32; padded lanes get 0 so padded
    output channels are exactly zero."""
    v = v.astype(jnp.float32)
    return jnp.pad(v, (0, Cp - v.shape[0])).reshape(1, Cp)


def _make_kernel(N, H1, W1, Hp, Wp, H2, W2, K, Cp, M1, M2, padding,
                 has_downsample):
    """Build the fused BasicBlock kernel (all shape params static)."""
    inv_m1 = 1.0 / M1     # BN1 population (valid conv1 outputs)
    inv_m2 = 1.0 / M2     # BN2 / downsample-BN population

    def kernel(*refs):
        if has_downsample:
            (p1_ref, w1_ref, g1_ref, b1_ref, w2_ref, g2_ref, b2_ref,
             pds_ref, wds_ref, gds_ref, bds_ref,
             o_ref, y1_scr, sum_scr, sq_scr, a1p_scr) = refs
        else:
            (p1_ref, w1_ref, g1_ref, b1_ref, w2_ref, g2_ref, b2_ref,
             res_ref, o_ref, y1_scr, sum_scr, sq_scr, a1p_scr) = refs

        g = pl.program_id(0)

        @pl.when(g == 0)
        def _():
            sum_scr[...] = jnp.zeros_like(sum_scr)
            sq_scr[...] = jnp.zeros_like(sq_scr)

        # ---- conv1 tile: one bf16 MXU matmul over the real K*K*Cin
        #      contraction, f32 accumulation.  p1 DMA for the next tile
        #      overlaps this matmul (BlockSpec double-buffering).
        y1 = jnp.dot(p1_ref[...], w1_ref[...],
                     preferred_element_type=jnp.float32)         # (tm1, Cp)
        y1_scr[g] = y1
        # One-pass batch stats.  Zero pad rows (if any) contribute exactly 0
        # to both sums; the divisor below is the true M1.
        # NOTE: E[y^2]-mean^2 can cancel catastrophically at large |mean|;
        # fine at these activation scales.
        sum_scr[...] += jnp.sum(y1, axis=0, keepdims=True)
        sq_scr[...] += jnp.sum(y1 * y1, axis=0, keepdims=True)

        @pl.when(g == pl.num_programs(0) - 1)
        def _():
            # ---- BN1 (training-mode batch stats) + ReLU, then straight to
            #      bf16 (the MXU operand dtype for conv2).
            mean1 = sum_scr[...] * inv_m1
            var1 = sq_scr[...] * inv_m1 - mean1 * mean1
            sc1 = g1_ref[...] * jax.lax.rsqrt(var1 + BN_EPS)
            sh1 = b1_ref[...] - mean1 * sc1
            Gn, tm1n = y1_scr.shape[0], y1_scr.shape[1]
            y1_all = y1_scr[...].reshape(Gn * tm1n, Cp)
            a1 = jnp.maximum(y1_all * sc1 + sh1, 0.0).astype(jnp.bfloat16)

            # ---- place valid a1 into a zeroed (N, Hp, Wp, Cp) scratch; the
            #      untouched ring IS conv2's zero padding.
            a1p_scr[...] = jnp.zeros_like(a1p_scr)
            a1p_scr[:, padding:padding + H1, padding:padding + W1, :] = (
                a1[:M1].reshape(N, H1, W1, Cp))

            # ---- conv2 as K*K shift-and-accumulate MXU matmuls: no (M2,K*K*Cp)
            #      patch matrix, a1 never leaves VMEM.
            acc = jnp.zeros((M2, Cp), jnp.float32)
            t = 0
            for kh in range(K):
                for kw in range(K):
                    slab = a1p_scr[:, kh:kh + H2, kw:kw + W2, :].reshape(M2, Cp)
                    acc = acc + jnp.dot(slab, w2_ref[t],
                                        preferred_element_type=jnp.float32)
                    t += 1

            # ---- BN2 (centered variance: acc is resident, second pass is cheap)
            mean2 = jnp.sum(acc, axis=0, keepdims=True) * inv_m2
            d2 = acc - mean2
            var2 = jnp.sum(d2 * d2, axis=0, keepdims=True) * inv_m2
            sc2 = g2_ref[...] * jax.lax.rsqrt(var2 + BN_EPS)
            y2 = d2 * sc2 + b2_ref[...]

            # ---- residual branch (identity, or fused 1x1-conv + BN downsample)
            if has_downsample:
                yd = jnp.dot(pds_ref[...], wds_ref[...],
                             preferred_element_type=jnp.float32)  # (M2, Cp)
                meand = jnp.sum(yd, axis=0, keepdims=True) * inv_m2
                dd = yd - meand
                vard = jnp.sum(dd * dd, axis=0, keepdims=True) * inv_m2
                scd = gds_ref[...] * jax.lax.rsqrt(vard + BN_EPS)
                residual = dd * scd + bds_ref[...]
            else:
                residual = res_ref[...].astype(jnp.float32)

            # ---- add + ReLU; lane-dense store (last dim = Cp = 128*k)
            o_ref[...] = jnp.maximum(y2 + residual, 0.0).astype(o_ref.dtype)

    return kernel


def basic_block_forward(x_nchw, params, *, stride, padding):
    """Pallas implementation of BasicBlock.forward.  Input/output are NCHW."""
    x = jnp.transpose(x_nchw, (0, 2, 3, 1)).astype(jnp.float32)  # -> NHWC
    N, H, W, Cin = x.shape
    w1 = params["conv1_w"]
    C_mid, K = w1.shape[0], w1.shape[-1]
    w2 = params["conv2_w"]
    C_out = w2.shape[0]

    # Geometry.
    H1 = (H + 2 * padding - K) // stride + 1      # conv1 output
    W1 = (W + 2 * padding - K) // stride + 1
    Hp = H1 + 2 * padding                         # conv1 output + conv2 halo
    Wp = W1 + 2 * padding
    H2 = Hp - K + 1                               # conv2 (= block) output
    W2 = Wp - K + 1
    M1 = N * H1 * W1                              # BN1 population
    M2 = N * H2 * W2                              # output pixels

    Cp = _round_up(max(C_mid, C_out, 1), LANE)    # output channels -> lane pad
    Kc = K * K * Cin                              # REAL conv1 contraction
    Kc_pad = _round_up(Kc, LANE)                  # padded once, not per tap

    # conv1 row tiling: >= 2 grid steps so the p1 DMA pipelines behind the MXU.
    G = max(2, -(-M1 // 256))
    tm1 = _round_up(-(-M1 // G), 8)
    M1_pad = tm1 * G

    # conv1 im2col over the VALID output grid only (zero rows for the pad tail:
    # they contribute exactly nothing to the BN1 sums).
    x_p = jnp.pad(x, ((0, 0), (padding, padding), (padding, padding), (0, 0)))
    p1 = _im2col_valid(x_p, K, stride, H1, W1)                      # (M1, Kc)
    p1 = jnp.pad(p1, ((0, M1_pad - M1), (0, Kc_pad - Kc))).astype(jnp.bfloat16)

    w1_m = _conv1_w_matrix(w1, Kc_pad, Cp)
    w2_s = _conv2_w_stack(w2, Cp)
    g1, b1 = _bn_vec(params["bn1_g"], Cp), _bn_vec(params["bn1_b"], Cp)
    g2, b2 = _bn_vec(params["bn2_g"], Cp), _bn_vec(params["bn2_b"], Cp)

    has_downsample = stride > 1
    inputs = [p1, w1_m, g1, b1, w2_s, g2, b2]
    if has_downsample:
        # 1x1 stride-s conv patches: strided spatial subsample of x.
        Ci_pad = _round_up(Cin, LANE)
        xs = x[:, 0:(H2 - 1) * stride + 1:stride,
                  0:(W2 - 1) * stride + 1:stride, :]                # (N,H2,W2,Cin)
        pds = jnp.pad(xs, ((0, 0), (0, 0), (0, 0), (0, Ci_pad - Cin)))
        wds_m = jnp.pad(params["ds_w"][:, :, 0, 0].T,
                        ((0, Ci_pad - Cin), (0, Cp - C_out))).astype(jnp.bfloat16)
        inputs += [pds.reshape(M2, Ci_pad).astype(jnp.bfloat16), wds_m,
                   _bn_vec(params["ds_g"], Cp), _bn_vec(params["ds_b"], Cp)]
    else:
        # Identity residual: same constraints the torch module implies.
        assert Cin == C_out and H == H2 and W == W2, \
            "identity residual requires matching shapes (as in torch)"
        res = jnp.pad(x, ((0, 0), (0, 0), (0, 0), (0, Cp - Cin)))
        inputs.append(res.reshape(M2, Cp).astype(jnp.bfloat16))     # bf16 DMA

    kernel = _make_kernel(N, H1, W1, Hp, Wp, H2, W2, K, Cp, M1, M2, padding,
                          has_downsample)

    def resident_spec(a):
        nd = a.ndim
        return pl.BlockSpec(a.shape, lambda g, nd=nd: (0,) * nd)

    in_specs = [pl.BlockSpec((tm1, Kc_pad), lambda g: (g, 0))]       # pipelined
    in_specs += [resident_spec(a) for a in inputs[1:]]               # fetched once

    out2d = pl.pallas_call(
        kernel,
        grid=(G,),
        in_specs=in_specs,
        out_specs=pl.BlockSpec((M2, Cp), lambda g: (0, 0)),
        out_shape=jax.ShapeDtypeStruct((M2, Cp), jnp.float32),
        scratch_shapes=[
            pltpu.VMEM((G, tm1, Cp), jnp.float32),      # raw conv1 output y1
            pltpu.VMEM((1, Cp), jnp.float32),           # BN1 running sum
            pltpu.VMEM((1, Cp), jnp.float32),           # BN1 running sum(y^2)
            pltpu.VMEM((N, Hp, Wp, Cp), jnp.bfloat16),  # a1 + zero halo (conv2 pad)
        ],
        compiler_params=pltpu.CompilerParams(
            dimension_semantics=("arbitrary",),   # grid axis carries BN1 stats
            vmem_limit_bytes=48 * 1024 * 1024),   # > v5e/v6e defaults, < v7x 64MiB
    )(*inputs)

    out = out2d.reshape(N, H2, W2, Cp)[..., :C_out]
    return jnp.transpose(out, (0, 3, 1, 2))                          # -> NCHW


# -------------------- plain-JAX f32 reference for validation --------------------

def _ref_conv(x, w_oikk, stride, padding):
    w = jnp.transpose(w_oikk, (2, 3, 1, 0))
    return jax.lax.conv_general_dilated(
        x, w, window_strides=(stride, stride),
        padding=((padding, padding), (padding, padding)),
        dimension_numbers=("NHWC", "HWIO", "NHWC"),
        precision=jax.lax.Precision.HIGHEST)


def _ref_bn(y, g, b):
    mean = jnp.mean(y, axis=(0, 1, 2), keepdims=True)
    var = jnp.mean((y - mean) ** 2, axis=(0, 1, 2), keepdims=True)
    return (y - mean) * jax.lax.rsqrt(var + BN_EPS) * g + b


def ref_basic_block(x_nchw, params, *, stride, padding):
    x = jnp.transpose(x_nchw, (0, 2, 3, 1))
    out = jax.nn.relu(_ref_bn(_ref_conv(x, params["conv1_w"], stride, padding),
                              params["bn1_g"], params["bn1_b"]))
    if stride > 1:
        residual = _ref_bn(_ref_conv(x, params["ds_w"], stride, 0),
                           params["ds_g"], params["ds_b"])
    else:
        residual = x
    out = jax.nn.relu(_ref_bn(_ref_conv(out, params["conv2_w"], 1, padding),
                              params["bn2_g"], params["bn2_b"]) + residual)
    return jnp.transpose(out, (0, 3, 1, 2))


def _make_params(key, Cin, Cout, K, stride):
    ks = jax.random.split(key, 9)
    p = {
        "conv1_w": 0.1 * jax.random.normal(ks[0], (Cout, Cin, K, K), jnp.float32),
        "bn1_g": 1.0 + 0.1 * jax.random.normal(ks[1], (Cout,), jnp.float32),
        "bn1_b": 0.1 * jax.random.normal(ks[2], (Cout,), jnp.float32),
        "conv2_w": 0.1 * jax.random.normal(ks[3], (Cout, Cout, K, K), jnp.float32),
        "bn2_g": 1.0 + 0.1 * jax.random.normal(ks[4], (Cout,), jnp.float32),
        "bn2_b": 0.1 * jax.random.normal(ks[5], (Cout,), jnp.float32),
    }
    if stride > 1:
        p["ds_w"] = 0.1 * jax.random.normal(ks[6], (Cout, Cin, 1, 1), jnp.float32)
        p["ds_g"] = 1.0 + 0.1 * jax.random.normal(ks[7], (Cout,), jnp.float32)
        p["ds_b"] = 0.1 * jax.random.normal(ks[8], (Cout,), jnp.float32)
    return p


if __name__ == "__main__":
    root = jax.random.PRNGKey(0)
    cases = [
        # (name,                 N, Cin, Cout, H,  W,  K, stride, padding)
        ("stride1_identity",     2, 8,   8,    16, 16, 3, 1,      1),
        ("stride2_downsample",   2, 8,   16,   16, 16, 3, 2,      1),
    ]
    for idx, (name, N, Cin, Cout, H, W, K, stride, padding) in enumerate(cases):
        kp, kx = jax.random.split(jax.random.fold_in(root, idx))
        params = _make_params(kp, Cin, Cout, K, stride)
        x = jax.random.normal(kx, (N, Cin, H, W), jnp.float32)

        out = jax.block_until_ready(
            basic_block_forward(x, params, stride=stride, padding=padding))
        ref = ref_basic_block(x, params, stride=stride, padding=padding)

        assert out.shape == ref.shape, (name, out.shape, ref.shape)
        max_err = float(jnp.max(jnp.abs(out - ref)))
        # bf16 MXU operands / bf16 intermediates with f32 accumulation ->
        # bf16-level tolerance vs the strict-f32 reference.
        assert jnp.allclose(out, ref, atol=5e-2, rtol=5e-2), (name, max_err)

    print("KERNEL_OK")
</pallas_src>

<mosaic_0001>
module attributes {stable_mosaic.version = 11 : i64} {
  func.func @kernel(%arg0: i32, %arg1: memref<256x128xbf16, #tpu.memory_space<vmem>>, %arg2: memref<128x128xbf16, #tpu.memory_space<vmem>>, %arg3: memref<1x128xf32, #tpu.memory_space<vmem>>, %arg4: memref<1x128xf32, #tpu.memory_space<vmem>>, %arg5: memref<9x128x128xbf16, #tpu.memory_space<vmem>>, %arg6: memref<1x128xf32, #tpu.memory_space<vmem>>, %arg7: memref<1x128xf32, #tpu.memory_space<vmem>>, %arg8: memref<512x128xbf16, #tpu.memory_space<vmem>>, %arg9: memref<512x128xf32, #tpu.memory_space<vmem>>, %arg10: memref<2x256x128xf32, #tpu.memory_space<vmem>>, %arg11: memref<1x128xf32, #tpu.memory_space<vmem>>, %arg12: memref<1x128xf32, #tpu.memory_space<vmem>>, %arg13: memref<2x18x18x128xbf16, #tpu.memory_space<vmem>>) attributes {dimension_semantics = [#tpu.dimension_semantics<arbitrary>], iteration_bounds = array<i64: 2>, scalar_prefetch = 0 : i64, scratch_operands = 4 : i64, tpu.core_type = #tpu.core_type<tc>, window_params = [{transform_indices = @transform_0, window_bounds = array<i64: 256, 128>}, {pipeline_mode = #tpu.pipeline_mode<synchronous>, transform_indices = @transform_1, window_bounds = array<i64: 128, 128>}, {pipeline_mode = #tpu.pipeline_mode<synchronous>, transform_indices = @transform_2, window_bounds = array<i64: 1, 128>}, {pipeline_mode = #tpu.pipeline_mode<synchronous>, transform_indices = @transform_3, window_bounds = array<i64: 1, 128>}, {pipeline_mode = #tpu.pipeline_mode<synchronous>, transform_indices = @transform_4, window_bounds = array<i64: 9, 128, 128>}, {pipeline_mode = #tpu.pipeline_mode<synchronous>, transform_indices = @transform_5, window_bounds = array<i64: 1, 128>}, {pipeline_mode = #tpu.pipeline_mode<synchronous>, transform_indices = @transform_6, window_bounds = array<i64: 1, 128>}, {pipeline_mode = #tpu.pipeline_mode<synchronous>, transform_indices = @transform_7, window_bounds = array<i64: 512, 128>}, {pipeline_mode = #tpu.pipeline_mode<synchronous>, transform_indices = @transform_8, window_bounds = array<i64: 512, 128>}]} {
    %c0_i32 = arith.constant 0 : i32
    %0 = arith.cmpi eq, %arg0, %c0_i32 : i32
    %1 = arith.extui %0 : i1 to i32
    %c0_i32_0 = arith.constant 0 : i32
    %2 = arith.cmpi ne, %1, %c0_i32_0 : i32
    scf.if %2 {
      %cst_17 = arith.constant 0.000000e+00 : f32
      %24 = vector.broadcast %cst_17 : f32 to vector<1x128xf32>
      %c0_18 = arith.constant 0 : index
      %c0_19 = arith.constant 0 : index
      %25 = vector.load %arg11[%c0_18, %c0_19] : memref<1x128xf32, #tpu.memory_space<vmem>>, vector<1x128xf32>
      tpu.vector_store %arg11[%c0_18, %c0_19], %24 {strides = array<i32>} : memref<1x128xf32, #tpu.memory_space<vmem>>, vector<1x128xf32>,
      %cst_20 = arith.constant 0.000000e+00 : f32
      %26 = vector.broadcast %cst_20 : f32 to vector<1x128xf32>
      %c0_21 = arith.constant 0 : index
      %c0_22 = arith.constant 0 : index
      %27 = vector.load %arg12[%c0_21, %c0_22] : memref<1x128xf32, #tpu.memory_space<vmem>>, vector<1x128xf32>
      tpu.vector_store %arg12[%c0_21, %c0_22], %26 {strides = array<i32>} : memref<1x128xf32, #tpu.memory_space<vmem>>, vector<1x128xf32>,
    } else {
    }
    %c0 = arith.constant 0 : index
    %c0_1 = arith.constant 0 : index
    %3 = vector.load %arg1[%c0, %c0_1] : memref<256x128xbf16, #tpu.memory_space<vmem>>, vector<256x128xbf16>
    %c0_2 = arith.constant 0 : index
    %c0_3 = arith.constant 0 : index
    %4 = vector.load %arg2[%c0_2, %c0_3] : memref<128x128xbf16, #tpu.memory_space<vmem>>, vector<128x128xbf16>
    %cst = arith.constant dense<0.000000e+00> : vector<256x128xf32>
    %5 = tpu.matmul %3, %4, %cst {dimension_numbers = #tpu.dot_dimension_numbers<[1], [0], [0], [1], [0, 0, 1, 1], [], []>} : vector<256x128xbf16>, vector<128x128xbf16>, vector<256x128xf32> -> vector<256x128xf32>
    %6 = arith.index_cast %arg0 : i32 to index
    %c0_4 = arith.constant 0 : index
    %c0_5 = arith.constant 0 : index
    %7 = vector.load %arg10[%6, %c0_4, %c0_5] : memref<2x256x128xf32, #tpu.memory_space<vmem>>, vector<1x256x128xf32>
    %8 = vector.shape_cast %7 : vector<1x256x128xf32> to vector<256x128xf32>
    %9 = vector.shape_cast %5 : vector<256x128xf32> to vector<1x256x128xf32>
    tpu.vector_store %arg10[%6, %c0_4, %c0_5], %9 {strides = array<i32>} : memref<2x256x128xf32, #tpu.memory_space<vmem>>, vector<1x256x128xf32>,
    %c0_6 = arith.constant 0 : index
    %c0_7 = arith.constant 0 : index
    %10 = vector.load %arg11[%c0_6, %c0_7] : memref<1x128xf32, #tpu.memory_space<vmem>>, vector<1x128xf32>
    %cst_8 = arith.constant dense<0.000000e+00> : vector<128xf32>
    %11 = vector.multi_reduction <add>, %5, %cst_8 [0] : vector<256x128xf32> to vector<128xf32>
    %12 = vector.shape_cast %11 : vector<128xf32> to vector<1x128xf32>
    %13 = arith.addf %10, %12 : vector<1x128xf32>
    %c0_9 = arith.constant 0 : index
    %c0_10 = arith.constant 0 : index
    %14 = vector.load %arg11[%c0_9, %c0_10] : memref<1x128xf32, #tpu.memory_space<vmem>>, vector<1x128xf32>
    tpu.vector_store %arg11[%c0_9, %c0_10], %13 {strides = array<i32>} : memref<1x128xf32, #tpu.memory_space<vmem>>, vector<1x128xf32>,
    %c0_11 = arith.constant 0 : index
    %c0_12 = arith.constant 0 : index
    %15 = vector.load %arg12[%c0_11, %c0_12] : memref<1x128xf32, #tpu.memory_space<vmem>>, vector<1x128xf32>
    %16 = arith.mulf %5, %5 : vector<256x128xf32>
    %cst_13 = arith.constant dense<0.000000e+00> : vector<128xf32>
    %17 = vector.multi_reduction <add>, %16, %cst_13 [0] : vector<256x128xf32> to vector<128xf32>
    %18 = vector.shape_cast %17 : vector<128xf32> to vector<1x128xf32>
    %19 = arith.addf %15, %18 : vector<1x128xf32>
    %c0_14 = arith.constant 0 : index
    %c0_15 = arith.constant 0 : index
    %20 = vector.load %arg12[%c0_14, %c0_15] : memref<1x128xf32, #tpu.memory_space<vmem>>, vector<1x128xf32>
    tpu.vector_store %arg12[%c0_14, %c0_15], %19 {strides = array<i32>} : memref<1x128xf32, #tpu.memory_space<vmem>>, vector<1x128xf32>,
    %c1_i32 = arith.constant 1 : i32
    %21 = arith.cmpi eq, %arg0, %c1_i32 : i32
    %22 = arith.extui %21 : i1 to i32
    %c0_i32_16 = arith.constant 0 : i32
    %23 = arith.cmpi ne, %22, %c0_i32_16 : i32
    scf.if %23 {
      %c0_17 = arith.constant 0 : index
      %c0_18 = arith.constant 0 : index
      %24 = vector.load %arg11[%c0_17, %c0_18] : memref<1x128xf32, #tpu.memory_space<vmem>>, vector<1x128xf32>
      %cst_19 = arith.constant 0.001953125 : f32
      %25 = vector.broadcast %cst_19 : f32 to vector<1x128xf32>
      %26 = arith.mulf %24, %25 : vector<1x128xf32>
      %c0_20 = arith.constant 0 : index
      %c0_21 = arith.constant 0 : index
      %27 = vector.load %arg12[%c0_20, %c0_21] : memref<1x128xf32, #tpu.memory_space<vmem>>, vector<1x128xf32>
      %cst_22 = arith.constant 0.001953125 : f32
      %28 = vector.broadcast %cst_22 : f32 to vector<1x128xf32>
      %29 = arith.mulf %27, %28 : vector<1x128xf32>
      %30 = arith.mulf %26, %26 : vector<1x128xf32>
      %31 = arith.subf %29, %30 : vector<1x128xf32>
      %c0_23 = arith.constant 0 : index
      %c0_24 = arith.constant 0 : index
      %32 = vector.load %arg3[%c0_23, %c0_24] : memref<1x128xf32, #tpu.memory_space<vmem>>, vector<1x128xf32>
      %cst_25 = arith.constant 9.99999974E-6 : f32
      %33 = vector.broadcast %cst_25 : f32 to vector<1x128xf32>
      %34 = arith.addf %31, %33 : vector<1x128xf32>
      %35 = math.rsqrt %34 : vector<1x128xf32>
      %36 = arith.mulf %32, %35 : vector<1x128xf32>
      %c0_26 = arith.constant 0 : index
      %c0_27 = arith.constant 0 : index
      %37 = vector.load %arg4[%c0_26, %c0_27] : memref<1x128xf32, #tpu.memory_space<vmem>>, vector<1x128xf32>
      %38 = arith.mulf %26, %36 : vector<1x128xf32>
      %39 = arith.subf %37, %38 : vector<1x128xf32>
      %c0_28 = arith.constant 0 : index
      %c0_29 = arith.constant 0 : index
      %c0_30 = arith.constant 0 : index
      %40 = vector.load %arg10[%c0_28, %c0_29, %c0_30] : memref<2x256x128xf32, #tpu.memory_space<vmem>>, vector<2x256x128xf32>
      %41 = vector.shape_cast %40 : vector<2x256x128xf32> to vector<512x128xf32>
      %42 = vector.broadcast %36 : vector<1x128xf32> to vector<512x128xf32>
      %43 = arith.mulf %41, %42 : vector<512x128xf32>
      %44 = vector.broadcast %39 : vector<1x128xf32> to vector<512x128xf32>
      %45 = arith.addf %43, %44 : vector<512x128xf32>
      %cst_31 = arith.constant 0.000000e+00 : f32
      %46 = vector.broadcast %cst_31 : f32 to vector<512x128xf32>
      %47 = arith.maximumf %45, %46 : vector<512x128xf32>
      %48 = arith.truncf %47 : vector<512x128xf32> to vector<512x128xbf16>
      %cst_32 = arith.constant 0.000000e+00 : bf16
      %49 = vector.broadcast %cst_32 : bf16 to vector<2x18x18x128xbf16>
      %c0_33 = arith.constant 0 : index
      %c0_34 = arith.constant 0 : index
      %c0_35 = arith.constant 0 : index
      %c0_36 = arith.constant 0 : index
      %50 = vector.load %arg13[%c0_33, %c0_34, %c0_35, %c0_36] : memref<2x18x18x128xbf16, #tpu.memory_space<vmem>>, vector<2x18x18x128xbf16>
      tpu.vector_store %arg13[%c0_33, %c0_34, %c0_35, %c0_36], %49 {strides = array<i32>} : memref<2x18x18x128xbf16, #tpu.memory_space<vmem>>, vector<2x18x18x128xbf16>,
      %51 = vector.shape_cast %48 : vector<512x128xbf16> to vector<2x16x16x128xbf16>
      %c0_37 = arith.constant 0 : index
      %c1 = arith.constant 1 : index
      %c1_38 = arith.constant 1 : index
      %c0_39 = arith.constant 0 : index
      %52 = vector.load %arg13[%c0_37, %c1, %c1_38, %c0_39] : memref<2x18x18x128xbf16, #tpu.memory_space<vmem>>, vector<2x16x16x128xbf16>
      tpu.vector_store %arg13[%c0_37, %c1, %c1_38, %c0_39], %51 {strides = array<i32>} : memref<2x18x18x128xbf16, #tpu.memory_space<vmem>>, vector<2x16x16x128xbf16>,
      %cst_40 = arith.constant 0.000000e+00 : f32
      %53 = vector.broadcast %cst_40 : f32 to vector<512x128xf32>
      %c0_41 = arith.constant 0 : index
      %c0_42 = arith.constant 0 : index
      %c0_43 = arith.constant 0 : index
      %c0_44 = arith.constant 0 : index
      %54 = vector.load %arg13[%c0_41, %c0_42, %c0_43, %c0_44] : memref<2x18x18x128xbf16, #tpu.memory_space<vmem>>, vector<2x16x16x128xbf16>
      %55 = vector.shape_cast %54 : vector<2x16x16x128xbf16> to vector<512x128xbf16>
      %c0_45 = arith.constant 0 : index
      %c0_46 = arith.constant 0 : index
      %c0_47 = arith.constant 0 : index
      %56 = vector.load %arg5[%c0_45, %c0_46, %c0_47] : memref<9x128x128xbf16, #tpu.memory_space<vmem>>, vector<1x128x128xbf16>
      %57 = vector.shape_cast %56 : vector<1x128x128xbf16> to vector<128x128xbf16>
      %cst_48 = arith.constant dense<0.000000e+00> : vector<512x128xf32>
      %58 = tpu.matmul %55, %57, %cst_48 {dimension_numbers = #tpu.dot_dimension_numbers<[1], [0], [0], [1], [0, 0, 1, 1], [], []>} : vector<512x128xbf16>, vector<128x128xbf16>, vector<512x128xf32> -> vector<512x128xf32>
      %59 = arith.addf %53, %58 : vector<512x128xf32>
      %c0_49 = arith.constant 0 : index
      %c0_50 = arith.constant 0 : index
      %c1_51 = arith.constant 1 : index
      %c0_52 = arith.constant 0 : index
      %60 = vector.load %arg13[%c0_49, %c0_50, %c1_51, %c0_52] : memref<2x18x18x128xbf16, #tpu.memory_space<vmem>>, vector<2x16x16x128xbf16>
      %61 = vector.shape_cast %60 : vector<2x16x16x128xbf16> to vector<512x128xbf16>
      %c1_53 = arith.constant 1 : index
      %c0_54 = arith.constant 0 : index
      %c0_55 = arith.constant 0 : index
      %62 = vector.load %arg5[%c1_53, %c0_54, %c0_55] : memref<9x128x128xbf16, #tpu.memory_space<vmem>>, vector<1x128x128xbf16>
      %63 = vector.shape_cast %62 : vector<1x128x128xbf16> to vector<128x128xbf16>
      %cst_56 = arith.constant dense<0.000000e+00> : vector<512x128xf32>
      %64 = tpu.matmul %61, %63, %cst_56 {dimension_numbers = #tpu.dot_dimension_numbers<[1], [0], [0], [1], [0, 0, 1, 1], [], []>} : vector<512x128xbf16>, vector<128x128xbf16>, vector<512x128xf32> -> vector<512x128xf32>
      %65 = arith.addf %59, %64 : vector<512x128xf32>
      %c0_57 = arith.constant 0 : index
      %c0_58 = arith.constant 0 : index
      %c2 = arith.constant 2 : index
      %c0_59 = arith.constant 0 : index
      %66 = vector.load %arg13[%c0_57, %c0_58, %c2, %c0_59] : memref<2x18x18x128xbf16, #tpu.memory_space<vmem>>, vector<2x16x16x128xbf16>
      %67 = vector.shape_cast %66 : vector<2x16x16x128xbf16> to vector<512x128xbf16>
      %c2_60 = arith.constant 2 : index
      %c0_61 = arith.constant 0 : index
      %c0_62 = arith.constant 0 : index
      %68 = vector.load %arg5[%c2_60, %c0_61, %c0_62] : memref<9x128x128xbf16, #tpu.memory_space<vmem>>, vector<1x128x128xbf16>
      %69 = vector.shape_cast %68 : vector<1x128x128xbf16> to vector<128x128xbf16>
      %cst_63 = arith.constant dense<0.000000e+00> : vector<512x128xf32>
      %70 = tpu.matmul %67, %69, %cst_63 {dimension_numbers = #tpu.dot_dimension_numbers<[1], [0], [0], [1], [0, 0, 1, 1], [], []>} : vector<512x128xbf16>, vector<128x128xbf16>, vector<512x128xf32> -> vector<512x128xf32>
      %71 = arith.addf %65, %70 : vector<512x128xf32>
      %c0_64 = arith.constant 0 : index
      %c1_65 = arith.constant 1 : index
      %c0_66 = arith.constant 0 : index
      %c0_67 = arith.constant 0 : index
      %72 = vector.load %arg13[%c0_64, %c1_65, %c0_66, %c0_67] : memref<2x18x18x128xbf16, #tpu.memory_space<vmem>>, vector<2x16x16x128xbf16>
      %73 = vector.shape_cast %72 : vector<2x16x16x128xbf16> to vector<512x128xbf16>
      %c3 = arith.constant 3 : index
      %c0_68 = arith.constant 0 : index
      %c0_69 = arith.constant 0 : index
      %74 = vector.load %arg5[%c3, %c0_68, %c0_69] : memref<9x128x128xbf16, #tpu.memory_space<vmem>>, vector<1x128x128xbf16>
      %75 = vector.shape_cast %74 : vector<1x128x128xbf16> to vector<128x128xbf16>
      %cst_70 = arith.constant dense<0.000000e+00> : vector<512x128xf32>
      %76 = tpu.matmul %73, %75, %cst_70 {dimension_numbers = #tpu.dot_dimension_numbers<[1], [0], [0], [1], [0, 0, 1, 1], [], []>} : vector<512x128xbf16>, vector<128x128xbf16>, vector<512x128xf32> -> vector<512x128xf32>
      %77 = arith.addf %71, %76 : vector<512x128xf32>
      %c0_71 = arith.constant 0 : index
      %c1_72 = arith.constant 1 : index
      %c1_73 = arith.constant 1 : index
      %c0_74 = arith.constant 0 : index
      %78 = vector.load %arg13[%c0_71, %c1_72, %c1_73, %c0_74] : memref<2x18x18x128xbf16, #tpu.memory_space<vmem>>, vector<2x16x16x128xbf16>
      %79 = vector.shape_cast %78 : vector<2x16x16x128xbf16> to vector<512x128xbf16>
      %c4 = arith.constant 4 : index
      %c0_75 = arith.constant 0 : index
      %c0_76 = arith.constant 0 : index
      %80 = vector.load %arg5[%c4, %c0_75, %c0_76] : memref<9x128x128xbf16, #tpu.memory_space<vmem>>, vector<1x128x128xbf16>
      %81 = vector.shape_cast %80 : vector<1x128x128xbf16> to vector<128x128xbf16>
      %cst_77 = arith.constant dense<0.000000e+00> : vector<512x128xf32>
      %82 = tpu.matmul %79, %81, %cst_77 {dimension_numbers = #tpu.dot_dimension_numbers<[1], [0], [0], [1], [0, 0, 1, 1], [], []>} : vector<512x128xbf16>, vector<128x128xbf16>, vector<512x128xf32> -> vector<512x128xf32>
      %83 = arith.addf %77, %82 : vector<512x128xf32>
      %c0_78 = arith.constant 0 : index
      %c1_79 = arith.constant 1 : index
      %c2_80 = arith.constant 2 : index
      %c0_81 = arith.constant 0 : index
      %84 = vector.load %arg13[%c0_78, %c1_79, %c2_80, %c0_81] : memref<2x18x18x128xbf16, #tpu.memory_space<vmem>>, vector<2x16x16x128xbf16>
      %85 = vector.shape_cast %84 : vector<2x16x16x128xbf16> to vector<512x128xbf16>
      %c5 = arith.constant 5 : index
      %c0_82 = arith.constant 0 : index
      %c0_83 = arith.constant 0 : index
      %86 = vector.load %arg5[%c5, %c0_82, %c0_83] : memref<9x128x128xbf16, #tpu.memory_space<vmem>>, vector<1x128x128xbf16>
      %87 = vector.shape_cast %86 : vector<1x128x128xbf16> to vector<128x128xbf16>
      %cst_84 = arith.constant dense<0.000000e+00> : vector<512x128xf32>
      %88 = tpu.matmul %85, %87, %cst_84 {dimension_numbers = #tpu.dot_dimension_numbers<[1], [0], [0], [1], [0, 0, 1, 1], [], []>} : vector<512x128xbf16>, vector<128x128xbf16>, vector<512x128xf32> -> vector<512x128xf32>
      %89 = arith.addf %83, %88 : vector<512x128xf32>
      %c0_85 = arith.constant 0 : index
      %c2_86 = arith.constant 2 : index
      %c0_87 = arith.constant 0 : index
      %c0_88 = arith.constant 0 : index
      %90 = vector.load %arg13[%c0_85, %c2_86, %c0_87, %c0_88] : memref<2x18x18x128xbf16, #tpu.memory_space<vmem>>, vector<2x16x16x128xbf16>
      %91 = vector.shape_cast %90 : vector<2x16x16x128xbf16> to vector<512x128xbf16>
      %c6 = arith.constant 6 : index
      %c0_89 = arith.constant 0 : index
      %c0_90 = arith.constant 0 : index
      %92 = vector.load %arg5[%c6, %c0_89, %c0_90] : memref<9x128x128xbf16, #tpu.memory_space<vmem>>, vector<1x128x128xbf16>
      %93 = vector.shape_cast %92 : vector<1x128x128xbf16> to vector<128x128xbf16>
      %cst_91 = arith.constant dense<0.000000e+00> : vector<512x128xf32>
      %94 = tpu.matmul %91, %93, %cst_91 {dimension_numbers = #tpu.dot_dimension_numbers<[1], [0], [0], [1], [0, 0, 1, 1], [], []>} : vector<512x128xbf16>, vector<128x128xbf16>, vector<512x128xf32> -> vector<512x128xf32>
      %95 = arith.addf %89, %94 : vector<512x128xf32>
      %c0_92 = arith.constant 0 : index
      %c2_93 = arith.constant 2 : index
      %c1_94 = arith.constant 1 : index
      %c0_95 = arith.constant 0 : index
      %96 = vector.load %arg13[%c0_92, %c2_93, %c1_94, %c0_95] : memref<2x18x18x128xbf16, #tpu.memory_space<vmem>>, vector<2x16x16x128xbf16>
      %97 = vector.shape_cast %96 : vector<2x16x16x128xbf16> to vector<512x128xbf16>
      %c7 = arith.constant 7 : index
      %c0_96 = arith.constant 0 : index
      %c0_97 = arith.constant 0 : index
      %98 = vector.load %arg5[%c7, %c0_96, %c0_97] : memref<9x128x128xbf16, #tpu.memory_space<vmem>>, vector<1x128x128xbf16>
      %99 = vector.shape_cast %98 : vector<1x128x128xbf16> to vector<128x128xbf16>
      %cst_98 = arith.constant dense<0.000000e+00> : vector<512x128xf32>
      %100 = tpu.matmul %97, %99, %cst_98 {dimension_numbers = #tpu.dot_dimension_numbers<[1], [0], [0], [1], [0, 0, 1, 1], [], []>} : vector<512x128xbf16>, vector<128x128xbf16>, vector<512x128xf32> -> vector<512x128xf32>
      %101 = arith.addf %95, %100 : vector<512x128xf32>
      %c0_99 = arith.constant 0 : index
      %c2_100 = arith.constant 2 : index
      %c2_101 = arith.constant 2 : index
      %c0_102 = arith.constant 0 : index
      %102 = vector.load %arg13[%c0_99, %c2_100, %c2_101, %c0_102] : memref<2x18x18x128xbf16, #tpu.memory_space<vmem>>, vector<2x16x16x128xbf16>
      %103 = vector.shape_cast %102 : vector<2x16x16x128xbf16> to vector<512x128xbf16>
      %c8 = arith.constant 8 : index
      %c0_103 = arith.constant 0 : index
      %c0_104 = arith.constant 0 : index
      %104 = vector.load %arg5[%c8, %c0_103, %c0_104] : memref<9x128x128xbf16, #tpu.memory_space<vmem>>, vector<1x128x128xbf16>
      %105 = vector.shape_cast %104 : vector<1x128x128xbf16> to vector<128x128xbf16>
      %cst_105 = arith.constant dense<0.000000e+00> : vector<512x128xf32>
      %106 = tpu.matmul %103, %105, %cst_105 {dimension_numbers = #tpu.dot_dimension_numbers<[1], [0], [0], [1], [0, 0, 1, 1], [], []>} : vector<512x128xbf16>, vector<128x128xbf16>, vector<512x128xf32> -> vector<512x128xf32>
      %107 = arith.addf %101, %106 : vector<512x128xf32>
      %cst_106 = arith.constant dense<0.000000e+00> : vector<128xf32>
      %108 = vector.multi_reduction <add>, %107, %cst_106 [0] : vector<512x128xf32> to vector<128xf32>
      %109 = vector.shape_cast %108 : vector<128xf32> to vector<1x128xf32>
      %cst_107 = arith.constant 0.001953125 : f32
      %110 = vector.broadcast %cst_107 : f32 to vector<1x128xf32>
      %111 = arith.mulf %109, %110 : vector<1x128xf32>
      %112 = vector.broadcast %111 : vector<1x128xf32> to vector<512x128xf32>
      %113 = arith.subf %107, %112 : vector<512x128xf32>
      %114 = arith.mulf %113, %113 : vector<512x128xf32>
      %cst_108 = arith.constant dense<0.000000e+00> : vector<128xf32>
      %115 = vector.multi_reduction <add>, %114, %cst_108 [0] : vector<512x128xf32> to vector<128xf32>
      %116 = vector.shape_cast %115 : vector<128xf32> to vector<1x128xf32>
      %cst_109 = arith.constant 0.001953125 : f32
      %117 = vector.broadcast %cst_109 : f32 to vector<1x128xf32>
      %118 = arith.mulf %116, %117 : vector<1x128xf32>
      %c0_110 = arith.constant 0 : index
      %c0_111 = arith.constant 0 : index
      %119 = vector.load %arg6[%c0_110, %c0_111] : memref<1x128xf32, #tpu.memory_space<vmem>>, vector<1x128xf32>
      %cst_112 = arith.constant 9.99999974E-6 : f32
      %120 = vector.broadcast %cst_112 : f32 to vector<1x128xf32>
      %121 = arith.addf %118, %120 : vector<1x128xf32>
      %122 = math.rsqrt %121 : vector<1x128xf32>
      %123 = arith.mulf %119, %122 : vector<1x128xf32>
      %124 = vector.broadcast %123 : vector<1x128xf32> to vector<512x128xf32>
      %125 = arith.mulf %113, %124 : vector<512x128xf32>
      %c0_113 = arith.constant 0 : index
      %c0_114 = arith.constant 0 : index
      %126 = vector.load %arg7[%c0_113, %c0_114] : memref<1x128xf32, #tpu.memory_space<vmem>>, vector<1x128xf32>
      %127 = vector.broadcast %126 : vector<1x128xf32> to vector<512x128xf32>
      %128 = arith.addf %125, %127 : vector<512x128xf32>
      %c0_115 = arith.constant 0 : index
      %c0_116 = arith.constant 0 : index
      %129 = vector.load %arg8[%c0_115, %c0_116] : memref<512x128xbf16, #tpu.memory_space<vmem>>, vector<512x128xbf16>
      %130 = arith.extf %129 : vector<512x128xbf16> to vector<512x128xf32>
      %131 = arith.addf %128, %130 : vector<512x128xf32>
      %cst_117 = arith.constant 0.000000e+00 : f32
      %132 = vector.broadcast %cst_117 : f32 to vector<512x128xf32>
      %133 = arith.maximumf %131, %132 : vector<512x128xf32>
      %c0_118 = arith.constant 0 : index
      %c0_119 = arith.constant 0 : index
      %134 = vector.load %arg9[%c0_118, %c0_119] : memref<512x128xf32, #tpu.memory_space<vmem>>, vector<512x128xf32>
      tpu.vector_store %arg9[%c0_118, %c0_119], %133 {strides = array<i32>} : memref<512x128xf32, #tpu.memory_space<vmem>>, vector<512x128xf32>,
    } else {
    }
    return
  }
  func.func @transform_0(%arg0: i32) -> (i32, i32) {
    %c0_i32 = arith.constant 0 : i32
    %c0_i32_0 = arith.constant 0 : i32
    return %arg0, %c0_i32 : i32, i32
  }
  func.func @transform_1(%arg0: i32) -> (i32, i32) {
    %c0_i32 = arith.constant 0 : i32
    %c0_i32_0 = arith.constant 0 : i32
    %c0_i32_1 = arith.constant 0 : i32
    return %c0_i32, %c0_i32_0 : i32, i32
  }
  func.func @transform_2(%arg0: i32) -> (i32, i32) {
    %c0_i32 = arith.constant 0 : i32
    %c0_i32_0 = arith.constant 0 : i32
    %c0_i32_1 = arith.constant 0 : i32
    return %c0_i32, %c0_i32_0 : i32, i32
  }
  func.func @transform_3(%arg0: i32) -> (i32, i32) {
    %c0_i32 = arith.constant 0 : i32
    %c0_i32_0 = arith.constant 0 : i32
    %c0_i32_1 = arith.constant 0 : i32
    return %c0_i32, %c0_i32_0 : i32, i32
  }
  func.func @transform_4(%arg0: i32) -> (i32, i32, i32) {
    %c0_i32 = arith.constant 0 : i32
    %c0_i32_0 = arith.constant 0 : i32
    %c0_i32_1 = arith.constant 0 : i32
    %c0_i32_2 = arith.constant 0 : i32
    return %c0_i32, %c0_i32_0, %c0_i32_1 : i32, i32, i32
  }
  func.func @transform_5(%arg0: i32) -> (i32, i32) {
    %c0_i32 = arith.constant 0 : i32
    %c0_i32_0 = arith.constant 0 : i32
    %c0_i32_1 = arith.constant 0 : i32
    return %c0_i32, %c0_i32_0 : i32, i32
  }
  func.func @transform_6(%arg0: i32) -> (i32, i32) {
    %c0_i32 = arith.constant 0 : i32
    %c0_i32_0 = arith.constant 0 : i32
    %c0_i32_1 = arith.constant 0 : i32
    return %c0_i32, %c0_i32_0 : i32, i32
  }
  func.func @transform_7(%arg0: i32) -> (i32, i32) {
    %c0_i32 = arith.constant 0 : i32
    %c0_i32_0 = arith.constant 0 : i32
    %c0_i32_1 = arith.constant 0 : i32
    return %c0_i32, %c0_i32_0 : i32, i32
  }
  func.func @transform_8(%arg0: i32) -> (i32, i32) {
    %c0_i32 = arith.constant 0 : i32
    %c0_i32_0 = arith.constant 0 : i32
    %c0_i32_1 = arith.constant 0 : i32
    return %c0_i32, %c0_i32_0 : i32, i32
  }
}

</mosaic_0001>

<bundles_post_ra>
// kernel: tpu_custom_call.1
= control target key start
LH: loop header
LB: loop body
LE: loop exit
PB: predicated region body
PF: predicated region fallthrough
CT: control target
= control target key end

     0   :  { %13 = vsyncpa [#allocation7], 0  ;;  %s19732_s0 = inlined_call_operand.hbm [shape: bf16[512,128], index: 0, kind: input, shape index: {}]   ;;  %s19733_s1 = inlined_call_operand.hbm [shape: bf16[128,128], index: 1, kind: input, shape index: {}]   ;;  %s19734_s2 = inlined_call_operand.vmem [shape: f32[1,128], index: 2, kind: input, shape index: {}]   ;;  %s19735_s3 = inlined_call_operand.vmem [shape: f32[1,128], index: 3, kind: input, shape index: {}]   ;;  %s19736_s4 = inlined_call_operand.hbm [shape: bf16[9,128,128], index: 4, kind: input, shape index: {}]   ;;  %s19737_s5 = inlined_call_operand.vmem [shape: f32[1,128], index: 5, kind: input, shape index: {}]   ;;  %s19738_s6 = inlined_call_operand.vmem [shape: f32[1,128], index: 6, kind: input, shape index: {}]   ;;  %s19739_s7 = inlined_call_operand.hbm [shape: bf16[512,128], index: 7, kind: input, shape index: {}]   ;;  %s19740_s8 = inlined_call_operand.hbm [shape: f32[512,128], index: 8, kind: output, shape index: {}]  }
   0x1   :  { %15 = vsyncpa [#allocation7 + $0x1], 0 }
   0x2   :  { %16 = vsyncpa [#allocation10], 0 }
   0x3   :  { %17 = vsyncpa [#allocation13], 0 }
   0x4   :  { %18 = vsyncpa [#allocation8], 0  ;;  %s15110_s27 = smov 0   ;;  %s15112_s28 = smov 0  }
   0x5   :  { %s15114_s29 = smov 0   ;;  %s15116_s30 = smov 0  }
   0x6 LB: > { %s15129_s9 = sadd.s32 4294967295, %s15052_s30   ;;  %p44_p0 = scmp.ne.s32.totalorder %s15044_s28, %s15040_s27  ;;  %s15052_s30 = sphi %s15116_s30, %s20260_s30   ;;  %s15048_s29 = sphi %s15114_s29, %s20259_s29   ;;  %s15044_s28 = sphi %s15112_s28, %s20258_s28   ;;  %s15040_s27 = sphi %s15110_s27, %s20257_s27  }
   0x7   : > { %p19741_p1 = scmp.eq.s32.totalorder %s15129_s9, 0  ;;  %p11873_p2 = scmp.ge.s32.totalorder %s15052_s30, 1 }
   0x8   : > { %p223_p3 = scmp.lt.s32.totalorder %s15052_s30, 3  ;;  %s15054_s12 = smov [#allocation9]  }
   0x9   : > { %p15138_p5 = por %p19741_p1, %p44_p0  ;;  %s235_s13 = sshll.u32 %s15054_s12, 4  ;;  %s15146_s13 = int_to_ptr.vmem [resolvable:$true] %s235_s13 }
   0xa   : > { %p15142_p6 = pnand %p11873_p2, %p223_p3  ;;  %s15055_s15 = smov [#allocation11]  }
   0xb   : > { %s19875_s10 = scalar_select %p15138_p5, 1, 0 }
   0xc   : > { %s19876_s11 = scalar_select %p15142_p6, 1, 0 }
   0xd   : > { %p14376_p7 = pneg %p15142_p6  ;;  %s254_s16 = sshll.u32 %s15055_s15, 4  ;;  %s15156_s16 = int_to_ptr.vmem [resolvable:$true] %s254_s16 }
   0xe   : > { %s15056_s17 = smov [#allocation12]   ;;  %s14866_s21 = scalar_lea.hbm %s19733_s1, 1024 }
   0xf   : > { %p15152_p8 = pnand %p14376_p7, %p19741_p1  ;;  %s15158_s18 = sshll.u32 %s15056_s17, 4  ;;  %s274_s18 = int_to_ptr.vmem [resolvable:$true] %s15158_s18 }
  0x10   : > { %p14867_p9 = scmp.ne.s32.totalorder %s19733_s1, %s14866_s21  ;;  %p14873_p13 = scmp.lt.u32.totalorder %s14866_s21, %s19733_s1 }
  0x11   : > { %p15168_p10 = pneg %p15152_p8 }
  0x13   : > { %p14869_p11 = pnand %p15168_p10, %p14867_p9 }
  0x15   : > { %p14870_p12 = pneg %p14869_p11 }
  0x17   : > { %p14875_p0 = pnand %p14873_p13, %p14870_p12 }
  0x19   : > { %14878 = shalt.err (!%p14875_p0)
}
  0x1a   : > { %s14879_s27 = scalar_lea.vmem %s15146_s13, 1024  ;;  %p14887_p4 = scmp.lt.s32.totalorder %s15146_s13, %s15146_s13 }
  0x1b   : > { %p14880_p2 = scmp.ne.s32.totalorder %s15146_s13, %s14879_s27  ;;  %p14888_p1 = scmp.lt.s32.totalorder %s14879_s27, %s14879_s27 }
  0x1d   : > { %p14882_p3 = pnand %p14880_p2, %p15168_p10  ;;  %p14889_p9 = por %p14888_p1, %p14887_p4 }
  0x1f   : > { %p14883_p7 = pneg %p14882_p3 }
  0x21   : > { %p14890_p11 = pnand %p14889_p9, %p14883_p7 }
  0x23   : > { %14893 = shalt.err (!%p14890_p11)
}
  0x24   : > { %s15057_s12 = smov 64   ;;  %s15058_s15 = smov 4  }
  0x25   : > { %14379 = dma.hbm_to_vmem [thread:$0]  (!%p15152_p8), %s19733_s1, 1024, %s15146_s13, [#allocation10], %s15057_s12, %s15057_s12, %s15058_s15  }
  0x26   : > { %s14894_s22 = scalar_lea.hbm %s19736_s4, 9216 }
  0x27   : > { %p14895_p1 = scmp.ne.s32.totalorder %s19736_s4, %s14894_s22  ;;  %p14901_p13 = scmp.lt.u32.totalorder %s14894_s22, %s19736_s4 }
  0x29   : > { %p14897_p4 = pnand %p14895_p1, %p15168_p10 }
  0x2b   : > { %p14898_p12 = pneg %p14897_p4 }
  0x2d   : > { %p14903_p0 = pnand %p14901_p13, %p14898_p12 }
  0x2f   : > { %14906 = shalt.err (!%p14903_p0)
}
  0x30   : > { %s14907_s13 = scalar_lea.vmem %s15156_s16, 9216  ;;  %p14915_p9 = scmp.lt.s32.totalorder %s15156_s16, %s15156_s16 }
  0x31   : > { %p14908_p2 = scmp.ne.s32.totalorder %s15156_s16, %s14907_s13  ;;  %p14916_p11 = scmp.lt.s32.totalorder %s14907_s13, %s14907_s13 }
  0x33   : > { %p14910_p3 = pnand %p14908_p2, %p15168_p10  ;;  %p14917_p1 = por %p14916_p11, %p14915_p9 }
  0x35   : > { %p14911_p7 = pneg %p14910_p3 }
  0x37   : > { %p14918_p4 = pnand %p14917_p1, %p14911_p7 }
  0x39   : > { %14921 = shalt.err (!%p14918_p4)
}
  0x3a   : > { %14382 = dma.hbm_to_vmem [thread:$0]  (!%p15152_p8), %s19736_s4, 9216, %s15156_s16, [#allocation10], %s15057_s12, %s15057_s12, %s15058_s15  }
  0x3b   : > { %s14922_s22 = scalar_lea.hbm %s19739_s7, 4096 }
  0x3c   : > { %p14923_p12 = scmp.ne.s32.totalorder %s19739_s7, %s14922_s22  ;;  %p14929_p2 = scmp.lt.u32.totalorder %s14922_s22, %s19739_s7 }
  0x3e   : > { %p14925_p13 = pnand %p14923_p12, %p15168_p10 }
  0x40   : > { %p14926_p0 = pneg %p14925_p13 }
  0x42   : > { %p14931_p3 = pnand %p14929_p2, %p14926_p0 }
  0x44   : > { %14934 = shalt.err (!%p14931_p3)
}
  0x45   : > { %s14935_s13 = scalar_lea.vmem %s274_s18, 4096  ;;  %p14943_p1 = scmp.lt.s32.totalorder %s274_s18, %s274_s18 }
  0x46   : > { %p14936_p7 = scmp.ne.s32.totalorder %s274_s18, %s14935_s13  ;;  %p14944_p4 = scmp.lt.s32.totalorder %s14935_s13, %s14935_s13 }
  0x48   : > { %p14938_p9 = pnand %p14936_p7, %p15168_p10  ;;  %p14945_p5 = por %p14944_p4, %p14943_p1 }
  0x4a   : > { %p14939_p11 = pneg %p14938_p9 }
  0x4c   : > { %p14946_p6 = pnand %p14945_p5, %p14939_p11 }
  0x4e   : > { %14949 = shalt.err (!%p14946_p6)
}
  0x4f   : > { %14385 = dma.hbm_to_vmem [thread:$0]  (!%p15152_p8), %s19739_s7, 4096, %s274_s18, [#allocation13], %s15057_s12, %s15057_s12, %s15058_s15  }
  0x50   : > { %s15241_s24 = sadd.s32 1, %s15052_s30   ;;  %s31_s19 = sadd.s32 1, %s15048_s29 }
  0x51   : > { %s28_s14 = ssub.s32 %s15052_s30, %s15241_s24  ;;  %p38_p6 = scmp.ne.s32.totalorder %s15048_s29, %s15044_s28 }
  0x52   : > { %p29_p5 = scmp.eq.s32.totalorder %s28_s14, 0  ;;  %p39_p10 = scmp.eq.s32.totalorder %s15052_s30, 0 }
  0x53   : > { %p14393_p12 = scmp.lt.s32.totalorder %s15052_s30, 2  ;;  %s287_s21 = sand.u32 1, %s15048_s29  }
  0x54   : > { %s15251_s20 = scalar_select %p29_p5, %s15048_s29, %s31_s19  }
  0x55   : > { %p40_p13 = por %p39_p10, %p38_p6  ;;  %s11878_s22 = sshll.u32 %s287_s21, 7 }
  0x56   : > { %s12438_s23 = sshll.u32 %s15052_s30, 11  ;;  %s291_s18 = scalar_lea.vmem [#allocation6], %s11878_s22 }
  0x57   : > { %s15258_s27 = scalar_lea.hbm %s19732_s0, %s12438_s23  ;;  %s298_s13 = sshll.u32 %s291_s18, 4  ;;  %s15260_s13 = int_to_ptr.vmem [resolvable:$true] %s298_s13 }
  0x58   : > { %p15262_p8 = pnand %p14393_p12, %p40_p13  ;;  %s15266_s30 = scalar_lea.sflag [#allocation7], %s287_s21 }
  0x59   : > { %s14950_s17 = scalar_lea.hbm %s15258_s27, 2048  ;;  %s14955_s22 = scalar_lea.hbm %s19732_s0, 4096 }
  0x5a   : > { %p14951_p0 = scmp.ne.s32.totalorder %s15258_s27, %s14950_s17  ;;  %p14952_p2 = pneg %p15262_p8 }
  0x5b   : > { %p14956_p9 = scmp.lt.u32.totalorder %s15258_s27, %s19732_s0  ;;  %p14957_p11 = scmp.lt.u32.totalorder %s14955_s22, %s14950_s17 }
  0x5c   : > { %p14953_p3 = pnand %p14952_p2, %p14951_p0  ;;  %p14959_p4 = scmp.lt.u32.totalorder %s14950_s17, %s15258_s27 }
  0x5d   : > { %p14958_p1 = por %p14957_p11, %p14956_p9 }
  0x5e   : > { %p14954_p7 = pneg %p14953_p3 }
  0x5f   : > { %p14960_p5 = por %p14959_p4, %p14958_p1 }
  0x61   : > { %p14961_p6 = pnand %p14960_p5, %p14954_p7 }
  0x63   : > { %14964 = shalt.err (!%p14961_p6)
}
  0x64   : > { %s14965_s21 = scalar_lea.vmem %s15260_s13, 2048  ;;  %s15059_s26 = smov [#allocation6]  }
  0x65   : > { %p14966_p10 = scmp.ne.s32.totalorder %s15260_s13, %s14965_s21  ;;  %s14970_s18 = sshll.u32 %s15059_s26, 4  ;;  %s14971_s18 = int_to_ptr.vmem [resolvable:$false] %s14970_s18 }
  0x66   : > { %s14972_s14 = scalar_lea.vmem %s14971_s18, 4096  ;;  %p14973_p0 = scmp.lt.s32.totalorder %s15260_s13, %s14971_s18 }
  0x67   : > { %p14968_p12 = pnand %p14966_p10, %p14952_p2  ;;  %p14974_p3 = scmp.lt.s32.totalorder %s14972_s14, %s14965_s21 }
  0x69   : > { %p14969_p13 = pneg %p14968_p12  ;;  %p14975_p9 = por %p14974_p3, %p14973_p0 }
  0x6b   : > { %p14976_p11 = pnand %p14975_p9, %p14969_p13 }
  0x6d   : > { %14979 = shalt.err (!%p14976_p11)
}
  0x6e   : > { %14389 = dma.hbm_to_vmem [thread:$0]  (!%p15262_p8), %s15258_s27, 2048, %s15260_s13, %s15266_s30, %s15057_s12, %s15057_s12, %s15058_s15  }
  0x6f   : > { %p19880_p2 = scmp.ne.s32.totalorder %s19876_s11, 0 }
  0x70   : > { %s312_s17 = sand.u32 (!%p19880_p2), 1, %s15044_s28   ;;  %p19881_p7 = scmp.ne.s32.totalorder (!%p19880_p2), %s19875_s10, 0 }
  0x71   : > { %310 = sbr.rel (%p19880_p2) target bundleno = 1907 (0x773), region = 52  ;;  %s11882_s19 = sshll.u32 (!%p19880_p2), %s312_s17, 7 }
  0x72   : > { %s313_s22 = scalar_lea.sflag (!%p19880_p2), [#allocation7], %s312_s17  ;;  %s15300_s23 = scalar_lea.vmem (!%p19880_p2), [#allocation6], %s11882_s19 }
  0x78   : > { %15023 = dma.done.wait (%p19881_p7), %s313_s22, 2048  }
  0x79   : > { %15025 = vsyncadd (%p19881_p7), %s313_s22, 4294965248  ;;  %p19882_p1 = scmp.eq.s32.totalorder %s15129_s9, 0 }
  0x7b   : > { %15027 = dma.done.wait (%p19882_p1), [#allocation10], 10240   ;;  %p19883_p8 = pmov %p19882_p1 }
  0x7c   : > { %p19884_p4 = pmov %p19882_p1 }
  0x7d   : > { %15029 = vsyncadd (%p19883_p8), [#allocation10], 4294957056 }
  0x7e   : > { %15031 = dma.done.wait (%p19884_p4), [#allocation13], 4096   ;;  %p19885_p5 = pmov %p19882_p1 }
  0x7f   : > { %p19886_p6 = scmp.ne.s32.totalorder %s15129_s9, 0 }
  0x80   : > { %15033 = vsyncadd (%p19885_p5), [#allocation13], 4294963200  ;;  %v15060_v0 = vmov (!%p19886_p6), 0.0  }
  0x81   : > { %361 = sbr.rel (%p19886_p6) target bundleno = 136 (0x88), region = 72  ;;  %362 = vst [vmem:[#allocation3] sm:$0x1] (!%p19886_p6), %v15060_v0  ;;  %363 = vst [vmem:[#allocation4] sm:$0x1] (!%p19886_p6), %v15060_v0 }
  0x88 PF: > { %v14441_v1 = vld [vmem:[#allocation9] sm:$0xff]   ;;  %v14442_v2 = vld [vmem:[#allocation9 + $0x8] sm:$0xff]   ;;  %v14443_v3 = vld [vmem:[#allocation9 + $0x10] sm:$0xff]   ;;  %s11911_s10 = sshll.u32 %s15129_s9, 8  ;;  %p11912_p10 = scmp.ne.s32.totalorder %s15129_s9, 1 }
  0x89   : > { %13046 = vmatprep.subr.bf16.mxu0 %v14441_v1  ;;  %13814 = vmatprep.subr.bf16.mxu1 %v14441_v1  ;;  %v14444_v4 = vld [vmem:[#allocation9 + $0x18] sm:$0xff]   ;;  %v14449_v5 = vld [vmem:[%s15300_s23] sm:$0xff]   ;;  %v14446_v7 = vld [vmem:[#allocation9 + $0x28] sm:$0xff]   ;;  %s15335_s11 = scalar_lea.vmem [#allocation2], %s11911_s10 }
  0x8a   : > { %13047 = vmatpush3.bf16.msra.mxu0 %v14441_v1  ;;  %13822 = vmatpush3.bf16.msra.mxu1 %v14441_v1  ;;  %v14445_v6 = vld [vmem:[#allocation9 + $0x20] sm:$0xff]   ;;  %v14447_v9 = vld [vmem:[#allocation9 + $0x30] sm:$0xff]   ;;  %v14448_v10 = vld [vmem:[#allocation9 + $0x38] sm:$0xff]  }
  0x8b   : > { %13048 = vmatprep.subr.bf16.mxu0 %v14442_v2  ;;  %13815 = vmatprep.subr.bf16.mxu1 %v14442_v2  ;;  %v14457_v8 = vld [vmem:[%s15300_s23 + $0x40] sm:$0xff]   ;;  %v14450_v11 = vld [vmem:[%s15300_s23 + $0x8] sm:$0xff]   ;;  %v14451_v13 = vld [vmem:[%s15300_s23 + $0x10] sm:$0xff]  }
  0x8c   : > { %13062 = vmatprep.mubr.bf16.mxu0 %v14449_v5  ;;  %13078 = vmatprep.mubr.bf16.mxu1 %v14457_v8  ;;  %v14458_v12 = vld [vmem:[%s15300_s23 + $0x48] sm:$0xff]   ;;  %v14459_v14 = vld [vmem:[%s15300_s23 + $0x50] sm:$0xff]   ;;  %v14452_v15 = vld [vmem:[%s15300_s23 + $0x18] sm:$0xff]  }
  0x8d   : > { %v14460_v16 = vld [vmem:[%s15300_s23 + $0x58] sm:$0xff]   ;;  %v14453_v17 = vld [vmem:[%s15300_s23 + $0x20] sm:$0xff]   ;;  %v14454_v19 = vld [vmem:[%s15300_s23 + $0x28] sm:$0xff]  }
  0x8e   : > { %13049 = vmatpush3.bf16.msra.mxu0 %v14442_v2  ;;  %13823 = vmatpush3.bf16.msra.mxu1 %v14442_v2  ;;  %v14461_v18 = vld [vmem:[%s15300_s23 + $0x60] sm:$0xff]   ;;  %v14462_v20 = vld [vmem:[%s15300_s23 + $0x68] sm:$0xff]   ;;  %v14455_v21 = vld [vmem:[%s15300_s23 + $0x30] sm:$0xff]  }
  0x8f   : > { %13050 = vmatprep.subr.bf16.mxu0 %v14443_v3  ;;  %13816 = vmatprep.subr.bf16.mxu1 %v14443_v3  ;;  %v14463_v22 = vld [vmem:[%s15300_s23 + $0x70] sm:$0xff]   ;;  %v14456_v23 = vld [vmem:[%s15300_s23 + $0x38] sm:$0xff]  }
  0x90   : > { %v14464_v24 = vld [vmem:[%s15300_s23 + $0x78] sm:$0xff]  }
  0x92   : > { %13051 = vmatpush3.bf16.msra.mxu0 %v14443_v3  ;;  %13824 = vmatpush3.bf16.msra.mxu1 %v14443_v3 }
  0x93   : > { %13052 = vmatprep.subr.bf16.mxu0 %v14444_v4  ;;  %13817 = vmatprep.subr.bf16.mxu1 %v14444_v4 }
  0x96   : > { %13053 = vmatpush3.bf16.msra.mxu0 %v14444_v4  ;;  %13825 = vmatpush3.bf16.msra.mxu1 %v14444_v4 }
  0x97   : > { %13054 = vmatprep.subr.bf16.mxu0 %v14445_v6  ;;  %13818 = vmatprep.subr.bf16.mxu1 %v14445_v6 }
  0x9a   : > { %13055 = vmatpush3.bf16.msra.mxu0 %v14445_v6  ;;  %13826 = vmatpush3.bf16.msra.mxu1 %v14445_v6 }
  0x9b   : > { %13056 = vmatprep.subr.bf16.mxu0 %v14446_v7  ;;  %13819 = vmatprep.subr.bf16.mxu1 %v14446_v7 }
  0x9e   : > { %13057 = vmatpush3.bf16.msra.mxu0 %v14446_v7  ;;  %13827 = vmatpush3.bf16.msra.mxu1 %v14446_v7 }
  0x9f   : > { %13058 = vmatprep.subr.bf16.mxu0 %v14447_v9  ;;  %13820 = vmatprep.subr.bf16.mxu1 %v14447_v9 }
  0xa2   : > { %13059 = vmatpush3.bf16.msra.mxu0 %v14447_v9  ;;  %13828 = vmatpush3.bf16.msra.mxu1 %v14447_v9 }
  0xa3   : > { %13060 = vmatprep.subr.bf16.mxu0 %v14448_v10  ;;  %13821 = vmatprep.subr.bf16.mxu1 %v14448_v10 }
  0xa6   : > { %13061 = vmatpush3.bf16.msra.mxu0 %v14448_v10  ;;  %13829 = vmatpush3.bf16.msra.mxu1 %v14448_v10 }
  0xa9   : > { %13063 = vmatmul.mubr.bf16.vlgmr.msra.gmra.mrb[0].mxu0 %v14450_v11  ;;  %13079 = vmatmul.mubr.bf16.vlgmr.msra.gmra.mrb[0].mxu1 %v14458_v12 }
  0xaa   : > { %13066 = vmatprep.mubr.bf16.mxu0 %v14451_v13  ;;  %13082 = vmatprep.mubr.bf16.mxu1 %v14459_v14 }
  0xb1   : > { %13067 = vmatmul.mubr.bf16.gmra.mrb[4].mxu0 %v14452_v15  ;;  %13083 = vmatmul.mubr.bf16.gmra.mrb[4].mxu1 %v14460_v16 }
  0xb2   : > { %13070 = vmatprep.mubr.bf16.mxu0 %v14453_v17  ;;  %13086 = vmatprep.mubr.bf16.mxu1 %v14461_v18 }
  0xb9   : > { %13071 = vmatmul.mubr.bf16.gmra.mrb[8].mxu0 %v14454_v19  ;;  %13087 = vmatmul.mubr.bf16.gmra.mrb[8].mxu1 %v14462_v20 }
  0xba   : > { %13074 = vmatprep.mubr.bf16.mxu0 %v14455_v21  ;;  %13090 = vmatprep.mubr.bf16.mxu1 %v14463_v22 }
  0xc1   : > { %13075 = vmatmul.mubr.bf16.gmra.mrb[12].mxu0 %v14456_v23  ;;  %13091 = vmatmul.mubr.bf16.gmra.mrb[12].mxu1 %v14464_v24 }
 0x17c   : > { %v13064_v25 = vpop.f32.mrb[0].mxu0  ;;  %v15333_v26 = vpop.f32.mrb[0].mxu1 }
 0x17d   : > { %721 = vst [vmem:[%s15335_s11 + $0x10] sm:$0xff] %v13064_v25  ;;  %v590_v27 = vpop.f32.mrb[1].mxu0  ;;  %737 = vst [vmem:[%s15335_s11 + $0x90] sm:$0xff] %v15333_v26  ;;  %v15340_v28 = vpop.f32.mrb[1].mxu1  ;;  %v794_v36 = vmul.f32 %v13064_v25, %v13064_v25 }
 0x17e   : > { %719 = vst [vmem:[%s15335_s11] sm:$0xff] %v590_v27  ;;  %v13065_v29 = vpop.f32.mrb[2].mxu0  ;;  %735 = vst [vmem:[%s15335_s11 + $0x80] sm:$0xff] %v15340_v28  ;;  %v15345_v30 = vpop.f32.mrb[2].mxu1  ;;  %v792_v33 = vmul.f32 %v590_v27, %v590_v27 }
 0x17f   : > { %722 = vst [vmem:[%s15335_s11 + $0x18] sm:$0xff] %v13065_v29  ;;  %v593_v31 = vpop.f32.mrb[3].mxu0  ;;  %738 = vst [vmem:[%s15335_s11 + $0x98] sm:$0xff] %v15345_v30  ;;  %v15350_v32 = vpop.f32.mrb[3].mxu1  ;;  %v795_v39 = vmul.f32 %v13065_v29, %v13065_v29 }
 0x180   : > { %720 = vst [vmem:[%s15335_s11 + $0x8] sm:$0xff] %v593_v31  ;;  %v752_v34 = vadd.f32 %v593_v31, %v590_v27  ;;  %v793_v35 = vmul.f32 %v593_v31, %v593_v31  ;;  %736 = vst [vmem:[%s15335_s11 + $0x88] sm:$0xff] %v15350_v32 }
 0x182   : > { %v753_v37 = vadd.f32 %v13064_v25, %v752_v34  ;;  %v824_v38 = vadd.f32 %v793_v35, %v792_v33 }
 0x184   : > { %v825_v40 = vadd.f32 %v824_v38, %v794_v36  ;;  %v13068_v41 = vpop.f32.mrb[4].mxu0  ;;  %v754_v42 = vadd.f32 %v13065_v29, %v753_v37  ;;  %v15355_v43 = vpop.f32.mrb[4].mxu1 }
 0x185   : > { %725 = vst [vmem:[%s15335_s11 + $0x30] sm:$0xff] %v13068_v41  ;;  %v606_v44 = vpop.f32.mrb[5].mxu0  ;;  %741 = vst [vmem:[%s15335_s11 + $0xb0] sm:$0xff] %v15355_v43  ;;  %v15360_v45 = vpop.f32.mrb[5].mxu1  ;;  %v798_v56 = vmul.f32 %v13068_v41, %v13068_v41 }
 0x186   : > { %723 = vst [vmem:[%s15335_s11 + $0x20] sm:$0xff] %v606_v44  ;;  %v755_v46 = vadd.f32 %v754_v42, %v606_v44  ;;  %v796_v47 = vmul.f32 %v606_v44, %v606_v44  ;;  %v826_v48 = vadd.f32 %v825_v40, %v795_v39  ;;  %v13069_v49 = vpop.f32.mrb[6].mxu0  ;;  %739 = vst [vmem:[%s15335_s11 + $0xa0] sm:$0xff] %v15360_v45  ;;  %v15365_v50 = vpop.f32.mrb[6].mxu1 }
 0x187   : > { %726 = vst [vmem:[%s15335_s11 + $0x38] sm:$0xff] %v13069_v49  ;;  %v609_v51 = vpop.f32.mrb[7].mxu0  ;;  %742 = vst [vmem:[%s15335_s11 + $0xb8] sm:$0xff] %v15365_v50  ;;  %v15370_v52 = vpop.f32.mrb[7].mxu1  ;;  %v799_v59 = vmul.f32 %v13069_v49, %v13069_v49  ;;  %v808_v42 = vmul.f32 %v15340_v28, %v15340_v28 }
 0x188   : > { %v827_v53 = vadd.f32 %v826_v48, %v796_v47  ;;  %724 = vst [vmem:[%s15335_s11 + $0x28] sm:$0xff] %v609_v51  ;;  %v756_v54 = vadd.f32 %v755_v46, %v609_v51  ;;  %v797_v55 = vmul.f32 %v609_v51, %v609_v51  ;;  %740 = vst [vmem:[%s15335_s11 + $0xa8] sm:$0xff] %v15370_v52 }
 0x189   : > { %v810_v51 = vmul.f32 %v15333_v26, %v15333_v26 }
 0x18a   : > { %v757_v57 = vadd.f32 %v13068_v41, %v756_v54  ;;  %v828_v58 = vadd.f32 %v827_v53, %v797_v55  ;;  %v811_v55 = vmul.f32 %v15345_v30, %v15345_v30 }
 0x18c   : > { %v829_v60 = vadd.f32 %v828_v58, %v798_v56  ;;  %v13072_v61 = vpop.f32.mrb[8].mxu0  ;;  %v758_v62 = vadd.f32 %v13069_v49, %v757_v57  ;;  %v15375_v63 = vpop.f32.mrb[8].mxu1  ;;  %v809_v49 = vmul.f32 %v15350_v32, %v15350_v32 }
 0x18d   : > { %729 = vst [vmem:[%s15335_s11 + $0x50] sm:$0xff] %v13072_v61  ;;  %v622_v0 = vpop.f32.mrb[9].mxu0  ;;  %745 = vst [vmem:[%s15335_s11 + $0xd0] sm:$0xff] %v15375_v63  ;;  %v15380_v1 = vpop.f32.mrb[9].mxu1  ;;  %v802_v12 = vmul.f32 %v13072_v61, %v13072_v61 }
 0x18e   : > { %727 = vst [vmem:[%s15335_s11 + $0x40] sm:$0xff] %v622_v0  ;;  %v759_v2 = vadd.f32 %v758_v62, %v622_v0  ;;  %v800_v3 = vmul.f32 %v622_v0, %v622_v0  ;;  %v830_v4 = vadd.f32 %v829_v60, %v799_v59  ;;  %v13073_v5 = vpop.f32.mrb[10].mxu0  ;;  %743 = vst [vmem:[%s15335_s11 + $0xc0] sm:$0xff] %v15380_v1  ;;  %v15385_v6 = vpop.f32.mrb[10].mxu1 }
 0x18f   : > { %730 = vst [vmem:[%s15335_s11 + $0x58] sm:$0xff] %v13073_v5  ;;  %v625_v7 = vpop.f32.mrb[11].mxu0  ;;  %746 = vst [vmem:[%s15335_s11 + $0xd8] sm:$0xff] %v15385_v6  ;;  %v15390_v8 = vpop.f32.mrb[11].mxu1  ;;  %v803_v15 = vmul.f32 %v13073_v5, %v13073_v5 }
 0x190   : > { %v831_v9 = vadd.f32 %v830_v4, %v800_v3  ;;  %728 = vst [vmem:[%s15335_s11 + $0x48] sm:$0xff] %v625_v7  ;;  %v760_v10 = vadd.f32 %v759_v2, %v625_v7  ;;  %v801_v11 = vmul.f32 %v625_v7, %v625_v7  ;;  %744 = vst [vmem:[%s15335_s11 + $0xc8] sm:$0xff] %v15390_v8 }
 0x192   : > { %v761_v13 = vadd.f32 %v13072_v61, %v760_v10  ;;  %v832_v14 = vadd.f32 %v831_v9, %v801_v11  ;;  %v813_v61 = vmul.f32 %v15370_v52, %v15370_v52  ;;  %v817_v9 = vmul.f32 %v15390_v8, %v15390_v8 }
 0x194   : > { %v833_v16 = vadd.f32 %v832_v14, %v802_v12  ;;  %v13076_v17 = vpop.f32.mrb[12].mxu0  ;;  %v762_v18 = vadd.f32 %v13073_v5, %v761_v13  ;;  %v15395_v19 = vpop.f32.mrb[12].mxu1 }
 0x195   : > { %733 = vst [vmem:[%s15335_s11 + $0x70] sm:$0xff] %v13076_v17  ;;  %v638_v20 = vpop.f32.mrb[13].mxu0  ;;  %749 = vst [vmem:[%s15335_s11 + $0xf0] sm:$0xff] %v15395_v19  ;;  %v702_v21 = vpop.f32.mrb[13].mxu1  ;;  %v806_v36 = vmul.f32 %v13076_v17, %v13076_v17 }
 0x196   : > { %731 = vst [vmem:[%s15335_s11 + $0x60] sm:$0xff] %v638_v20  ;;  %v763_v22 = vadd.f32 %v762_v18, %v638_v20  ;;  %v804_v23 = vmul.f32 %v638_v20, %v638_v20  ;;  %v834_v24 = vadd.f32 %v833_v16, %v803_v15  ;;  %v13077_v25 = vpop.f32.mrb[14].mxu0  ;;  %747 = vst [vmem:[%s15335_s11 + $0xe0] sm:$0xff] %v702_v21  ;;  %v13093_v27 = vpop.f32.mrb[14].mxu1 }
 0x197   : > { %734 = vst [vmem:[%s15335_s11 + $0x78] sm:$0xff] %v13077_v25  ;;  %v641_v29 = vpop.f32.mrb[15].mxu0  ;;  %750 = vst [vmem:[%s15335_s11 + $0xf8] sm:$0xff] %v13093_v27  ;;  %v705_v31 = vpop.f32.mrb[15].mxu1  ;;  %v807_v39 = vmul.f32 %v13077_v25, %v13077_v25 }
 0x198   : > { %v835_v33 = vadd.f32 %v834_v24, %v804_v23  ;;  %732 = vst [vmem:[%s15335_s11 + $0x68] sm:$0xff] %v641_v29  ;;  %v764_v34 = vadd.f32 %v763_v22, %v641_v29  ;;  %v805_v35 = vmul.f32 %v641_v29, %v641_v29  ;;  %748 = vst [vmem:[%s15335_s11 + $0xe8] sm:$0xff] %v705_v31 }
 0x199   : > { %v821_v18 = vmul.f32 %v705_v31, %v705_v31 }
 0x19a   : > { %v765_v37 = vadd.f32 %v13076_v17, %v764_v34  ;;  %v836_v38 = vadd.f32 %v835_v33, %v805_v35 }
 0x19c   : > { %v837_v40 = vadd.f32 %v836_v38, %v806_v36  ;;  %v766_v41 = vadd.f32 %v13077_v25, %v765_v37 }
 0x19e   : > { %v767_v44 = vadd.f32 %v766_v41, %v15340_v28  ;;  %v838_v46 = vadd.f32 %v837_v40, %v807_v39  ;;  %v812_v28 = vmul.f32 %v15360_v45, %v15360_v45  ;;  %v791_v41 = vld [vmem:[#allocation4] sm:$0x1] }
 0x1a0   : > { %v839_v47 = vadd.f32 %v838_v46, %v808_v42  ;;  %v768_v48 = vadd.f32 %v767_v44, %v15350_v32 }
 0x1a2   : > { %v769_v53 = vadd.f32 %v15333_v26, %v768_v48  ;;  %v840_v54 = vadd.f32 %v839_v47, %v809_v49  ;;  %v814_v26 = vmul.f32 %v15355_v43, %v15355_v43 }
 0x1a4   : > { %v841_v56 = vadd.f32 %v840_v54, %v810_v51  ;;  %v770_v57 = vadd.f32 %v15345_v30, %v769_v53  ;;  %v815_v30 = vmul.f32 %v15365_v50, %v15365_v50 }
 0x1a6   : > { %v771_v58 = vadd.f32 %v770_v57, %v15360_v45  ;;  %v842_v59 = vadd.f32 %v841_v56, %v811_v55  ;;  %v816_v45 = vmul.f32 %v15380_v1, %v15380_v1 }
 0x1a8   : > { %v843_v60 = vadd.f32 %v842_v59, %v812_v28  ;;  %v772_v32 = vadd.f32 %v771_v58, %v15370_v52 }
 0x1aa   : > { %v773_v62 = vadd.f32 %v15355_v43, %v772_v32  ;;  %v844_v0 = vadd.f32 %v843_v60, %v813_v61  ;;  %v818_v43 = vmul.f32 %v15375_v63, %v15375_v63 }
 0x1ac   : > { %v845_v2 = vadd.f32 %v844_v0, %v814_v26  ;;  %v774_v3 = vadd.f32 %v15365_v50, %v773_v62  ;;  %v819_v50 = vmul.f32 %v15385_v6, %v15385_v6 }
 0x1ae   : > { %v775_v4 = vadd.f32 %v774_v3, %v15380_v1  ;;  %v846_v5 = vadd.f32 %v845_v2, %v815_v30  ;;  %v820_v1 = vmul.f32 %v702_v21, %v702_v21 }
 0x1b0   : > { %v847_v7 = vadd.f32 %v846_v5, %v816_v45  ;;  %v776_v52 = vadd.f32 %v775_v4, %v15390_v8  ;;  %v822_v8 = vmul.f32 %v15395_v19, %v15395_v19 }
 0x1b2   : > { %v777_v10 = vadd.f32 %v15375_v63, %v776_v52  ;;  %v848_v11 = vadd.f32 %v847_v7, %v817_v9  ;;  %v823_v63 = vmul.f32 %v13093_v27, %v13093_v27 }
 0x1b4   : > { %v849_v12 = vadd.f32 %v848_v11, %v818_v43  ;;  %v778_v13 = vadd.f32 %v15385_v6, %v777_v10 }
 0x1b6   : > { %v779_v14 = vadd.f32 %v778_v13, %v702_v21  ;;  %v850_v15 = vadd.f32 %v849_v12, %v819_v50 }
 0x1b8   : > { %v851_v16 = vadd.f32 %v850_v15, %v820_v1  ;;  %v780_v17 = vadd.f32 %v779_v14, %v705_v31  ;;  %v751_v31 = vld [vmem:[#allocation3] sm:$0x1] }
 0x1ba   : > { %v781_v20 = vadd.f32 %v15395_v19, %v780_v17  ;;  %v852_v22 = vadd.f32 %v851_v16, %v821_v18 }
 0x1bc   : > { %v782_v23 = vadd.f32 %v13093_v27, %v781_v20  ;;  %v853_v24 = vadd.f32 %v852_v22, %v822_v8 }
 0x1be   : > { %v783_v25 = vrot.slane %v782_v23, 4  ;;  %v854_v29 = vadd.f32 %v853_v24, %v823_v63 }
 0x1c0   : > { %v784_v33 = vadd.f32 %v783_v25, %v782_v23  ;;  %v855_v34 = vrot.slane %v854_v29, 4 }
 0x1c2   : > { %v785_v6 = vrot.slane %v784_v33, 2  ;;  %v856_v35 = vadd.f32 %v855_v34, %v854_v29 }
 0x1c4   : > { %v786_v21 = vadd.f32 %v785_v6, %v784_v33  ;;  %v857_v36 = vrot.slane %v856_v35, 2 }
 0x1c6   : > { %v787_v37 = vrot.slane %v786_v21, 1  ;;  %v858_v38 = vadd.f32 %v857_v36, %v856_v35 }
 0x1c8   : > { %v788_v39 = vadd.f32 %v787_v37, %v786_v21  ;;  %v859_v40 = vrot.slane %v858_v38, 1  ;;  %866 = sbr.rel (%p11912_p10) target bundleno = 1881 (0x759), region = 76 }
 0x1ca   : > { %v789_v42 = vadd.f32 %v788_v39, %v751_v31  ;;  %v860_v19 = vadd.f32 %v859_v40, %v858_v38 }
 0x1cc   : > { %790 = vst [vmem:[#allocation3] sm:$0x1] %v789_v42  ;;  %v861_v44 = vadd.f32 %v860_v19, %v791_v41 }
 0x1ce   : > { %862 = vst [vmem:[#allocation4] sm:$0x1] %v861_v44 }
 0x1cf   : > { %v15446_v27 = vld [vmem:[#allocation11 + $0x40] sm:$0xff]   ;;  %v15061_v47 = vmov 0   ;;  %v14467_v48 = vld [vmem:[#allocation11 + $0x48] sm:$0xff]   ;;  %v14469_v51 = vld [vmem:[#allocation11 + $0x50] sm:$0xff]   ;;  %vm2433_vm0 = vsmask.f32 3328  ;;  %v945_v23 = vlaneseq }
 0x1d0   : > { %v15448_v46 = vld [vmem:[#allocation11 + $0x100] sm:$0xff]   ;;  %1180 = vst [vmem:[#allocation5] sm:$0xf] %v15061_v47  ;;  %1181 = vst [vmem:[#allocation5 + $0x4] sm:$0xf] %v15061_v47  ;;  %13094 = vmatprep.subr.bf16.mxu1 %v15446_v27  ;;  %v14468_v49 = vld [vmem:[#allocation11 + $0x108] sm:$0xff]  }
 0x1d1   : > { %1182 = vst [vmem:[#allocation5 + $0x8] sm:$0x1] %v15061_v47  ;;  %1183 = vst [vmem:[#allocation5 + $0xc] sm:$0xf] %v15061_v47  ;;  %13414 = vmatprep.subr.bf16.mxu0 %v15448_v46  ;;  %13095 = vmatpush3.bf16.msra.mxu1 %v15446_v27  ;;  %v14470_v53 = vld [vmem:[#allocation11 + $0x110] sm:$0xff]   ;;  %v14471_v54 = vld [vmem:[#allocation11 + $0x58] sm:$0xff]  }
 0x1d2   : > { %1184 = vst [vmem:[#allocation5 + $0x10] sm:$0xf] %v15061_v47  ;;  %1185 = vst [vmem:[#allocation5 + $0x14] sm:$0x1] %v15061_v47  ;;  %13415 = vmatpush3.bf16.msra.mxu0 %v15448_v46  ;;  %13096 = vmatprep.subr.bf16.mxu1 %v14467_v48  ;;  %v14472_v55 = vld [vmem:[#allocation11 + $0x118] sm:$0xff]   ;;  %v14473_v56 = vld [vmem:[#allocation11 + $0x60] sm:$0xff]  }
 0x1d3   : > { %1186 = vst [vmem:[#allocation5 + $0x18] sm:$0xf] %v15061_v47  ;;  %1187 = vst [vmem:[#allocation5 + $0x1c] sm:$0xf] %v15061_v47  ;;  %13416 = vmatprep.subr.bf16.mxu0 %v14468_v49  ;;  %v14474_v57 = vld [vmem:[#allocation11 + $0x120] sm:$0xff]   ;;  %v14475_v28 = vld [vmem:[#allocation11 + $0x68] sm:$0xff]  }
 0x1d4   : > { %1188 = vst [vmem:[#allocation5 + $0x20] sm:$0x1] %v15061_v47  ;;  %1189 = vst [vmem:[#allocation5 + $0x24] sm:$0xf] %v15061_v47  ;;  %v14476_v58 = vld [vmem:[#allocation11 + $0x128] sm:$0xff]   ;;  %v14477_v7 = vld [vmem:[#allocation11 + $0x70] sm:$0xff]  }
 0x1d5   : > { %1190 = vst [vmem:[#allocation5 + $0x28] sm:$0xf] %v15061_v47  ;;  %1191 = vst [vmem:[#allocation5 + $0x2c] sm:$0x1] %v15061_v47  ;;  %13097 = vmatpush3.bf16.msra.mxu1 %v14467_v48  ;;  %vm2434_vm1 = vsmask.f32 7440 }
 0x1d6   : > { %1192 = vst [vmem:[#allocation5 + $0x30] sm:$0xf] %v15061_v47  ;;  %1193 = vst [vmem:[#allocation5 + $0x34] sm:$0xf] %v15061_v47  ;;  %13417 = vmatpush3.bf16.msra.mxu0 %v14468_v49  ;;  %13098 = vmatprep.subr.bf16.mxu1 %v14469_v51  ;;  %v867_v2 = vld [vmem:[#allocation3] sm:$0x1] }
 0x1d7   : > { %1194 = vst [vmem:[#allocation5 + $0x38] sm:$0x1] %v15061_v47  ;;  %1195 = vst [vmem:[#allocation5 + $0x3c] sm:$0xf] %v15061_v47  ;;  %13418 = vmatprep.subr.bf16.mxu0 %v14470_v53  ;;  %v2321_v59 = vld [vmem:[#allocation5] sm:$0xf] }
 0x1d8   : > { %1196 = vst [vmem:[#allocation5 + $0x40] sm:$0xf] %v15061_v47  ;;  %1197 = vst [vmem:[#allocation5 + $0x44] sm:$0x1] %v15061_v47  ;;  %v2322_v60 = vld [vmem:[#allocation5 + $0x4] sm:$0xf] }
 0x1d9   : > { %1198 = vst [vmem:[#allocation5 + $0x48] sm:$0xf] %v15061_v47  ;;  %1199 = vst [vmem:[#allocation5 + $0x4c] sm:$0xf] %v15061_v47  ;;  %13099 = vmatpush3.bf16.msra.mxu1 %v14469_v51  ;;  %v2401_v32 = vld [vmem:[#allocation5 + $0x8] sm:$0x1] }
 0x1da   : > { %1200 = vst [vmem:[#allocation5 + $0x50] sm:$0x1] %v15061_v47  ;;  %1201 = vst [vmem:[#allocation5 + $0x54] sm:$0xf] %v15061_v47  ;;  %13419 = vmatpush3.bf16.msra.mxu0 %v14470_v53  ;;  %13100 = vmatprep.subr.bf16.mxu1 %v14471_v54  ;;  %v2437_v61 = vshrl.u32 %v2321_v59, 16  ;;  %v2440_v26 = vshll.u32 %v2321_v59, 16 }
 0x1db   : > { %1202 = vst [vmem:[#allocation5 + $0x58] sm:$0xf] %v15061_v47  ;;  %1203 = vst [vmem:[#allocation5 + $0x5c] sm:$0x1] %v15061_v47  ;;  %13420 = vmatprep.subr.bf16.mxu0 %v14472_v55  ;;  %v2446_v62 = vshll.u32 %v2322_v60, 16  ;;  %v2450_v0 = vshrl.u32 %v2322_v60, 16 }
 0x1dc   : > { %1204 = vst [vmem:[#allocation5 + $0x60] sm:$0xf] %v15061_v47  ;;  %1205 = vst [vmem:[#allocation5 + $0x64] sm:$0xf] %v15061_v47  ;;  %v2456_v30 = vshll.u32 %v2401_v32, 16  ;;  %v2439_v3 = vrot.slane %v2437_v61, 4 }
 0x1dd   : > { %1206 = vst [vmem:[#allocation5 + $0x68] sm:$0x1] %v15061_v47  ;;  %1207 = vst [vmem:[#allocation5 + $0x6c] sm:$0xf] %v15061_v47  ;;  %13101 = vmatpush3.bf16.msra.mxu1 %v14471_v54  ;;  %v2442_v45 = vrot.slane %v2440_v26, 5  ;;  %v868_v4 = vmul.f32 0.001953125, %v867_v2 }
 0x1de   : > { %1208 = vst [vmem:[#allocation5 + $0x70] sm:$0xf] %v15061_v47  ;;  %1209 = vst [vmem:[#allocation5 + $0x74] sm:$0x1] %v15061_v47  ;;  %13421 = vmatpush3.bf16.msra.mxu0 %v14472_v55  ;;  %13102 = vmatprep.subr.bf16.mxu1 %v14473_v56  ;;  %v869_v5 = vld [vmem:[#allocation4] sm:$0x1] }
 0x1df   : > { %1210 = vst [vmem:[#allocation5 + $0x78] sm:$0xf] %v15061_v47  ;;  %1211 = vst [vmem:[#allocation5 + $0x7c] sm:$0xf] %v15061_v47  ;;  %13422 = vmatprep.subr.bf16.mxu0 %v14474_v57  ;;  %v2448_v52 = vrot.slane %v2446_v62, 5  ;;  %v2452_v9 = vrot.slane %v2450_v0, 4  ;;  %v2443_v11 = vor.u32 %v2442_v45, %v2439_v3  ;;  %v871_v50 = vmul.f32 %v868_v4, %v868_v4 }
 0x1e0   : > { %1212 = vst [vmem:[#allocation5 + $0x80] sm:$0x1] %v15061_v47  ;;  %1213 = vst [vmem:[#allocation5 + $0x84] sm:$0xf] %v15061_v47  ;;  %v870_v43 = vmul.f32 0.001953125, %v869_v5  ;;  %v14478_v10 = vld [vmem:[#allocation11 + $0x130] sm:$0xff]  }
 0x1e1   : > { %1214 = vst [vmem:[#allocation5 + $0x88] sm:$0xf] %v15061_v47  ;;  %1215 = vst [vmem:[#allocation5 + $0x8c] sm:$0x1] %v15061_v47  ;;  %13103 = vmatpush3.bf16.msra.mxu1 %v14473_v56  ;;  %v2453_v13 = vor.u32 %v2452_v9, %v2448_v52  ;;  %v2458_v1 = vrot.slane %v2456_v30, 5  ;;  %v2444_v14 = vrot.slane %v2443_v11, 4 }
 0x1e2   : > { %1216 = vst [vmem:[#allocation5 + $0x90] sm:$0xf] %v15061_v47  ;;  %1217 = vst [vmem:[#allocation5 + $0x94] sm:$0xf] %v15061_v47  ;;  %13423 = vmatpush3.bf16.msra.mxu0 %v14474_v57  ;;  %13104 = vmatprep.subr.bf16.mxu1 %v14475_v28  ;;  %v872_v15 = vsub.f32 %v870_v43, %v871_v50  ;;  %v14479_v16 = vld [vmem:[#allocation11 + $0x78] sm:$0xff]   ;;  %v15572_v24 = vld [vmem:[#allocation11] sm:$0xff]  }
 0x1e3   : > { %1218 = vst [vmem:[#allocation5 + $0x98] sm:$0x1] %v15061_v47  ;;  %1219 = vst [vmem:[#allocation5 + $0x9c] sm:$0xf] %v15061_v47  ;;  %13424 = vmatprep.subr.bf16.mxu0 %v14476_v58  ;;  %v2454_v17 = vrot.slane %v2453_v13, 4  ;;  %v14480_v18 = vld [vmem:[#allocation11 + $0x138] sm:$0xff]  }
 0x1e4   : > { %1220 = vst [vmem:[#allocation5 + $0xa0] sm:$0xf] %v15061_v47  ;;  %1221 = vst [vmem:[#allocation5 + $0xa4] sm:$0x1] %v15061_v47  ;;  %v874_v20 = vadd.f32 1e-05, %v872_v15 }
 0x1e5   : > { %1222 = vst [vmem:[#allocation5 + $0xa8] sm:$0xf] %v15061_v47  ;;  %1223 = vst [vmem:[#allocation5 + $0xac] sm:$0xf] %v15061_v47  ;;  %13105 = vmatpush3.bf16.msra.mxu1 %v14475_v28  ;;  %v15574_v25 = vld [vmem:[#allocation11 + $0x140] sm:$0xff]   ;;  %v946_v29 = vshrl.u32 %v945_v23, 7 }
 0x1e6   : > { %1224 = vst [vmem:[#allocation5 + $0xb0] sm:$0x1] %v15061_v47  ;;  %1225 = vst [vmem:[#allocation5 + $0xb4] sm:$0xf] %v15061_v47  ;;  %13425 = vmatpush3.bf16.msra.mxu0 %v14476_v58  ;;  %13106 = vmatprep.subr.bf16.mxu1 %v14477_v7  ;;  %14633 = vrsqrt.f32 %v874_v20  ;;  %v873_v33 = vld [vmem:[%s19734_s2] sm:$0x1] }
 0x1e7   : > { %1226 = vst [vmem:[#allocation5 + $0xb8] sm:$0xf] %v15061_v47  ;;  %1227 = vst [vmem:[#allocation5 + $0xbc] sm:$0x1] %v15061_v47  ;;  %13426 = vmatprep.subr.bf16.mxu0 %v14478_v10  ;;  %v15581_v34 = vsub.s32 0, %v946_v29  ;;  %v880_v21 = vld [vmem:[#allocation2] sm:$0xff] }
 0x1e8   : > { %1228 = vst [vmem:[#allocation5 + $0xc0] sm:$0xf] %v15061_v47  ;;  %1229 = vst [vmem:[#allocation5 + $0xc4] sm:$0xf] %v15061_v47  ;;  %v877_v35 = vld [vmem:[%s19735_s3] sm:$0x1] }
 0x1e9   : > { %1230 = vst [vmem:[#allocation5 + $0xc8] sm:$0x1] %v15061_v47  ;;  %1231 = vst [vmem:[#allocation5 + $0xcc] sm:$0xf] %v15061_v47  ;;  %13107 = vmatpush3.bf16.msra.mxu1 %v14477_v7  ;;  %v881_v36 = vld [vmem:[#allocation2 + $0x8] sm:$0xff]  ;;  %v882_v38 = vld [vmem:[#allocation2 + $0x10] sm:$0xff] }
 0x1ea   : > { %1232 = vst [vmem:[#allocation5 + $0xd0] sm:$0xf] %v15061_v47  ;;  %1233 = vst [vmem:[#allocation5 + $0xd4] sm:$0x1] %v15061_v47  ;;  %13427 = vmatpush3.bf16.msra.mxu0 %v14478_v10  ;;  %13108 = vmatprep.subr.bf16.mxu1 %v14479_v16  ;;  %v883_v31 = vld [vmem:[#allocation2 + $0x18] sm:$0xff]  ;;  %v884_v39 = vld [vmem:[#allocation2 + $0x20] sm:$0xff] }
 0x1eb   : > { %1234 = vst [vmem:[#allocation5 + $0xd8] sm:$0xf] %v15061_v47  ;;  %1235 = vst [vmem:[#allocation5 + $0xdc] sm:$0xf] %v15061_v47  ;;  %13428 = vmatprep.subr.bf16.mxu0 %v14480_v18  ;;  %v885_v40 = vld [vmem:[#allocation2 + $0x28] sm:$0xff]  ;;  %v886_v41 = vld [vmem:[#allocation2 + $0x30] sm:$0xff] }
 0x1ec   : > { %1236 = vst [vmem:[#allocation5 + $0xe0] sm:$0x1] %v15061_v47  ;;  %1237 = vst [vmem:[#allocation5 + $0xe4] sm:$0xf] %v15061_v47  ;;  %v887_v42 = vld [vmem:[#allocation2 + $0x38] sm:$0xff]  ;;  %v888_v27 = vld [vmem:[#allocation2 + $0x40] sm:$0xff] }
 0x1ed   : > { %1238 = vst [vmem:[#allocation5 + $0xe8] sm:$0xf] %v15061_v47  ;;  %1239 = vst [vmem:[#allocation5 + $0xec] sm:$0x1] %v15061_v47  ;;  %13109 = vmatpush3.bf16.msra.mxu1 %v14479_v16  ;;  %v889_v46 = vld [vmem:[#allocation2 + $0x48] sm:$0xff]  ;;  %vm2099_vm3 = vcmask 1040384  }
 0x1ee   : > { %1240 = vst [vmem:[#allocation5 + $0xf0] sm:$0xf] %v15061_v47  ;;  %1241 = vst [vmem:[#allocation5 + $0xf4] sm:$0xf] %v15061_v47  ;;  %13429 = vmatpush3.bf16.msra.mxu0 %v14480_v18  ;;  %13174 = vmatprep.subr.bf16.mxu1 %v15572_v24  ;;  %v890_v53 = vld [vmem:[#allocation2 + $0x50] sm:$0xff]  ;;  %v891_v54 = vld [vmem:[#allocation2 + $0x58] sm:$0xff] }
 0x1ef   : > { %1242 = vst [vmem:[#allocation5 + $0xf8] sm:$0x1] %v15061_v47  ;;  %1243 = vst [vmem:[#allocation5 + $0xfc] sm:$0xf] %v15061_v47  ;;  %13494 = vmatprep.subr.bf16.mxu0 %v15574_v25  ;;  %v892_v55 = vld [vmem:[#allocation2 + $0x60] sm:$0xff]  ;;  %vm2092_vm6 = vcmask 1043456  }
 0x1f0   : > { %1244 = vst [vmem:[#allocation5 + $0x100] sm:$0xf] %v15061_v47  ;;  %1245 = vst [vmem:[#allocation5 + $0x104] sm:$0x1] %v15061_v47  ;;  %v14634_v6 = vpop.eup %14633  ;;  %vm1448_vm4 = vsmask.f32 256 }
 0x1f1   : > { %1246 = vst [vmem:[#allocation5 + $0x108] sm:$0xf] %v15061_v47  ;;  %1247 = vst [vmem:[#allocation5 + $0x10c] sm:$0xf] %v15061_v47  ;;  %v876_v37 = vmul.f32 %v14634_v6, %v873_v33  ;;  %vm1449_vm5 = vsmask.f32 4368 }
 0x1f2   : > { %1248 = vst [vmem:[#allocation5 + $0x110] sm:$0x1] %v15061_v47  ;;  %1249 = vst [vmem:[#allocation5 + $0x114] sm:$0xf] %v15061_v47  ;;  %vm2093_vm7 = vsmask.f32 7938 }
 0x1f3   : > { %1250 = vst [vmem:[#allocation5 + $0x118] sm:$0xf] %v15061_v47  ;;  %1251 = vst [vmem:[#allocation5 + $0x11c] sm:$0x1] %v15061_v47  ;;  %v878_v19 = vmul.f32 %v876_v37, %v868_v4  ;;  %v15587_v44 = vrot.slane %v876_v37, %v15581_v34  ;;  %vm4311_vm11 = vcmask 1042432   ;;  %vm4312_vm12 = vcmask 1046532  }
 0x1f4   : > { %1252 = vst [vmem:[#allocation5 + $0x120] sm:$0xf] %v15061_v47  ;;  %1253 = vst [vmem:[#allocation5 + $0x124] sm:$0xf] %v15061_v47 }
 0x1f5   : > { %1254 = vst [vmem:[#allocation5 + $0x128] sm:$0x1] %v15061_v47  ;;  %1255 = vst [vmem:[#allocation5 + $0x12c] sm:$0xf] %v15061_v47  ;;  %v950_v48 = vmul.f32 %v15587_v44, %v880_v21  ;;  %v951_v49 = vmul.f32 %v15587_v44, %v881_v36  ;;  %v952_v51 = vmul.f32 %v15587_v44, %v882_v38  ;;  %v2101_v36 = vld [vmem:[#allocation5 + $0x14] sm:$0x1] }
 0x1f6   : > { %1256 = vst [vmem:[#allocation5 + $0x130] sm:$0xf] %v15061_v47  ;;  %1257 = vst [vmem:[#allocation5 + $0x134] sm:$0x1] %v15061_v47  ;;  %v953_v56 = vmul.f32 %v15587_v44, %v883_v31  ;;  %v954_v57 = vmul.f32 %v15587_v44, %v884_v39  ;;  %v955_v28 = vmul.f32 %v15587_v44, %v885_v40 }
 0x1f7   : > { %1258 = vst [vmem:[#allocation5 + $0x138] sm:$0xf] %v15061_v47  ;;  %1259 = vst [vmem:[#allocation5 + $0x13c] sm:$0xf] %v15061_v47  ;;  %v956_v58 = vmul.f32 %v15587_v44, %v886_v41  ;;  %v957_v60 = vmul.f32 %v15587_v44, %v887_v42  ;;  %v15601_v32 = vmul.f32 %v15587_v44, %v888_v27  ;;  %v2108_v27 = vld [vmem:[#allocation5 + $0x20] sm:$0x1] }
 0x1f8   : > { %1260 = vst [vmem:[#allocation5 + $0x140] sm:$0x1] %v15061_v47  ;;  %1261 = vst [vmem:[#allocation5 + $0x144] sm:$0xf] %v15061_v47  ;;  %v15604_v61 = vmul.f32 %v15587_v44, %v889_v46  ;;  %v15607_v26 = vmul.f32 %v15587_v44, %v890_v53  ;;  %v15610_v62 = vmul.f32 %v15587_v44, %v891_v54 }
 0x1f9   : > { %1262 = vst [vmem:[#allocation5 + $0x148] sm:$0xf] %v15061_v47  ;;  %1263 = vst [vmem:[#allocation5 + $0x14c] sm:$0x1] %v15061_v47  ;;  %v15613_v0 = vmul.f32 %v15587_v44, %v892_v55 }
 0x1fa   : > { %1264 = vst [vmem:[#allocation5 + $0x150] sm:$0xf] %v15061_v47  ;;  %1265 = vst [vmem:[#allocation5 + $0x154] sm:$0xf] %v15061_v47 }
 0x1fb   : > { %1266 = vst [vmem:[#allocation5 + $0x158] sm:$0x1] %v15061_v47  ;;  %1267 = vst [vmem:[#allocation5 + $0x15c] sm:$0xf] %v15061_v47 }
 0x1fc   : > { %1268 = vst [vmem:[#allocation5 + $0x160] sm:$0xf] %v15061_v47  ;;  %1269 = vst [vmem:[#allocation5 + $0x164] sm:$0x1] %v15061_v47 }
 0x1fd   : > { %1270 = vst [vmem:[#allocation5 + $0x168] sm:$0xf] %v15061_v47  ;;  %1271 = vst [vmem:[#allocation5 + $0x16c] sm:$0xf] %v15061_v47 }
 0x1fe   : > { %1272 = vst [vmem:[#allocation5 + $0x170] sm:$0x1] %v15061_v47  ;;  %1273 = vst [vmem:[#allocation5 + $0x174] sm:$0xf] %v15061_v47 }
 0x1ff   : > { %1274 = vst [vmem:[#allocation5 + $0x178] sm:$0xf] %v15061_v47  ;;  %1275 = vst [vmem:[#allocation5 + $0x17c] sm:$0x1] %v15061_v47 }
 0x200   : > { %1276 = vst [vmem:[#allocation5 + $0x180] sm:$0xf] %v15061_v47  ;;  %1277 = vst [vmem:[#allocation5 + $0x184] sm:$0xf] %v15061_v47 }
 0x201   : > { %1278 = vst [vmem:[#allocation5 + $0x188] sm:$0x1] %v15061_v47  ;;  %1279 = vst [vmem:[#allocation5 + $0x18c] sm:$0xf] %v15061_v47 }
 0x202   : > { %1280 = vst [vmem:[#allocation5 + $0x190] sm:$0xf] %v15061_v47  ;;  %1281 = vst [vmem:[#allocation5 + $0x194] sm:$0x1] %v15061_v47 }
 0x203   : > { %1282 = vst [vmem:[#allocation5 + $0x198] sm:$0xf] %v15061_v47  ;;  %1283 = vst [vmem:[#allocation5 + $0x19c] sm:$0xf] %v15061_v47 }
 0x204   : > { %1284 = vst [vmem:[#allocation5 + $0x1a0] sm:$0x1] %v15061_v47  ;;  %1285 = vst [vmem:[#allocation5 + $0x1a4] sm:$0xf] %v15061_v47 }
 0x205   : > { %1286 = vst [vmem:[#allocation5 + $0x1a8] sm:$0xf] %v15061_v47  ;;  %1287 = vst [vmem:[#allocation5 + $0x1ac] sm:$0x1] %v15061_v47  ;;  %v879_v47 = vsub.f32 %v877_v35, %v878_v19  ;;  %v2095_v35 = vld [vmem:[#allocation5 + $0xc] sm:$0xf] }
 0x206   : > { %vm15564_vm2 = vmor %vm2433_vm0, %vm2434_vm1  ;;  %19889 = vst [vmem:[#allocation19_spill] sm:$0xff] %v15581_v34  ;;  %v2104_v19 = vld [vmem:[#allocation5 + $0x18] sm:$0xf] }
 0x207   : > { %v2449_v8 = vsel %vm15564_vm2, %v2444_v14, %v2448_v52  ;;  %v2459_v22 = vsel %vm15564_vm2, %v2454_v17, %v2458_v1  ;;  %v15597_v59 = vrot.slane %v879_v47, %v15581_v34  ;;  %vm15629_vm8 = vmand %vm2099_vm3, %vm1448_vm4 }
 0x208   : > { %v11977_v63 = vcombine.low %v2449_v8, %v2459_v22  ;;  %vm15635_vm9 = vmor %vm1448_vm4, %vm1449_vm5 }
 0x209   : > { %v1020_v30 = vadd.f32 %v15597_v59, %v950_v48  ;;  %v1021_v2 = vadd.f32 %v15597_v59, %v951_v49  ;;  %v1022_v3 = vadd.f32 %v15597_v59, %v952_v51  ;;  %v1023_v45 = vadd.f32 %v15597_v59, %v953_v56  ;;  %vm15641_vm10 = vmand %vm2092_vm6, %vm2093_vm7 }
 0x20a   : > { %13110 = vmatprep.mubr.bf16.mxu1 %v11977_v63  ;;  %v1024_v4 = vadd.f32 %v15597_v59, %v954_v57  ;;  %v1025_v5 = vadd.f32 %v15597_v59, %v955_v28  ;;  %v1026_v7 = vadd.f32 %v15597_v59, %v956_v58  ;;  %v1027_v52 = vadd.f32 %v15597_v59, %v957_v60  ;;  %vm16149_vm13 = vmor %vm4311_vm11, %vm4312_vm12 }
 0x20b   : > { %v1084_v9 = vmax.f32 %v1020_v30, 0.0  ;;  %v1085_v43 = vmax.f32 %v1021_v2, 0.0  ;;  %v1086_v10 = vmax.f32 %v1022_v3, 0.0  ;;  %v1087_v11 = vmax.f32 %v1023_v45, 0.0  ;;  %v2111_v3 = vld [vmem:[#allocation5 + $0x24] sm:$0xf] }
 0x20c   : > { %v1088_v50 = vmax.f32 %v1024_v4, 0.0  ;;  %v1089_v13 = vmax.f32 %v1025_v5, 0.0  ;;  %v1090_v1 = vmax.f32 %v1026_v7, 0.0  ;;  %v1091_v14 = vmax.f32 %v1027_v52, 0.0  ;;  %v2115_v52 = vld [vmem:[#allocation5 + $0x2c] sm:$0x1] }
 0x20d   : > { %v12439_v15 = vpack.c.bf16 %v1084_v9, %v1084_v9  ;;  %v12440_v16 = vpack.c.bf16 %v1085_v43, %v1085_v43  ;;  %v12441_v17 = vpack.c.bf16 %v1086_v10, %v1086_v10  ;;  %v12442_v18 = vpack.c.bf16 %v1087_v11, %v1087_v11 }
 0x20e   : > { %v12443_v8 = vpack.c.bf16 %v1088_v50, %v1088_v50  ;;  %v12444_v20 = vpack.c.bf16 %v1089_v13, %v1089_v13  ;;  %v15623_v22 = vpack.c.bf16 %v1090_v1, %v1090_v1  ;;  %v15625_v63 = vpack.c.bf16 %v1091_v14, %v1091_v14 }
 0x20f   : > { %v1452_v23 = vshrl.u32 %v12439_v15, 16  ;;  %v1455_v29 = vshll.u32 %v12439_v15, 16  ;;  %v1460_v33 = vshrl.u32 %v12440_v16, 16  ;;  %v1463_v6 = vshll.u32 %v12440_v16, 16 }
 0x210   : > { %v1469_v37 = vshrl.u32 %v12441_v17, 16  ;;  %v1472_v38 = vshll.u32 %v12441_v17, 16  ;;  %v1477_v31 = vshrl.u32 %v12442_v18, 16  ;;  %v1480_v39 = vshll.u32 %v12442_v18, 16 }
 0x211   : > { %v1454_v41 = vrot.slane %v1452_v23, 7  ;;  %v1462_v42 = vrot.slane %v1460_v33, 7  ;;  %v1486_v46 = vshrl.u32 %v12443_v8, 16  ;;  %v1489_v47 = vshll.u32 %v12443_v8, 16  ;;  %v2118_v8 = vld [vmem:[#allocation5 + $0x30] sm:$0xf] }
 0x212   : > { %v1471_v49 = vrot.slane %v1469_v37, 7  ;;  %v1479_v51 = vrot.slane %v1477_v31, 7  ;;  %v1494_v53 = vshrl.u32 %v12444_v20, 16  ;;  %v1497_v54 = vshll.u32 %v12444_v20, 16 }
 0x213   : > { %v1457_v55 = vor.u32 %v1455_v29, %v1454_v41  ;;  %v1458_v56 = vrot.slane %v1454_v41, 4  ;;  %v1465_v57 = vor.u32 %v1463_v6, %v1462_v42  ;;  %v1467_v28 = vrot.slane %v1462_v42, 4  ;;  %v893_v6 = vld [vmem:[#allocation2 + $0x68] sm:$0xff] }
 0x214   : > { %v1474_v58 = vor.u32 %v1472_v38, %v1471_v49  ;;  %v1475_v60 = vrot.slane %v1471_v49, 4  ;;  %v1482_v30 = vor.u32 %v1480_v39, %v1479_v51  ;;  %v1484_v2 = vrot.slane %v1479_v51, 4 }
 0x215   : > { %v1466_v45 = vsel %vm15635_vm9, %v1458_v56, %v1465_v57  ;;  %v2096_v4 = vsel %vm15641_vm10, %v1457_v55, %v2095_v35  ;;  %v2102_v5 = vsel %vm15629_vm8, %v1467_v28, %v2101_v36  ;;  %v1488_v7 = vrot.slane %v1486_v46, 7  ;;  %v2122_v36 = vld [vmem:[#allocation5 + $0x38] sm:$0x1] }
 0x216   : > { %2097 = vst [vmem:[#allocation5 + $0xc] sm:$0xf] %v2096_v4  ;;  %2098 = vst [vmem:[#allocation5 + $0x10] sm:$0xf] %v1466_v45  ;;  %v1483_v9 = vsel %vm15635_vm9, %v1475_v60, %v1482_v30  ;;  %v2105_v43 = vsel %vm15641_vm10, %v1474_v58, %v2104_v19  ;;  %v2109_v10 = vsel %vm15629_vm8, %v1484_v2, %v2108_v27  ;;  %v1496_v11 = vrot.slane %v1494_v53, 7 }
 0x217   : > { %2103 = vst [vmem:[#allocation5 + $0x14] sm:$0x1] %v2102_v5  ;;  %2106 = vst [vmem:[#allocation5 + $0x18] sm:$0xf] %v2105_v43  ;;  %v1491_v50 = vor.u32 %v1489_v47, %v1488_v7  ;;  %v1492_v13 = vrot.slane %v1488_v7, 4  ;;  %v1503_v1 = vshrl.u32 %v15623_v22, 16  ;;  %v1028_v29 = vadd.f32 %v15597_v59, %v15601_v32 }
 0x218   : > { %2107 = vst [vmem:[#allocation5 + $0x1c] sm:$0xf] %v1483_v9  ;;  %2110 = vst [vmem:[#allocation5 + $0x20] sm:$0x1] %v2109_v10  ;;  %v1506_v14 = vshll.u32 %v15623_v22, 16  ;;  %v1499_v15 = vor.u32 %v1497_v54, %v1496_v11  ;;  %v1501_v16 = vrot.slane %v1496_v11, 4  ;;  %v1029_v33 = vadd.f32 %v15597_v59, %v15604_v61 }
 0x219   : > { %v1511_v17 = vshrl.u32 %v15625_v63, 16  ;;  %v1514_v18 = vshll.u32 %v15625_v63, 16  ;;  %v2112_v20 = vsel %vm15641_vm10, %v1491_v50, %v2111_v3  ;;  %v1505_v23 = vrot.slane %v1503_v1, 7 }
 0x21a   : > { %v1500_v22 = vsel %vm15635_vm9, %v1492_v13, %v1499_v15  ;;  %2113 = vst [vmem:[#allocation5 + $0x24] sm:$0xf] %v2112_v20  ;;  %v2116_v35 = vsel %vm15629_vm8, %v1501_v16, %v2115_v52  ;;  %v15673_v37 = vadd.f32 %v15597_v59, %v15607_v26  ;;  %v1092_v31 = vmax.f32 %v1028_v29, 0.0 }
 0x21b   : > { %v1513_v63 = vrot.slane %v1511_v17, 7  ;;  %2114 = vst [vmem:[#allocation5 + $0x28] sm:$0xf] %v1500_v22  ;;  %2117 = vst [vmem:[#allocation5 + $0x2c] sm:$0x1] %v2116_v35  ;;  %v1508_v32 = vor.u32 %v1506_v14, %v1505_v23  ;;  %v1509_v38 = vrot.slane %v1505_v23, 4  ;;  %v15677_v19 = vmul.f32 %v15587_v44, %v893_v6 }
 0x21c   : > { %v1093_v61 = vmax.f32 %v1029_v33, 0.0  ;;  %v1094_v42 = vmax.f32 %v15673_v37, 0.0  ;;  %v15681_v49 = vpack.c.bf16 %v1092_v31, %v1092_v31  ;;  %v15687_v53 = vadd.f32 %v15597_v59, %v15610_v62 }
 0x21d   : > { %v1516_v39 = vor.u32 %v1514_v18, %v1513_v63  ;;  %v1518_v41 = vrot.slane %v1513_v63, 4  ;;  %v2323_v27 = vld [vmem:[#allocation5 + $0xc] sm:$0xf]  ;;  %v2324_v46 = vld [vmem:[#allocation5 + $0x10] sm:$0xf]  ;;  %v2119_v26 = vsel %vm15641_vm10, %v1508_v32, %v2118_v8  ;;  %v15697_v62 = vadd.f32 %v15597_v59, %v15613_v0 }
 0x21e   : > { %v2402_v47 = vld [vmem:[#allocation5 + $0x14] sm:$0x1]  ;;  %v15683_v51 = vpack.c.bf16 %v1093_v61, %v1093_v61  ;;  %v2461_v54 = vshrl.u32 %v2323_v27, 16  ;;  %v2464_v55 = vshll.u32 %v2323_v27, 16  ;;  %v2470_v56 = vshll.u32 %v2324_v46, 16 }
 0x21f   : > { %v2474_v57 = vshrl.u32 %v2324_v46, 16  ;;  %v5758_v28 = vld [vmem:[#allocation5 + $0xc] sm:$0xf]  ;;  %2120 = vst [vmem:[#allocation5 + $0x30] sm:$0xf] %v2119_v26  ;;  %v2480_v58 = vshll.u32 %v2402_v47, 16  ;;  %v1517_v2 = vsel %vm15635_vm9, %v1509_v38, %v1516_v39  ;;  %v2123_v3 = vsel %vm15629_vm8, %v1518_v41, %v2122_v36 }
 0x220   : > { %v5759_v60 = vld [vmem:[#allocation5 + $0x10] sm:$0xf]  ;;  %v15689_v30 = vld [vmem:[#allocation5 + $0x14] sm:$0x1]  ;;  %v2463_v45 = vrot.slane %v2461_v54, 4  ;;  %v2466_v4 = vrot.slane %v2464_v55, 5 }
 0x221   : > { %v2472_v5 = vrot.slane %v2470_v56, 5  ;;  %v2476_v7 = vrot.slane %v2474_v57, 4  ;;  %2121 = vst [vmem:[#allocation5 + $0x34] sm:$0xf] %v1517_v2  ;;  %2124 = vst [vmem:[#allocation5 + $0x38] sm:$0x1] %v2123_v3 }
 0x222   : > { %v2482_v52 = vrot.slane %v2480_v58, 5  ;;  %v5855_v9 = vshrl.u32 %v5758_v28, 16  ;;  %v5858_v43 = vshll.u32 %v5758_v28, 16  ;;  %v5864_v10 = vshll.u32 %v5759_v60, 16  ;;  %v5761_v14 = vld [vmem:[#allocation5 + $0x18] sm:$0xf] }
 0x223   : > { %v2467_v11 = vor.u32 %v2466_v4, %v2463_v45  ;;  %v2477_v50 = vor.u32 %v2476_v7, %v2472_v5  ;;  %v5868_v13 = vshrl.u32 %v5759_v60, 16  ;;  %v5874_v1 = vshll.u32 %v15689_v30, 16  ;;  %v15700_v15 = vld [vmem:[#allocation5 + $0x1c] sm:$0xf]  ;;  %v15703_v6 = vld [vmem:[#allocation5 + $0x20] sm:$0x1] }
 0x224   : > { %v5857_v0 = vrot.slane %v5855_v9, 4  ;;  %v5860_v16 = vrot.slane %v5858_v43, 5  ;;  %v5866_v17 = vrot.slane %v5864_v10, 5  ;;  %v7301_v18 = vrot.slane %v15689_v30, 5  ;;  %v2325_v46 = vld [vmem:[#allocation5 + $0x18] sm:$0xf] }
 0x225   : > { %v2468_v8 = vrot.slane %v2467_v11, 4  ;;  %v2478_v20 = vrot.slane %v2477_v50, 4  ;;  %v5870_v23 = vrot.slane %v5868_v13, 4  ;;  %v5876_v29 = vrot.slane %v5874_v1, 5  ;;  %v14484_v47 = vld [vmem:[#allocation11 + $0x8] sm:$0xff]   ;;  %v14487_v50 = vld [vmem:[#allocation11 + $0x10] sm:$0xff]  }
 0x226   : > { %v5861_v33 = vor.u32 %v5860_v16, %v5857_v0  ;;  %v5879_v22 = vshrl.u32 %v5761_v14, 16  ;;  %v5882_v35 = vshll.u32 %v5761_v14, 16  ;;  %v5888_v63 = vshll.u32 %v15700_v15, 16  ;;  %v2326_v2 = vld [vmem:[#allocation5 + $0x1c] sm:$0xf] }
 0x227   : > { %v2473_v36 = vsel %vm15564_vm2, %v2468_v8, %v2472_v5  ;;  %v2483_v32 = vsel %vm15564_vm2, %v2478_v20, %v2482_v52  ;;  %v5871_v38 = vor.u32 %v5870_v23, %v5866_v17  ;;  %v5892_v31 = vshrl.u32 %v15700_v15, 16  ;;  %v2403_v5 = vld [vmem:[#allocation5 + $0x20] sm:$0x1]  ;;  %v2327_v52 = vld [vmem:[#allocation5 + $0x24] sm:$0xf] }
 0x228   : > { %v11978_v61 = vcombine.low %v2473_v36, %v2483_v32  ;;  %v5862_v39 = vrot.slane %v5861_v33, 4  ;;  %v5881_v41 = vrot.slane %v5879_v22, 4  ;;  %v5884_v27 = vrot.slane %v5882_v35, 5  ;;  %v2328_v16 = vld [vmem:[#allocation5 + $0x28] sm:$0xf] }
 0x229   : > { %v5872_v26 = vrot.slane %v5871_v38, 4  ;;  %v5890_v54 = vrot.slane %v5888_v63, 5  ;;  %v5894_v55 = vrot.slane %v5892_v31, 4  ;;  %v5898_v56 = vshll.u32 %v15703_v6, 16  ;;  %v2404_v20 = vld [vmem:[#allocation5 + $0x2c] sm:$0x1] }
 0x22a   : > { %13111 = vmatmul.mubr.bf16.vlgmr.msra.gmra.mrb[0].mxu1 %v11978_v61  ;;  %v5867_v57 = vsel %vm15564_vm2, %v5862_v39, %v5866_v17  ;;  %v5885_v28 = vor.u32 %v5884_v27, %v5881_v41  ;;  %v7305_v58 = vrot.slane %v15700_v15, 5  ;;  %v7308_v60 = vrot.slane %v15703_v6, 5  ;;  %v5764_v63 = vld [vmem:[#allocation5 + $0x24] sm:$0xf]  ;;  %v5765_v61 = vld [vmem:[#allocation5 + $0x28] sm:$0xf] }
 0x22b   : > { %v5877_v3 = vsel %vm15564_vm2, %v5872_v26, %v5876_v29  ;;  %13175 = vmatpush3.bf16.msra.mxu1 %v15572_v24  ;;  %v5895_v45 = vor.u32 %v5894_v55, %v5890_v54  ;;  %v5900_v4 = vrot.slane %v5898_v56, 5  ;;  %v2485_v7 = vshrl.u32 %v2325_v46, 16  ;;  %v14483_v39 = vld [vmem:[#allocation11 + $0x148] sm:$0xff]  }
 0x22c   : > { %v12169_v9 = vcombine.low %v5867_v57, %v5877_v3  ;;  %v5886_v43 = vrot.slane %v5885_v28, 4  ;;  %v15721_v10 = vrot.slane %v7305_v58, 4  ;;  %v2488_v11 = vshll.u32 %v2325_v46, 16  ;;  %13176 = vmatprep.subr.bf16.mxu1 %v14484_v47 }
 0x22d   : > { %v5896_v13 = vrot.slane %v5895_v45, 4  ;;  %v2487_v1 = vrot.slane %v2485_v7, 4  ;;  %v2494_v14 = vshll.u32 %v2326_v2, 16  ;;  %v2498_v0 = vshrl.u32 %v2326_v2, 16  ;;  %v5767_v2 = vld [vmem:[#allocation5 + $0x30] sm:$0xf] }
 0x22e   : > { %13430 = vmatprep.mubr.bf16.mxu0 %v12169_v9  ;;  %v5891_v24 = vsel %vm15564_vm2, %v5886_v43, %v5890_v54  ;;  %v2490_v17 = vrot.slane %v2488_v11, 5  ;;  %v2504_v8 = vshll.u32 %v2403_v5, 16  ;;  %v2509_v23 = vshrl.u32 %v2327_v52, 16  ;;  %v5766_v54 = vld [vmem:[#allocation5 + $0x2c] sm:$0x1]  ;;  %v14485_v11 = vld [vmem:[#allocation11 + $0x150] sm:$0xff]  }
 0x22f   : > { %v5901_v29 = vsel %vm15564_vm2, %v5896_v13, %v5900_v4  ;;  %v2496_v33 = vrot.slane %v2494_v14, 5  ;;  %v2500_v22 = vrot.slane %v2498_v0, 4  ;;  %v2512_v35 = vshll.u32 %v2327_v52, 16  ;;  %13177 = vmatpush3.bf16.msra.mxu1 %v14484_v47  ;;  %v5768_v43 = vld [vmem:[#allocation5 + $0x34] sm:$0xf] }
 0x230   : > { %v12170_v36 = vcombine.low %v5891_v24, %v5901_v29  ;;  %v2491_v32 = vor.u32 %v2490_v17, %v2487_v1  ;;  %v2506_v38 = vrot.slane %v2504_v8, 5  ;;  %v2511_v31 = vrot.slane %v2509_v23, 4  ;;  %13178 = vmatprep.subr.bf16.mxu1 %v14487_v50  ;;  %v2329_v8 = vld [vmem:[#allocation5 + $0x30] sm:$0xf] }
 0x231   : > { %v2501_v41 = vor.u32 %v2500_v22, %v2496_v33  ;;  %v2514_v27 = vrot.slane %v2512_v35, 5  ;;  %v2518_v46 = vshll.u32 %v2328_v16, 16  ;;  %v2522_v26 = vshrl.u32 %v2328_v16, 16  ;;  %v2330_v22 = vld [vmem:[#allocation5 + $0x34] sm:$0xf]  ;;  %v14486_v35 = vld [vmem:[#allocation11 + $0x158] sm:$0xff]  }
 0x232   : > { %13431 = vmatmul.mubr.bf16.vlgmr.msra.gmra.mrb[0].mxu0 %v12170_v36  ;;  %v2492_v55 = vrot.slane %v2491_v32, 4  ;;  %v2528_v56 = vshll.u32 %v2404_v20, 16  ;;  %v5903_v57 = vshrl.u32 %v5764_v63, 16  ;;  %v5906_v28 = vshll.u32 %v5764_v63, 16 }
 0x233   : > { %13495 = vmatpush3.bf16.msra.mxu0 %v15574_v25  ;;  %v2502_v47 = vrot.slane %v2501_v41, 4  ;;  %v2515_v3 = vor.u32 %v2514_v27, %v2511_v31  ;;  %v2520_v45 = vrot.slane %v2518_v46, 5  ;;  %v2524_v4 = vrot.slane %v2522_v26, 4  ;;  %13179 = vmatpush3.bf16.msra.mxu1 %v14487_v50  ;;  %v5769_v50 = vld [vmem:[#allocation5 + $0x38] sm:$0x1] }
 0x234   : > { %v2497_v5 = vsel %vm15564_vm2, %v2492_v55, %v2496_v33  ;;  %v2530_v7 = vrot.slane %v2528_v56, 5  ;;  %v5905_v52 = vrot.slane %v5903_v57, 4  ;;  %v5908_v9 = vrot.slane %v5906_v28, 5  ;;  %13496 = vmatprep.subr.bf16.mxu0 %v14483_v39  ;;  %v2405_v55 = vld [vmem:[#allocation5 + $0x38] sm:$0x1] }
 0x235   : > { %v2507_v13 = vsel %vm15564_vm2, %v2502_v47, %v2506_v38  ;;  %v2516_v1 = vrot.slane %v2515_v3, 4  ;;  %v2525_v14 = vor.u32 %v2524_v4, %v2520_v45  ;;  %v5912_v25 = vshll.u32 %v5765_v61, 16 }
 0x236   : > { %v11979_v0 = vcombine.low %v2497_v5, %v2507_v13  ;;  %v5909_v16 = vor.u32 %v5908_v9, %v5905_v52  ;;  %v5916_v24 = vshrl.u32 %v5765_v61, 16  ;;  %v5922_v17 = vshll.u32 %v5766_v54, 16  ;;  %v14488_v5 = vld [vmem:[#allocation11 + $0x160] sm:$0xff]  }
 0x237   : > { %v2521_v20 = vsel %vm15564_vm2, %v2516_v1, %v2520_v45  ;;  %v2526_v23 = vrot.slane %v2525_v14, 4  ;;  %v5914_v29 = vrot.slane %v5912_v25, 5  ;;  %v5927_v33 = vshrl.u32 %v5767_v2, 16  ;;  %13497 = vmatpush3.bf16.msra.mxu0 %v14483_v39 }
 0x238   : > { %13114 = vmatprep.mubr.bf16.mxu1 %v11979_v0  ;;  %v5910_v63 = vrot.slane %v5909_v16, 4  ;;  %v5918_v36 = vrot.slane %v5916_v24, 4  ;;  %v5924_v32 = vrot.slane %v5922_v17, 5  ;;  %v5930_v38 = vshll.u32 %v5767_v2, 16  ;;  %13498 = vmatprep.subr.bf16.mxu0 %v14485_v11  ;;  %v14489_v17 = vld [vmem:[#allocation11 + $0x168] sm:$0xff]  }
 0x239   : > { %v2531_v31 = vsel %vm15564_vm2, %v2526_v23, %v2530_v7  ;;  %v5929_v61 = vrot.slane %v5927_v33, 4  ;;  %v5936_v41 = vshll.u32 %v5768_v43, 16  ;;  %v5940_v27 = vshrl.u32 %v5768_v43, 16 }
 0x23a   : > { %v11980_v46 = vcombine.low %v2521_v20, %v2531_v31  ;;  %v5915_v26 = vsel %vm15564_vm2, %v5910_v63, %v5914_v29  ;;  %v5919_v54 = vor.u32 %v5918_v36, %v5914_v29  ;;  %v5932_v39 = vrot.slane %v5930_v38, 5  ;;  %v2125_v36 = vld [vmem:[#allocation5 + $0x3c] sm:$0xf] }
 0x23b   : > { %v5938_v56 = vrot.slane %v5936_v41, 5  ;;  %v5942_v57 = vrot.slane %v5940_v27, 4  ;;  %v5946_v28 = vshll.u32 %v5769_v50, 16  ;;  %v2533_v47 = vshrl.u32 %v2329_v8, 16  ;;  %13499 = vmatpush3.bf16.msra.mxu0 %v14485_v11 }
 0x23c   : > { %13115 = vmatmul.mubr.bf16.gmra.mrb[4].mxu1 %v11980_v46  ;;  %v5920_v2 = vrot.slane %v5919_v54, 4  ;;  %v5933_v3 = vor.u32 %v5932_v39, %v5929_v61  ;;  %v2536_v45 = vshll.u32 %v2329_v8, 16  ;;  %v2542_v4 = vshll.u32 %v2330_v22, 16  ;;  %13500 = vmatprep.subr.bf16.mxu0 %v14486_v35  ;;  %v2129_v61 = vld [vmem:[#allocation5 + $0x44] sm:$0x1]  ;;  %v14490_v54 = vld [vmem:[#allocation11 + $0x18] sm:$0xff]  }
 0x23d   : > { %v5943_v7 = vor.u32 %v5942_v57, %v5938_v56  ;;  %v5948_v52 = vrot.slane %v5946_v28, 5  ;;  %v2535_v9 = vrot.slane %v2533_v47, 4  ;;  %v2546_v43 = vshrl.u32 %v2330_v22, 16  ;;  %v895_v57 = vld [vmem:[#allocation2 + $0x78] sm:$0xff]  ;;  %v896_v47 = vld [vmem:[#allocation2 + $0x80] sm:$0xff]  ;;  %13180 = vmatprep.subr.bf16.mxu1 %v14490_v54 }
 0x23e   : > { %v5925_v13 = vsel %vm15564_vm2, %v5920_v2, %v5924_v32  ;;  %v5934_v1 = vrot.slane %v5933_v3, 4  ;;  %v2538_v14 = vrot.slane %v2536_v45, 5  ;;  %v2544_v25 = vrot.slane %v2542_v4, 5  ;;  %v897_v2 = vld [vmem:[#allocation2 + $0x88] sm:$0xff]  ;;  %13181 = vmatpush3.bf16.msra.mxu1 %v14490_v54 }
 0x23f   : > { %v12171_v0 = vcombine.low %v5915_v26, %v5925_v13  ;;  %v5944_v16 = vrot.slane %v5943_v7, 4  ;;  %v2548_v11 = vrot.slane %v2546_v43, 4  ;;  %v2552_v24 = vshll.u32 %v2405_v55, 16  ;;  %13501 = vmatpush3.bf16.msra.mxu0 %v14486_v35  ;;  %v894_v26 = vld [vmem:[#allocation2 + $0x70] sm:$0xff]  ;;  %v2132_v43 = vld [vmem:[#allocation5 + $0x48] sm:$0xf] }
 0x240   : > { %v5939_v50 = vsel %vm15564_vm2, %v5934_v1, %v5938_v56  ;;  %v2539_v8 = vor.u32 %v2538_v14, %v2535_v9  ;;  %v1520_v20 = vshrl.u32 %v15681_v49, 16  ;;  %v1523_v23 = vshll.u32 %v15681_v49, 16  ;;  %13502 = vmatprep.subr.bf16.mxu0 %v14488_v5  ;;  %v2136_v1 = vld [vmem:[#allocation5 + $0x50] sm:$0x1] }
 0x241   : > { %13434 = vmatprep.mubr.bf16.mxu0 %v12171_v0  ;;  %v5949_v29 = vsel %vm15564_vm2, %v5944_v16, %v5948_v52  ;;  %v2549_v33 = vor.u32 %v2548_v11, %v2544_v25  ;;  %v2554_v22 = vrot.slane %v2552_v24, 5  ;;  %v1528_v63 = vshrl.u32 %v15683_v51, 16  ;;  %v14491_v16 = vld [vmem:[#allocation11 + $0x170] sm:$0xff]  }
 0x242   : > { %v12172_v35 = vcombine.low %v5939_v50, %v5949_v29  ;;  %v2540_v32 = vrot.slane %v2539_v8, 4  ;;  %v1522_v38 = vrot.slane %v1520_v20, 7  ;;  %v1531_v31 = vshll.u32 %v15683_v51, 16 }
 0x243   : > { %v2550_v41 = vrot.slane %v2549_v33, 4  ;;  %v1530_v27 = vrot.slane %v1528_v63, 7  ;;  %v1095_v49 = vmax.f32 %v15687_v53, 0.0  ;;  %v12449_v46 = vpack.c.bf16 %v1094_v42, %v1094_v42  ;;  %13503 = vmatpush3.bf16.msra.mxu0 %v14488_v5 }
 0x244   : > { %13435 = vmatmul.mubr.bf16.gmra.mrb[4].mxu0 %v12172_v35  ;;  %v2545_v39 = vsel %vm15564_vm2, %v2540_v32, %v2544_v25  ;;  %v1525_v55 = vor.u32 %v1523_v23, %v1522_v38  ;;  %v1526_v56 = vrot.slane %v1522_v38, 4  ;;  %v1033_v51 = vadd.f32 %v15597_v59, %v15677_v19  ;;  %13504 = vmatprep.subr.bf16.mxu0 %v14489_v17 }
 0x245   : > { %v2555_v53 = vsel %vm15564_vm2, %v2550_v41, %v2554_v22  ;;  %v1533_v37 = vor.u32 %v1531_v31, %v1530_v27  ;;  %v1535_v28 = vrot.slane %v1530_v27, 4  ;;  %v12450_v42 = vpack.c.bf16 %v1095_v49, %v1095_v49  ;;  %v898_v31 = vld [vmem:[#allocation2 + $0x90] sm:$0xff] }
 0x246   : > { %v11981_v3 = vcombine.low %v2545_v39, %v2555_v53  ;;  %v2126_v45 = vsel %vm15641_vm10, %v1525_v55, %v2125_v36  ;;  %v1537_v4 = vshrl.u32 %v12449_v46, 16  ;;  %v1540_v5 = vshll.u32 %v12449_v46, 16 }
 0x247   : > { %v1534_v19 = vsel %vm15635_vm9, %v1526_v56, %v1533_v37  ;;  %2127 = vst [vmem:[#allocation5 + $0x3c] sm:$0xf] %v2126_v45  ;;  %v2130_v7 = vsel %vm15629_vm8, %v1535_v28, %v2129_v61  ;;  %v1545_v52 = vshrl.u32 %v12450_v42, 16  ;;  %v1548_v9 = vshll.u32 %v12450_v42, 16  ;;  %13505 = vmatpush3.bf16.msra.mxu0 %v14489_v17 }
 0x248   : > { %13118 = vmatprep.mubr.bf16.mxu1 %v11981_v3  ;;  %2128 = vst [vmem:[#allocation5 + $0x40] sm:$0xf] %v1534_v19  ;;  %2131 = vst [vmem:[#allocation5 + $0x44] sm:$0x1] %v2130_v7  ;;  %v1539_v13 = vrot.slane %v1537_v4, 7  ;;  %v1096_v14 = vmax.f32 %v15697_v62, 0.0  ;;  %v964_v0 = vmul.f32 %v15587_v44, %v894_v26  ;;  %v965_v24 = vmul.f32 %v15587_v44, %v895_v57 }
 0x249   : > { %v1097_v25 = vmax.f32 %v1033_v51, 0.0  ;;  %v1547_v11 = vrot.slane %v1545_v52, 7  ;;  %v966_v50 = vmul.f32 %v15587_v44, %v896_v47  ;;  %v967_v8 = vmul.f32 %v15587_v44, %v897_v2  ;;  %13506 = vmatprep.subr.bf16.mxu0 %v14491_v16 }
 0x24a   : > { %v1542_v20 = vor.u32 %v1540_v5, %v1539_v13  ;;  %v1543_v17 = vrot.slane %v1539_v13, 4  ;;  %v12451_v23 = vpack.c.bf16 %v1096_v14, %v1096_v14  ;;  %v1034_v62 = vadd.f32 %v15597_v59, %v964_v0 }
 0x24b   : > { %v12452_v29 = vpack.c.bf16 %v1097_v25, %v1097_v25  ;;  %v1550_v33 = vor.u32 %v1548_v9, %v1547_v11  ;;  %v1552_v22 = vrot.slane %v1547_v11, 4  ;;  %v15771_v63 = vadd.f32 %v15597_v59, %v965_v24  ;;  %13507 = vmatpush3.bf16.msra.mxu0 %v14491_v16 }
 0x24c   : > { %v2133_v36 = vsel %vm15641_vm10, %v1542_v20, %v2132_v43  ;;  %v1554_v35 = vshrl.u32 %v12451_v23, 16  ;;  %v1557_v32 = vshll.u32 %v12451_v23, 16  ;;  %v1098_v49 = vmax.f32 %v1034_v62, 0.0 }
 0x24d   : > { %v1562_v38 = vshrl.u32 %v12452_v29, 16  ;;  %v1551_v61 = vsel %vm15635_vm9, %v1543_v17, %v1550_v33  ;;  %2134 = vst [vmem:[#allocation5 + $0x48] sm:$0xf] %v2133_v36  ;;  %v2137_v41 = vsel %vm15629_vm8, %v1552_v22, %v2136_v1  ;;  %v1565_v27 = vshll.u32 %v12452_v29, 16 }
 0x24e   : > { %v2331_v46 = vld [vmem:[#allocation5 + $0x3c] sm:$0xf]  ;;  %2135 = vst [vmem:[#allocation5 + $0x4c] sm:$0xf] %v1551_v61  ;;  %2138 = vst [vmem:[#allocation5 + $0x50] sm:$0x1] %v2137_v41  ;;  %v15784_v55 = vadd.f32 %v15597_v59, %v966_v50  ;;  %v15787_v56 = vadd.f32 %v15597_v59, %v967_v8  ;;  %v15789_v28 = vpack.c.bf16 %v1098_v49, %v1098_v49 }
 0x24f   : > { %v5770_v26 = vld [vmem:[#allocation5 + $0x3c] sm:$0xf]  ;;  %v15779_v54 = vrot.slane %v1554_v35, 7  ;;  %v15781_v39 = vrot.slane %v1562_v38, 7  ;;  %v2332_v51 = vld [vmem:[#allocation5 + $0x40] sm:$0xf]  ;;  %v15792_v42 = vmul.f32 %v15587_v44, %v898_v31 }
 0x250   : > { %v2406_v57 = vld [vmem:[#allocation5 + $0x44] sm:$0x1]  ;;  %v2557_v53 = vshrl.u32 %v2331_v46, 16  ;;  %v2560_v37 = vshll.u32 %v2331_v46, 16  ;;  %v2566_v47 = vshll.u32 %v2332_v51, 16  ;;  %v2570_v2 = vshrl.u32 %v2332_v51, 16 }
 0x251   : > { %v2576_v3 = vshll.u32 %v2406_v57, 16  ;;  %v5771_v45 = vld [vmem:[#allocation5 + $0x40] sm:$0xf]  ;;  %v5951_v4 = vshrl.u32 %v5770_v26, 16  ;;  %v5772_v7 = vld [vmem:[#allocation5 + $0x44] sm:$0x1]  ;;  %v1559_v20 = vor.u32 %v1557_v32, %v15779_v54  ;;  %v1567_v62 = vor.u32 %v1565_v27, %v15781_v39 }
 0x252   : > { %v2559_v5 = vrot.slane %v2557_v53, 4  ;;  %v2562_v19 = vrot.slane %v2560_v37, 5  ;;  %v5954_v52 = vshll.u32 %v5770_v26, 16  ;;  %v5960_v9 = vshll.u32 %v5771_v45, 16 }
 0x253   : > { %v2568_v43 = vrot.slane %v2566_v47, 5  ;;  %v2572_v13 = vrot.slane %v2570_v2, 4  ;;  %v2578_v1 = vrot.slane %v2576_v3, 5  ;;  %v5953_v14 = vrot.slane %v5951_v4, 4 }
 0x254   : > { %v2563_v25 = vor.u32 %v2562_v19, %v2559_v5  ;;  %v5956_v0 = vrot.slane %v5954_v52, 5  ;;  %v5962_v16 = vrot.slane %v5960_v9, 5  ;;  %v5964_v11 = vshrl.u32 %v5771_v45, 16  ;;  %v5773_v8 = vld [vmem:[#allocation5 + $0x48] sm:$0xf] }
 0x255   : > { %v2573_v24 = vor.u32 %v2572_v13, %v2568_v43  ;;  %v5970_v50 = vshll.u32 %v5772_v7, 16  ;;  %v1560_v17 = vrot.slane %v15779_v54, 4  ;;  %v5774_v22 = vld [vmem:[#allocation5 + $0x4c] sm:$0xf]  ;;  %v5975_v38 = vshrl.u32 %v5773_v8, 16 }
 0x256   : > { %v2564_v23 = vrot.slane %v2563_v25, 4  ;;  %v5957_v29 = vor.u32 %v5956_v0, %v5953_v14  ;;  %v5966_v33 = vrot.slane %v5964_v11, 4  ;;  %v5978_v31 = vshll.u32 %v5773_v8, 16  ;;  %v2333_v61 = vld [vmem:[#allocation5 + $0x48] sm:$0xf] }
 0x257   : > { %v2574_v36 = vrot.slane %v2573_v24, 4  ;;  %v5972_v35 = vrot.slane %v5970_v50, 5  ;;  %v5775_v26 = vld [vmem:[#allocation5 + $0x50] sm:$0x1]  ;;  %v5984_v32 = vshll.u32 %v5774_v22, 16  ;;  %v5977_v57 = vrot.slane %v5975_v38, 4 }
 0x258   : > { %v2569_v41 = vsel %vm15564_vm2, %v2564_v23, %v2568_v43  ;;  %v5958_v49 = vrot.slane %v5957_v29, 4  ;;  %v5967_v46 = vor.u32 %v5966_v33, %v5962_v16  ;;  %v2334_v51 = vld [vmem:[#allocation5 + $0x4c] sm:$0xf]  ;;  %v5980_v53 = vrot.slane %v5978_v31, 5  ;;  %v2407_v45 = vld [vmem:[#allocation5 + $0x50] sm:$0x1] }
 0x259   : > { %v2579_v54 = vsel %vm15564_vm2, %v2574_v36, %v2578_v1  ;;  %v5988_v37 = vshrl.u32 %v5774_v22, 16  ;;  %v5986_v3 = vrot.slane %v5984_v32, 5  ;;  %v5994_v19 = vshll.u32 %v5775_v26, 16  ;;  %v2139_v52 = vld [vmem:[#allocation5 + $0x54] sm:$0xf] }
 0x25a   : > { %v11982_v27 = vcombine.low %v2569_v41, %v2579_v54  ;;  %v5963_v47 = vsel %vm15564_vm2, %v5958_v49, %v5962_v16  ;;  %v5968_v2 = vrot.slane %v5967_v46, 4  ;;  %v5981_v4 = vor.u32 %v5980_v53, %v5977_v57  ;;  %v2143_v23 = vld [vmem:[#allocation5 + $0x5c] sm:$0x1]  ;;  %v2146_v54 = vld [vmem:[#allocation5 + $0x60] sm:$0xf]  ;;  %v14492_v57 = vld [vmem:[#allocation11 + $0x178] sm:$0xff]  }
 0x25b   : > { %v5990_v5 = vrot.slane %v5988_v37, 4  ;;  %v2581_v7 = vshrl.u32 %v2333_v61, 16  ;;  %v2584_v43 = vshll.u32 %v2333_v61, 16  ;;  %v2590_v13 = vshll.u32 %v2334_v51, 16  ;;  %v899_v32 = vld [vmem:[#allocation2 + $0x98] sm:$0xff]  ;;  %13508 = vmatprep.subr.bf16.mxu0 %v14492_v57 }
 0x25c   : > { %13119 = vmatmul.mubr.bf16.gmra.mrb[8].mxu1 %v11982_v27  ;;  %v5973_v9 = vsel %vm15564_vm2, %v5968_v2, %v5972_v35  ;;  %v2594_v1 = vshrl.u32 %v2334_v51, 16  ;;  %v5982_v25 = vrot.slane %v5981_v4, 4  ;;  %v5996_v11 = vrot.slane %v5994_v19, 5  ;;  %13509 = vmatpush3.bf16.msra.mxu0 %v14492_v57 }
 0x25d   : > { %v12173_v14 = vcombine.low %v5963_v47, %v5973_v9  ;;  %v5991_v0 = vor.u32 %v5990_v5, %v5986_v3  ;;  %v2583_v16 = vrot.slane %v2581_v7, 4  ;;  %v2586_v24 = vrot.slane %v2584_v43, 5  ;;  %v900_v47 = vld [vmem:[#allocation2 + $0xa0] sm:$0xff]  ;;  %v902_v5 = vld [vmem:[#allocation2 + $0xb0] sm:$0xff] }
 0x25e   : > { %v2592_v50 = vrot.slane %v2590_v13, 5  ;;  %v2596_v8 = vrot.slane %v2594_v1, 4  ;;  %v5987_v29 = vsel %vm15564_vm2, %v5982_v25, %v5986_v3  ;;  %v2600_v22 = vshll.u32 %v2407_v45, 16 }
 0x25f   : > { %13438 = vmatprep.mubr.bf16.mxu0 %v12173_v14  ;;  %v5992_v33 = vrot.slane %v5991_v0, 4  ;;  %v1568_v36 = vsel %vm15635_vm9, %v1560_v17, %v1567_v62  ;;  %v2587_v35 = vor.u32 %v2586_v24, %v2583_v16  ;;  %v1569_v31 = vrot.slane %v15781_v39, 4 }
 0x260   : > { %v2597_v38 = vor.u32 %v2596_v8, %v2592_v50  ;;  %v2140_v61 = vsel %vm15641_vm10, %v1559_v20, %v2139_v52  ;;  %2142 = vst [vmem:[#allocation5 + $0x58] sm:$0xf] %v1568_v36  ;;  %v2602_v49 = vrot.slane %v2600_v22, 5  ;;  %v1099_v46 = vmax.f32 %v15771_v63, 0.0  ;;  %v901_v63 = vld [vmem:[#allocation2 + $0xa8] sm:$0xff] }
 0x261   : > { %v5997_v41 = vsel %vm15564_vm2, %v5992_v33, %v5996_v11  ;;  %2141 = vst [vmem:[#allocation5 + $0x54] sm:$0xf] %v2140_v61  ;;  %v1571_v26 = vshrl.u32 %v15789_v28, 16  ;;  %v2588_v17 = vrot.slane %v2587_v35, 4  ;;  %v2144_v39 = vsel %vm15629_vm8, %v1569_v31, %v2143_v23 }
 0x262   : > { %v12174_v51 = vcombine.low %v5987_v29, %v5997_v41  ;;  %v2598_v62 = vrot.slane %v2597_v38, 4  ;;  %2145 = vst [vmem:[#allocation5 + $0x5c] sm:$0x1] %v2144_v39  ;;  %v12454_v20 = vpack.c.bf16 %v1099_v46, %v1099_v46  ;;  %v1574_v37 = vshll.u32 %v15789_v28, 16 }
 0x263   : > { %v1573_v53 = vrot.slane %v1571_v26, 7  ;;  %v1100_v27 = vmax.f32 %v15784_v55, 0.0  ;;  %v2593_v2 = vsel %vm15564_vm2, %v2588_v17, %v2592_v50  ;;  %v1101_v45 = vmax.f32 %v15787_v56, 0.0 }
 0x264   : > { %13439 = vmatmul.mubr.bf16.gmra.mrb[8].mxu0 %v12174_v51  ;;  %v2603_v3 = vsel %vm15564_vm2, %v2598_v62, %v2602_v49  ;;  %v969_v4 = vmul.f32 %v15587_v44, %v899_v32  ;;  %v1579_v52 = vshrl.u32 %v12454_v20, 16  ;;  %v1582_v55 = vshll.u32 %v12454_v20, 16 }
 0x265   : > { %v11983_v19 = vcombine.low %v2593_v2, %v2603_v3  ;;  %v1576_v7 = vor.u32 %v1574_v37, %v1573_v53  ;;  %v1577_v28 = vrot.slane %v1573_v53, 4  ;;  %v15826_v9 = vpack.c.bf16 %v1100_v27, %v1100_v27  ;;  %v2150_v3 = vld [vmem:[#allocation5 + $0x68] sm:$0x1] }
 0x266   : > { %v15828_v43 = vpack.c.bf16 %v1101_v45, %v1101_v45  ;;  %v15832_v13 = vadd.f32 %v15597_v59, %v15792_v42  ;;  %v1581_v14 = vrot.slane %v1579_v52, 7  ;;  %v15837_v0 = vadd.f32 %v15597_v59, %v969_v4 }
 0x267   : > { %13122 = vmatprep.mubr.bf16.mxu1 %v11983_v19  ;;  %v2336_v56 = vld [vmem:[#allocation5 + $0x58] sm:$0xf]  ;;  %v2147_v25 = vsel %vm15641_vm10, %v1576_v7, %v2146_v54  ;;  %v970_v11 = vmul.f32 %v15587_v44, %v900_v47  ;;  %v15841_v42 = vmul.f32 %v15587_v44, %v901_v63  ;;  %v15844_v23 = vmul.f32 %v15587_v44, %v902_v5 }
 0x268   : > { %v5777_v1 = vld [vmem:[#allocation5 + $0x58] sm:$0xf]  ;;  %v2335_v16 = vld [vmem:[#allocation5 + $0x54] sm:$0xf]  ;;  %v2614_v24 = vshll.u32 %v2336_v56, 16  ;;  %v2618_v50 = vshrl.u32 %v2336_v56, 16  ;;  %v1584_v41 = vor.u32 %v1582_v55, %v1581_v14 }
 0x269   : > { %v5776_v8 = vld [vmem:[#allocation5 + $0x54] sm:$0xf]  ;;  %2148 = vst [vmem:[#allocation5 + $0x60] sm:$0xf] %v2147_v25  ;;  %v2605_v29 = vshrl.u32 %v2335_v16, 16  ;;  %v2608_v33 = vshll.u32 %v2335_v16, 16  ;;  %v15847_v49 = vadd.f32 %v15597_v59, %v970_v11 }
 0x26a   : > { %v5999_v22 = vshrl.u32 %v5776_v8, 16  ;;  %v6002_v36 = vshll.u32 %v5776_v8, 16  ;;  %v2408_v35 = vld [vmem:[#allocation5 + $0x5c] sm:$0x1]  ;;  %v2616_v38 = vrot.slane %v2614_v24, 5  ;;  %v2620_v31 = vrot.slane %v2618_v50, 4 }
 0x26b   : > { %v5778_v61 = vld [vmem:[#allocation5 + $0x5c] sm:$0x1]  ;;  %v2607_v46 = vrot.slane %v2605_v29, 4  ;;  %v2610_v26 = vrot.slane %v2608_v33, 5  ;;  %v2624_v32 = vshll.u32 %v2408_v35, 16  ;;  %v6008_v39 = vshll.u32 %v5777_v1, 16 }
 0x26c   : > { %v6001_v51 = vrot.slane %v5999_v22, 4  ;;  %v2621_v17 = vor.u32 %v2620_v31, %v2616_v38  ;;  %v6004_v62 = vrot.slane %v6002_v36, 5  ;;  %v6012_v54 = vshrl.u32 %v5777_v1, 16 }
 0x26d   : > { %v2611_v57 = vor.u32 %v2610_v26, %v2607_v46  ;;  %v2626_v20 = vrot.slane %v2624_v32, 5  ;;  %v6018_v53 = vshll.u32 %v5778_v61, 16  ;;  %v1585_v37 = vsel %vm15635_vm9, %v1577_v28, %v1584_v41  ;;  %v2153_v46 = vld [vmem:[#allocation5 + $0x6c] sm:$0xf] }
 0x26e   : > { %v2622_v27 = vrot.slane %v2621_v17, 4  ;;  %v6005_v47 = vor.u32 %v6004_v62, %v6001_v51  ;;  %v6010_v63 = vrot.slane %v6008_v39, 5  ;;  %v6014_v2 = vrot.slane %v6012_v54, 4  ;;  %2149 = vst [vmem:[#allocation5 + $0x64] sm:$0xf] %v1585_v37 }
 0x26f   : > { %v2612_v45 = vrot.slane %v2611_v57, 4  ;;  %v6020_v4 = vrot.slane %v6018_v53, 5  ;;  %v1586_v5 = vrot.slane %v1581_v14, 4  ;;  %v1588_v7 = vshrl.u32 %v15826_v9, 16 }
 0x270   : > { %v5779_v19 = vld [vmem:[#allocation5 + $0x60] sm:$0xf]  ;;  %v2627_v52 = vsel %vm15564_vm2, %v2622_v27, %v2626_v20  ;;  %v6006_v55 = vrot.slane %v6005_v47, 4  ;;  %v6015_v56 = vor.u32 %v6014_v2, %v6010_v63  ;;  %v1591_v31 = vshll.u32 %v15826_v9, 16 }
 0x271   : > { %v6023_v1 = vshrl.u32 %v5779_v19, 16  ;;  %v2337_v25 = vld [vmem:[#allocation5 + $0x60] sm:$0xf]  ;;  %v2617_v28 = vsel %vm15564_vm2, %v2612_v45, %v2616_v38  ;;  %v2151_v11 = vsel %vm15629_vm8, %v1586_v5, %v2150_v3  ;;  %v6026_v16 = vshll.u32 %v5779_v19, 16  ;;  %v2157_v45 = vld [vmem:[#allocation5 + $0x74] sm:$0x1] }
 0x272   : > { %v2629_v24 = vshrl.u32 %v2337_v25, 16  ;;  %v11984_v50 = vcombine.low %v2617_v28, %v2627_v52  ;;  %v6011_v14 = vsel %vm15564_vm2, %v6006_v55, %v6010_v63  ;;  %v6016_v8 = vrot.slane %v6015_v56, 4  ;;  %2152 = vst [vmem:[#allocation5 + $0x68] sm:$0x1] %v2151_v11 }
 0x273   : > { %v6025_v29 = vrot.slane %v6023_v1, 4  ;;  %v6028_v33 = vrot.slane %v6026_v16, 5  ;;  %v2632_v36 = vshll.u32 %v2337_v25, 16  ;;  %v1590_v35 = vrot.slane %v1588_v7, 7 }
 0x274   : > { %v2631_v22 = vrot.slane %v2629_v24, 4  ;;  %13123 = vmatmul.mubr.bf16.gmra.mrb[12].mxu1 %v11984_v50  ;;  %v6021_v38 = vsel %vm15564_vm2, %v6016_v8, %v6020_v4  ;;  %v1596_v61 = vshrl.u32 %v15828_v43, 16  ;;  %v1599_v41 = vshll.u32 %v15828_v43, 16 }
 0x275   : > { %v12175_v26 = vcombine.low %v6011_v14, %v6021_v38  ;;  %v5780_v32 = vld [vmem:[#allocation5 + $0x64] sm:$0xf]  ;;  %v6029_v51 = vor.u32 %v6028_v33, %v6025_v29  ;;  %v2634_v62 = vrot.slane %v2632_v36, 5  ;;  %v1594_v39 = vrot.slane %v1590_v35, 4  ;;  %v903_v14 = vld [vmem:[#allocation2 + $0xb8] sm:$0xff] }
 0x276   : > { %v2338_v17 = vld [vmem:[#allocation5 + $0x64] sm:$0xf]  ;;  %v6032_v54 = vshll.u32 %v5780_v32, 16  ;;  %v6036_v57 = vshrl.u32 %v5780_v32, 16  ;;  %v1593_v47 = vor.u32 %v1591_v31, %v1590_v35  ;;  %v1598_v9 = vrot.slane %v1596_v61, 7 }
 0x277   : > { %v2638_v20 = vshll.u32 %v2338_v17, 16  ;;  %v2642_v53 = vshrl.u32 %v2338_v17, 16  ;;  %13442 = vmatprep.mubr.bf16.mxu0 %v12175_v26  ;;  %v6030_v37 = vrot.slane %v6029_v51, 4  ;;  %v2635_v27 = vor.u32 %v2634_v62, %v2631_v22  ;;  %v905_v32 = vld [vmem:[#allocation2 + $0xc8] sm:$0xff]  ;;  %v906_v51 = vld [vmem:[#allocation2 + $0xd0] sm:$0xff] }
 0x278   : > { %v6034_v63 = vrot.slane %v6032_v54, 5  ;;  %v6038_v2 = vrot.slane %v6036_v57, 4  ;;  %v1601_v7 = vor.u32 %v1599_v41, %v1598_v9  ;;  %v1603_v52 = vrot.slane %v1598_v9, 4  ;;  %v14494_v54 = vld [vmem:[#allocation11 + $0x180] sm:$0xff]  }
 0x279   : > { %v2640_v3 = vrot.slane %v2638_v20, 5  ;;  %v2644_v43 = vrot.slane %v2642_v53, 4  ;;  %v5781_v4 = vld [vmem:[#allocation5 + $0x68] sm:$0x1]  ;;  %v2636_v19 = vrot.slane %v2635_v27, 4  ;;  %v2154_v55 = vsel %vm15641_vm10, %v1593_v47, %v2153_v46  ;;  %13574 = vmatprep.subr.bf16.mxu0 %v14494_v54 }
 0x27a   : > { %v2409_v5 = vld [vmem:[#allocation5 + $0x68] sm:$0x1]  ;;  %v6035_v56 = vsel %vm15564_vm2, %v6030_v37, %v6034_v63  ;;  %v6039_v1 = vor.u32 %v6038_v2, %v6034_v63  ;;  %v6042_v25 = vshll.u32 %v5781_v4, 16  ;;  %2155 = vst [vmem:[#allocation5 + $0x6c] sm:$0xf] %v2154_v55  ;;  %v1602_v24 = vsel %vm15635_vm9, %v1594_v39, %v1601_v7  ;;  %v14493_v39 = vld [vmem:[#allocation11 + $0x20] sm:$0xff]  }
 0x27b   : > { %v2645_v28 = vor.u32 %v2644_v43, %v2640_v3  ;;  %v2641_v11 = vsel %vm15564_vm2, %v2636_v19, %v2640_v3  ;;  %v2648_v16 = vshll.u32 %v2409_v5, 16  ;;  %v2158_v50 = vsel %vm15629_vm8, %v1603_v52, %v2157_v45  ;;  %2156 = vst [vmem:[#allocation5 + $0x70] sm:$0xf] %v1602_v24  ;;  %13182 = vmatprep.subr.bf16.mxu1 %v14493_v39 }
 0x27c   : > { %v6040_v8 = vrot.slane %v6039_v1, 4  ;;  %v6044_v29 = vrot.slane %v6042_v25, 5  ;;  %2159 = vst [vmem:[#allocation5 + $0x74] sm:$0x1] %v2158_v50  ;;  %v1102_v22 = vmax.f32 %v15832_v13, 0.0  ;;  %v1103_v35 = vmax.f32 %v15837_v0, 0.0  ;;  %13183 = vmatpush3.bf16.msra.mxu1 %v14493_v39 }
 0x27d   : > { %v2646_v33 = vrot.slane %v2645_v28, 4  ;;  %v2650_v36 = vrot.slane %v2648_v16, 5  ;;  %v1041_v38 = vadd.f32 %v15597_v59, %v15841_v42  ;;  %v1104_v31 = vmax.f32 %v15847_v49, 0.0  ;;  %v904_v13 = vld [vmem:[#allocation2 + $0xc0] sm:$0xff]  ;;  %v907_v0 = vld [vmem:[#allocation2 + $0xd8] sm:$0xff] }
 0x27e   : > { %v6045_v61 = vsel %vm15564_vm2, %v6040_v8, %v6044_v29  ;;  %v15882_v41 = vpack.c.bf16 %v1102_v22, %v1102_v22  ;;  %v973_v46 = vmul.f32 %v15587_v44, %v903_v14  ;;  %v15887_v26 = vadd.f32 %v15597_v59, %v15844_v23 }
 0x27f   : > { %v12176_v17 = vcombine.low %v6035_v56, %v6045_v61  ;;  %v2651_v42 = vsel %vm15564_vm2, %v2646_v33, %v2650_v36  ;;  %v15891_v49 = vpack.c.bf16 %v1103_v35, %v1103_v35  ;;  %v1105_v62 = vmax.f32 %v1041_v38, 0.0 }
 0x280   : > { %v11985_v57 = vcombine.low %v2641_v11, %v2651_v42  ;;  %v1605_v20 = vshrl.u32 %v15882_v41, 16  ;;  %v1608_v53 = vshll.u32 %v15882_v41, 16  ;;  %v15895_v23 = vpack.c.bf16 %v1104_v31, %v1104_v31 }
 0x281   : > { %13443 = vmatmul.mubr.bf16.gmra.mrb[12].mxu0 %v12176_v17  ;;  %v2339_v37 = vld [vmem:[#allocation5 + $0x6c] sm:$0xf]  ;;  %v1613_v47 = vshrl.u32 %v15891_v49, 16  ;;  %v1616_v9 = vshll.u32 %v15891_v49, 16  ;;  %v15899_v63 = vpack.c.bf16 %v1105_v62, %v1105_v62  ;;  %v15902_v2 = vadd.f32 %v15597_v59, %v973_v46  ;;  %v2160_v46 = vld [vmem:[#allocation5 + $0x78] sm:$0xf] }
 0x282   : > { %v5782_v27 = vld [vmem:[#allocation5 + $0x6c] sm:$0xf]  ;;  %13126 = vmatprep.mubr.bf16.mxu1 %v11985_v57  ;;  %v2653_v3 = vshrl.u32 %v2339_v37, 16  ;;  %v2656_v43 = vshll.u32 %v2339_v37, 16  ;;  %v2340_v5 = vld [vmem:[#allocation5 + $0x70] sm:$0xf]  ;;  %v15905_v52 = vmul.f32 %v15587_v44, %v904_v13  ;;  %v15908_v55 = vmul.f32 %v15587_v44, %v905_v32 }
 0x283   : > { %v6047_v45 = vshrl.u32 %v5782_v27, 16  ;;  %v6050_v4 = vshll.u32 %v5782_v27, 16  ;;  %v2410_v19 = vld [vmem:[#allocation5 + $0x74] sm:$0x1]  ;;  %v5783_v7 = vld [vmem:[#allocation5 + $0x70] sm:$0xf]  ;;  %v15911_v56 = vmul.f32 %v15587_v44, %v906_v51  ;;  %v15914_v1 = vmul.f32 %v15587_v44, %v907_v0 }
 0x284   : > { %v2655_v25 = vrot.slane %v2653_v3, 4  ;;  %v2658_v28 = vrot.slane %v2656_v43, 5  ;;  %v2662_v11 = vshll.u32 %v2340_v5, 16  ;;  %v2666_v16 = vshrl.u32 %v2340_v5, 16  ;;  %v5784_v24 = vld [vmem:[#allocation5 + $0x74] sm:$0x1] }
 0x285   : > { %v2672_v50 = vshll.u32 %v2410_v19, 16  ;;  %v6049_v14 = vrot.slane %v6047_v45, 4  ;;  %v6052_v8 = vrot.slane %v6050_v4, 5  ;;  %v6056_v29 = vshll.u32 %v5783_v7, 16  ;;  %v2164_v17 = vld [vmem:[#allocation5 + $0x80] sm:$0x1] }
 0x286   : > { %v2659_v33 = vor.u32 %v2658_v28, %v2655_v25  ;;  %v2664_v22 = vrot.slane %v2662_v11, 5  ;;  %v2668_v36 = vrot.slane %v2666_v16, 4  ;;  %v6060_v35 = vshrl.u32 %v5783_v7, 16 }
 0x287   : > { %v2674_v38 = vrot.slane %v2672_v50, 5  ;;  %v6053_v31 = vor.u32 %v6052_v8, %v6049_v14  ;;  %v6058_v61 = vrot.slane %v6056_v29, 5  ;;  %v6066_v41 = vshll.u32 %v5784_v24, 16  ;;  %v2167_v50 = vld [vmem:[#allocation5 + $0x84] sm:$0xf] }
 0x288   : > { %v2660_v13 = vrot.slane %v2659_v33, 4  ;;  %v2669_v32 = vor.u32 %v2668_v36, %v2664_v22  ;;  %v6062_v51 = vrot.slane %v6060_v35, 4  ;;  %v1607_v0 = vrot.slane %v1605_v20, 7  ;;  %v2171_v29 = vld [vmem:[#allocation5 + $0x8c] sm:$0x1] }
 0x289   : > { %v6054_v42 = vrot.slane %v6053_v31, 4  ;;  %v6068_v49 = vrot.slane %v6066_v41, 5  ;;  %v1615_v62 = vrot.slane %v1613_v47, 7  ;;  %v1622_v39 = vshrl.u32 %v15895_v23, 16 }
 0x28a   : > { %v2665_v54 = vsel %vm15564_vm2, %v2660_v13, %v2664_v22  ;;  %v2670_v57 = vrot.slane %v2669_v32, 4  ;;  %v6063_v37 = vor.u32 %v6062_v51, %v6058_v61  ;;  %v1610_v27 = vor.u32 %v1608_v53, %v1607_v0 }
 0x28b   : > { %v6059_v3 = vsel %vm15564_vm2, %v6054_v42, %v6058_v61  ;;  %v1611_v43 = vrot.slane %v1607_v0, 4  ;;  %v1618_v45 = vor.u32 %v1616_v9, %v1615_v62  ;;  %v1620_v4 = vrot.slane %v1615_v62, 4 }
 0x28c   : > { %v2675_v20 = vsel %vm15564_vm2, %v2670_v57, %v2674_v38  ;;  %v6064_v5 = vrot.slane %v6063_v37, 4  ;;  %v2161_v47 = vsel %vm15641_vm10, %v1610_v27, %v2160_v46  ;;  %v1624_v19 = vrot.slane %v1622_v39, 7 }
 0x28d   : > { %v11986_v7 = vcombine.low %v2665_v54, %v2675_v20  ;;  %v1619_v25 = vsel %vm15635_vm9, %v1611_v43, %v1618_v45  ;;  %2162 = vst [vmem:[#allocation5 + $0x78] sm:$0xf] %v2161_v47  ;;  %v2165_v53 = vsel %vm15629_vm8, %v1620_v4, %v2164_v17  ;;  %v1625_v28 = vshll.u32 %v15895_v23, 16 }
 0x28e   : > { %v6069_v9 = vsel %vm15564_vm2, %v6064_v5, %v6068_v49  ;;  %2163 = vst [vmem:[#allocation5 + $0x7c] sm:$0xf] %v1619_v25  ;;  %2166 = vst [vmem:[#allocation5 + $0x80] sm:$0x1] %v2165_v53  ;;  %v1628_v11 = vrot.slane %v1624_v19, 4  ;;  %v1630_v16 = vshrl.u32 %v15899_v63, 16  ;;  %v1044_v36 = vadd.f32 %v15597_v59, %v15905_v52 }
 0x28f   : > { %v1633_v24 = vshll.u32 %v15899_v63, 16  ;;  %13127 = vmatmul.mubr.bf16.gmra.mrb[16].mxu1 %v11986_v7  ;;  %v12177_v14 = vcombine.low %v6059_v3, %v6069_v9  ;;  %v1627_v8 = vor.u32 %v1625_v28, %v1624_v19  ;;  %v1106_v33 = vmax.f32 %v15887_v26, 0.0  ;;  %v908_v52 = vld [vmem:[#allocation2 + $0xe0] sm:$0xff] }
 0x290   : > { %v1107_v22 = vmax.f32 %v15902_v2, 0.0  ;;  %v1632_v23 = vrot.slane %v1630_v16, 7  ;;  %v1045_v35 = vadd.f32 %v15597_v59, %v15908_v55  ;;  %v15942_v38 = vadd.f32 %v15597_v59, %v15911_v56  ;;  %v909_v56 = vld [vmem:[#allocation2 + $0xe8] sm:$0xff] }
 0x291   : > { %13446 = vmatprep.mubr.bf16.mxu0 %v12177_v14  ;;  %v2168_v63 = vsel %vm15641_vm10, %v1627_v8, %v2167_v50  ;;  %v15946_v31 = vpack.c.bf16 %v1106_v33, %v1106_v33  ;;  %v15952_v2 = vadd.f32 %v15597_v59, %v15914_v1  ;;  %v1108_v55 = vmax.f32 %v1044_v36, 0.0 }
 0x292   : > { %v15948_v26 = vpack.c.bf16 %v1107_v22, %v1107_v22  ;;  %v1635_v61 = vor.u32 %v1633_v24, %v1632_v23  ;;  %v1637_v41 = vrot.slane %v1632_v23, 4  ;;  %2169 = vst [vmem:[#allocation5 + $0x84] sm:$0xf] %v2168_v63  ;;  %v1109_v46 = vmax.f32 %v1045_v35, 0.0 }
 0x293   : > { %v1639_v13 = vshrl.u32 %v15946_v31, 16  ;;  %v1642_v32 = vshll.u32 %v15946_v31, 16  ;;  %v15962_v62 = vpack.c.bf16 %v1108_v55, %v1108_v55  ;;  %v978_v3 = vmul.f32 %v15587_v44, %v908_v52 }
 0x294   : > { %v1647_v51 = vshrl.u32 %v15948_v26, 16  ;;  %v1650_v0 = vshll.u32 %v15948_v26, 16  ;;  %v5785_v17 = vld [vmem:[#allocation5 + $0x78] sm:$0xf]  ;;  %v1636_v1 = vsel %vm15635_vm9, %v1628_v11, %v1635_v61  ;;  %v2172_v49 = vsel %vm15629_vm8, %v1637_v41, %v2171_v29 }
 0x295   : > { %v2341_v42 = vld [vmem:[#allocation5 + $0x78] sm:$0xf]  ;;  %v15964_v39 = vpack.c.bf16 %v1109_v46, %v1109_v46  ;;  %v5786_v54 = vld [vmem:[#allocation5 + $0x7c] sm:$0xf]  ;;  %v5787_v57 = vld [vmem:[#allocation5 + $0x80] sm:$0x1]  ;;  %v979_v43 = vmul.f32 %v15587_v44, %v909_v56 }
 0x296   : > { %v6071_v37 = vshrl.u32 %v5785_v17, 16  ;;  %v6074_v27 = vshll.u32 %v5785_v17, 16  ;;  %2170 = vst [vmem:[#allocation5 + $0x88] sm:$0xf] %v1636_v1  ;;  %2173 = vst [vmem:[#allocation5 + $0x8c] sm:$0x1] %v2172_v49  ;;  %v15969_v1 = vadd.f32 %v15597_v59, %v978_v3 }
 0x297   : > { %v6080_v45 = vshll.u32 %v5786_v54, 16  ;;  %v6084_v4 = vshrl.u32 %v5786_v54, 16  ;;  %v6090_v20 = vshll.u32 %v5787_v57, 16  ;;  %v2342_v5 = vld [vmem:[#allocation5 + $0x7c] sm:$0xf]  ;;  %v2677_v47 = vshrl.u32 %v2341_v42, 16 }
 0x298   : > { %v6073_v19 = vrot.slane %v6071_v37, 4  ;;  %v6076_v7 = vrot.slane %v6074_v27, 5  ;;  %v2411_v25 = vld [vmem:[#allocation5 + $0x80] sm:$0x1]  ;;  %v2680_v53 = vshll.u32 %v2341_v42, 16  ;;  %v2686_v28 = vshll.u32 %v2342_v5, 16 }
 0x299   : > { %v6082_v9 = vrot.slane %v6080_v45, 5  ;;  %v6086_v11 = vrot.slane %v6084_v4, 4  ;;  %v6092_v16 = vrot.slane %v6090_v20, 5  ;;  %v2679_v24 = vrot.slane %v2677_v47, 4  ;;  %v2343_v33 = vld [vmem:[#allocation5 + $0x84] sm:$0xf] }
 0x29a   : > { %v6077_v50 = vor.u32 %v6076_v7, %v6073_v19  ;;  %v2682_v14 = vrot.slane %v2680_v53, 5  ;;  %v2688_v8 = vrot.slane %v2686_v28, 5  ;;  %v2690_v29 = vshrl.u32 %v2342_v5, 16  ;;  %v5788_v63 = vld [vmem:[#allocation5 + $0x84] sm:$0xf] }
 0x29b   : > { %v6087_v22 = vor.u32 %v6086_v11, %v6082_v9  ;;  %v2696_v23 = vshll.u32 %v2411_v25, 16  ;;  %v2701_v36 = vshrl.u32 %v2343_v33, 16  ;;  %v2704_v35 = vshll.u32 %v2343_v33, 16 }
 0x29c   : > { %v6078_v52 = vrot.slane %v6077_v50, 4  ;;  %v2683_v61 = vor.u32 %v2682_v14, %v2679_v24  ;;  %v2692_v41 = vrot.slane %v2690_v29, 4  ;;  %v6095_v55 = vshrl.u32 %v5788_v63, 16 }
 0x29d   : > { %v6088_v46 = vrot.slane %v6087_v22, 4  ;;  %v2698_v56 = vrot.slane %v2696_v23, 5  ;;  %v2344_v17 = vld [vmem:[#allocation5 + $0x88] sm:$0xf]  ;;  %v2412_v42 = vld [vmem:[#allocation5 + $0x8c] sm:$0x1]  ;;  %v15972_v49 = vadd.f32 %v15597_v59, %v979_v43 }
 0x29e   : > { %v6083_v54 = vsel %vm15564_vm2, %v6078_v52, %v6082_v9  ;;  %v2684_v57 = vrot.slane %v2683_v61, 4  ;;  %v2693_v37 = vor.u32 %v2692_v41, %v2688_v8  ;;  %v2703_v27 = vrot.slane %v2701_v36, 4  ;;  %v5789_v45 = vld [vmem:[#allocation5 + $0x88] sm:$0xf]  ;;  %v5790_v19 = vld [vmem:[#allocation5 + $0x8c] sm:$0x1] }
 0x29f   : > { %v6093_v4 = vsel %vm15564_vm2, %v6088_v46, %v6092_v16  ;;  %v2706_v20 = vrot.slane %v2704_v35, 5  ;;  %v2710_v5 = vshll.u32 %v2344_v17, 16  ;;  %v2714_v47 = vshrl.u32 %v2344_v17, 16  ;;  %v2174_v46 = vld [vmem:[#allocation5 + $0x90] sm:$0xf] }
 0x2a0   : > { %v12178_v7 = vcombine.low %v6083_v54, %v6093_v4  ;;  %v2689_v3 = vsel %vm15564_vm2, %v2684_v57, %v2688_v8  ;;  %v2694_v43 = vrot.slane %v2693_v37, 4  ;;  %v2720_v25 = vshll.u32 %v2412_v42, 16  ;;  %v2178_v57 = vld [vmem:[#allocation5 + $0x98] sm:$0x1] }
 0x2a1   : > { %v2707_v53 = vor.u32 %v2706_v20, %v2703_v27  ;;  %v2712_v28 = vrot.slane %v2710_v5, 5  ;;  %v2716_v9 = vrot.slane %v2714_v47, 4  ;;  %v6097_v11 = vrot.slane %v6095_v55, 4 }
 0x2a2   : > { %13447 = vmatmul.mubr.bf16.gmra.mrb[16].mxu0 %v12178_v7  ;;  %v2699_v24 = vsel %vm15564_vm2, %v2694_v43, %v2698_v56  ;;  %v2722_v50 = vrot.slane %v2720_v25, 5  ;;  %v6098_v16 = vshll.u32 %v5788_v63, 16  ;;  %v6104_v14 = vshll.u32 %v5789_v45, 16  ;;  %v14495_v43 = vld [vmem:[#allocation11 + $0x28] sm:$0xff]  }
 0x2a3   : > { %v11987_v29 = vcombine.low %v2689_v3, %v2699_v24  ;;  %v2708_v33 = vrot.slane %v2707_v53, 4  ;;  %v2717_v22 = vor.u32 %v2716_v9, %v2712_v28  ;;  %v6108_v23 = vshrl.u32 %v5789_v45, 16  ;;  %v2181_v53 = vld [vmem:[#allocation5 + $0x9c] sm:$0xf]  ;;  %13184 = vmatprep.subr.bf16.mxu1 %v14495_v43 }
 0x2a4   : > { %v6100_v36 = vrot.slane %v6098_v16, 5  ;;  %v6106_v35 = vrot.slane %v6104_v14, 5  ;;  %v6114_v8 = vshll.u32 %v5790_v19, 16  ;;  %v1641_v52 = vrot.slane %v1639_v13, 7  ;;  %13185 = vmatpush3.bf16.msra.mxu1 %v14495_v43 }
 0x2a5   : > { %13130 = vmatprep.mubr.bf16.mxu1 %v11987_v29  ;;  %v2713_v61 = vsel %vm15564_vm2, %v2708_v33, %v2712_v28  ;;  %v2718_v41 = vrot.slane %v2717_v22, 4  ;;  %v6110_v55 = vrot.slane %v6108_v23, 4  ;;  %v1649_v63 = vrot.slane %v1647_v51, 7  ;;  %v2185_v29 = vld [vmem:[#allocation5 + $0xa4] sm:$0x1] }
 0x2a6   : > { %v6101_v56 = vor.u32 %v6100_v36, %v6097_v11  ;;  %v6116_v17 = vrot.slane %v6114_v8, 5  ;;  %v1644_v42 = vor.u32 %v1642_v32, %v1641_v52  ;;  %v1645_v54 = vrot.slane %v1641_v52, 4  ;;  %v910_v11 = vld [vmem:[#allocation2 + $0xf0] sm:$0xff]  ;;  %v911_v36 = vld [vmem:[#allocation2 + $0xf8] sm:$0xff] }
 0x2a7   : > { %v2723_v13 = vsel %vm15564_vm2, %v2718_v41, %v2722_v50  ;;  %v6111_v37 = vor.u32 %v6110_v55, %v6106_v35  ;;  %v1652_v27 = vor.u32 %v1650_v0, %v1649_v63  ;;  %v1654_v45 = vrot.slane %v1649_v63, 4 }
 0x2a8   : > { %v11988_v4 = vcombine.low %v2713_v61, %v2723_v13  ;;  %v6102_v20 = vrot.slane %v6101_v56, 4  ;;  %v2175_v51 = vsel %vm15641_vm10, %v1644_v42, %v2174_v46  ;;  %v1656_v5 = vshrl.u32 %v15962_v62, 16 }
 0x2a9   : > { %v6112_v47 = vrot.slane %v6111_v37, 4  ;;  %v1653_v31 = vsel %vm15635_vm9, %v1645_v54, %v1652_v27  ;;  %2176 = vst [vmem:[#allocation5 + $0x90] sm:$0xf] %v2175_v51  ;;  %v2179_v32 = vsel %vm15629_vm8, %v1654_v45, %v2178_v57  ;;  %v1659_v19 = vshll.u32 %v15962_v62, 16 }
 0x2aa   : > { %13131 = vmatmul.mubr.bf16.gmra.mrb[20].mxu1 %v11988_v4  ;;  %v6107_v26 = vsel %vm15564_vm2, %v6102_v20, %v6106_v35  ;;  %2177 = vst [vmem:[#allocation5 + $0x94] sm:$0xf] %v1653_v31  ;;  %2180 = vst [vmem:[#allocation5 + $0x98] sm:$0x1] %v2179_v32  ;;  %v1658_v0 = vrot.slane %v1656_v5, 7  ;;  %v1664_v7 = vshrl.u32 %v15964_v39, 16  ;;  %v980_v35 = vmul.f32 %v15587_v44, %v910_v11 }
 0x2ab   : > { %v1667_v3 = vshll.u32 %v15964_v39, 16  ;;  %v6117_v25 = vsel %vm15564_vm2, %v6112_v47, %v6116_v17  ;;  %v1110_v28 = vmax.f32 %v15942_v38, 0.0  ;;  %v1111_v62 = vmax.f32 %v15952_v2, 0.0 }
 0x2ac   : > { %v1112_v9 = vmax.f32 %v15969_v1, 0.0  ;;  %v12179_v24 = vcombine.low %v6107_v26, %v6117_v25  ;;  %v1661_v50 = vor.u32 %v1659_v19, %v1658_v0  ;;  %v1662_v16 = vrot.slane %v1658_v0, 4 }
 0x2ad   : > { %v1666_v14 = vrot.slane %v1664_v7, 7  ;;  %v16011_v33 = vpack.c.bf16 %v1110_v28, %v1110_v28  ;;  %v16013_v39 = vpack.c.bf16 %v1111_v62, %v1111_v62  ;;  %v1113_v22 = vmax.f32 %v15972_v49, 0.0 }
 0x2ae   : > { %v16016_v23 = vpack.c.bf16 %v1112_v9, %v1112_v9  ;;  %13450 = vmatprep.mubr.bf16.mxu0 %v12179_v24  ;;  %v2182_v1 = vsel %vm15641_vm10, %v1661_v50, %v2181_v53  ;;  %v981_v37 = vmul.f32 %v15587_v44, %v911_v36  ;;  %v16034_v27 = vadd.f32 %v15597_v59, %v980_v35  ;;  %v912_v9 = vld [vmem:[#allocation2 + $0x100] sm:$0xff] }
 0x2af   : > { %v1669_v38 = vor.u32 %v1667_v3, %v1666_v14  ;;  %v1671_v2 = vrot.slane %v1666_v14, 4  ;;  %2183 = vst [vmem:[#allocation5 + $0x9c] sm:$0xf] %v2182_v1  ;;  %v1673_v8 = vshrl.u32 %v16011_v33, 16  ;;  %v1676_v52 = vshll.u32 %v16011_v33, 16 }
 0x2b0   : > { %v1681_v61 = vshrl.u32 %v16013_v39, 16  ;;  %v1684_v49 = vshll.u32 %v16013_v39, 16  ;;  %v5791_v41 = vld [vmem:[#allocation5 + $0x90] sm:$0xf]  ;;  %v16029_v56 = vpack.c.bf16 %v1113_v22, %v1113_v22  ;;  %v1690_v17 = vshrl.u32 %v16016_v23, 16 }
 0x2b1   : > { %v2345_v55 = vld [vmem:[#allocation5 + $0x90] sm:$0xf]  ;;  %v1670_v63 = vsel %vm15635_vm9, %v1662_v16, %v1669_v38  ;;  %v2186_v46 = vsel %vm15629_vm8, %v1671_v2, %v2185_v29  ;;  %v5792_v42 = vld [vmem:[#allocation5 + $0x94] sm:$0xf]  ;;  %v5793_v54 = vld [vmem:[#allocation5 + $0x98] sm:$0x1]  ;;  %v16039_v14 = vadd.f32 %v15597_v59, %v981_v37 }
 0x2b2   : > { %v6119_v57 = vshrl.u32 %v5791_v41, 16  ;;  %v6122_v13 = vshll.u32 %v5791_v41, 16  ;;  %2184 = vst [vmem:[#allocation5 + $0xa0] sm:$0xf] %v1670_v63  ;;  %2187 = vst [vmem:[#allocation5 + $0xa4] sm:$0x1] %v2186_v46 }
 0x2b3   : > { %v6128_v45 = vshll.u32 %v5792_v42, 16  ;;  %v6132_v4 = vshrl.u32 %v5792_v42, 16  ;;  %v6138_v20 = vshll.u32 %v5793_v54, 16  ;;  %v2346_v51 = vld [vmem:[#allocation5 + $0x94] sm:$0xf]  ;;  %v2725_v5 = vshrl.u32 %v2345_v55, 16 }
 0x2b4   : > { %v6121_v47 = vrot.slane %v6119_v57, 4  ;;  %v6124_v31 = vrot.slane %v6122_v13, 5  ;;  %v2413_v32 = vld [vmem:[#allocation5 + $0x98] sm:$0x1]  ;;  %v2728_v19 = vshll.u32 %v2345_v55, 16  ;;  %v2734_v26 = vshll.u32 %v2346_v51, 16 }
 0x2b5   : > { %v6130_v0 = vrot.slane %v6128_v45, 5  ;;  %v6134_v7 = vrot.slane %v6132_v4, 4  ;;  %v6140_v3 = vrot.slane %v6138_v20, 5  ;;  %v2727_v43 = vrot.slane %v2725_v5, 4  ;;  %v2353_v39 = vld [vmem:[#allocation5 + $0xd8] sm:$0xf] }
 0x2b6   : > { %v6125_v25 = vor.u32 %v6124_v31, %v6121_v47  ;;  %v2730_v53 = vrot.slane %v2728_v19, 5  ;;  %v2736_v28 = vrot.slane %v2734_v26, 5  ;;  %v2738_v62 = vshrl.u32 %v2346_v51, 16  ;;  %v2347_v50 = vld [vmem:[#allocation5 + $0x9c] sm:$0xf] }
 0x2b7   : > { %v6135_v11 = vor.u32 %v6134_v7, %v6130_v0  ;;  %v2744_v24 = vshll.u32 %v2413_v32, 16  ;;  %v16036_v16 = vrot.slane %v1673_v8, 7  ;;  %v2749_v38 = vshrl.u32 %v2347_v50, 16  ;;  %v5794_v54 = vld [vmem:[#allocation5 + $0x9c] sm:$0xf] }
 0x2b8   : > { %v6126_v29 = vrot.slane %v6125_v25, 4  ;;  %v2731_v33 = vor.u32 %v2730_v53, %v2727_v43  ;;  %v2740_v22 = vrot.slane %v2738_v62, 4  ;;  %v16043_v55 = vmul.f32 %v15587_v44, %v912_v9  ;;  %v2188_v25 = vld [vmem:[#allocation5 + $0xa8] sm:$0xf] }
 0x2b9   : > { %v6136_v2 = vrot.slane %v6135_v11, 4  ;;  %v2746_v1 = vrot.slane %v2744_v24, 5  ;;  %v2348_v36 = vld [vmem:[#allocation5 + $0xa0] sm:$0xf]  ;;  %v2414_v35 = vld [vmem:[#allocation5 + $0xa4] sm:$0x1]  ;;  %v1678_v41 = vor.u32 %v1676_v52, %v16036_v16 }
 0x2ba   : > { %v6131_v8 = vsel %vm15564_vm2, %v6126_v29, %v6130_v0  ;;  %v2732_v63 = vrot.slane %v2731_v33, 4  ;;  %v2741_v46 = vor.u32 %v2740_v22, %v2736_v28  ;;  %v2751_v42 = vrot.slane %v2749_v38, 4  ;;  %v5795_v57 = vld [vmem:[#allocation5 + $0xa0] sm:$0xf]  ;;  %v5796_v19 = vld [vmem:[#allocation5 + $0xa4] sm:$0x1] }
 0x2bb   : > { %v6141_v13 = vsel %vm15564_vm2, %v6136_v2, %v6140_v3  ;;  %v2752_v37 = vshll.u32 %v2347_v50, 16  ;;  %v2758_v45 = vshll.u32 %v2348_v36, 16  ;;  %v2762_v4 = vshrl.u32 %v2348_v36, 16 }
 0x2bc   : > { %v12180_v20 = vcombine.low %v6131_v8, %v6141_v13  ;;  %v2737_v52 = vsel %vm15564_vm2, %v2732_v63, %v2736_v28  ;;  %v2742_v51 = vrot.slane %v2741_v46, 4  ;;  %v2768_v5 = vshll.u32 %v2414_v35, 16  ;;  %v2192_v63 = vld [vmem:[#allocation5 + $0xb0] sm:$0x1] }
 0x2bd   : > { %v2754_v47 = vrot.slane %v2752_v37, 5  ;;  %v2760_v31 = vrot.slane %v2758_v45, 5  ;;  %v2764_v32 = vrot.slane %v2762_v4, 4  ;;  %v6143_v26 = vshrl.u32 %v5794_v54, 16 }
 0x2be   : > { %13451 = vmatmul.mubr.bf16.gmra.mrb[20].mxu0 %v12180_v20  ;;  %v2747_v0 = vsel %vm15564_vm2, %v2742_v51, %v2746_v1  ;;  %v2770_v7 = vrot.slane %v2768_v5, 5  ;;  %v6146_v3 = vshll.u32 %v5794_v54, 16  ;;  %v6152_v43 = vshll.u32 %v5795_v57, 16 }
 0x2bf   : > { %v11989_v53 = vcombine.low %v2737_v52, %v2747_v0  ;;  %v2755_v62 = vor.u32 %v2754_v47, %v2751_v42  ;;  %v2765_v9 = vor.u32 %v2764_v32, %v2760_v31  ;;  %v6145_v11 = vrot.slane %v6143_v26, 4  ;;  %v2195_v47 = vld [vmem:[#allocation5 + $0xb4] sm:$0xf] }
 0x2c0   : > { %v6148_v28 = vrot.slane %v6146_v3, 5  ;;  %v6154_v24 = vrot.slane %v6152_v43, 5  ;;  %v6156_v50 = vshrl.u32 %v5795_v57, 16  ;;  %v6162_v29 = vshll.u32 %v5796_v19, 16 }
 0x2c1   : > { %13134 = vmatprep.mubr.bf16.mxu1 %v11989_v53  ;;  %v2756_v33 = vrot.slane %v2755_v62, 4  ;;  %v2766_v22 = vrot.slane %v2765_v9, 4  ;;  %v1679_v38 = vrot.slane %v16036_v16, 4  ;;  %v1683_v2 = vrot.slane %v1681_v61, 7  ;;  %v2199_v62 = vld [vmem:[#allocation5 + $0xbc] sm:$0x1] }
 0x2c2   : > { %v6149_v1 = vor.u32 %v6148_v28, %v6145_v11  ;;  %v6158_v36 = vrot.slane %v6156_v50, 4  ;;  %v6164_v35 = vrot.slane %v6162_v29, 5  ;;  %v2189_v8 = vsel %vm15641_vm10, %v1678_v41, %v2188_v25  ;;  %v913_v9 = vld [vmem:[#allocation2 + $0x108] sm:$0xff] }
 0x2c3   : > { %v2761_v46 = vsel %vm15564_vm2, %v2756_v33, %v2760_v31  ;;  %v2771_v42 = vsel %vm15564_vm2, %v2766_v22, %v2770_v7  ;;  %v1686_v54 = vor.u32 %v1684_v49, %v1683_v2  ;;  %v1688_v16 = vrot.slane %v1683_v2, 4  ;;  %2190 = vst [vmem:[#allocation5 + $0xa8] sm:$0xf] %v2189_v8  ;;  %v16072_v49 = vld [vmem:[#allocation5 + $0xdc] sm:$0xf] }
 0x2c4   : > { %v11990_v57 = vcombine.low %v2761_v46, %v2771_v42  ;;  %v6150_v61 = vrot.slane %v6149_v1, 4  ;;  %v6159_v13 = vor.u32 %v6158_v36, %v6154_v24  ;;  %v1692_v37 = vrot.slane %v1690_v17, 7 }
 0x2c5   : > { %v1687_v41 = vsel %vm15635_vm9, %v1679_v38, %v1686_v54  ;;  %v2193_v45 = vsel %vm15629_vm8, %v1688_v16, %v2192_v63  ;;  %v1693_v4 = vshll.u32 %v16016_v23, 16  ;;  %v1698_v20 = vshrl.u32 %v16029_v56, 16 }
 0x2c6   : > { %13135 = vmatmul.mubr.bf16.gmra.mrb[24].mxu1 %v11990_v57  ;;  %v6155_v52 = vsel %vm15564_vm2, %v6150_v61, %v6154_v24  ;;  %v6160_v51 = vrot.slane %v6159_v13, 4  ;;  %2191 = vst [vmem:[#allocation5 + $0xac] sm:$0xf] %v1687_v41  ;;  %2194 = vst [vmem:[#allocation5 + $0xb0] sm:$0x1] %v2193_v45  ;;  %v1696_v17 = vrot.slane %v1692_v37, 4  ;;  %v983_v16 = vmul.f32 %v15587_v44, %v913_v9 }
 0x2c7   : > { %v1701_v5 = vshll.u32 %v16029_v56, 16  ;;  %v1695_v31 = vor.u32 %v1693_v4, %v1692_v37  ;;  %v1700_v32 = vrot.slane %v1698_v20, 7  ;;  %v1114_v23 = vmax.f32 %v16034_v27, 0.0 }
 0x2c8   : > { %v1115_v19 = vmax.f32 %v16039_v14, 0.0  ;;  %v6165_v26 = vsel %vm15564_vm2, %v6160_v51, %v6164_v35  ;;  %v2821_v0 = vshrl.u32 %v2353_v39, 16  ;;  %v2824_v7 = vshll.u32 %v2353_v39, 16 }
 0x2c9   : > { %v2830_v3 = vshll.u32 %v16072_v49, 16  ;;  %v12181_v43 = vcombine.low %v6155_v52, %v6165_v26  ;;  %v1703_v25 = vor.u32 %v1701_v5, %v1700_v32  ;;  %v1705_v53 = vrot.slane %v1700_v32, 4 }
 0x2ca   : > { %v2196_v56 = vsel %vm15641_vm10, %v1695_v31, %v2195_v47  ;;  %v5797_v11 = vld [vmem:[#allocation5 + $0xa8] sm:$0xf]  ;;  %v16084_v27 = vpack.c.bf16 %v1114_v23, %v1114_v23  ;;  %v16086_v14 = vpack.c.bf16 %v1115_v19, %v1115_v19  ;;  %v16088_v24 = vrot.slane %v2821_v0, 4 }
 0x2cb   : > { %v2349_v28 = vld [vmem:[#allocation5 + $0xa8] sm:$0xf]  ;;  %2197 = vst [vmem:[#allocation5 + $0xb4] sm:$0xf] %v2196_v56  ;;  %v16090_v50 = vrot.slane %v2824_v7, 5  ;;  %13454 = vmatprep.mubr.bf16.mxu0 %v12181_v43  ;;  %v6167_v29 = vshrl.u32 %v5797_v11, 16  ;;  %v1704_v2 = vsel %vm15635_vm9, %v1696_v17, %v1703_v25  ;;  %v2200_v1 = vsel %vm15629_vm8, %v1705_v53, %v2199_v62 }
 0x2cc   : > { %v6170_v33 = vshll.u32 %v5797_v11, 16  ;;  %v2773_v22 = vshrl.u32 %v2349_v28, 16  ;;  %v2776_v38 = vshll.u32 %v2349_v28, 16  ;;  %v1707_v36 = vshrl.u32 %v16084_v27, 16  ;;  %2198 = vst [vmem:[#allocation5 + $0xb8] sm:$0xf] %v1704_v2 }
 0x2cd   : > { %v1710_v35 = vshll.u32 %v16084_v27, 16  ;;  %v5798_v8 = vld [vmem:[#allocation5 + $0xac] sm:$0xf]  ;;  %v5799_v63 = vld [vmem:[#allocation5 + $0xb0] sm:$0x1]  ;;  %v6169_v46 = vrot.slane %v6167_v29, 4  ;;  %v2827_v54 = vor.u32 %v16090_v50, %v16088_v24  ;;  %v16108_v2 = vadd.f32 %v15597_v59, %v983_v16 }
 0x2ce   : > { %v6172_v42 = vrot.slane %v6170_v33, 5  ;;  %2201 = vst [vmem:[#allocation5 + $0xbc] sm:$0x1] %v2200_v1  ;;  %v6176_v57 = vshll.u32 %v5798_v8, 16  ;;  %v6180_v61 = vshrl.u32 %v5798_v8, 16  ;;  %v6186_v13 = vshll.u32 %v5799_v63, 16 }
 0x2cf   : > { %v2350_v37 = vld [vmem:[#allocation5 + $0xac] sm:$0xf]  ;;  %v2775_v41 = vrot.slane %v2773_v22, 4  ;;  %v2415_v4 = vld [vmem:[#allocation5 + $0xb0] sm:$0x1]  ;;  %v2778_v20 = vrot.slane %v2776_v38, 5  ;;  %v16105_v38 = vadd.f32 %v15597_v59, %v16043_v55 }
 0x2d0   : > { %v6173_v45 = vor.u32 %v6172_v42, %v6169_v46  ;;  %v2782_v39 = vshll.u32 %v2350_v37, 16  ;;  %v2786_v52 = vshrl.u32 %v2350_v37, 16  ;;  %v6178_v51 = vrot.slane %v6176_v57, 5 }
 0x2d1   : > { %v6182_v17 = vrot.slane %v6180_v61, 4  ;;  %v6188_v5 = vrot.slane %v6186_v13, 5  ;;  %v2792_v47 = vshll.u32 %v2415_v4, 16  ;;  %v2779_v32 = vor.u32 %v2778_v20, %v2775_v41 }
 0x2d2   : > { %v6174_v31 = vrot.slane %v6173_v45, 4  ;;  %v2784_v23 = vrot.slane %v2782_v39, 5  ;;  %v2788_v19 = vrot.slane %v2786_v52, 4  ;;  %v2351_v26 = vld [vmem:[#allocation5 + $0xb4] sm:$0xf] }
 0x2d3   : > { %v6183_v0 = vor.u32 %v6182_v17, %v6178_v51  ;;  %v2794_v7 = vrot.slane %v2792_v47, 5  ;;  %v2797_v43 = vshrl.u32 %v2351_v26, 16  ;;  %v2800_v25 = vshll.u32 %v2351_v26, 16  ;;  %v5800_v53 = vld [vmem:[#allocation5 + $0xb4] sm:$0xf] }
 0x2d4   : > { %v6179_v56 = vsel %vm15564_vm2, %v6174_v31, %v6178_v51  ;;  %v2780_v62 = vrot.slane %v2779_v32, 4  ;;  %v2789_v9 = vor.u32 %v2788_v19, %v2784_v23  ;;  %v6191_v11 = vshrl.u32 %v5800_v53, 16  ;;  %v2352_v29 = vld [vmem:[#allocation5 + $0xb8] sm:$0xf] }
 0x2d5   : > { %v6184_v28 = vrot.slane %v6183_v0, 4  ;;  %v2416_v33 = vld [vmem:[#allocation5 + $0xbc] sm:$0x1]  ;;  %v2799_v22 = vrot.slane %v2797_v43, 4  ;;  %v2802_v63 = vrot.slane %v2800_v25, 5  ;;  %v2806_v46 = vshll.u32 %v2352_v29, 16 }
 0x2d6   : > { %v2785_v1 = vsel %vm15564_vm2, %v2780_v62, %v2784_v23  ;;  %v2790_v8 = vrot.slane %v2789_v9, 4  ;;  %v5801_v42 = vld [vmem:[#allocation5 + $0xb8] sm:$0xf]  ;;  %v2810_v61 = vshrl.u32 %v2352_v29, 16  ;;  %v2816_v13 = vshll.u32 %v2416_v33, 16  ;;  %v14497_v23 = vld [vmem:[#allocation11 + $0x30] sm:$0xff]  }
 0x2d7   : > { %v6189_v57 = vsel %vm15564_vm2, %v6184_v28, %v6188_v5  ;;  %v5802_v37 = vld [vmem:[#allocation5 + $0xbc] sm:$0x1]  ;;  %v6193_v41 = vrot.slane %v6191_v11, 4  ;;  %v2803_v16 = vor.u32 %v2802_v63, %v2799_v22  ;;  %v2808_v4 = vrot.slane %v2806_v46, 5  ;;  %v2202_v5 = vld [vmem:[#allocation5 + $0xc0] sm:$0xf]  ;;  %13186 = vmatprep.subr.bf16.mxu1 %v14497_v23 }
 0x2d8   : > { %v12182_v45 = vcombine.low %v6179_v56, %v6189_v57  ;;  %v2795_v55 = vsel %vm15564_vm2, %v2790_v8, %v2794_v7  ;;  %v2812_v39 = vrot.slane %v2810_v61, 4  ;;  %v2818_v52 = vrot.slane %v2816_v13, 5  ;;  %13187 = vmatpush3.bf16.msra.mxu1 %v14497_v23  ;;  %v2417_v22 = vld [vmem:[#allocation5 + $0xe0] sm:$0x1] }
 0x2d9   : > { %v11991_v20 = vcombine.low %v2785_v1, %v2795_v55  ;;  %v6194_v51 = vshll.u32 %v5800_v53, 16  ;;  %v2804_v17 = vrot.slane %v2803_v16, 4  ;;  %v6200_v47 = vshll.u32 %v5801_v42, 16  ;;  %v7169_v16 = vld [vmem:[#allocation5 + $0x18] sm:$0xe] }
 0x2da   : > { %13455 = vmatmul.mubr.bf16.gmra.mrb[24].mxu0 %v12182_v45  ;;  %v6204_v31 = vshrl.u32 %v5801_v42, 16  ;;  %v6210_v32 = vshll.u32 %v5802_v37, 16  ;;  %v2813_v19 = vor.u32 %v2812_v39, %v2808_v4  ;;  %v1709_v0 = vrot.slane %v1707_v36, 7  ;;  %v7168_v37 = vld [vmem:[#allocation5 + $0xc] sm:$0xe] }
 0x2db   : > { %13138 = vmatprep.mubr.bf16.mxu1 %v11991_v20  ;;  %v6196_v26 = vrot.slane %v6194_v51, 5  ;;  %v1715_v7 = vshrl.u32 %v16086_v14, 16  ;;  %v2809_v43 = vsel %vm15564_vm2, %v2804_v17, %v2808_v4  ;;  %v6202_v25 = vrot.slane %v6200_v47, 5 }
 0x2dc   : > { %v6206_v53 = vrot.slane %v6204_v31, 4  ;;  %v6212_v56 = vrot.slane %v6210_v32, 5  ;;  %v2814_v62 = vrot.slane %v2813_v19, 4  ;;  %v1712_v11 = vor.u32 %v1710_v35, %v1709_v0  ;;  %v2206_v35 = vld [vmem:[#allocation5 + $0xc8] sm:$0x1] }
 0x2dd   : > { %v6197_v9 = vor.u32 %v6196_v26, %v6193_v41  ;;  %v1713_v28 = vrot.slane %v1709_v0, 4  ;;  %v1717_v33 = vrot.slane %v1715_v7, 7  ;;  %v1718_v36 = vshll.u32 %v16086_v14, 16  ;;  %v915_v0 = vld [vmem:[#allocation2 + $0x118] sm:$0xff] }
 0x2de   : > { %v6207_v29 = vor.u32 %v6206_v53, %v6202_v25  ;;  %v16127_v1 = vrot.slane %v2827_v54, 4  ;;  %v2819_v8 = vsel %vm15564_vm2, %v2814_v62, %v2818_v52  ;;  %v2203_v27 = vsel %vm15641_vm10, %v1712_v11, %v2202_v5  ;;  %v914_v52 = vld [vmem:[#allocation2 + $0x110] sm:$0xff] }
 0x2df   : > { %v6198_v63 = vrot.slane %v6197_v9, 4  ;;  %v2832_v46 = vrot.slane %v2830_v3, 5  ;;  %v11992_v42 = vcombine.low %v2809_v43, %v2819_v8  ;;  %v1720_v14 = vor.u32 %v1718_v36, %v1717_v33  ;;  %2204 = vst [vmem:[#allocation5 + $0xc0] sm:$0xf] %v2203_v27 }
 0x2e0   : > { %v6208_v57 = vrot.slane %v6207_v29, 4  ;;  %v1722_v61 = vrot.slane %v1717_v33, 4  ;;  %v2834_v54 = vshrl.u32 %v16072_v49, 16  ;;  %v2840_v13 = vshll.u32 %v2417_v22, 16 }
 0x2e1   : > { %v6203_v24 = vsel %vm15564_vm2, %v6198_v63, %v6202_v25  ;;  %v2833_v50 = vsel %vm15564_vm2, %v16127_v1, %v2832_v46  ;;  %13139 = vmatmul.mubr.bf16.gmra.mrb[28].mxu1 %v11992_v42  ;;  %v1721_v41 = vsel %vm15635_vm9, %v1713_v28, %v1720_v14  ;;  %v1116_v55 = vmax.f32 %v16105_v38, 0.0  ;;  %v14637_v38 = vld [vmem:[#allocation5 + $0x10] sm:$0xf] }
 0x2e2   : > { %v6213_v3 = vsel %vm15564_vm2, %v6208_v57, %v6212_v56  ;;  %v2207_v45 = vsel %vm15629_vm8, %v1722_v61, %v2206_v35  ;;  %2205 = vst [vmem:[#allocation5 + $0xc4] sm:$0xf] %v1721_v41  ;;  %v2836_v20 = vrot.slane %v2834_v54, 4  ;;  %v2842_v49 = vrot.slane %v2840_v13, 5  ;;  %v2213_v61 = vld [vmem:[#allocation5 + $0xec] sm:$0x1] }
 0x2e3   : > { %v12183_v4 = vcombine.low %v6203_v24, %v6213_v3  ;;  %2208 = vst [vmem:[#allocation5 + $0xc8] sm:$0x1] %v2207_v45  ;;  %v1117_v39 = vmax.f32 %v16108_v2, 0.0  ;;  %v12471_v51 = vpack.c.bf16 %v1116_v55, %v1116_v55  ;;  %v12209_v17 = vrot.slane %v7168_v37, 9  ;;  %v916_v13 = vld [vmem:[#allocation2 + $0x120] sm:$0xff]  ;;  %v917_v45 = vld [vmem:[#allocation2 + $0x128] sm:$0xff] }
 0x2e4   : > { %v2837_v47 = vor.u32 %v2836_v20, %v2832_v46  ;;  %v7298_v5 = vrot.slane %v14637_v38, 5  ;;  %v12210_v23 = vrot.slane %v7169_v16, 9  ;;  %v16158_v2 = vsel %vm16149_vm13, %v15721_v10, %v7308_v60  ;;  %v2209_v10 = vld [vmem:[#allocation5 + $0xe4] sm:$0xf] }
 0x2e5   : > { %13458 = vmatprep.mubr.bf16.mxu0 %v12183_v4  ;;  %v12472_v31 = vpack.c.bf16 %v1117_v39, %v1117_v39  ;;  %v1724_v19 = vshrl.u32 %v12471_v51, 16  ;;  %v1727_v26 = vshll.u32 %v12471_v51, 16  ;;  %v984_v7 = vmul.f32 %v15587_v44, %v914_v52  ;;  %v7170_v55 = vld [vmem:[#allocation5 + $0x24] sm:$0xe]  ;;  %v16189_v51 = vld [vmem:[#allocation5 + $0x30] sm:$0xe] }
 0x2e6   : > { %v5803_v43 = vld [vmem:[#allocation5 + $0xc0] sm:$0xf]  ;;  %v2838_v25 = vrot.slane %v2837_v47, 4  ;;  %v16163_v62 = vsel %vm16149_vm13, %v12209_v17, %v7298_v5  ;;  %v7300_v6 = vrot.slane %v7298_v5, 4  ;;  %v16171_v33 = vsel %vm16149_vm13, %v12210_v23, %v7305_v58 }
 0x2e7   : > { %v1732_v53 = vshrl.u32 %v12472_v31, 16  ;;  %v1735_v56 = vshll.u32 %v12472_v31, 16  ;;  %v6215_v9 = vshrl.u32 %v5803_v43, 16  ;;  %v6218_v11 = vshll.u32 %v5803_v43, 16 }
 0x2e8   : > { %v1726_v28 = vrot.slane %v1724_v19, 7  ;;  %v2843_v29 = vsel %vm15564_vm2, %v2838_v25, %v2842_v49  ;;  %v985_v36 = vmul.f32 %v15587_v44, %v915_v0  ;;  %v12242_v30 = vcombine.low %v16171_v33, %v16158_v2  ;;  %v16197_v25 = vld [vmem:[#allocation5 + $0x2c] sm:$0x1]  ;;  %v2227_v33 = vld [vmem:[#allocation5 + $0x104] sm:$0x1] }
 0x2e9   : > { %v1734_v60 = vrot.slane %v1732_v53, 7  ;;  %v5804_v22 = vld [vmem:[#allocation5 + $0xc4] sm:$0xf]  ;;  %v6217_v8 = vrot.slane %v6215_v9, 4  ;;  %v6220_v63 = vrot.slane %v6218_v11, 5  ;;  %v11993_v27 = vcombine.low %v2833_v50, %v2843_v29 }
 0x2ea   : > { %v5805_v1 = vld [vmem:[#allocation5 + $0xc8] sm:$0x1]  ;;  %v1729_v35 = vor.u32 %v1727_v26, %v1726_v28  ;;  %v6224_v46 = vshll.u32 %v5804_v22, 16  ;;  %v6228_v42 = vshrl.u32 %v5804_v22, 16  ;;  %v1730_v14 = vrot.slane %v1726_v28, 4 }
 0x2eb   : > { %v6234_v57 = vshll.u32 %v5805_v1, 16  ;;  %v6221_v24 = vor.u32 %v6220_v63, %v6217_v8  ;;  %13142 = vmatprep.mubr.bf16.mxu1 %v11993_v27  ;;  %v1737_v15 = vor.u32 %v1735_v56, %v1734_v60  ;;  %v1739_v54 = vrot.slane %v1734_v60, 4  ;;  %v14638_v26 = vld [vmem:[#allocation5 + $0x28] sm:$0xf] }
 0x2ec   : > { %v2210_v58 = vsel %vm15641_vm10, %v1729_v35, %v2209_v10  ;;  %v6226_v37 = vrot.slane %v6224_v46, 5  ;;  %v6230_v3 = vrot.slane %v6228_v42, 4  ;;  %v7302_v50 = vsel %vm16149_vm13, %v7300_v6, %v7301_v18 }
 0x2ed   : > { %v6236_v41 = vrot.slane %v6234_v57, 5  ;;  %2211 = vst [vmem:[#allocation5 + $0xe4] sm:$0xf] %v2210_v58  ;;  %v6222_v16 = vrot.slane %v6221_v24, 4  ;;  %v1738_v4 = vsel %vm15635_vm9, %v1730_v14, %v1737_v15  ;;  %v2214_v20 = vsel %vm15629_vm8, %v1739_v54, %v2213_v61  ;;  %v2216_v58 = vld [vmem:[#allocation5 + $0xf0] sm:$0xf] }
 0x2ee   : > { %v12241_v49 = vcombine.low %v16163_v62, %v7302_v50  ;;  %v6231_v39 = vor.u32 %v6230_v3, %v6226_v37  ;;  %2212 = vst [vmem:[#allocation5 + $0xe8] sm:$0xf] %v1738_v4  ;;  %2215 = vst [vmem:[#allocation5 + $0xec] sm:$0x1] %v2214_v20  ;;  %v1054_v52 = vadd.f32 %v15597_v59, %v984_v7  ;;  %v12211_v38 = vrot.slane %v7170_v55, 9 }
 0x2ef   : > { %v1055_v18 = vadd.f32 %v15597_v59, %v985_v36  ;;  %v6227_v17 = vsel %vm15564_vm2, %v6222_v16, %v6226_v37  ;;  %v986_v47 = vmul.f32 %v15587_v44, %v916_v13  ;;  %v987_v31 = vmul.f32 %v15587_v44, %v917_v45 }
 0x2f0   : > { %v6232_v5 = vrot.slane %v6231_v39, 4  ;;  %v1118_v23 = vmax.f32 %v1054_v52, 0.0  ;;  %v7312_v0 = vrot.slane %v14638_v26, 5  ;;  %v7315_v53 = vrot.slane %v16197_v25, 5  ;;  %v2223_v26 = vld [vmem:[#allocation5 + $0xfc] sm:$0xf] }
 0x2f1   : > { %v1119_v19 = vmax.f32 %v1055_v18, 0.0  ;;  %v1056_v43 = vadd.f32 %v15597_v59, %v986_v47  ;;  %v1057_v7 = vadd.f32 %v15597_v59, %v987_v31  ;;  %v12212_v56 = vrot.slane %v16189_v51, 9  ;;  %v2220_v18 = vld [vmem:[#allocation5 + $0xf8] sm:$0x1] }
 0x2f2   : > { %v6237_v62 = vsel %vm15564_vm2, %v6232_v5, %v6236_v41  ;;  %v12473_v9 = vpack.c.bf16 %v1118_v23, %v1118_v23  ;;  %v16205_v28 = vsel %vm16149_vm13, %v12211_v38, %v7312_v0  ;;  %v7314_v36 = vrot.slane %v7312_v0, 4  ;;  %v14496_v0 = vld [vmem:[#allocation11 + $0x188] sm:$0xff]  }
 0x2f3   : > { %v12474_v11 = vpack.c.bf16 %v1119_v19, %v1119_v19  ;;  %v12184_v6 = vcombine.low %v6227_v17, %v6237_v62  ;;  %v1120_v60 = vmax.f32 %v1056_v43, 0.0  ;;  %v1121_v10 = vmax.f32 %v1057_v7, 0.0 }
 0x2f4   : > { %v2355_v29 = vld [vmem:[#allocation5 + $0xe4] sm:$0xf]  ;;  %v1741_v8 = vshrl.u32 %v12473_v9, 16  ;;  %v1744_v63 = vshll.u32 %v12473_v9, 16 }
 0x2f5   : > { %v2845_v22 = vshrl.u32 %v2355_v29, 16  ;;  %v2848_v1 = vshll.u32 %v2355_v29, 16  ;;  %13459 = vmatmul.mubr.bf16.gmra.mrb[28].mxu0 %v12184_v6  ;;  %v2356_v27 = vld [vmem:[#allocation5 + $0xe8] sm:$0xf]  ;;  %v2418_v35 = vld [vmem:[#allocation5 + $0xec] sm:$0x1]  ;;  %v12475_v57 = vpack.c.bf16 %v1120_v60, %v1120_v60  ;;  %v12476_v14 = vpack.c.bf16 %v1121_v10, %v1121_v10 }
 0x2f6   : > { %v1749_v46 = vshrl.u32 %v12474_v11, 16  ;;  %v1752_v42 = vshll.u32 %v12474_v11, 16  ;;  %v2854_v15 = vshll.u32 %v2356_v27, 16  ;;  %v2858_v54 = vshrl.u32 %v2356_v27, 16  ;;  %13510 = vmatprep.mubr.bf16.mxu0 %v12241_v49  ;;  %v14640_v29 = vld [vmem:[#allocation5 + $0x34] sm:$0xf] }
 0x2f7   : > { %v2847_v61 = vrot.slane %v2845_v22, 4  ;;  %v2850_v24 = vrot.slane %v2848_v1, 5  ;;  %v2864_v13 = vshll.u32 %v2418_v35, 16  ;;  %v1743_v37 = vrot.slane %v1741_v8, 7  ;;  %v918_v10 = vld [vmem:[#allocation2 + $0x130] sm:$0xff]  ;;  %v919_v22 = vld [vmem:[#allocation2 + $0x138] sm:$0xff] }
 0x2f8   : > { %v1751_v3 = vrot.slane %v1749_v46, 7  ;;  %v1758_v41 = vshrl.u32 %v12475_v57, 16  ;;  %v2856_v45 = vrot.slane %v2854_v15, 5  ;;  %v2860_v55 = vrot.slane %v2858_v54, 4  ;;  %v920_v1 = vld [vmem:[#allocation2 + $0x140] sm:$0xff]  ;;  %v921_v46 = vld [vmem:[#allocation2 + $0x148] sm:$0xff] }
 0x2f9   : > { %v2851_v50 = vor.u32 %v2850_v24, %v2847_v61  ;;  %v1761_v16 = vshll.u32 %v12475_v57, 16  ;;  %v2866_v4 = vrot.slane %v2864_v13, 5  ;;  %v1746_v20 = vor.u32 %v1744_v63, %v1743_v37  ;;  %v14641_v63 = vld [vmem:[#allocation11 + $0x180] sm:$0xff]   ;;  %v14642_v27 = vld [vmem:[#allocation5 + $0x38] sm:$0x1]  ;;  %v14498_v61 = vld [vmem:[#allocation11 + $0x190] sm:$0xff]  }
 0x2fa   : > { %v1747_v39 = vrot.slane %v1743_v37, 4  ;;  %v1754_v52 = vor.u32 %v1752_v42, %v1751_v3  ;;  %v2861_v47 = vor.u32 %v2860_v55, %v2856_v45  ;;  %v1756_v31 = vrot.slane %v1751_v3, 4 }
 0x2fb   : > { %v2852_v17 = vrot.slane %v2851_v50, 4  ;;  %v1760_v38 = vrot.slane %v1758_v41, 7  ;;  %v2217_v5 = vsel %vm15641_vm10, %v1746_v20, %v2216_v58  ;;  %v1766_v23 = vshrl.u32 %v12476_v14, 16  ;;  %v16248_v20 = vld [vmem:[#allocation5 + $0x40] sm:$0xf] }
 0x2fc   : > { %v1755_v49 = vsel %vm15635_vm9, %v1747_v39, %v1754_v52  ;;  %v1769_v19 = vshll.u32 %v12476_v14, 16  ;;  %v2862_v7 = vrot.slane %v2861_v47, 4  ;;  %2218 = vst [vmem:[#allocation5 + $0xf0] sm:$0xf] %v2217_v5  ;;  %v2221_v25 = vsel %vm15629_vm8, %v1756_v31, %v2220_v18  ;;  %v16251_v52 = vld [vmem:[#allocation5 + $0x44] sm:$0x1] }
 0x2fd   : > { %v2857_v43 = vsel %vm15564_vm2, %v2852_v17, %v2856_v45  ;;  %2219 = vst [vmem:[#allocation5 + $0xf4] sm:$0xf] %v1755_v49  ;;  %v1763_v62 = vor.u32 %v1761_v16, %v1760_v38  ;;  %13511 = vmatmul.mubr.bf16.vlgmr.msra.gmra.mrb[0].mxu0 %v12242_v30  ;;  %2222 = vst [vmem:[#allocation5 + $0xf8] sm:$0x1] %v2221_v25  ;;  %v1764_v9 = vrot.slane %v1760_v38, 4  ;;  %v1768_v11 = vrot.slane %v1766_v23, 7 }
 0x2fe   : > { %v7316_v6 = vsel %vm16149_vm13, %v7314_v36, %v7315_v53  ;;  %v7319_v60 = vrot.slane %v14640_v29, 5  ;;  %v2867_v8 = vsel %vm15564_vm2, %v2862_v7, %v2866_v4  ;;  %13575 = vmatpush3.bf16.msra.mxu0 %v14641_v63  ;;  %v7322_v35 = vrot.slane %v14642_v27, 5  ;;  %v16225_v53 = vld [vmem:[#allocation5 + $0x3c] sm:$0xe] }
 0x2ff   : > { %v2224_v2 = vsel %vm15641_vm10, %v1763_v62, %v2223_v26  ;;  %v12243_v30 = vcombine.low %v16205_v28, %v7316_v6  ;;  %v11994_v36 = vcombine.low %v2857_v43, %v2867_v8  ;;  %v1771_v42 = vor.u32 %v1769_v19, %v1768_v11  ;;  %13576 = vmatprep.subr.bf16.mxu0 %v14496_v0  ;;  %v14500_v43 = vld [vmem:[#allocation11 + $0x198] sm:$0xff]  }
 0x300   : > { %v1773_v57 = vrot.slane %v1768_v11, 4  ;;  %2225 = vst [vmem:[#allocation5 + $0xfc] sm:$0xf] %v2224_v2  ;;  %v7320_v14 = vsel %vm16149_vm13, %v12212_v56, %v7319_v60  ;;  %v7321_v24 = vrot.slane %v7319_v60, 4  ;;  %v988_v28 = vmul.f32 %v15587_v44, %v918_v10 }
 0x301   : > { %13514 = vmatprep.mubr.bf16.mxu0 %v12243_v30  ;;  %v989_v15 = vmul.f32 %v15587_v44, %v919_v22  ;;  %v990_v54 = vmul.f32 %v15587_v44, %v920_v1  ;;  %13143 = vmatmul.mubr.bf16.gmra.mrb[32].mxu1 %v11994_v36  ;;  %v1772_v58 = vsel %vm15635_vm9, %v1764_v9, %v1771_v42  ;;  %v12213_v56 = vrot.slane %v16225_v53, 9 }
 0x302   : > { %v2228_v51 = vsel %vm15629_vm8, %v1773_v57, %v2227_v33  ;;  %v991_v13 = vmul.f32 %v15587_v44, %v921_v46  ;;  %2226 = vst [vmem:[#allocation5 + $0x100] sm:$0xf] %v1772_v58  ;;  %v7323_v37 = vsel %vm16149_vm13, %v7321_v24, %v7322_v35  ;;  %v1058_v3 = vadd.f32 %v15597_v59, %v988_v28 }
 0x303   : > { %2229 = vst [vmem:[#allocation5 + $0x104] sm:$0x1] %v2228_v51  ;;  %v1059_v41 = vadd.f32 %v15597_v59, %v989_v15  ;;  %v1060_v50 = vadd.f32 %v15597_v59, %v990_v54  ;;  %13577 = vmatpush3.bf16.msra.mxu0 %v14496_v0  ;;  %v2357_v45 = vld [vmem:[#allocation5 + $0xf0] sm:$0xf]  ;;  %v12244_v16 = vcombine.low %v7320_v14, %v7323_v37  ;;  %v7326_v39 = vrot.slane %v16248_v20, 5  ;;  %v14499_v0 = vld [vmem:[#allocation11 + $0x38] sm:$0xff]  }
 0x304   : > { %v2358_v55 = vld [vmem:[#allocation5 + $0xf4] sm:$0xf]  ;;  %v16246_v4 = vadd.f32 %v15597_v59, %v991_v13  ;;  %v7329_v18 = vrot.slane %v16251_v52, 5  ;;  %13578 = vmatprep.subr.bf16.mxu0 %v14498_v61  ;;  %v2419_v17 = vld [vmem:[#allocation5 + $0xf8] sm:$0x1]  ;;  %v2869_v47 = vshrl.u32 %v2357_v45, 16  ;;  %13188 = vmatprep.subr.bf16.mxu1 %v14499_v0 }
 0x305   : > { %v2872_v31 = vshll.u32 %v2357_v45, 16  ;;  %v2878_v38 = vshll.u32 %v2358_v55, 16  ;;  %v2882_v49 = vshrl.u32 %v2358_v55, 16  ;;  %v2888_v5 = vshll.u32 %v2419_v17, 16  ;;  %13515 = vmatmul.mubr.bf16.gmra.mrb[4].mxu0 %v12244_v16  ;;  %13189 = vmatpush3.bf16.msra.mxu1 %v14499_v0  ;;  %v2230_v13 = vld [vmem:[#allocation5 + $0x108] sm:$0xf] }
 0x306   : > { %v1122_v23 = vmax.f32 %v1058_v3, 0.0  ;;  %v1123_v19 = vmax.f32 %v1059_v41, 0.0  ;;  %v1124_v26 = vmax.f32 %v1060_v50, 0.0  ;;  %v2871_v7 = vrot.slane %v2869_v47, 4  ;;  %v922_v20 = vld [vmem:[#allocation2 + $0x150] sm:$0xff] }
 0x307   : > { %v2874_v25 = vrot.slane %v2872_v31, 5  ;;  %v2880_v62 = vrot.slane %v2878_v38, 5  ;;  %v2884_v9 = vrot.slane %v2882_v49, 4  ;;  %v2359_v11 = vld [vmem:[#allocation5 + $0xfc] sm:$0xf]  ;;  %13579 = vmatpush3.bf16.msra.mxu0 %v14498_v61  ;;  %v2890_v6 = vrot.slane %v2888_v5, 5 }
 0x308   : > { %v2893_v29 = vshrl.u32 %v2359_v11, 16  ;;  %v2896_v60 = vshll.u32 %v2359_v11, 16  ;;  %v12477_v10 = vpack.c.bf16 %v1122_v23, %v1122_v23  ;;  %13580 = vmatprep.subr.bf16.mxu0 %v14500_v43  ;;  %v12478_v8 = vpack.c.bf16 %v1123_v19, %v1123_v19 }
 0x309   : > { %v2875_v22 = vor.u32 %v2874_v25, %v2871_v7  ;;  %v2885_v1 = vor.u32 %v2884_v9, %v2880_v62  ;;  %v1125_v63 = vmax.f32 %v16246_v4, 0.0  ;;  %v2360_v2 = vld [vmem:[#allocation5 + $0x100] sm:$0xf]  ;;  %v12479_v35 = vpack.c.bf16 %v1124_v26, %v1124_v26  ;;  %v2234_v26 = vld [vmem:[#allocation5 + $0x110] sm:$0x1] }
 0x30a   : > { %v2420_v33 = vld [vmem:[#allocation5 + $0x104] sm:$0x1]  ;;  %v2895_v30 = vrot.slane %v2893_v29, 4  ;;  %v2898_v27 = vrot.slane %v2896_v60, 5  ;;  %v16259_v46 = vsel %vm16149_vm13, %v12213_v56, %v7326_v39  ;;  %v2902_v42 = vshll.u32 %v2360_v2, 16 }
 0x30b   : > { %v2876_v53 = vrot.slane %v2875_v22, 4  ;;  %v2886_v36 = vrot.slane %v2885_v1, 4  ;;  %v2906_v57 = vshrl.u32 %v2360_v2, 16  ;;  %13581 = vmatpush3.bf16.msra.mxu0 %v14500_v43  ;;  %v2912_v61 = vshll.u32 %v2420_v33, 16  ;;  %v7173_v29 = vld [vmem:[#allocation5 + $0x48] sm:$0xe] }
 0x30c   : > { %v2899_v14 = vor.u32 %v2898_v27, %v2895_v30  ;;  %v1775_v24 = vshrl.u32 %v12477_v10, 16  ;;  %v1778_v28 = vshll.u32 %v12477_v10, 16  ;;  %v2904_v58 = vrot.slane %v2902_v42, 5  ;;  %v2241_v1 = vld [vmem:[#allocation5 + $0x11c] sm:$0x1]  ;;  %v924_v27 = vld [vmem:[#allocation2 + $0x160] sm:$0xff] }
 0x30d   : > { %v2881_v15 = vsel %vm15564_vm2, %v2876_v53, %v2880_v62  ;;  %v2891_v54 = vsel %vm15564_vm2, %v2886_v36, %v2890_v6  ;;  %v2908_v51 = vrot.slane %v2906_v57, 4  ;;  %v2914_v3 = vrot.slane %v2912_v61, 5  ;;  %v2237_v6 = vld [vmem:[#allocation5 + $0x114] sm:$0xf]  ;;  %v14645_v53 = vld [vmem:[#allocation5 + $0x4c] sm:$0xf] }
 0x30e   : > { %v11995_v56 = vcombine.low %v2881_v15, %v2891_v54  ;;  %v2900_v37 = vrot.slane %v2899_v14, 4  ;;  %v1777_v41 = vrot.slane %v1775_v24, 7  ;;  %v1783_v45 = vshrl.u32 %v12478_v8, 16  ;;  %v923_v30 = vld [vmem:[#allocation2 + $0x158] sm:$0xff]  ;;  %v925_v42 = vld [vmem:[#allocation2 + $0x168] sm:$0xff] }
 0x30f   : > { %v2909_v50 = vor.u32 %v2908_v51, %v2904_v58  ;;  %v1786_v55 = vshll.u32 %v12478_v8, 16  ;;  %v12480_v16 = vpack.c.bf16 %v1125_v63, %v1125_v63  ;;  %v1792_v31 = vshrl.u32 %v12479_v35, 16  ;;  %v7174_v57 = vld [vmem:[#allocation5 + $0x54] sm:$0xe]  ;;  %v14646_v24 = vld [vmem:[#allocation5 + $0x50] sm:$0x1] }
 0x310   : > { %13146 = vmatprep.mubr.bf16.mxu1 %v11995_v56  ;;  %v2905_v4 = vsel %vm15564_vm2, %v2900_v37, %v2904_v58  ;;  %v1780_v17 = vor.u32 %v1778_v28, %v1777_v41  ;;  %v1781_v47 = vrot.slane %v1777_v41, 4  ;;  %v1785_v49 = vrot.slane %v1783_v45, 7 }
 0x311   : > { %v2910_v38 = vrot.slane %v2909_v50, 4  ;;  %v1795_v5 = vshll.u32 %v12479_v35, 16  ;;  %v1800_v23 = vshrl.u32 %v12480_v16, 16  ;;  %v1794_v0 = vrot.slane %v1792_v31, 7 }
 0x312   : > { %v2231_v19 = vsel %vm15641_vm10, %v1780_v17, %v2230_v13  ;;  %v1803_v43 = vshll.u32 %v12480_v16, 16  ;;  %v7328_v7 = vrot.slane %v7326_v39, 4  ;;  %v1788_v62 = vor.u32 %v1786_v55, %v1785_v49 }
 0x313   : > { %v2915_v25 = vsel %vm15564_vm2, %v2910_v38, %v2914_v3  ;;  %v1790_v9 = vrot.slane %v1785_v49, 4  ;;  %2232 = vst [vmem:[#allocation5 + $0x108] sm:$0xf] %v2231_v19  ;;  %v1802_v11 = vrot.slane %v1800_v23, 7  ;;  %v1797_v10 = vor.u32 %v1795_v5, %v1794_v0  ;;  %v16295_v3 = vld [vmem:[#allocation5 + $0x58] sm:$0xf] }
 0x314   : > { %v11996_v60 = vcombine.low %v2905_v4, %v2915_v25  ;;  %v1798_v22 = vrot.slane %v1794_v0, 4  ;;  %v7330_v8 = vsel %vm16149_vm13, %v7328_v7, %v7329_v18  ;;  %v1789_v39 = vsel %vm15635_vm9, %v1781_v47, %v1788_v62  ;;  %v16302_v4 = vld [vmem:[#allocation5 + $0x5c] sm:$0x1]  ;;  %v926_v47 = vld [vmem:[#allocation2 + $0x170] sm:$0xff] }
 0x315   : > { %v2235_v63 = vsel %vm15629_vm8, %v1790_v9, %v2234_v26  ;;  %v1805_v2 = vor.u32 %v1803_v43, %v1802_v11  ;;  %v1807_v33 = vrot.slane %v1802_v11, 4  ;;  %2233 = vst [vmem:[#allocation5 + $0x10c] sm:$0xf] %v1789_v39  ;;  %v2238_v52 = vsel %vm15641_vm10, %v1797_v10, %v2237_v6 }
 0x316   : > { %13147 = vmatmul.mubr.bf16.gmra.mrb[36].mxu1 %v11996_v60  ;;  %2236 = vst [vmem:[#allocation5 + $0x110] sm:$0x1] %v2235_v63  ;;  %v12245_v35 = vcombine.low %v16259_v46, %v7330_v8  ;;  %v12214_v18 = vrot.slane %v7173_v29, 9  ;;  %v7333_v36 = vrot.slane %v14645_v53, 5  ;;  %2239 = vst [vmem:[#allocation5 + $0x114] sm:$0xf] %v2238_v52  ;;  %v992_v15 = vmul.f32 %v15587_v44, %v922_v20 }
 0x317   : > { %v1806_v14 = vsel %vm15635_vm9, %v1798_v22, %v1805_v2  ;;  %v2242_v61 = vsel %vm15629_vm8, %v1807_v33, %v2241_v1  ;;  %v7336_v28 = vrot.slane %v14646_v24, 5  ;;  %v993_v58 = vmul.f32 %v15587_v44, %v923_v30 }
 0x318   : > { %2240 = vst [vmem:[#allocation5 + $0x118] sm:$0xf] %v1806_v14  ;;  %2243 = vst [vmem:[#allocation5 + $0x11c] sm:$0x1] %v2242_v61  ;;  %13518 = vmatprep.mubr.bf16.mxu0 %v12245_v35  ;;  %v7334_v46 = vsel %vm16149_vm13, %v12214_v18, %v7333_v36  ;;  %v7335_v54 = vrot.slane %v7333_v36, 4  ;;  %v994_v51 = vmul.f32 %v15587_v44, %v924_v27  ;;  %v12215_v37 = vrot.slane %v7174_v57, 9 }
 0x319   : > { %v1062_v13 = vadd.f32 %v15597_v59, %v992_v15  ;;  %v995_v56 = vmul.f32 %v15587_v44, %v925_v42  ;;  %v7340_v41 = vrot.slane %v16295_v3, 5  ;;  %v1063_v55 = vadd.f32 %v15597_v59, %v993_v58 }
 0x31a   : > { %v2361_v50 = vld [vmem:[#allocation5 + $0x108] sm:$0xf]  ;;  %v7337_v45 = vsel %vm16149_vm13, %v7335_v54, %v7336_v28  ;;  %v1064_v16 = vadd.f32 %v15597_v59, %v994_v51  ;;  %v7343_v17 = vrot.slane %v16302_v4, 5  ;;  %v16313_v11 = vmul.f32 %v15587_v44, %v926_v47  ;;  %v14504_v47 = vld [vmem:[#allocation11 + $0x1a0] sm:$0xff]  }
 0x31b   : > { %v2917_v31 = vshrl.u32 %v2361_v50, 16  ;;  %v2920_v38 = vshll.u32 %v2361_v50, 16  ;;  %v12246_v49 = vcombine.low %v7334_v46, %v7337_v45  ;;  %v1126_v5 = vmax.f32 %v1062_v13, 0.0  ;;  %13582 = vmatprep.subr.bf16.mxu0 %v14504_v47 }
 0x31c   : > { %v1127_v23 = vmax.f32 %v1063_v55, 0.0  ;;  %v1065_v19 = vadd.f32 %v15597_v59, %v995_v56  ;;  %v1128_v26 = vmax.f32 %v1064_v16, 0.0  ;;  %v16310_v0 = vsel %vm16149_vm13, %v12215_v37, %v7340_v41  ;;  %v2362_v43 = vld [vmem:[#allocation5 + $0x10c] sm:$0xf]  ;;  %v2244_v56 = vld [vmem:[#allocation5 + $0x120] sm:$0xf]  ;;  %13583 = vmatpush3.bf16.msra.mxu0 %v14504_v47 }
 0x31d   : > { %v2421_v7 = vld [vmem:[#allocation5 + $0x110] sm:$0x1]  ;;  %v2919_v25 = vrot.slane %v2917_v31, 4  ;;  %v2922_v62 = vrot.slane %v2920_v38, 5  ;;  %13519 = vmatmul.mubr.bf16.gmra.mrb[8].mxu0 %v12246_v49  ;;  %v12481_v9 = vpack.c.bf16 %v1126_v5, %v1126_v5  ;;  %v2926_v6 = vshll.u32 %v2362_v43, 16 }
 0x31e   : > { %v2930_v29 = vshrl.u32 %v2362_v43, 16  ;;  %v2936_v60 = vshll.u32 %v2421_v7, 16  ;;  %v2363_v10 = vld [vmem:[#allocation5 + $0x114] sm:$0xf]  ;;  %v12482_v22 = vpack.c.bf16 %v1127_v23, %v1127_v23  ;;  %v16315_v2 = vpack.c.bf16 %v1128_v26, %v1128_v26  ;;  %v2248_v7 = vld [vmem:[#allocation5 + $0x128] sm:$0x1] }
 0x31f   : > { %v2923_v1 = vor.u32 %v2922_v62, %v2919_v25  ;;  %v2364_v8 = vld [vmem:[#allocation5 + $0x118] sm:$0xf]  ;;  %v2422_v20 = vld [vmem:[#allocation5 + $0x11c] sm:$0x1]  ;;  %v2941_v39 = vshrl.u32 %v2363_v10, 16  ;;  %v2944_v63 = vshll.u32 %v2363_v10, 16 }
 0x320   : > { %v2928_v33 = vrot.slane %v2926_v6, 5  ;;  %v2932_v30 = vrot.slane %v2930_v29, 4  ;;  %v2938_v27 = vrot.slane %v2936_v60, 5  ;;  %v2950_v52 = vshll.u32 %v2364_v8, 16  ;;  %v14503_v16 = vld [vmem:[#allocation11 + $0x80] sm:$0xff]  }
 0x321   : > { %v2924_v35 = vrot.slane %v2923_v1, 4  ;;  %v2943_v18 = vrot.slane %v2941_v39, 4  ;;  %v2946_v53 = vrot.slane %v2944_v63, 5  ;;  %v2954_v36 = vshrl.u32 %v2364_v8, 16  ;;  %13254 = vmatprep.subr.bf16.mxu1 %v14503_v16  ;;  %v7175_v29 = vld [vmem:[#allocation5 + $0x60] sm:$0xe] }
 0x322   : > { %v2933_v42 = vor.u32 %v2932_v30, %v2928_v33  ;;  %v2952_v57 = vrot.slane %v2950_v52, 5  ;;  %v2960_v14 = vshll.u32 %v2422_v20, 16  ;;  %v1809_v61 = vshrl.u32 %v12481_v9, 16  ;;  %v2251_v8 = vld [vmem:[#allocation5 + $0x12c] sm:$0xf]  ;;  %v927_v20 = vld [vmem:[#allocation2 + $0x178] sm:$0xff] }
 0x323   : > { %v2929_v24 = vsel %vm15564_vm2, %v2924_v35, %v2928_v33  ;;  %v2947_v28 = vor.u32 %v2946_v53, %v2943_v18  ;;  %v2956_v15 = vrot.slane %v2954_v36, 4  ;;  %v1812_v46 = vshll.u32 %v12481_v9, 16  ;;  %v928_v52 = vld [vmem:[#allocation2 + $0x180] sm:$0xff] }
 0x324   : > { %v2934_v54 = vrot.slane %v2933_v42, 4  ;;  %v2962_v58 = vrot.slane %v2960_v14, 5  ;;  %v1811_v51 = vrot.slane %v1809_v61, 7  ;;  %v1817_v13 = vshrl.u32 %v12482_v22, 16  ;;  %v14649_v53 = vld [vmem:[#allocation5 + $0x64] sm:$0xf] }
 0x325   : > { %v2948_v37 = vrot.slane %v2947_v28, 4  ;;  %v2957_v50 = vor.u32 %v2956_v15, %v2952_v57  ;;  %v1820_v45 = vshll.u32 %v12482_v22, 16  ;;  %v1129_v55 = vmax.f32 %v1065_v19, 0.0  ;;  %v14650_v14 = vld [vmem:[#allocation5 + $0x68] sm:$0x1] }
 0x326   : > { %v2939_v31 = vsel %vm15564_vm2, %v2934_v54, %v2938_v27  ;;  %v1814_v38 = vor.u32 %v1812_v46, %v1811_v51  ;;  %v1815_v49 = vrot.slane %v1811_v51, 4  ;;  %v1819_v5 = vrot.slane %v1817_v13, 7  ;;  %v2255_v27 = vld [vmem:[#allocation5 + $0x134] sm:$0x1]  ;;  %v16342_v54 = vld [vmem:[#allocation5 + $0x6c] sm:$0xe] }
 0x327   : > { %v11997_v23 = vcombine.low %v2929_v24, %v2939_v31  ;;  %v2953_v26 = vsel %vm15564_vm2, %v2948_v37, %v2952_v57  ;;  %v2958_v43 = vrot.slane %v2957_v50, 4  ;;  %v12484_v25 = vpack.c.bf16 %v1129_v55, %v1129_v55 }
 0x328   : > { %v1822_v62 = vor.u32 %v1820_v45, %v1819_v5  ;;  %v1824_v9 = vrot.slane %v1819_v5, 4  ;;  %v2245_v19 = vsel %vm15641_vm10, %v1814_v38, %v2244_v56  ;;  %v1826_v6 = vshrl.u32 %v16315_v2, 16 }
 0x329   : > { %13150 = vmatprep.mubr.bf16.mxu1 %v11997_v23  ;;  %v2963_v60 = vsel %vm15564_vm2, %v2958_v43, %v2962_v58  ;;  %2246 = vst [vmem:[#allocation5 + $0x120] sm:$0xf] %v2245_v19  ;;  %v1829_v10 = vshll.u32 %v16315_v2, 16  ;;  %v1834_v22 = vshrl.u32 %v12484_v25, 16  ;;  %v1837_v1 = vshll.u32 %v12484_v25, 16 }
 0x32a   : > { %v11998_v39 = vcombine.low %v2953_v26, %v2963_v60  ;;  %v1823_v63 = vsel %vm15635_vm9, %v1815_v49, %v1822_v62  ;;  %v2249_v33 = vsel %vm15629_vm8, %v1824_v9, %v2248_v7  ;;  %v1828_v30 = vrot.slane %v1826_v6, 7  ;;  %v16361_v25 = vld [vmem:[#allocation5 + $0x70] sm:$0xf] }
 0x32b   : > { %2247 = vst [vmem:[#allocation5 + $0x124] sm:$0xf] %v1823_v63  ;;  %2250 = vst [vmem:[#allocation5 + $0x128] sm:$0x1] %v2249_v33  ;;  %v1836_v35 = vrot.slane %v1834_v22, 7  ;;  %v7342_v2 = vrot.slane %v7340_v41, 4  ;;  %v997_v24 = vmul.f32 %v15587_v44, %v927_v20  ;;  %v1066_v56 = vadd.f32 %v15597_v59, %v16313_v11 }
 0x32c   : > { %v12216_v18 = vrot.slane %v7175_v29, 9  ;;  %v7347_v36 = vrot.slane %v14649_v53, 5  ;;  %13151 = vmatmul.mubr.bf16.gmra.mrb[40].mxu1 %v11998_v39  ;;  %v1831_v42 = vor.u32 %v1829_v10, %v1828_v30  ;;  %v1832_v57 = vrot.slane %v1828_v30, 4  ;;  %v929_v41 = vld [vmem:[#allocation2 + $0x188] sm:$0xff]  ;;  %v14510_v33 = vld [vmem:[#allocation11 + $0x1a8] sm:$0xff]  }
 0x32d   : > { %v7350_v61 = vrot.slane %v14650_v14, 5  ;;  %v1839_v28 = vor.u32 %v1837_v1, %v1836_v35  ;;  %v1841_v15 = vrot.slane %v1836_v35, 4  ;;  %v7344_v46 = vsel %vm16149_vm13, %v7342_v2, %v7343_v17  ;;  %13584 = vmatprep.subr.bf16.mxu0 %v14510_v33 }
 0x32e   : > { %v7348_v3 = vsel %vm16149_vm13, %v12216_v18, %v7347_v36  ;;  %v2252_v58 = vsel %vm15641_vm10, %v1831_v42, %v2251_v8  ;;  %v12247_v51 = vcombine.low %v16310_v0, %v7344_v46  ;;  %v7349_v13 = vrot.slane %v7347_v36, 4  ;;  %v2258_v46 = vld [vmem:[#allocation5 + $0x138] sm:$0xf]  ;;  %13585 = vmatpush3.bf16.msra.mxu0 %v14510_v33 }
 0x32f   : > { %v1840_v4 = vsel %vm15635_vm9, %v1832_v57, %v1839_v28  ;;  %2253 = vst [vmem:[#allocation5 + $0x12c] sm:$0xf] %v2252_v58  ;;  %v2256_v17 = vsel %vm15629_vm8, %v1841_v15, %v2255_v27  ;;  %v1067_v37 = vadd.f32 %v15597_v59, %v997_v24  ;;  %v998_v50 = vmul.f32 %v15587_v44, %v928_v52 }
 0x330   : > { %v2365_v45 = vld [vmem:[#allocation5 + $0x120] sm:$0xf]  ;;  %2254 = vst [vmem:[#allocation5 + $0x130] sm:$0xf] %v1840_v4  ;;  %2257 = vst [vmem:[#allocation5 + $0x134] sm:$0x1] %v2256_v17  ;;  %13522 = vmatprep.mubr.bf16.mxu0 %v12247_v51  ;;  %v7351_v0 = vsel %vm16149_vm13, %v7349_v13, %v7350_v61  ;;  %v999_v11 = vmul.f32 %v15587_v44, %v929_v41 }
 0x331   : > { %v1130_v55 = vmax.f32 %v1066_v56, 0.0  ;;  %v12217_v16 = vrot.slane %v16342_v54, 9  ;;  %v2965_v47 = vshrl.u32 %v2365_v45, 16  ;;  %v2968_v31 = vshll.u32 %v2365_v45, 16 }
 0x332   : > { %v12248_v38 = vcombine.low %v7348_v3, %v7351_v0  ;;  %v1131_v49 = vmax.f32 %v1067_v37, 0.0  ;;  %v2366_v5 = vld [vmem:[#allocation5 + $0x124] sm:$0xf]  ;;  %v2423_v23 = vld [vmem:[#allocation5 + $0x128] sm:$0x1]  ;;  %v1068_v43 = vadd.f32 %v15597_v59, %v998_v50  ;;  %v1069_v7 = vadd.f32 %v15597_v59, %v999_v11 }
 0x333   : > { %v12485_v26 = vpack.c.bf16 %v1130_v55, %v1130_v55  ;;  %v7354_v62 = vrot.slane %v16361_v25, 5  ;;  %v2967_v9 = vrot.slane %v2965_v47, 4  ;;  %v2970_v19 = vrot.slane %v2968_v31, 5  ;;  %v2262_v37 = vld [vmem:[#allocation5 + $0x140] sm:$0x1] }
 0x334   : > { %v2974_v6 = vshll.u32 %v2366_v5, 16  ;;  %v2978_v29 = vshrl.u32 %v2366_v5, 16  ;;  %13523 = vmatmul.mubr.bf16.gmra.mrb[12].mxu0 %v12248_v38  ;;  %v2984_v60 = vshll.u32 %v2423_v23, 16  ;;  %v12486_v10 = vpack.c.bf16 %v1131_v49, %v1131_v49 }
 0x335   : > { %v1843_v22 = vshrl.u32 %v12485_v26, 16  ;;  %v1846_v1 = vshll.u32 %v12485_v26, 16  ;;  %v2971_v8 = vor.u32 %v2970_v19, %v2967_v9  ;;  %v1132_v63 = vmax.f32 %v1068_v43, 0.0 }
 0x336   : > { %v2976_v20 = vrot.slane %v2974_v6, 5  ;;  %v2980_v39 = vrot.slane %v2978_v29, 4  ;;  %v2986_v30 = vrot.slane %v2984_v60, 5  ;;  %v2367_v27 = vld [vmem:[#allocation5 + $0x12c] sm:$0xf]  ;;  %v1851_v35 = vshrl.u32 %v12486_v10, 16 }
 0x337   : > { %v1845_v52 = vrot.slane %v1843_v22, 7  ;;  %v1854_v2 = vshll.u32 %v12486_v10, 16  ;;  %v2972_v18 = vrot.slane %v2971_v8, 4  ;;  %v2368_v36 = vld [vmem:[#allocation5 + $0x130] sm:$0xf]  ;;  %v2989_v57 = vshrl.u32 %v2367_v27, 16 }
 0x338   : > { %v2981_v53 = vor.u32 %v2980_v39, %v2976_v20  ;;  %v2424_v42 = vld [vmem:[#allocation5 + $0x134] sm:$0x1]  ;;  %v12487_v14 = vpack.c.bf16 %v1132_v63, %v1132_v63  ;;  %v2992_v61 = vshll.u32 %v2367_v27, 16  ;;  %v2998_v24 = vshll.u32 %v2368_v36, 16  ;;  %v7177_v22 = vld [vmem:[#allocation5 + $0x78] sm:$0xe] }
 0x339   : > { %v3002_v28 = vshrl.u32 %v2368_v36, 16  ;;  %v3008_v15 = vshll.u32 %v2424_v42, 16  ;;  %v2977_v3 = vsel %vm15564_vm2, %v2972_v18, %v2976_v20  ;;  %v2991_v58 = vrot.slane %v2989_v57, 4  ;;  %v2265_v20 = vld [vmem:[#allocation5 + $0x144] sm:$0xf]  ;;  %v930_v39 = vld [vmem:[#allocation2 + $0x190] sm:$0xff] }
 0x33a   : > { %v2982_v41 = vrot.slane %v2981_v53, 4  ;;  %v1848_v51 = vor.u32 %v1846_v1, %v1845_v52  ;;  %v2994_v13 = vrot.slane %v2992_v61, 5  ;;  %v3000_v56 = vrot.slane %v2998_v24, 5  ;;  %v931_v63 = vld [vmem:[#allocation2 + $0x198] sm:$0xff]  ;;  %v14654_v53 = vld [vmem:[#allocation5 + $0x80] sm:$0x1] }
 0x33b   : > { %v3004_v4 = vrot.slane %v3002_v28, 4  ;;  %v3010_v17 = vrot.slane %v3008_v15, 5  ;;  %v1849_v45 = vrot.slane %v1845_v52, 4  ;;  %v1853_v0 = vrot.slane %v1851_v35, 7  ;;  %v14652_v52 = vld [vmem:[#allocation5 + $0x74] sm:$0x1] }
 0x33c   : > { %v2987_v50 = vsel %vm15564_vm2, %v2982_v41, %v2986_v30  ;;  %v2259_v55 = vsel %vm15641_vm10, %v1848_v51, %v2258_v46  ;;  %v2995_v47 = vor.u32 %v2994_v13, %v2991_v58  ;;  %v1133_v38 = vmax.f32 %v1069_v7, 0.0  ;;  %v932_v58 = vld [vmem:[#allocation2 + $0x1a0] sm:$0xff] }
 0x33d   : > { %v11999_v11 = vcombine.low %v2977_v3, %v2987_v50  ;;  %v3005_v31 = vor.u32 %v3004_v4, %v3000_v56  ;;  %2260 = vst [vmem:[#allocation5 + $0x138] sm:$0xf] %v2259_v55  ;;  %v1856_v49 = vor.u32 %v1854_v2, %v1853_v0  ;;  %v1858_v5 = vrot.slane %v1853_v0, 4  ;;  %v14653_v2 = vld [vmem:[#allocation5 + $0x7c] sm:$0xf]  ;;  %v933_v55 = vld [vmem:[#allocation2 + $0x1a8] sm:$0xff] }
 0x33e   : > { %v1860_v23 = vshrl.u32 %v12487_v14, 16  ;;  %v1863_v26 = vshll.u32 %v12487_v14, 16  ;;  %v2996_v43 = vrot.slane %v2995_v47, 4  ;;  %v12488_v19 = vpack.c.bf16 %v1133_v38, %v1133_v38  ;;  %v2269_v14 = vld [vmem:[#allocation5 + $0x14c] sm:$0x1] }
 0x33f   : > { %13154 = vmatprep.mubr.bf16.mxu1 %v11999_v11  ;;  %v3006_v9 = vrot.slane %v3005_v31, 4  ;;  %v7355_v6 = vsel %vm16149_vm13, %v12217_v16, %v7354_v62  ;;  %v1857_v29 = vsel %vm15635_vm9, %v1849_v45, %v1856_v49  ;;  %v2263_v7 = vsel %vm15629_vm8, %v1858_v5, %v2262_v37 }
 0x340   : > { %v1862_v60 = vrot.slane %v1860_v23, 7  ;;  %v7356_v10 = vrot.slane %v7354_v62, 4  ;;  %v3001_v1 = vsel %vm15564_vm2, %v2996_v43, %v3000_v56  ;;  %2261 = vst [vmem:[#allocation5 + $0x13c] sm:$0xf] %v1857_v29  ;;  %2264 = vst [vmem:[#allocation5 + $0x140] sm:$0x1] %v2263_v7  ;;  %v1000_v24 = vmul.f32 %v15587_v44, %v930_v39 }
 0x341   : > { %v3011_v54 = vsel %vm15564_vm2, %v3006_v9, %v3010_v17  ;;  %v1868_v16 = vshrl.u32 %v12488_v19, 16  ;;  %v1871_v8 = vshll.u32 %v12488_v19, 16  ;;  %v7357_v25 = vrot.slane %v14652_v52, 5  ;;  %v14516_v17 = vld [vmem:[#allocation11 + $0x1b0] sm:$0xff]  }
 0x342   : > { %v12000_v33 = vcombine.low %v3001_v1, %v3011_v54  ;;  %v1865_v30 = vor.u32 %v1863_v26, %v1862_v60  ;;  %v1866_v27 = vrot.slane %v1862_v60, 4  ;;  %v12218_v35 = vrot.slane %v7177_v22, 9  ;;  %13586 = vmatprep.subr.bf16.mxu0 %v14516_v17 }
 0x343   : > { %v1870_v62 = vrot.slane %v1868_v16, 7  ;;  %v7361_v18 = vrot.slane %v14653_v2, 5  ;;  %v7364_v36 = vrot.slane %v14654_v53, 5  ;;  %v7358_v61 = vsel %vm16149_vm13, %v7356_v10, %v7357_v25  ;;  %13587 = vmatpush3.bf16.msra.mxu0 %v14516_v17 }
 0x344   : > { %13155 = vmatmul.mubr.bf16.gmra.mrb[44].mxu1 %v12000_v33  ;;  %v2369_v42 = vld [vmem:[#allocation5 + $0x138] sm:$0xf]  ;;  %v2266_v57 = vsel %vm15641_vm10, %v1865_v30, %v2265_v20  ;;  %v1001_v28 = vmul.f32 %v15587_v44, %v931_v63  ;;  %v12249_v51 = vcombine.low %v7355_v6, %v7358_v61  ;;  %v1070_v4 = vadd.f32 %v15597_v59, %v1000_v24  ;;  %v934_v63 = vld [vmem:[#allocation2 + $0x1b0] sm:$0xff] }
 0x345   : > { %v3013_v15 = vshrl.u32 %v2369_v42, 16  ;;  %v3016_v46 = vshll.u32 %v2369_v42, 16  ;;  %v1873_v3 = vor.u32 %v1871_v8, %v1870_v62  ;;  %v1875_v41 = vrot.slane %v1870_v62, 4  ;;  %2267 = vst [vmem:[#allocation5 + $0x144] sm:$0xf] %v2266_v57  ;;  %v935_v33 = vld [vmem:[#allocation2 + $0x1b8] sm:$0xff] }
 0x346   : > { %v7362_v13 = vsel %vm16149_vm13, %v12218_v35, %v7361_v18  ;;  %v7363_v56 = vrot.slane %v7361_v18, 4  ;;  %13526 = vmatprep.mubr.bf16.mxu0 %v12249_v51  ;;  %v1071_v38 = vadd.f32 %v15597_v59, %v1001_v28  ;;  %v1134_v49 = vmax.f32 %v1070_v4, 0.0 }
 0x347   : > { %v3015_v37 = vrot.slane %v3013_v15, 4  ;;  %v3018_v50 = vrot.slane %v3016_v46, 5  ;;  %v1874_v45 = vsel %vm15635_vm9, %v1866_v27, %v1873_v3  ;;  %v2270_v0 = vsel %vm15629_vm8, %v1875_v41, %v2269_v14  ;;  %v2370_v11 = vld [vmem:[#allocation5 + $0x13c] sm:$0xf]  ;;  %v2425_v47 = vld [vmem:[#allocation5 + $0x140] sm:$0x1] }
 0x348   : > { %2268 = vst [vmem:[#allocation5 + $0x148] sm:$0xf] %v1874_v45  ;;  %2271 = vst [vmem:[#allocation5 + $0x14c] sm:$0x1] %v2270_v0  ;;  %v7365_v31 = vsel %vm16149_vm13, %v7363_v56, %v7364_v36  ;;  %v1002_v5 = vmul.f32 %v15587_v44, %v932_v58  ;;  %v3022_v26 = vshll.u32 %v2370_v11, 16  ;;  %v3026_v43 = vshrl.u32 %v2370_v11, 16 }
 0x349   : > { %v3019_v23 = vor.u32 %v3018_v50, %v3015_v37  ;;  %v3032_v9 = vshll.u32 %v2425_v47, 16  ;;  %v12250_v19 = vcombine.low %v7362_v13, %v7365_v31  ;;  %v1135_v6 = vmax.f32 %v1071_v38, 0.0  ;;  %v2272_v3 = vld [vmem:[#allocation5 + $0x150] sm:$0xf]  ;;  %v2276_v56 = vld [vmem:[#allocation5 + $0x158] sm:$0x1] }
 0x34a   : > { %v12489_v29 = vpack.c.bf16 %v1134_v49, %v1134_v49  ;;  %v1003_v7 = vmul.f32 %v15587_v44, %v933_v55  ;;  %v3024_v10 = vrot.slane %v3022_v26, 5  ;;  %v3028_v22 = vrot.slane %v3026_v43, 4  ;;  %v7178_v45 = vld [vmem:[#allocation5 + $0x84] sm:$0xe] }
 0x34b   : > { %v3020_v60 = vrot.slane %v3019_v23, 4  ;;  %v3034_v1 = vrot.slane %v3032_v9, 5  ;;  %13527 = vmatmul.mubr.bf16.gmra.mrb[16].mxu0 %v12250_v19  ;;  %v12490_v16 = vpack.c.bf16 %v1135_v6, %v1135_v6  ;;  %v1072_v39 = vadd.f32 %v15597_v59, %v1002_v5  ;;  %v7179_v23 = vld [vmem:[#allocation5 + $0x90] sm:$0xe]  ;;  %v14655_v19 = vld [vmem:[#allocation5 + $0x88] sm:$0xf] }
 0x34c   : > { %v2371_v54 = vld [vmem:[#allocation5 + $0x144] sm:$0xf]  ;;  %v1877_v8 = vshrl.u32 %v12489_v29, 16  ;;  %v1880_v20 = vshll.u32 %v12489_v29, 16  ;;  %v3029_v27 = vor.u32 %v3028_v22, %v3024_v10  ;;  %v1073_v18 = vadd.f32 %v15597_v59, %v1003_v7  ;;  %v14522_v22 = vld [vmem:[#allocation11 + $0x1b8] sm:$0xff]  }
 0x34d   : > { %v3025_v30 = vsel %vm15564_vm2, %v3020_v60, %v3024_v10  ;;  %v3037_v52 = vshrl.u32 %v2371_v54, 16  ;;  %v3040_v25 = vshll.u32 %v2371_v54, 16  ;;  %v1885_v35 = vshrl.u32 %v12490_v16, 16  ;;  %13588 = vmatprep.subr.bf16.mxu0 %v14522_v22 }
 0x34e   : > { %v1879_v62 = vrot.slane %v1877_v8, 7  ;;  %v1888_v2 = vshll.u32 %v12490_v16, 16  ;;  %v3030_v53 = vrot.slane %v3029_v27, 4  ;;  %v16409_v14 = vmul.f32 %v15587_v44, %v934_v63  ;;  %v14656_v16 = vld [vmem:[#allocation5 + $0x8c] sm:$0x1]  ;;  %13589 = vmatpush3.bf16.msra.mxu0 %v14522_v22 }
 0x34f   : > { %v2372_v36 = vld [vmem:[#allocation5 + $0x148] sm:$0xf]  ;;  %v2426_v42 = vld [vmem:[#allocation5 + $0x14c] sm:$0x1]  ;;  %v3039_v57 = vrot.slane %v3037_v52, 4  ;;  %v16412_v61 = vmul.f32 %v15587_v44, %v935_v33  ;;  %v3042_v24 = vrot.slane %v3040_v25, 5 }
 0x350   : > { %v3046_v28 = vshll.u32 %v2372_v36, 16  ;;  %v3050_v15 = vshrl.u32 %v2372_v36, 16  ;;  %v3056_v46 = vshll.u32 %v2426_v42, 16  ;;  %v3035_v41 = vsel %vm15564_vm2, %v3030_v53, %v3034_v1  ;;  %v2279_v53 = vld [vmem:[#allocation5 + $0x15c] sm:$0xf] }
 0x351   : > { %v1882_v58 = vor.u32 %v1880_v20, %v1879_v62  ;;  %v1883_v51 = vrot.slane %v1879_v62, 4  ;;  %v1887_v13 = vrot.slane %v1885_v35, 7  ;;  %v12001_v4 = vcombine.low %v3025_v30, %v3035_v41  ;;  %v14657_v62 = vld [vmem:[#allocation5 + $0x94] sm:$0xf]  ;;  %v14658_v42 = vld [vmem:[#allocation5 + $0x98] sm:$0x1] }
 0x352   : > { %v3043_v17 = vor.u32 %v3042_v24, %v3039_v57  ;;  %v3048_v37 = vrot.slane %v3046_v28, 5  ;;  %v3052_v50 = vrot.slane %v3050_v15, 4  ;;  %v3058_v0 = vrot.slane %v3056_v46, 5  ;;  %v2283_v28 = vld [vmem:[#allocation5 + $0x164] sm:$0x1] }
 0x353   : > { %v1890_v55 = vor.u32 %v1888_v2, %v1887_v13  ;;  %v1892_v11 = vrot.slane %v1887_v13, 4  ;;  %v2273_v47 = vsel %vm15641_vm10, %v1882_v58, %v2272_v3  ;;  %13158 = vmatprep.mubr.bf16.mxu1 %v12001_v4  ;;  %v1136_v49 = vmax.f32 %v1072_v39, 0.0 }
 0x354   : > { %v3044_v31 = vrot.slane %v3043_v17, 4  ;;  %v3053_v38 = vor.u32 %v3052_v50, %v3048_v37  ;;  %2274 = vst [vmem:[#allocation5 + $0x150] sm:$0xf] %v2273_v47  ;;  %v1137_v5 = vmax.f32 %v1073_v18, 0.0  ;;  %v12219_v9 = vrot.slane %v7178_v45, 9 }
 0x355   : > { %v1891_v26 = vsel %vm15635_vm9, %v1883_v51, %v1890_v55  ;;  %v2277_v43 = vsel %vm15629_vm8, %v1892_v11, %v2276_v56  ;;  %v7368_v6 = vrot.slane %v14655_v19, 5  ;;  %v12491_v60 = vpack.c.bf16 %v1136_v49, %v1136_v49 }
 0x356   : > { %v3049_v29 = vsel %vm15564_vm2, %v3044_v31, %v3048_v37  ;;  %v3054_v7 = vrot.slane %v3053_v38, 4  ;;  %2275 = vst [vmem:[#allocation5 + $0x154] sm:$0xf] %v1891_v26  ;;  %2278 = vst [vmem:[#allocation5 + $0x158] sm:$0x1] %v2277_v43  ;;  %v12492_v10 = vpack.c.bf16 %v1137_v5, %v1137_v5  ;;  %v7371_v8 = vrot.slane %v14656_v16, 5 }
 0x357   : > { %v7369_v1 = vsel %vm16149_vm13, %v12219_v9, %v7368_v6  ;;  %v7370_v54 = vrot.slane %v7368_v6, 4  ;;  %v12220_v20 = vrot.slane %v7179_v23, 9  ;;  %v1894_v63 = vshrl.u32 %v12491_v60, 16  ;;  %v936_v31 = vld [vmem:[#allocation2 + $0x1c0] sm:$0xff]  ;;  %v937_v23 = vld [vmem:[#allocation2 + $0x1c8] sm:$0xff] }
 0x358   : > { %v3059_v39 = vsel %vm15564_vm2, %v3054_v7, %v3058_v0  ;;  %v1897_v33 = vshll.u32 %v12491_v60, 16  ;;  %v1902_v30 = vshrl.u32 %v12492_v10, 16  ;;  %v1905_v52 = vshll.u32 %v12492_v10, 16  ;;  %v7180_v26 = vld [vmem:[#allocation5 + $0x9c] sm:$0xe] }
 0x359   : > { %v12002_v27 = vcombine.low %v3049_v29, %v3059_v39  ;;  %v7372_v25 = vsel %vm16149_vm13, %v7370_v54, %v7371_v8  ;;  %v7375_v35 = vrot.slane %v14657_v62, 5  ;;  %v1896_v2 = vrot.slane %v1894_v63, 7  ;;  %v938_v62 = vld [vmem:[#allocation2 + $0x1d0] sm:$0xff] }
 0x35a   : > { %v1904_v18 = vrot.slane %v1902_v30, 7  ;;  %v12251_v36 = vcombine.low %v7369_v1, %v7372_v25  ;;  %v7378_v57 = vrot.slane %v14658_v42, 5  ;;  %v1074_v3 = vadd.f32 %v15597_v59, %v16409_v14  ;;  %v2286_v42 = vld [vmem:[#allocation5 + $0x168] sm:$0xf] }
 0x35b   : > { %13159 = vmatmul.mubr.bf16.gmra.mrb[48].mxu1 %v12002_v27  ;;  %v2373_v24 = vld [vmem:[#allocation5 + $0x150] sm:$0xf]  ;;  %v7376_v15 = vsel %vm16149_vm13, %v12220_v20, %v7375_v35  ;;  %v7377_v46 = vrot.slane %v7375_v35, 4  ;;  %v1075_v41 = vadd.f32 %v15597_v59, %v16412_v61  ;;  %v1899_v13 = vor.u32 %v1897_v33, %v1896_v2 }
 0x35c   : > { %v3061_v58 = vshrl.u32 %v2373_v24, 16  ;;  %v3064_v51 = vshll.u32 %v2373_v24, 16  ;;  %v1900_v56 = vrot.slane %v1896_v2, 4  ;;  %13530 = vmatprep.mubr.bf16.mxu0 %v12251_v36  ;;  %v1907_v37 = vor.u32 %v1905_v52, %v1904_v18  ;;  %v14659_v52 = vld [vmem:[#allocation5 + $0xa0] sm:$0xf] }
 0x35d   : > { %v2374_v4 = vld [vmem:[#allocation5 + $0x154] sm:$0xf]  ;;  %v2427_v17 = vld [vmem:[#allocation5 + $0x158] sm:$0x1]  ;;  %v1909_v50 = vrot.slane %v1904_v18, 4  ;;  %v7379_v45 = vsel %vm16149_vm13, %v7377_v46, %v7378_v57  ;;  %v1138_v0 = vmax.f32 %v1074_v3, 0.0  ;;  %v2280_v49 = vsel %vm15641_vm10, %v1899_v13, %v2279_v53 }
 0x35e   : > { %v3063_v55 = vrot.slane %v3061_v58, 4  ;;  %v3066_v11 = vrot.slane %v3064_v51, 5  ;;  %v3070_v47 = vshll.u32 %v2374_v4, 16  ;;  %v3074_v14 = vshrl.u32 %v2374_v4, 16  ;;  %2281 = vst [vmem:[#allocation5 + $0x15c] sm:$0xf] %v2280_v49 }
 0x35f   : > { %v3080_v38 = vshll.u32 %v2427_v17, 16  ;;  %v1908_v61 = vsel %vm15635_vm9, %v1900_v56, %v1907_v37  ;;  %v2284_v5 = vsel %vm15629_vm8, %v1909_v50, %v2283_v28  ;;  %v12252_v6 = vcombine.low %v7376_v15, %v7379_v45  ;;  %v14529_v15 = vld [vmem:[#allocation11 + $0x1c0] sm:$0xff]  }
 0x360   : > { %v3067_v43 = vor.u32 %v3066_v11, %v3063_v55  ;;  %v3072_v9 = vrot.slane %v3070_v47, 5  ;;  %v3076_v19 = vrot.slane %v3074_v14, 4  ;;  %2282 = vst [vmem:[#allocation5 + $0x160] sm:$0xf] %v1908_v61  ;;  %2285 = vst [vmem:[#allocation5 + $0x164] sm:$0x1] %v2284_v5  ;;  %v12493_v60 = vpack.c.bf16 %v1138_v0, %v1138_v0  ;;  %13654 = vmatprep.subr.bf16.mxu0 %v14529_v15 }
 0x361   : > { %v3082_v29 = vrot.slane %v3080_v38, 5  ;;  %v1139_v7 = vmax.f32 %v1075_v41, 0.0  ;;  %v1006_v10 = vmul.f32 %v15587_v44, %v936_v31  ;;  %13531 = vmatmul.mubr.bf16.gmra.mrb[20].mxu0 %v12252_v6  ;;  %v1007_v54 = vmul.f32 %v15587_v44, %v937_v23  ;;  %v2290_v61 = vld [vmem:[#allocation5 + $0x170] sm:$0x1] }
 0x362   : > { %v3068_v22 = vrot.slane %v3067_v43, 4  ;;  %v3077_v1 = vor.u32 %v3076_v19, %v3072_v9  ;;  %v12221_v16 = vrot.slane %v7180_v26, 9  ;;  %v1911_v20 = vshrl.u32 %v12493_v60, 16 }
 0x363   : > { %v12494_v8 = vpack.c.bf16 %v1139_v7, %v1139_v7  ;;  %v1914_v39 = vshll.u32 %v12493_v60, 16  ;;  %v1076_v63 = vadd.f32 %v15597_v59, %v1006_v10  ;;  %v1077_v27 = vadd.f32 %v15597_v59, %v1007_v54 }
 0x364   : > { %v3073_v33 = vsel %vm15564_vm2, %v3068_v22, %v3072_v9  ;;  %v3078_v30 = vrot.slane %v3077_v1, 4  ;;  %v7382_v25 = vrot.slane %v14659_v52, 5  ;;  %v1913_v35 = vrot.slane %v1911_v20, 7  ;;  %v14662_v52 = vld [vmem:[#allocation5 + $0xb0] sm:$0x1] }
 0x365   : > { %v1919_v2 = vshrl.u32 %v12494_v8, 16  ;;  %v1922_v18 = vshll.u32 %v12494_v8, 16  ;;  %v1140_v53 = vmax.f32 %v1076_v63, 0.0  ;;  %v1141_v57 = vmax.f32 %v1077_v27, 0.0  ;;  %v2375_v3 = vld [vmem:[#allocation5 + $0x15c] sm:$0xf] }
 0x366   : > { %v3083_v36 = vsel %vm15564_vm2, %v3078_v30, %v3082_v29  ;;  %v16454_v24 = vsel %vm16149_vm13, %v12221_v16, %v7382_v25  ;;  %v16456_v28 = vrot.slane %v7382_v25, 4  ;;  %v1916_v51 = vor.u32 %v1914_v39, %v1913_v35  ;;  %v7181_v29 = vld [vmem:[#allocation5 + $0xa8] sm:$0xe]  ;;  %v14660_v8 = vld [vmem:[#allocation5 + $0xa4] sm:$0x1] }
 0x367   : > { %v12003_v46 = vcombine.low %v3073_v33, %v3083_v36  ;;  %v2376_v41 = vld [vmem:[#allocation5 + $0x160] sm:$0xf]  ;;  %v2428_v58 = vld [vmem:[#allocation5 + $0x164] sm:$0x1]  ;;  %v12495_v13 = vpack.c.bf16 %v1140_v53, %v1140_v53  ;;  %v16459_v56 = vmul.f32 %v15587_v44, %v938_v62  ;;  %v3085_v4 = vshrl.u32 %v2375_v3, 16  ;;  %v939_v36 = vld [vmem:[#allocation2 + $0x1d8] sm:$0xff] }
 0x368   : > { %v3088_v17 = vshll.u32 %v2375_v3, 16  ;;  %v3094_v37 = vshll.u32 %v2376_v41, 16  ;;  %v3098_v50 = vshrl.u32 %v2376_v41, 16  ;;  %v3104_v45 = vshll.u32 %v2428_v58, 16  ;;  %v2293_v63 = vld [vmem:[#allocation5 + $0x174] sm:$0xf] }
 0x369   : > { %13162 = vmatprep.mubr.bf16.mxu1 %v12003_v46  ;;  %v1917_v0 = vrot.slane %v1913_v35, 4  ;;  %v1921_v55 = vrot.slane %v1919_v2, 7  ;;  %v2287_v11 = vsel %vm15641_vm10, %v1916_v51, %v2286_v42  ;;  %v3087_v47 = vrot.slane %v3085_v4, 4  ;;  %v14661_v30 = vld [vmem:[#allocation5 + $0xac] sm:$0xf]  ;;  %v940_v42 = vld [vmem:[#allocation2 + $0x1e0] sm:$0xff] }
 0x36a   : > { %v3090_v14 = vrot.slane %v3088_v17, 5  ;;  %v3096_v31 = vrot.slane %v3094_v37, 5  ;;  %v3100_v38 = vrot.slane %v3098_v50, 4  ;;  %2288 = vst [vmem:[#allocation5 + $0x168] sm:$0xf] %v2287_v11  ;;  %v3106_v49 = vrot.slane %v3104_v45, 5 }
 0x36b   : > { %v1924_v5 = vor.u32 %v1922_v18, %v1921_v55  ;;  %v1926_v23 = vrot.slane %v1921_v55, 4  ;;  %v12496_v26 = vpack.c.bf16 %v1141_v57, %v1141_v57  ;;  %v1928_v19 = vshrl.u32 %v12495_v13, 16  ;;  %v2297_v53 = vld [vmem:[#allocation5 + $0x17c] sm:$0x1]  ;;  %v941_v58 = vld [vmem:[#allocation2 + $0x1e8] sm:$0xff] }
 0x36c   : > { %v3091_v43 = vor.u32 %v3090_v14, %v3087_v47  ;;  %v3101_v9 = vor.u32 %v3100_v38, %v3096_v31  ;;  %v1931_v6 = vshll.u32 %v12495_v13, 16  ;;  %v7385_v20 = vrot.slane %v14660_v8, 5  ;;  %v16474_v51 = vld [vmem:[#allocation5 + $0xb4] sm:$0xe] }
 0x36d   : > { %v1925_v7 = vsel %vm15635_vm9, %v1917_v0, %v1924_v5  ;;  %v2291_v60 = vsel %vm15629_vm8, %v1926_v23, %v2290_v61  ;;  %v1936_v10 = vshrl.u32 %v12496_v26, 16  ;;  %v1939_v22 = vshll.u32 %v12496_v26, 16 }
 0x36e   : > { %v3092_v1 = vrot.slane %v3091_v43, 4  ;;  %v3102_v54 = vrot.slane %v3101_v9, 4  ;;  %2289 = vst [vmem:[#allocation5 + $0x16c] sm:$0xf] %v1925_v7  ;;  %2292 = vst [vmem:[#allocation5 + $0x170] sm:$0x1] %v2291_v60  ;;  %v7386_v41 = vsel %vm16149_vm13, %v16456_v28, %v7385_v20  ;;  %v1009_v47 = vmul.f32 %v15587_v44, %v939_v36 }
 0x36f   : > { %v1930_v16 = vrot.slane %v1928_v19, 7  ;;  %v1938_v39 = vrot.slane %v1936_v10, 7  ;;  %v12222_v33 = vrot.slane %v7181_v29, 9  ;;  %v7389_v27 = vrot.slane %v14661_v30, 5 }
 0x370   : > { %v7392_v25 = vrot.slane %v14662_v52, 5  ;;  %v3097_v62 = vsel %vm15564_vm2, %v3092_v1, %v3096_v31  ;;  %v3107_v35 = vsel %vm15564_vm2, %v3102_v54, %v3106_v49  ;;  %v12253_v37 = vcombine.low %v16454_v24, %v7386_v41 }
 0x371   : > { %v1933_v2 = vor.u32 %v1931_v6, %v1930_v16  ;;  %v1934_v18 = vrot.slane %v1930_v16, 4  ;;  %v12004_v57 = vcombine.low %v3097_v62, %v3107_v35  ;;  %v2377_v15 = vld [vmem:[#allocation5 + $0x168] sm:$0xf]  ;;  %v1941_v46 = vor.u32 %v1939_v22, %v1938_v39 }
 0x372   : > { %v1943_v3 = vrot.slane %v1938_v39, 4  ;;  %v3109_v13 = vshrl.u32 %v2377_v15, 16  ;;  %v3112_v4 = vshll.u32 %v2377_v15, 16  ;;  %v7390_v28 = vsel %vm16149_vm13, %v12222_v33, %v7389_v27  ;;  %13534 = vmatprep.mubr.bf16.mxu0 %v12253_v37  ;;  %v16500_v33 = vld [vmem:[#allocation5 + $0xb8] sm:$0xf] }
 0x373   : > { %v2294_v17 = vsel %vm15641_vm10, %v1933_v2, %v2293_v63  ;;  %13163 = vmatmul.mubr.bf16.gmra.mrb[52].mxu1 %v12004_v57  ;;  %v1942_v50 = vsel %vm15635_vm9, %v1934_v18, %v1941_v46  ;;  %v7391_v0 = vrot.slane %v7389_v27, 4  ;;  %v1078_v24 = vadd.f32 %v15597_v59, %v16459_v56  ;;  %v16503_v27 = vld [vmem:[#allocation5 + $0xbc] sm:$0x1] }
 0x374   : > { %2295 = vst [vmem:[#allocation5 + $0x174] sm:$0xf] %v2294_v17  ;;  %v2298_v45 = vsel %vm15629_vm8, %v1943_v3, %v2297_v53  ;;  %v3111_v55 = vrot.slane %v3109_v13, 4  ;;  %v3114_v11 = vrot.slane %v3112_v4, 5  ;;  %2296 = vst [vmem:[#allocation5 + $0x178] sm:$0xf] %v1942_v50  ;;  %v1010_v61 = vmul.f32 %v15587_v44, %v940_v42 }
 0x375   : > { %2299 = vst [vmem:[#allocation5 + $0x17c] sm:$0x1] %v2298_v45  ;;  %v2378_v14 = vld [vmem:[#allocation5 + $0x16c] sm:$0xf]  ;;  %v2429_v31 = vld [vmem:[#allocation5 + $0x170] sm:$0x1]  ;;  %v7393_v38 = vsel %vm16149_vm13, %v7391_v0, %v7392_v25  ;;  %v1011_v49 = vmul.f32 %v15587_v44, %v941_v58  ;;  %v1079_v6 = vadd.f32 %v15597_v59, %v1009_v47 }
 0x376   : > { %v12223_v5 = vrot.slane %v16474_v51, 9  ;;  %v3115_v23 = vor.u32 %v3114_v11, %v3111_v55  ;;  %v3118_v26 = vshll.u32 %v2378_v14, 16  ;;  %v3122_v43 = vshrl.u32 %v2378_v14, 16  ;;  %v2300_v50 = vld [vmem:[#allocation5 + $0x180] sm:$0xf] }
 0x377   : > { %v3128_v9 = vshll.u32 %v2429_v31, 16  ;;  %v12254_v19 = vcombine.low %v7390_v28, %v7393_v38  ;;  %v1142_v29 = vmax.f32 %v1078_v24, 0.0  ;;  %v1080_v56 = vadd.f32 %v15597_v59, %v1010_v61 }
 0x378   : > { %v3116_v7 = vrot.slane %v3115_v23, 4  ;;  %v3120_v60 = vrot.slane %v3118_v26, 5  ;;  %v3124_v10 = vrot.slane %v3122_v43, 4  ;;  %v1143_v1 = vmax.f32 %v1079_v6, 0.0  ;;  %v2304_v26 = vld [vmem:[#allocation5 + $0x188] sm:$0x1] }
 0x379   : > { %v3130_v22 = vrot.slane %v3128_v9, 5  ;;  %13535 = vmatmul.mubr.bf16.gmra.mrb[24].mxu0 %v12254_v19  ;;  %v12497_v54 = vpack.c.bf16 %v1142_v29, %v1142_v29  ;;  %v1081_v16 = vadd.f32 %v15597_v59, %v1011_v49  ;;  %v1144_v8 = vmax.f32 %v1080_v56, 0.0 }
 0x37a   : > { %v3121_v20 = vsel %vm15564_vm2, %v3116_v7, %v3120_v60  ;;  %v3125_v39 = vor.u32 %v3124_v10, %v3120_v60  ;;  %v7396_v30 = vrot.slane %v16500_v33, 5  ;;  %v7399_v52 = vrot.slane %v16503_v27, 5  ;;  %v2307_v60 = vld [vmem:[#allocation5 + $0x18c] sm:$0xf] }
 0x37b   : > { %v16498_v63 = vld [vmem:[#allocation5 + $0x174] sm:$0xf]  ;;  %v16506_v25 = vld [vmem:[#allocation5 + $0x178] sm:$0xf]  ;;  %v12498_v18 = vpack.c.bf16 %v1143_v1, %v1143_v1  ;;  %v12499_v53 = vpack.c.bf16 %v1144_v8, %v1144_v8  ;;  %v1945_v41 = vshrl.u32 %v12497_v54, 16  ;;  %v1948_v58 = vshll.u32 %v12497_v54, 16 }
 0x37c   : > { %v2430_v62 = vld [vmem:[#allocation5 + $0x17c] sm:$0x1]  ;;  %v3133_v35 = vshrl.u32 %v16498_v63, 16  ;;  %v3136_v2 = vshll.u32 %v16498_v63, 16  ;;  %v3126_v36 = vrot.slane %v3125_v39, 4  ;;  %v3142_v42 = vshll.u32 %v16506_v25, 16 }
 0x37d   : > { %v3146_v57 = vshrl.u32 %v16506_v25, 16  ;;  %v3152_v15 = vshll.u32 %v2430_v62, 16  ;;  %v1947_v0 = vrot.slane %v1945_v41, 7  ;;  %v1953_v55 = vshrl.u32 %v12498_v18, 16  ;;  %v5807_v41 = vld [vmem:[#allocation5 + $0xe8] sm:$0xf] }
 0x37e   : > { %v3135_v46 = vrot.slane %v3133_v35, 4  ;;  %v3138_v3 = vrot.slane %v3136_v2, 5  ;;  %v3131_v13 = vsel %vm15564_vm2, %v3126_v36, %v3130_v22  ;;  %v3144_v4 = vrot.slane %v3142_v42, 5  ;;  %v2311_v2 = vld [vmem:[#allocation5 + $0x194] sm:$0x1] }
 0x37f   : > { %v3148_v17 = vrot.slane %v3146_v57, 4  ;;  %v3154_v37 = vrot.slane %v3152_v15, 5  ;;  %v12005_v45 = vcombine.low %v3121_v20, %v3131_v13  ;;  %v1956_v47 = vshll.u32 %v12498_v18, 16  ;;  %v7184_v36 = vld [vmem:[#allocation5 + $0xe4] sm:$0xe] }
 0x380   : > { %v3139_v28 = vor.u32 %v3138_v3, %v3135_v46  ;;  %v1145_v24 = vmax.f32 %v1081_v16, 0.0  ;;  %v1962_v14 = vshrl.u32 %v12499_v53, 16  ;;  %v1950_v38 = vor.u32 %v1948_v58, %v1947_v0  ;;  %v7183_v16 = vld [vmem:[#allocation5 + $0xc0] sm:$0xe]  ;;  %v14665_v57 = vld [vmem:[#allocation5 + $0xc4] sm:$0xf] }
 0x381   : > { %v3149_v11 = vor.u32 %v3148_v17, %v3144_v4  ;;  %13166 = vmatprep.mubr.bf16.mxu1 %v12005_v45  ;;  %v1951_v61 = vrot.slane %v1947_v0, 4  ;;  %v1955_v49 = vrot.slane %v1953_v55, 7  ;;  %v1965_v19 = vshll.u32 %v12499_v53, 16  ;;  %v14666_v46 = vld [vmem:[#allocation5 + $0xc8] sm:$0x1] }
 0x382   : > { %v3140_v31 = vrot.slane %v3139_v28, 4  ;;  %v12500_v43 = vpack.c.bf16 %v1145_v24, %v1145_v24  ;;  %v1964_v9 = vrot.slane %v1962_v14, 7  ;;  %v2301_v7 = vsel %vm15641_vm10, %v1950_v38, %v2300_v50 }
 0x383   : > { %v3150_v23 = vrot.slane %v3149_v11, 4  ;;  %v1958_v29 = vor.u32 %v1956_v47, %v1955_v49  ;;  %v1960_v56 = vrot.slane %v1955_v49, 4  ;;  %2302 = vst [vmem:[#allocation5 + $0x180] sm:$0xf] %v2301_v7  ;;  %v7397_v18 = vsel %vm16149_vm13, %v12223_v5, %v7396_v30 }
 0x384   : > { %v3145_v6 = vsel %vm15564_vm2, %v3140_v31, %v3144_v4  ;;  %v1967_v22 = vor.u32 %v1965_v19, %v1964_v9  ;;  %v1968_v1 = vrot.slane %v1964_v9, 4  ;;  %v1970_v54 = vshrl.u32 %v12500_v43, 16  ;;  %v5808_v4 = vld [vmem:[#allocation5 + $0xec] sm:$0x1] }
 0x385   : > { %v3155_v10 = vsel %vm15564_vm2, %v3150_v23, %v3154_v37  ;;  %v1959_v20 = vsel %vm15635_vm9, %v1951_v61, %v1958_v29  ;;  %v2305_v39 = vsel %vm15629_vm8, %v1960_v56, %v2304_v26  ;;  %v1973_v33 = vshll.u32 %v12500_v43, 16 }
 0x386   : > { %v12006_v8 = vcombine.low %v3145_v6, %v3155_v10  ;;  %2303 = vst [vmem:[#allocation5 + $0x184] sm:$0xf] %v1959_v20  ;;  %2306 = vst [vmem:[#allocation5 + $0x188] sm:$0x1] %v2305_v39  ;;  %v1972_v62 = vrot.slane %v1970_v54, 7  ;;  %v2308_v35 = vsel %vm15641_vm10, %v1967_v22, %v2307_v60  ;;  %v7398_v53 = vrot.slane %v7396_v30, 4 }
 0x387   : > { %2309 = vst [vmem:[#allocation5 + $0x18c] sm:$0xf] %v2308_v35  ;;  %v12224_v42 = vrot.slane %v7183_v16, 9  ;;  %v7403_v15 = vrot.slane %v14665_v57, 5  ;;  %v7406_v3 = vrot.slane %v14666_v46, 5  ;;  %v12225_v37 = vrot.slane %v7184_v36, 9 }
 0x388   : > { %13167 = vmatmul.mubr.bf16.gmra.mrb[56].mxu1 %v12006_v8  ;;  %v1975_v58 = vor.u32 %v1973_v33, %v1972_v62  ;;  %v1977_v13 = vrot.slane %v1972_v62, 4  ;;  %v7400_v51 = vsel %vm16149_vm13, %v7398_v53, %v7399_v52  ;;  %v7410_v28 = vrot.slane %v5807_v41, 5  ;;  %v16558_v54 = vld [vmem:[#allocation5 + $0xf4] sm:$0xf]  ;;  %v16560_v16 = vld [vmem:[#allocation5 + $0xf8] sm:$0x1] }
 0x389   : > { %v12255_v17 = vcombine.low %v7397_v18, %v7400_v51  ;;  %v7404_v5 = vsel %vm16149_vm13, %v12224_v42, %v7403_v15  ;;  %v7405_v30 = vrot.slane %v7403_v15, 4  ;;  %v7413_v52 = vrot.slane %v5808_v4, 5  ;;  %v7185_v8 = vld [vmem:[#allocation5 + $0xf0] sm:$0xe]  ;;  %v5813_v42 = vld [vmem:[#allocation5 + $0x100] sm:$0xf] }
 0x38a   : > { %v1976_v50 = vsel %vm15635_vm9, %v1968_v1, %v1975_v58  ;;  %v2312_v45 = vsel %vm15629_vm8, %v1977_v13, %v2311_v2  ;;  %v16540_v0 = vld [vmem:[#allocation5 + $0x180] sm:$0xf]  ;;  %v7411_v31 = vsel %vm16149_vm13, %v12225_v37, %v7410_v28  ;;  %v7412_v38 = vrot.slane %v7410_v28, 4  ;;  %v5816_v41 = vld [vmem:[#allocation5 + $0x10c] sm:$0xf] }
 0x38b   : > { %2310 = vst [vmem:[#allocation5 + $0x190] sm:$0xf] %v1976_v50  ;;  %2313 = vst [vmem:[#allocation5 + $0x194] sm:$0x1] %v2312_v45  ;;  %13538 = vmatprep.mubr.bf16.mxu0 %v12255_v17  ;;  %v7407_v27 = vsel %vm16149_vm13, %v7405_v30, %v7406_v3  ;;  %v3157_v55 = vshrl.u32 %v16540_v0, 16  ;;  %v3160_v11 = vshll.u32 %v16540_v0, 16 }
 0x38c   : > { %v12256_v47 = vcombine.low %v7404_v5, %v7407_v27  ;;  %v7414_v29 = vsel %vm16149_vm13, %v7412_v38, %v7413_v52  ;;  %v12226_v46 = vrot.slane %v7185_v8, 9  ;;  %v7186_v3 = vld [vmem:[#allocation5 + $0xfc] sm:$0xe]  ;;  %v5814_v4 = vld [vmem:[#allocation5 + $0x104] sm:$0x1]  ;;  %v7417_v5 = vrot.slane %v16558_v54, 5 }
 0x38d   : > { %v16546_v24 = vld [vmem:[#allocation5 + $0x184] sm:$0xf]  ;;  %v2431_v14 = vld [vmem:[#allocation5 + $0x188] sm:$0x1]  ;;  %v3159_v61 = vrot.slane %v3157_v55, 4  ;;  %v3162_v49 = vrot.slane %v3160_v11, 5  ;;  %v12257_v10 = vcombine.low %v7411_v31, %v7414_v29 }
 0x38e   : > { %v3166_v23 = vshll.u32 %v16546_v24, 16  ;;  %v3170_v26 = vshrl.u32 %v16546_v24, 16  ;;  %v16552_v43 = vld [vmem:[#allocation5 + $0x18c] sm:$0xf]  ;;  %13539 = vmatmul.mubr.bf16.gmra.mrb[28].mxu0 %v12256_v47  ;;  %v3176_v9 = vshll.u32 %v2431_v14, 16  ;;  %v7420_v30 = vrot.slane %v16560_v16, 5 }
 0x38f   : > { %v3181_v19 = vshrl.u32 %v16552_v43, 16  ;;  %v3184_v6 = vshll.u32 %v16552_v43, 16  ;;  %v3163_v56 = vor.u32 %v3162_v49, %v3159_v61  ;;  %13542 = vmatprep.mubr.bf16.mxu0 %v12257_v10  ;;  %v5817_v37 = vld [vmem:[#allocation5 + $0x110] sm:$0x1]  ;;  %v7187_v50 = vld [vmem:[#allocation5 + $0x108] sm:$0xe]  ;;  %v7418_v47 = vsel %vm16149_vm13, %v12226_v46, %v7417_v5 }
 0x390   : > { %v3168_v7 = vrot.slane %v3166_v23, 5  ;;  %v3172_v60 = vrot.slane %v3170_v26, 4  ;;  %v3178_v33 = vrot.slane %v3176_v9, 5  ;;  %v12227_v52 = vrot.slane %v7186_v3, 9  ;;  %v5819_v55 = vld [vmem:[#allocation5 + $0x118] sm:$0xf] }
 0x391   : > { %v3183_v22 = vrot.slane %v3181_v19, 4  ;;  %v3186_v1 = vrot.slane %v3184_v6, 5  ;;  %v3164_v20 = vrot.slane %v3163_v56, 4  ;;  %v7188_v11 = vld [vmem:[#allocation5 + $0x114] sm:$0xe]  ;;  %v7419_v14 = vrot.slane %v7417_v5, 4 }
 0x392   : > { %v3173_v39 = vor.u32 %v3172_v60, %v3168_v7  ;;  %v16562_v62 = vld [vmem:[#allocation5 + $0x190] sm:$0xf]  ;;  %v2432_v35 = vld [vmem:[#allocation5 + $0x194] sm:$0x1]  ;;  %v7424_v31 = vrot.slane %v5813_v42, 5  ;;  %v7427_v38 = vrot.slane %v5814_v4, 5 }
 0x393   : > { %v3187_v2 = vor.u32 %v3186_v1, %v3183_v22  ;;  %v3190_v18 = vshll.u32 %v16562_v62, 16  ;;  %v3194_v53 = vshrl.u32 %v16562_v62, 16  ;;  %v3200_v36 = vshll.u32 %v2432_v35, 16  ;;  %v5820_v61 = vld [vmem:[#allocation5 + $0x11c] sm:$0x1] }
 0x394   : > { %v3169_v57 = vsel %vm15564_vm2, %v3164_v20, %v3168_v7  ;;  %v3174_v15 = vrot.slane %v3173_v39, 4  ;;  %v12228_v26 = vrot.slane %v7187_v50, 9  ;;  %v7431_v9 = vrot.slane %v5816_v41, 5  ;;  %v14667_v60 = vld [vmem:[#allocation5] sm:$0xf] }
 0x395   : > { %v3188_v58 = vrot.slane %v3187_v2, 4  ;;  %v3192_v13 = vrot.slane %v3190_v18, 5  ;;  %v3196_v51 = vrot.slane %v3194_v53, 4  ;;  %v3202_v27 = vrot.slane %v3200_v36, 5  ;;  %v16582_v10 = vld [vmem:[#allocation5 + $0x4] sm:$0xf] }
 0x396   : > { %v3179_v17 = vsel %vm15564_vm2, %v3174_v15, %v3178_v33  ;;  %v7421_v19 = vsel %vm16149_vm13, %v7419_v14, %v7420_v30  ;;  %v7425_v6 = vsel %vm16149_vm13, %v12227_v52, %v7424_v31  ;;  %v7426_v29 = vrot.slane %v7424_v31, 4  ;;  %v5822_v20 = vld [vmem:[#allocation5 + $0x124] sm:$0xf]  ;;  %v5825_v36 = vld [vmem:[#allocation5 + $0x130] sm:$0xf] }
 0x397   : > { %v12007_v45 = vcombine.low %v3169_v57, %v3179_v17  ;;  %v3197_v28 = vor.u32 %v3196_v51, %v3192_v13  ;;  %v3193_v49 = vsel %vm15564_vm2, %v3188_v58, %v3192_v13  ;;  %v7434_v56 = vrot.slane %v5817_v37, 5  ;;  %v5823_v41 = vld [vmem:[#allocation5 + $0x128] sm:$0x1]  ;;  %v7189_v58 = vld [vmem:[#allocation5 + $0x120] sm:$0xe] }
 0x398   : > { %v12017_v22 = vcombine.low %v14667_v60, %v16582_v10  ;;  %v12258_v1 = vcombine.low %v7418_v47, %v7421_v19  ;;  %v7433_v8 = vrot.slane %v7431_v9, 4  ;;  %v7428_v33 = vsel %vm16149_vm13, %v7426_v29, %v7427_v38  ;;  %v5826_v51 = vld [vmem:[#allocation5 + $0x134] sm:$0x1]  ;;  %v7190_v4 = vld [vmem:[#allocation5 + $0x12c] sm:$0xe] }
 0x399   : > { %13170 = vmatprep.mubr.bf16.mxu1 %v12007_v45  ;;  %v3198_v23 = vrot.slane %v3197_v28, 4  ;;  %v12229_v35 = vrot.slane %v7188_v11, 9  ;;  %v7438_v2 = vrot.slane %v5819_v55, 5  ;;  %v12259_v18 = vcombine.low %v7425_v6, %v7428_v33  ;;  %v14669_v5 = vld [vmem:[#allocation5 + $0xc] sm:$0xf] }
 0x39a   : > { %13543 = vmatmul.mubr.bf16.gmra.mrb[32].mxu0 %v12258_v1  ;;  %v7441_v53 = vrot.slane %v5820_v61, 5  ;;  %v7432_v42 = vsel %vm16149_vm13, %v12228_v26, %v7431_v9  ;;  %v7435_v57 = vsel %vm16149_vm13, %v7433_v8, %v7434_v56  ;;  %v7445_v46 = vrot.slane %v5822_v20, 5  ;;  %v16595_v30 = vld [vmem:[#allocation5 + $0x10] sm:$0xf]  ;;  %v5828_v55 = vld [vmem:[#allocation5 + $0x13c] sm:$0xf] }
 0x39b   : > { %v3203_v7 = vsel %vm15564_vm2, %v3198_v23, %v3202_v27  ;;  %v7440_v15 = vrot.slane %v7438_v2, 4  ;;  %13546 = vmatprep.mubr.bf16.mxu0 %v12259_v18  ;;  %v7439_v3 = vsel %vm16149_vm13, %v12229_v35, %v7438_v2  ;;  %v7452_v17 = vrot.slane %v5825_v36, 5  ;;  %v14671_v11 = vld [vmem:[#allocation5 + $0x18] sm:$0xf]  ;;  %v16598_v47 = vld [vmem:[#allocation5 + $0x1c] sm:$0xf] }
 0x39c   : > { %v12008_v39 = vcombine.low %v3193_v49, %v3203_v7  ;;  %v12018_v37 = vcombine.low %v14669_v5, %v16595_v30  ;;  %v12260_v50 = vcombine.low %v7432_v42, %v7435_v57  ;;  %v12230_v28 = vrot.slane %v7189_v58, 9  ;;  %v14509_v49 = vld [vmem:[#allocation11 + $0x88] sm:$0xff]   ;;  %v5831_v23 = vld [vmem:[#allocation5 + $0x148] sm:$0xf]  ;;  %v5829_v6 = vld [vmem:[#allocation5 + $0x140] sm:$0x1] }
 0x39d   : > { %v7442_v13 = vsel %vm16149_vm13, %v7440_v15, %v7441_v53  ;;  %v7447_v27 = vrot.slane %v7445_v46, 4  ;;  %v7448_v52 = vrot.slane %v5823_v41, 5  ;;  %v12019_v14 = vcombine.low %v14671_v11, %v16598_v47  ;;  %v7191_v29 = vld [vmem:[#allocation5 + $0x138] sm:$0xe]  ;;  %v14673_v56 = vld [vmem:[#allocation11 + $0x80] sm:$0xff]   ;;  %v14515_v1 = vld [vmem:[#allocation11 + $0x90] sm:$0xff]  }
 0x39e   : > { %13171 = vmatmul.mubr.bf16.gmra.mrb[60].mxu1 %v12008_v39  ;;  %v12261_v45 = vcombine.low %v7439_v3, %v7442_v13  ;;  %v12231_v31 = vrot.slane %v7190_v4, 9  ;;  %v7454_v38 = vrot.slane %v7452_v17, 4  ;;  %v7455_v61 = vrot.slane %v5826_v51, 5  ;;  %v5832_v8 = vld [vmem:[#allocation5 + $0x14c] sm:$0x1] }
 0x39f   : > { %13190 = vmatprep.mubr.bf16.mxu1 %v12017_v22  ;;  %v7459_v26 = vrot.slane %v5828_v55, 5  ;;  %v7446_v9 = vsel %vm16149_vm13, %v12230_v28, %v7445_v46  ;;  %v7449_v19 = vsel %vm16149_vm13, %v7447_v27, %v7448_v52  ;;  %v7466_v22 = vrot.slane %v5831_v23, 5  ;;  %v7192_v20 = vld [vmem:[#allocation5 + $0x144] sm:$0xe]  ;;  %v16609_v53 = vld [vmem:[#allocation5 + $0x28] sm:$0xf] }
 0x3a0   : > { %v7453_v7 = vsel %vm16149_vm13, %v12231_v31, %v7452_v17  ;;  %v7456_v60 = vsel %vm16149_vm13, %v7454_v38, %v7455_v61  ;;  %v12262_v39 = vcombine.low %v7446_v9, %v7449_v19  ;;  %v12232_v33 = vrot.slane %v7191_v29, 9  ;;  %v14674_v18 = vld [vmem:[#allocation5 + $0x24] sm:$0xf]  ;;  %v5834_v57 = vld [vmem:[#allocation5 + $0x154] sm:$0xf]  ;;  %v14521_v4 = vld [vmem:[#allocation11 + $0x98] sm:$0xff]  }
 0x3a1   : > { %v7461_v35 = vrot.slane %v7459_v26, 4  ;;  %v7462_v2 = vrot.slane %v5829_v6, 5  ;;  %v12020_v36 = vcombine.low %v14674_v18, %v16609_v53  ;;  %v12263_v42 = vcombine.low %v7453_v7, %v7456_v60  ;;  %v14676_v15 = vld [vmem:[#allocation5 + $0x30] sm:$0xf]  ;;  %v16612_v46 = vld [vmem:[#allocation5 + $0x34] sm:$0xf] }
 0x3a2   : > { %13547 = vmatmul.mubr.bf16.gmra.mrb[36].mxu0 %v12260_v50  ;;  %v12021_v3 = vcombine.low %v14676_v15, %v16612_v46  ;;  %v12233_v41 = vrot.slane %v7192_v20, 9  ;;  %v7468_v58 = vrot.slane %v7466_v22, 4  ;;  %v7469_v13 = vrot.slane %v5832_v8, 5  ;;  %v5837_v51 = vld [vmem:[#allocation5 + $0x160] sm:$0xf]  ;;  %v942_v28 = vld [vmem:[#allocation2 + $0x1f0] sm:$0xff] }
 0x3a3   : > { %13550 = vmatprep.mubr.bf16.mxu0 %v12261_v45  ;;  %v7460_v17 = vsel %vm16149_vm13, %v12232_v33, %v7459_v26  ;;  %v7463_v5 = vsel %vm16149_vm13, %v7461_v35, %v7462_v2  ;;  %v7473_v50 = vrot.slane %v5834_v57, 5  ;;  %v5835_v45 = vld [vmem:[#allocation5 + $0x158] sm:$0x1]  ;;  %v7194_v11 = vld [vmem:[#allocation5 + $0x15c] sm:$0xe]  ;;  %v1012_v19 = vmul.f32 %v15587_v44, %v942_v28 }
 0x3a4   : > { %v943_v27 = vld [vmem:[#allocation2 + $0x1f8] sm:$0xff]  ;;  %v7467_v52 = vsel %vm16149_vm13, %v12233_v41, %v7466_v22  ;;  %v7470_v55 = vsel %vm16149_vm13, %v7468_v58, %v7469_v13  ;;  %v12264_v31 = vcombine.low %v7460_v17, %v7463_v5  ;;  %v5838_v61 = vld [vmem:[#allocation5 + $0x164] sm:$0x1]  ;;  %v7476_v26 = vrot.slane %v5835_v45, 5  ;;  %v16623_v9 = vld [vmem:[#allocation5 + $0x16c] sm:$0xf] }
 0x3a5   : > { %v7475_v23 = vrot.slane %v7473_v50, 4  ;;  %v1013_v6 = vmul.f32 %v15587_v44, %v943_v27  ;;  %v14678_v29 = vld [vmem:[#allocation5 + $0x3c] sm:$0xf]  ;;  %v14680_v60 = vld [vmem:[#allocation5 + $0x48] sm:$0xf]  ;;  %v12265_v8 = vcombine.low %v7467_v52, %v7470_v55  ;;  %v12235_v20 = vrot.slane %v7194_v11, 9 }
 0x3a6   : > { %13191 = vmatmul.mubr.bf16.vlgmr.msra.gmra.mrb[0].mxu1 %v12018_v37  ;;  %v7193_v37 = vld [vmem:[#allocation5 + $0x150] sm:$0xe]  ;;  %v16630_v22 = vld [vmem:[#allocation5 + $0x4c] sm:$0xf]  ;;  %v7483_v33 = vrot.slane %v5838_v61, 5  ;;  %v1082_v2 = vadd.f32 %v15597_v59, %v1012_v19  ;;  %v7487_v18 = vrot.slane %v16623_v9, 5 }
 0x3a7   : > { %13255 = vmatpush3.bf16.msra.mxu1 %v14673_v56  ;;  %13194 = vmatprep.mubr.bf16.mxu1 %v12019_v14  ;;  %v7480_v14 = vrot.slane %v5837_v51, 5  ;;  %v12234_v38 = vrot.slane %v7193_v37, 9  ;;  %v16627_v56 = vld [vmem:[#allocation5 + $0x40] sm:$0xf]  ;;  %v16633_v35 = vld [vmem:[#allocation5 + $0x178] sm:$0xf]  ;;  %v1083_v44 = vadd.f32 %v15597_v59, %v1013_v6  ;;  %v7477_v57 = vsel %vm16149_vm13, %v7475_v23, %v7476_v26 }
 0x3a8   : > { %13256 = vmatprep.subr.bf16.mxu1 %v14509_v49  ;;  %v12022_v7 = vcombine.low %v14678_v29, %v16627_v56  ;;  %v5841_v15 = vld [vmem:[#allocation5 + $0x170] sm:$0x1]  ;;  %v1146_v41 = vmax.f32 %v1082_v2, 0.0  ;;  %v16642_v13 = vld [vmem:[#allocation5 + $0x58] sm:$0xf]  ;;  %v7494_v17 = vrot.slane %v16633_v35, 5 }
 0x3a9   : > { %v1147_v58 = vmax.f32 %v1083_v44, 0.0  ;;  %v14683_v51 = vld [vmem:[#allocation5 + $0x54] sm:$0xf]  ;;  %v5844_v37 = vld [vmem:[#allocation5 + $0x17c] sm:$0x1]  ;;  %v7489_v55 = vrot.slane %v7487_v18, 4 }
 0x3aa   : > { %13551 = vmatmul.mubr.bf16.gmra.mrb[40].mxu0 %v12262_v39  ;;  %v7482_v39 = vrot.slane %v7480_v14, 4  ;;  %v12024_v59 = vcombine.low %v14683_v51, %v16642_v13  ;;  %v12501_v45 = vpack.c.bf16 %v1146_v41, %v1146_v41  ;;  %v7490_v11 = vrot.slane %v5841_v15, 5  ;;  %v14684_v29 = vld [vmem:[#allocation5 + $0x60] sm:$0xf]  ;;  %v14557_v2 = vld [vmem:[#allocation11 + $0xb8] sm:$0xff]  }
 0x3ab   : > { %13257 = vmatpush3.bf16.msra.mxu1 %v14509_v49  ;;  %13554 = vmatprep.mubr.bf16.mxu0 %v12263_v42  ;;  %v14527_v49 = vld [vmem:[#allocation11 + $0xa0] sm:$0xff]   ;;  %v7474_v42 = vsel %vm16149_vm13, %v12234_v38, %v7473_v50  ;;  %v12502_v28 = vpack.c.bf16 %v1147_v58, %v1147_v58  ;;  %v7496_v19 = vrot.slane %v7494_v17, 4  ;;  %v7497_v6 = vrot.slane %v5844_v37, 5  ;;  %v2318_v35 = vld [vmem:[#allocation5 + $0x1a0] sm:$0x1] }
 0x3ac   : > { %13258 = vmatprep.subr.bf16.mxu1 %v14515_v1  ;;  %v7484_v5 = vsel %vm16149_vm13, %v7482_v39, %v7483_v33  ;;  %v7196_v50 = vld [vmem:[#allocation5 + $0x174] sm:$0xe]  ;;  %v12266_v27 = vcombine.low %v7474_v42, %v7477_v57  ;;  %v1979_v38 = vshrl.u32 %v12501_v45, 16  ;;  %v1982_v61 = vshll.u32 %v12501_v45, 16  ;;  %v5849_v33 = vld [vmem:[#allocation5 + $0x190] sm:$0xf] }
 0x3ad   : > { %v1990_v23 = vshll.u32 %v12502_v28, 16  ;;  %v12237_v9 = vrot.slane %v7196_v50, 9  ;;  %v5847_v58 = vld [vmem:[#allocation5 + $0x188] sm:$0x1]  ;;  %v7197_v51 = vld [vmem:[#allocation5 + $0x180] sm:$0xe] }
 0x3ae   : > { %13195 = vmatmul.mubr.bf16.gmra.mrb[4].mxu1 %v12020_v36  ;;  %v14537_v36 = vld [vmem:[#allocation11 + $0xa8] sm:$0xff]   ;;  %v5850_v50 = vld [vmem:[#allocation5 + $0x194] sm:$0x1]  ;;  %v7504_v21 = vrot.slane %v5847_v58, 5 }
 0x3af   : > { %13198 = vmatprep.mubr.bf16.mxu1 %v12021_v3  ;;  %13259 = vmatpush3.bf16.msra.mxu1 %v14515_v1  ;;  %v12023_v1 = vcombine.low %v14680_v60, %v16630_v22  ;;  %v7195_v3 = vld [vmem:[#allocation5 + $0x168] sm:$0xe]  ;;  %v16667_v45 = vld [vmem:[#allocation11 + $0xc0] sm:$0xff]  }
 0x3b0   : > { %13260 = vmatprep.subr.bf16.mxu1 %v14521_v4  ;;  %v12236_v52 = vrot.slane %v7195_v3, 9  ;;  %v7491_v3 = vsel %vm16149_vm13, %v7489_v55, %v7490_v11  ;;  %v12238_v55 = vrot.slane %v7197_v51, 9  ;;  %v14694_v51 = vld [vmem:[#allocation5 + $0x9c] sm:$0xf] }
 0x3b2   : > { %13555 = vmatmul.mubr.bf16.gmra.mrb[44].mxu0 %v12264_v31  ;;  %v14547_v31 = vld [vmem:[#allocation11 + $0xb0] sm:$0xff]   ;;  %v7488_v39 = vsel %vm16149_vm13, %v12236_v52, %v7487_v18  ;;  %v7498_v18 = vsel %vm16149_vm13, %v7496_v19, %v7497_v6 }
 0x3b3   : > { %13261 = vmatpush3.bf16.msra.mxu1 %v14521_v4  ;;  %13558 = vmatprep.mubr.bf16.mxu0 %v12265_v8  ;;  %v7481_v4 = vsel %vm16149_vm13, %v12235_v20, %v7480_v14  ;;  %v1987_v14 = vshrl.u32 %v12502_v28, 16  ;;  %v2314_v20 = vld [vmem:[#allocation5 + $0x198] sm:$0xf]  ;;  %v14686_v28 = vld [vmem:[#allocation5 + $0x6c] sm:$0xf]  ;;  %v12268_v52 = vcombine.low %v7488_v39, %v7491_v3 }
 0x3b4   : > { %13262 = vmatprep.subr.bf16.mxu1 %v14527_v49  ;;  %v12267_v26 = vcombine.low %v7481_v4, %v7484_v5  ;;  %v7508_v4 = vrot.slane %v5849_v33, 5  ;;  %v14690_v33 = vld [vmem:[#allocation5 + $0x84] sm:$0xf]  ;;  %v16687_v3 = vld [vmem:[#allocation5 + $0x94] sm:$0xf] }
 0x3b5   : > { %v1989_v8 = vrot.slane %v1987_v14, 7 }
 0x3b6   : > { %13199 = vmatmul.mubr.bf16.gmra.mrb[8].mxu1 %v12022_v7  ;;  %v16650_v7 = vld [vmem:[#allocation5 + $0x64] sm:$0xf] }
 0x3b7   : > { %13202 = vmatprep.mubr.bf16.mxu1 %v12023_v1  ;;  %13263 = vmatpush3.bf16.msra.mxu1 %v14527_v49  ;;  %v12025_v60 = vcombine.low %v14684_v29, %v16650_v7  ;;  %v5846_v49 = vld [vmem:[#allocation5 + $0x184] sm:$0xf]  ;;  %v1981_v1 = vrot.slane %v1979_v38, 7  ;;  %v1992_v57 = vor.u32 %v1990_v23, %v1989_v8  ;;  %v1994_v15 = vrot.slane %v1989_v8, 4  ;;  %v14688_v38 = vld [vmem:[#allocation5 + $0x78] sm:$0xf] }
 0x3b8   : > { %13264 = vmatprep.subr.bf16.mxu1 %v14537_v36  ;;  %v7501_v41 = vrot.slane %v5846_v49, 5  ;;  %v7510_v23 = vrot.slane %v7508_v4, 4 }
 0x3b9   : > { %v1984_v44 = vor.u32 %v1982_v61, %v1981_v1  ;;  %v1985_v42 = vrot.slane %v1981_v1, 4  ;;  %v2319_v37 = vsel %vm15629_vm8, %v1994_v15, %v2318_v35  ;;  %v16684_v35 = vld [vmem:[#allocation5 + $0x88] sm:$0xf]  ;;  %v14692_v15 = vld [vmem:[#allocation5 + $0x90] sm:$0xf] }
 0x3ba   : > { %13559 = vmatmul.mubr.bf16.gmra.mrb[48].mxu0 %v12266_v27  ;;  %2320 = vst [vmem:[#allocation5 + $0x1a0] sm:$0x1] %v2319_v37  ;;  %v16669_v27 = vld [vmem:[#allocation5 + $0x70] sm:$0xf]  ;;  %v7503_v11 = vrot.slane %v7501_v41, 4 }
 0x3bb   : > { %13265 = vmatpush3.bf16.msra.mxu1 %v14537_v36  ;;  %13562 = vmatprep.mubr.bf16.mxu0 %v12267_v26  ;;  %v7495_v36 = vsel %vm16149_vm13, %v12237_v9, %v7494_v17  ;;  %v1993_v5 = vsel %vm15635_vm9, %v1985_v42, %v1992_v57  ;;  %v7198_v17 = vld [vmem:[#allocation5 + $0x18c] sm:$0xe]  ;;  %v12026_v40 = vcombine.low %v14686_v28, %v16669_v27  ;;  %v7511_v26 = vrot.slane %v5850_v50, 5  ;;  %v14696_v37 = vld [vmem:[#allocation5 + $0xa8] sm:$0xf] }
 0x3bc   : > { %13266 = vmatprep.subr.bf16.mxu1 %v14547_v31  ;;  %2317 = vst [vmem:[#allocation5 + $0x19c] sm:$0xf] %v1993_v5  ;;  %v12269_v48 = vcombine.low %v7495_v36, %v7498_v18  ;;  %v12239_v14 = vrot.slane %v7198_v17, 9  ;;  %v7502_v9 = vsel %vm16149_vm13, %v12238_v55, %v7501_v41  ;;  %v7505_v19 = vsel %vm16149_vm13, %v7503_v11, %v7504_v21  ;;  %v16697_v50 = vld [vmem:[#allocation5 + $0xac] sm:$0xf]  ;;  %v14530_v28 = vld [vmem:[#allocation5 + $0x24] sm:$0xff]  }
 0x3bd   : > { %v7512_v29 = vsel %vm16149_vm13, %v7510_v23, %v7511_v26  ;;  %v12029_v36 = vcombine.low %v14692_v15, %v16687_v3  ;;  %v12031_v17 = vcombine.low %v14696_v37, %v16697_v50  ;;  %v14700_v55 = vld [vmem:[#allocation5 + $0xd8] sm:$0xf]  ;;  %v16703_v11 = vld [vmem:[#allocation5 + $0xdc] sm:$0xf]  ;;  %v14549_v23 = vld [vmem:[#allocation11 + $0x1d0] sm:$0xff]  }
 0x3be   : > { %13203 = vmatmul.mubr.bf16.gmra.mrb[12].mxu1 %v12024_v59  ;;  %v2315_v59 = vsel %vm15641_vm10, %v1984_v44, %v2314_v20  ;;  %v7509_v6 = vsel %vm16149_vm13, %v12239_v14, %v7508_v4  ;;  %v12270_v20 = vcombine.low %v7502_v9, %v7505_v19  ;;  %v16694_v4 = vld [vmem:[#allocation5 + $0xa0] sm:$0xf]  ;;  %v12033_v21 = vcombine.low %v14700_v55, %v16703_v11  ;;  %v14702_v14 = vld [vmem:[#allocation11 + $0x1c0] sm:$0xff]   ;;  %v14703_v9 = vld [vmem:[#allocation5 + $0xe4] sm:$0xf] }
 0x3bf   : > { %13206 = vmatprep.mubr.bf16.mxu1 %v12025_v60  ;;  %13267 = vmatpush3.bf16.msra.mxu1 %v14547_v31  ;;  %2316 = vst [vmem:[#allocation5 + $0x198] sm:$0xf] %v2315_v59  ;;  %v16672_v31 = vld [vmem:[#allocation5 + $0x7c] sm:$0xf]  ;;  %v12271_v44 = vcombine.low %v7509_v6, %v7512_v29  ;;  %v12030_v5 = vcombine.low %v14694_v51, %v16694_v4  ;;  %v16706_v19 = vld [vmem:[#allocation5 + $0xe8] sm:$0xf] }
 0x3c0   : > { %13268 = vmatprep.subr.bf16.mxu1 %v14557_v2  ;;  %v12027_v61 = vcombine.low %v14688_v38, %v16672_v31  ;;  %v14528_v59 = vld [vmem:[#allocation5 + $0x18] sm:$0xff]   ;;  %v14533_v38 = vld [vmem:[#allocation5 + $0x30] sm:$0xff]   ;;  %v12034_v6 = vcombine.low %v14703_v9, %v16706_v19  ;;  %v14538_v29 = vld [vmem:[#allocation5 + $0x48] sm:$0xff]   ;;  %v6276_v9 = vshrl.u32 %v16558_v54, 16 }
 0x3c1   : > { %v5853_v49 = vld [vmem:[#allocation5 + $0x1a0] sm:$0x1]  ;;  %v16715_v15 = vld [vmem:[#allocation5 + $0x10c] sm:$0xf]  ;;  %v14711_v51 = vld [vmem:[#allocation5 + $0x114] sm:$0xf] }
 0x3c2   : > { %13563 = vmatmul.mubr.bf16.gmra.mrb[52].mxu0 %v12268_v52  ;;  %v7518_v57 = vrot.slane %v5853_v49, 5  ;;  %v16700_v52 = vld [vmem:[#allocation5 + $0xb8] sm:$0xf]  ;;  %v14534_v26 = vld [vmem:[#allocation5 + $0x3c] sm:$0xff]   ;;  %v16709_v49 = vld [vmem:[#allocation5 + $0xf4] sm:$0xf] }
 0x3c3   : > { %13269 = vmatpush3.bf16.msra.mxu1 %v14557_v2  ;;  %13566 = vmatprep.mubr.bf16.mxu0 %v12269_v48  ;;  %v5852_v60 = vld [vmem:[#allocation5 + $0x19c] sm:$0xf]  ;;  %v12028_v2 = vcombine.low %v14690_v33, %v16684_v35  ;;  %v14590_v55 = vld [vmem:[#allocation11 + $0x200] sm:$0xff]  }
 0x3c4   : > { %13334 = vmatprep.subr.bf16.mxu1 %v16667_v45  ;;  %v7515_v8 = vrot.slane %v5852_v60, 5  ;;  %v14705_v60 = vld [vmem:[#allocation5 + $0xf0] sm:$0xf]  ;;  %v14707_v33 = vld [vmem:[#allocation5 + $0xfc] sm:$0xf] }
 0x3c5   : > { %v14548_v37 = vld [vmem:[#allocation5 + $0x78] sm:$0xff]  }
 0x3c6   : > { %13207 = vmatmul.mubr.bf16.gmra.mrb[16].mxu1 %v12026_v40  ;;  %v7199_v1 = vld [vmem:[#allocation5 + $0x198] sm:$0xe]  ;;  %v7517_v42 = vrot.slane %v7515_v8, 4  ;;  %v14698_v40 = vld [vmem:[#allocation5 + $0xb4] sm:$0xf] }
 0x3c7   : > { %13210 = vmatprep.mubr.bf16.mxu1 %v12027_v61  ;;  %v12240_v39 = vrot.slane %v7199_v1, 9  ;;  %v12032_v48 = vcombine.low %v14698_v40, %v16700_v52  ;;  %v14539_v61 = vld [vmem:[#allocation11 + $0x1c8] sm:$0xff]   ;;  %v12035_v1 = vcombine.low %v14705_v60, %v16709_v49 }
 0x3c8   : > { %v7519_v41 = vsel %vm16149_vm13, %v7517_v42, %v7518_v57  ;;  %v14543_v42 = vld [vmem:[#allocation5 + $0x60] sm:$0xff]   ;;  %v14709_v57 = vld [vmem:[#allocation5 + $0x108] sm:$0xf] }
 0x3c9   : > { %v7516_v18 = vsel %vm16149_vm13, %v12240_v39, %v7515_v8  ;;  %v14559_v8 = vld [vmem:[#allocation11 + $0x1d8] sm:$0xff]   ;;  %v14540_v39 = vld [vmem:[#allocation5 + $0x54] sm:$0xff]  }
 0x3ca   : > { %13567 = vmatmul.mubr.bf16.gmra.mrb[56].mxu0 %v12270_v20  ;;  %v12272_v58 = vcombine.low %v7516_v18, %v7519_v41  ;;  %v14567_v20 = vld [vmem:[#allocation11 + $0x1e0] sm:$0xff]   ;;  %v14573_v18 = vld [vmem:[#allocation11 + $0x1e8] sm:$0xff]   ;;  %v14579_v41 = vld [vmem:[#allocation11 + $0x1f0] sm:$0xff]  }
 0x3cb   : > { %13570 = vmatprep.mubr.bf16.mxu0 %v12271_v44 }
 0x3ce   : > { %13211 = vmatmul.mubr.bf16.gmra.mrb[20].mxu1 %v12028_v2  ;;  %v16712_v2 = vld [vmem:[#allocation5 + $0x100] sm:$0xf] }
 0x3cf   : > { %13214 = vmatprep.mubr.bf16.mxu1 %v12029_v36  ;;  %v12036_v44 = vcombine.low %v14707_v33, %v16712_v2  ;;  %v12037_v36 = vcombine.low %v14709_v57, %v16715_v15  ;;  %v4330_v33 = vrot.slane %v16598_v47, 5  ;;  %v4217_v57 = vld [vmem:[#allocation5 + $0x18] sm:$0xe] }
 0x3d2   : > { %13571 = vmatmul.mubr.bf16.gmra.mrb[60].mxu0 %v12272_v58  ;;  %v14544_v58 = vld [vmem:[#allocation5 + $0x6c] sm:$0xff]  }
 0x3d3   : > { %13590 = vmatprep.mubr.bf16.mxu0 %v14528_v59 }
 0x3d6   : > { %13215 = vmatmul.mubr.bf16.gmra.mrb[24].mxu1 %v12030_v5  ;;  %v16718_v5 = vld [vmem:[#allocation5 + $0x118] sm:$0xf] }
 0x3d7   : > { %13218 = vmatprep.mubr.bf16.mxu1 %v12031_v17  ;;  %v12038_v59 = vcombine.low %v14711_v51, %v16718_v5  ;;  %v14713_v17 = vld [vmem:[#allocation5 + $0x120] sm:$0xf] }
 0x3d8   : > { %v14554_v51 = vld [vmem:[#allocation5 + $0x9c] sm:$0xff]  }
 0x3da   : > { %13591 = vmatmul.mubr.bf16.vlgmr.msra.gmra.mrb[0].mxu0 %v14530_v28  ;;  %v16721_v28 = vld [vmem:[#allocation5 + $0x124] sm:$0xf] }
 0x3db   : > { %13655 = vmatpush3.bf16.msra.mxu0 %v14702_v14  ;;  %13594 = vmatprep.mubr.bf16.mxu0 %v14533_v38  ;;  %19898 = vst [vmem:[#allocation20_spill] sm:$0xff] %v16721_v28  ;;  %v12039_v40 = vcombine.low %v14713_v17, %v16721_v28  ;;  %v14715_v38 = vld [vmem:[#allocation5 + $0x12c] sm:$0xf]  ;;  %v14721_v17 = vld [vmem:[#allocation5 + $0x144] sm:$0xf] }
 0x3dc   : > { %13656 = vmatprep.subr.bf16.mxu0 %v14539_v61  ;;  %v8744_v28 = vld [vmem:[#allocation5 + $0x24] sm:$0xf] }
 0x3de   : > { %13219 = vmatmul.mubr.bf16.gmra.mrb[28].mxu1 %v12032_v48  ;;  %v14585_v48 = vld [vmem:[#allocation11 + $0x1f8] sm:$0xff]  }
 0x3df   : > { %13222 = vmatprep.mubr.bf16.mxu1 %v12033_v21  ;;  %13657 = vmatpush3.bf16.msra.mxu0 %v14539_v61  ;;  %v14550_v21 = vld [vmem:[#allocation5 + $0x84] sm:$0xff]   ;;  %v16724_v61 = vld [vmem:[#allocation5 + $0x130] sm:$0xf] }
 0x3e0   : > { %13658 = vmatprep.subr.bf16.mxu0 %v14549_v23  ;;  %19899 = vst [vmem:[#allocation21_spill] sm:$0xff] %v16724_v61  ;;  %v12040_v14 = vcombine.low %v14715_v38, %v16724_v61 }
 0x3e2   : > { %13595 = vmatmul.mubr.bf16.gmra.mrb[4].mxu0 %v14534_v26  ;;  %v6272_v26 = vshll.u32 %v16558_v54, 16  ;;  %v16737_v54 = vrot.slane %v6276_v9, 4  ;;  %v16747_v9 = vld [vmem:[#allocation5 + $0x154] sm:$0xf] }
 0x3e3   : > { %13598 = vmatprep.mubr.bf16.mxu0 %v14538_v29  ;;  %13659 = vmatpush3.bf16.msra.mxu0 %v14549_v23  ;;  %v14553_v23 = vld [vmem:[#allocation5 + $0x90] sm:$0xff]   ;;  %v16729_v29 = vld [vmem:[#allocation5 + $0x13c] sm:$0xf]  ;;  %19904 = vst [vmem:[#allocation26_spill] sm:$0xff] %v16747_v9 }
 0x3e4   : > { %13660 = vmatprep.subr.bf16.mxu0 %v14559_v8  ;;  %19900 = vst [vmem:[#allocation22_spill] sm:$0xff] %v16729_v29 }
 0x3e6   : > { %13223 = vmatmul.mubr.bf16.gmra.mrb[32].mxu1 %v12034_v6  ;;  %v14717_v6 = vld [vmem:[#allocation5 + $0x138] sm:$0xf] }
 0x3e7   : > { %13226 = vmatprep.mubr.bf16.mxu1 %v12035_v1  ;;  %13661 = vmatpush3.bf16.msra.mxu0 %v14559_v8  ;;  %v12041_v60 = vcombine.low %v14717_v6, %v16729_v29  ;;  %v4215_v1 = vld [vmem:[#allocation5] sm:$0xe]  ;;  %v4316_v8 = vrot.slane %v16582_v10, 5 }
 0x3e8   : > { %13662 = vmatprep.subr.bf16.mxu0 %v14567_v20 }
 0x3ea   : > { %13599 = vmatmul.mubr.bf16.gmra.mrb[8].mxu0 %v14540_v39  ;;  %v4216_v39 = vld [vmem:[#allocation5 + $0xc] sm:$0xe] }
 0x3eb   : > { %13602 = vmatprep.mubr.bf16.mxu0 %v14543_v42  ;;  %13663 = vmatpush3.bf16.msra.mxu0 %v14567_v20  ;;  %v4323_v20 = vrot.slane %v16595_v30, 5  ;;  %v6282_v42 = vshll.u32 %v16560_v16, 16  ;;  %v4318_v30 = vrot.slane %v4316_v8, 4  ;;  %v14723_v16 = vld [vmem:[#allocation5 + $0x20] sm:$0x1] }
 0x3ec   : > { %13664 = vmatprep.subr.bf16.mxu0 %v14573_v18  ;;  %v4333_v38 = vrot.slane %v14723_v16, 5  ;;  %v16756_v16 = vld [vmem:[#allocation5 + $0x16c] sm:$0xf] }
 0x3ed   : > { %19906 = vst [vmem:[#allocation28_spill] sm:$0xff] %v16756_v16 }
 0x3ee   : > { %13227 = vmatmul.mubr.bf16.gmra.mrb[36].mxu1 %v12036_v44  ;;  %v16735_v44 = vrot.slane %v6272_v26, 5  ;;  %v14724_v26 = vld [vmem:[#allocation5 + $0x150] sm:$0xf] }
 0x3ef   : > { %13230 = vmatprep.mubr.bf16.mxu1 %v12037_v36  ;;  %13665 = vmatpush3.bf16.msra.mxu0 %v14573_v18  ;;  %v14719_v36 = vld [vmem:[#allocation5 + $0x8] sm:$0x1]  ;;  %v12043_v6 = vcombine.low %v14724_v26, %v16747_v9  ;;  %v4379_v9 = vrot.slane %v16669_v27, 5 }
 0x3f0   : > { %13666 = vmatprep.subr.bf16.mxu0 %v14579_v41  ;;  %19901 = vst [vmem:[#allocation23_spill] sm:$0xff] %v16735_v44  ;;  %v4319_v18 = vrot.slane %v14719_v36, 5  ;;  %v14726_v36 = vld [vmem:[#allocation5 + $0x15c] sm:$0xf] }
 0x3f2   : > { %13603 = vmatmul.mubr.bf16.gmra.mrb[12].mxu0 %v14544_v58  ;;  %v14720_v58 = vld [vmem:[#allocation5 + $0x14] sm:$0x1] }
 0x3f3   : > { %13606 = vmatprep.mubr.bf16.mxu0 %v14548_v37  ;;  %13667 = vmatpush3.bf16.msra.mxu0 %v14579_v41  ;;  %v12057_v41 = vrot.slane %v4215_v1, 9  ;;  %v4326_v10 = vrot.slane %v14720_v58, 5  ;;  %v4325_v37 = vrot.slane %v4323_v20, 4  ;;  %v4337_v1 = vrot.slane %v16609_v53, 5  ;;  %v16751_v58 = vld [vmem:[#allocation5 + $0x160] sm:$0xf] }
 0x3f4   : > { %13668 = vmatprep.subr.bf16.mxu0 %v14585_v48  ;;  %19905 = vst [vmem:[#allocation27_spill] sm:$0xff] %v16751_v58  ;;  %v16768_v53 = vsel %vm16149_vm13, %v4318_v30, %v4319_v18  ;;  %v14730_v30 = vld [vmem:[#allocation5 + $0x2c] sm:$0x1] }
 0x3f5   : > { %v16764_v26 = vsel %vm16149_vm13, %v12057_v41, %v4316_v8  ;;  %v16776_v34 = vsel %vm16149_vm13, %v4325_v37, %v4326_v10  ;;  %v4220_v37 = vld [vmem:[#allocation5 + $0x3c] sm:$0xe] }
 0x3f6   : > { %13231 = vmatmul.mubr.bf16.gmra.mrb[40].mxu1 %v12038_v59  ;;  %v12058_v59 = vrot.slane %v4216_v39, 9  ;;  %v4219_v39 = vld [vmem:[#allocation5 + $0x30] sm:$0xe] }
 0x3f7   : > { %13234 = vmatprep.mubr.bf16.mxu1 %v12039_v40  ;;  %13669 = vmatpush3.bf16.msra.mxu0 %v14585_v48  ;;  %v16740_v40 = vld [vmem:[#allocation5 + $0x148] sm:$0xf] }
 0x3f8   : > { %13734 = vmatprep.subr.bf16.mxu0 %v14590_v55  ;;  %19902 = vst [vmem:[#allocation24_spill] sm:$0xff] %v16740_v40  ;;  %v12042_v47 = vcombine.low %v14721_v17, %v16740_v40  ;;  %v14558_v48 = vld [vmem:[#allocation5 + $0xa8] sm:$0xff]   ;;  %v12059_v55 = vrot.slane %v4217_v57, 9  ;;  %v12044_v57 = vcombine.low %v14726_v36, %v16751_v58  ;;  %v16772_v36 = vsel %vm16149_vm13, %v12058_v59, %v4323_v20 }
 0x3f9   : > { %v16754_v17 = vld [vmem:[#allocation5 + $0x168] sm:$0xf]  ;;  %v4340_v59 = vrot.slane %v14730_v30, 5  ;;  %v4222_v30 = vld [vmem:[#allocation5 + $0x54] sm:$0xe]  ;;  %v4365_v20 = vrot.slane %v16642_v13, 5 }
 0x3fa   : > { %13607 = vmatmul.mubr.bf16.gmra.mrb[16].mxu0 %v14550_v21  ;;  %v4332_v21 = vrot.slane %v4330_v33, 4  ;;  %v16781_v8 = vsel %vm16149_vm13, %v12059_v55, %v4330_v33  ;;  %v4221_v55 = vld [vmem:[#allocation5 + $0x48] sm:$0xe]  ;;  %v4223_v13 = vld [vmem:[#allocation5 + $0x60] sm:$0xe]  ;;  %v12064_v61 = vrot.slane %v4222_v30, 9 }
 0x3fb   : > { %13610 = vmatprep.mubr.bf16.mxu0 %v14553_v23  ;;  %v16745_v23 = vrot.slane %v6282_v42, 5  ;;  %v4344_v42 = vrot.slane %v16612_v46, 5  ;;  %v4339_v46 = vrot.slane %v4337_v1, 4  ;;  %v12063_v58 = vrot.slane %v4221_v55, 9  ;;  %v14735_v30 = vld [vmem:[#allocation5 + $0x68] sm:$0x1] }
 0x3fc   : > { %v16785_v18 = vsel %vm16149_vm13, %v4332_v21, %v4333_v38  ;;  %v4358_v21 = vrot.slane %v16630_v22, 5  ;;  %v14560_v38 = vld [vmem:[#allocation5 + $0xb4] sm:$0xff]   ;;  %v12062_v22 = vrot.slane %v4220_v37, 9  ;;  %v4386_v37 = vrot.slane %v16672_v31, 5 }
 0x3fd   : > { %19903 = vst [vmem:[#allocation25_spill] sm:$0xff] %v16745_v23  ;;  %v12065_v55 = vrot.slane %v4223_v13, 9  ;;  %v4226_v13 = vld [vmem:[#allocation5 + $0x84] sm:$0xe] }
 0x3fe   : > { %13235 = vmatmul.mubr.bf16.gmra.mrb[44].mxu1 %v12040_v14  ;;  %v14563_v14 = vld [vmem:[#allocation5 + $0xc0] sm:$0xff]  }
 0x3ff   : > { %13238 = vmatprep.mubr.bf16.mxu1 %v12041_v60  ;;  %v4218_v60 = vld [vmem:[#allocation5 + $0x24] sm:$0xe] }
 0x400   : > { %v12060_v41 = vrot.slane %v4218_v60, 9  ;;  %v4346_v60 = vrot.slane %v4344_v42, 4 }
 0x402   : > { %13611 = vmatmul.mubr.bf16.gmra.mrb[20].mxu0 %v14554_v51  ;;  %v12061_v51 = vrot.slane %v4219_v39, 9  ;;  %v14731_v39 = vld [vmem:[#allocation5 + $0x38] sm:$0x1]  ;;  %v16802_v33 = vsel %vm16149_vm13, %v12060_v41, %v4337_v1  ;;  %v4360_v1 = vrot.slane %v4358_v21, 4  ;;  %v14733_v41 = vld [vmem:[#allocation5 + $0x50] sm:$0x1] }
 0x403   : > { %13614 = vmatprep.mubr.bf16.mxu0 %v14558_v48  ;;  %v4351_v48 = vrot.slane %v16627_v56, 5  ;;  %v4347_v10 = vrot.slane %v14731_v39, 5  ;;  %v14732_v39 = vld [vmem:[#allocation5 + $0x44] sm:$0x1]  ;;  %v4361_v29 = vrot.slane %v14733_v41, 5  ;;  %v4375_v41 = vrot.slane %v14735_v30, 5 }
 0x404   : > { %v16806_v56 = vsel %vm16149_vm13, %v12061_v51, %v4344_v42  ;;  %v4354_v23 = vrot.slane %v14732_v39, 5  ;;  %v4224_v42 = vld [vmem:[#allocation5 + $0x6c] sm:$0xe]  ;;  %v4367_v51 = vrot.slane %v4365_v20, 4 }
 0x405   : > { %v4353_v40 = vrot.slane %v4351_v48, 4  ;;  %v16821_v27 = vsel %vm16149_vm13, %v12062_v22, %v4351_v48  ;;  %v12066_v31 = vrot.slane %v4224_v42, 9  ;;  %v16836_v22 = vsel %vm16149_vm13, %v4360_v1, %v4361_v29  ;;  %v4227_v1 = vld [vmem:[#allocation5 + $0x90] sm:$0xe] }
 0x406   : > { %13239 = vmatmul.mubr.bf16.gmra.mrb[48].mxu1 %v12042_v47  ;;  %v4372_v47 = vrot.slane %v16650_v7, 5  ;;  %v16816_v7 = vsel %vm16149_vm13, %v4346_v60, %v4347_v10  ;;  %v19907_v10 = vcombine.low %v16754_v17, %v16756_v16  ;;  %v16828_v60 = vsel %vm16149_vm13, %v12063_v58, %v4358_v21  ;;  %v14564_v21 = vld [vmem:[#allocation5 + $0xcc] sm:$0xff]  }
 0x407   : > { %13242 = vmatprep.mubr.bf16.mxu1 %v12043_v6  ;;  %v16811_v6 = vsel %vm16149_vm13, %v4339_v46, %v4340_v59  ;;  %v14734_v46 = vld [vmem:[#allocation5 + $0x5c] sm:$0x1]  ;;  %v16832_v48 = vsel %vm16149_vm13, %v4353_v40, %v4354_v23  ;;  %v16840_v17 = vsel %vm16149_vm13, %v12064_v61, %v4365_v20  ;;  %v4393_v58 = vrot.slane %v16684_v35, 5  ;;  %v14737_v40 = vld [vmem:[#allocation5 + $0x80] sm:$0x1] }
 0x408   : > { %v4368_v59 = vrot.slane %v14734_v46, 5  ;;  %v4374_v39 = vrot.slane %v4372_v47, 4  ;;  %v4389_v23 = vrot.slane %v14737_v40, 5  ;;  %v16853_v20 = vsel %vm16149_vm13, %v12065_v55, %v4372_v47  ;;  %v8741_v61 = vld [vmem:[#allocation5 + $0x18] sm:$0xf] }
 0x409   : > { %v12068_v40 = vrot.slane %v4226_v13, 9  ;;  %v19913_v13 = vcombine.low %v16498_v63, %v16506_v25  ;;  %v8838_v55 = vshrl.u32 %v8741_v61, 16  ;;  %v8841_v47 = vshll.u32 %v8741_v61, 16  ;;  %v14740_v61 = vld [vmem:[#allocation5 + $0xa4] sm:$0x1] }
 0x40a   : > { %13615 = vmatmul.mubr.bf16.gmra.mrb[24].mxu0 %v14560_v38  ;;  %v4225_v38 = vld [vmem:[#allocation5 + $0x78] sm:$0xe]  ;;  %v16845_v42 = vsel %vm16149_vm13, %v4367_v51, %v4368_v59  ;;  %v16857_v35 = vsel %vm16149_vm13, %v4374_v39, %v4375_v41  ;;  %v16863_v59 = vsel %vm16149_vm13, %v12066_v31, %v4379_v9  ;;  %v4395_v39 = vrot.slane %v4393_v58, 4  ;;  %v14738_v41 = vld [vmem:[#allocation5 + $0x8c] sm:$0x1] }
 0x40b   : > { %13618 = vmatprep.mubr.bf16.mxu0 %v14563_v14  ;;  %v14736_v14 = vld [vmem:[#allocation5 + $0x74] sm:$0x1]  ;;  %v12067_v30 = vrot.slane %v4225_v38, 9  ;;  %19908 = vst [vmem:[#allocation29_spill] sm:$0xff] %v16857_v35  ;;  %19909 = vst [vmem:[#allocation30_spill] sm:$0xff] %v16863_v59  ;;  %v4396_v29 = vrot.slane %v14738_v41, 5 }
 0x40c   : > { %v4382_v46 = vrot.slane %v14736_v14, 5  ;;  %v14566_v14 = vld [vmem:[#allocation5 + $0xf0] sm:$0xff]   ;;  %v4228_v51 = vld [vmem:[#allocation5 + $0x9c] sm:$0xe]  ;;  %v4400_v41 = vrot.slane %v16687_v3, 5 }
 0x40d   : > { %v16877_v31 = vsel %vm16149_vm13, %v12067_v30, %v4386_v37  ;;  %v16894_v30 = vsel %vm16149_vm13, %v12068_v40, %v4393_v58  ;;  %v12070_v25 = vrot.slane %v4228_v51, 9  ;;  %v16901_v3 = vsel %vm16149_vm13, %v4395_v39, %v4396_v29  ;;  %v4230_v51 = vld [vmem:[#allocation5 + $0xb4] sm:$0xe]  ;;  %v14741_v16 = vld [vmem:[#allocation5 + $0xb0] sm:$0x1] }
 0x40e   : > { %13243 = vmatmul.mubr.bf16.gmra.mrb[52].mxu1 %v12044_v57  ;;  %v4381_v57 = vrot.slane %v4379_v9, 4  ;;  %19911 = vst [vmem:[#allocation32_spill] sm:$0xff] %v16877_v31  ;;  %v8742_v9 = vld [vmem:[#allocation5 + $0x1c] sm:$0xf]  ;;  %19915 = vst [vmem:[#allocation34_spill] sm:$0xff] %v16901_v3  ;;  %v4428_v29 = vrot.slane %v16703_v11, 5 }
 0x40f   : > { %13246 = vmatprep.mubr.bf16.mxu1 %v19907_v10  ;;  %v4388_v10 = vrot.slane %v4386_v37, 4  ;;  %v19914_v37 = vcombine.low %v16540_v0, %v16546_v24  ;;  %v4229_v0 = vld [vmem:[#allocation5 + $0xa8] sm:$0xe]  ;;  %v4414_v24 = vrot.slane %v16697_v50, 5  ;;  %v8847_v40 = vshll.u32 %v8742_v9, 16 }
 0x410   : > { %v16867_v38 = vsel %vm16149_vm13, %v4381_v57, %v4382_v46  ;;  %v12069_v46 = vrot.slane %v4227_v1, 9  ;;  %v4410_v1 = vrot.slane %v14740_v61, 5  ;;  %v8840_v39 = vrot.slane %v8838_v55, 4  ;;  %v4231_v31 = vld [vmem:[#allocation5 + $0xd8] sm:$0xe] }
 0x411   : > { %19910 = vst [vmem:[#allocation31_spill] sm:$0xff] %v16867_v38  ;;  %v16881_v57 = vsel %vm16149_vm13, %v4388_v10, %v4389_v23  ;;  %v14739_v10 = vld [vmem:[#allocation5 + $0x98] sm:$0x1]  ;;  %v4407_v23 = vrot.slane %v16694_v4, 5  ;;  %v4421_v4 = vrot.slane %v16700_v52, 5  ;;  %v12071_v52 = vrot.slane %v4229_v0, 9 }
 0x412   : > { %13619 = vmatmul.mubr.bf16.gmra.mrb[28].mxu0 %v14564_v21  ;;  %19912 = vst [vmem:[#allocation33_spill] sm:$0xff] %v16881_v57  ;;  %v4403_v63 = vrot.slane %v14739_v10, 5  ;;  %v16906_v58 = vsel %vm16149_vm13, %v12069_v46, %v4400_v41  ;;  %v14569_v10 = vld [vmem:[#allocation5 + $0x108] sm:$0xff]   ;;  %v8843_v21 = vrot.slane %v8841_v47, 5  ;;  %v4417_v57 = vrot.slane %v14741_v16, 5 }
 0x413   : > { %13622 = vmatprep.mubr.bf16.mxu0 %v14566_v14  ;;  %v4402_v14 = vrot.slane %v4400_v41, 4  ;;  %v16914_v50 = vsel %vm16149_vm13, %v12070_v25, %v4407_v23  ;;  %v4409_v46 = vrot.slane %v4407_v23, 4  ;;  %v4416_v38 = vrot.slane %v4414_v24, 4  ;;  %v14742_v59 = vld [vmem:[#allocation5 + $0xbc] sm:$0x1] }
 0x414   : > { %19916 = vst [vmem:[#allocation35_spill] sm:$0xff] %v16914_v50  ;;  %v4424_v41 = vrot.slane %v14742_v59, 5  ;;  %v4423_v11 = vrot.slane %v4421_v4, 4  ;;  %v14743_v47 = vld [vmem:[#allocation5 + $0xe0] sm:$0x1]  ;;  %v16916_v61 = vrot.slane %v8847_v40, 5  ;;  %v19917_v25 = vcombine.low %v16552_v43, %v16562_v62 }
 0x415   : > { %v4431_v55 = vrot.slane %v14743_v47, 5  ;;  %v8743_v35 = vld [vmem:[#allocation5 + $0x20] sm:$0x1]  ;;  %v12073_v16 = vrot.slane %v4231_v31, 9  ;;  %v4430_v23 = vrot.slane %v4428_v29, 4  ;;  %v8844_v59 = vor.u32 %v8843_v21, %v8840_v39  ;;  %v14570_v21 = vld [vmem:[#allocation5 + $0x114] sm:$0xff]  }
 0x416   : > { %13247 = vmatmul.mubr.bf16.gmra.mrb[56].mxu1 %v19913_v13  ;;  %v14568_v13 = vld [vmem:[#allocation5 + $0xfc] sm:$0xff]   ;;  %v4232_v0 = vld [vmem:[#allocation5 + $0xe4] sm:$0xe]  ;;  %v16927_v40 = vsel %vm16149_vm13, %v4402_v14, %v4403_v63  ;;  %v8862_v43 = vshrl.u32 %v8744_v28, 16  ;;  %v8865_v62 = vshll.u32 %v8744_v28, 16  ;;  %v16935_v31 = vsel %vm16149_vm13, %v12071_v52, %v4414_v24 }
 0x417   : > { %13250 = vmatprep.mubr.bf16.mxu1 %v19914_v37  ;;  %v8851_v37 = vshrl.u32 %v8742_v9, 16  ;;  %v12072_v9 = vrot.slane %v4230_v51, 9  ;;  %v4435_v51 = vrot.slane %v16706_v19, 5  ;;  %19920 = vst [vmem:[#allocation37_spill] sm:$0xff] %v16935_v31  ;;  %v16939_v19 = vsel %vm16149_vm13, %v4416_v38, %v4417_v57  ;;  %v14744_v28 = vld [vmem:[#allocation5 + $0xec] sm:$0x1] }
 0x418   : > { %19921 = vst [vmem:[#allocation38_spill] sm:$0xff] %v16939_v19  ;;  %v16947_v63 = vsel %vm16149_vm13, %v4423_v11, %v4424_v41  ;;  %v12074_v14 = vrot.slane %v4232_v0, 9  ;;  %v14572_v39 = vld [vmem:[#allocation5 + $0x120] sm:$0xff]   ;;  %v16952_v38 = vsel %vm16149_vm13, %v12073_v16, %v4428_v29  ;;  %v16956_v57 = vsel %vm16149_vm13, %v4430_v23, %v4431_v55  ;;  %v8747_v41 = vld [vmem:[#allocation5 + $0x30] sm:$0xf]  ;;  %v14571_v47 = vld [vmem:[#allocation11 + $0xc8] sm:$0xff]  }
 0x419   : > { %v8853_v3 = vrot.slane %v8851_v37, 4  ;;  %v16931_v37 = vsel %vm16149_vm13, %v4409_v46, %v4410_v1  ;;  %19923 = vst [vmem:[#allocation40_spill] sm:$0xff] %v16947_v63  ;;  %v4438_v1 = vrot.slane %v14744_v28, 5  ;;  %19924 = vst [vmem:[#allocation41_spill] sm:$0xff] %v16952_v38  ;;  %v8748_v11 = vld [vmem:[#allocation5 + $0x34] sm:$0xf]  ;;  %v19926_v28 = vcombine.low %v16772_v36, %v16776_v34 }
 0x41a   : > { %13623 = vmatmul.mubr.bf16.gmra.mrb[32].mxu0 %v14568_v13  ;;  %v19918_v13 = vcombine.low %v16764_v26, %v16768_v53  ;;  %19919 = vst [vmem:[#allocation36_spill] sm:$0xff] %v16931_v37  ;;  %v16943_v26 = vsel %vm16149_vm13, %v12072_v9, %v4421_v4  ;;  %v8857_v53 = vshll.u32 %v8743_v35, 16  ;;  %19925 = vst [vmem:[#allocation42_spill] sm:$0xff] %v16956_v57  ;;  %v4437_v35 = vrot.slane %v4435_v51, 4  ;;  %v4234_v46 = vld [vmem:[#allocation5 + $0xfc] sm:$0xe] }
 0x41b   : > { %13626 = vmatprep.mubr.bf16.mxu0 %v14569_v10  ;;  %19922 = vst [vmem:[#allocation39_spill] sm:$0xff] %v16943_v26  ;;  %v8854_v24 = vor.u32 %v8853_v3, %v16916_v61  ;;  %v8745_v10 = vld [vmem:[#allocation5 + $0x28] sm:$0xf]  ;;  %v16958_v4 = vrot.slane %v8844_v59, 4  ;;  %v8864_v3 = vrot.slane %v8862_v43, 4  ;;  %v8867_v9 = vrot.slane %v8865_v62, 5 }
 0x41c   : > { %v8871_v16 = vshll.u32 %v8745_v10, 16  ;;  %v16974_v0 = vsel %vm16149_vm13, %v12074_v14, %v4435_v51  ;;  %v8750_v43 = vld [vmem:[#allocation5 + $0x3c] sm:$0xf]  ;;  %v8751_v62 = vld [vmem:[#allocation5 + $0x40] sm:$0xf]  ;;  %v8886_v55 = vshrl.u32 %v8747_v41, 16  ;;  %v19927_v51 = vcombine.low %v16781_v8, %v16785_v18 }
 0x41d   : > { %v16976_v59 = vrot.slane %v8854_v24, 4  ;;  %v8895_v29 = vshll.u32 %v8748_v11, 16  ;;  %v8899_v52 = vshrl.u32 %v8748_v11, 16  ;;  %v14574_v14 = vld [vmem:[#allocation5 + $0x12c] sm:$0xff]   ;;  %v14577_v24 = vld [vmem:[#allocation11 + $0xd0] sm:$0xff]   ;;  %v8868_v36 = vor.u32 %v8867_v9, %v8864_v3  ;;  %v14591_v50 = vld [vmem:[#allocation11 + $0xe8] sm:$0xff]  }
 0x41e   : > { %13251 = vmatmul.mubr.bf16.gmra.mrb[60].mxu1 %v19917_v25  ;;  %v16968_v25 = vrot.slane %v8857_v53, 5  ;;  %v8746_v53 = vld [vmem:[#allocation5 + $0x2c] sm:$0x1]  ;;  %v8913_v11 = vshll.u32 %v8750_v43, 16  ;;  %v8919_v8 = vshll.u32 %v8751_v62, 16  ;;  %v8923_v18 = vshrl.u32 %v8751_v62, 16 }
 0x41f   : > { %13270 = vmatprep.mubr.bf16.mxu1 %v19918_v13  ;;  %v8875_v13 = vshrl.u32 %v8745_v10, 16  ;;  %v16987_v10 = vsel %vm16149_vm13, %v4437_v35, %v4438_v1  ;;  %v16998_v35 = vrot.slane %v8871_v16, 5  ;;  %v8881_v23 = vshll.u32 %v8746_v53, 16  ;;  %v8749_v3 = vld [vmem:[#allocation5 + $0x38] sm:$0x1]  ;;  %v14583_v16 = vld [vmem:[#allocation11 + $0xd8] sm:$0xff]  }
 0x420   : > { %v8888_v9 = vrot.slane %v8886_v55, 4  ;;  %v17000_v34 = vrot.slane %v8895_v29, 5  ;;  %v8901_v57 = vrot.slane %v8899_v52, 4  ;;  %v14745_v63 = vld [vmem:[#allocation5 + $0xf8] sm:$0x1]  ;;  %v17004_v53 = vrot.slane %v8919_v8, 5 }
 0x421   : > { %v4445_v26 = vrot.slane %v14745_v63, 5  ;;  %v8752_v19 = vld [vmem:[#allocation5 + $0x44] sm:$0x1]  ;;  %v8925_v31 = vrot.slane %v8923_v18, 4  ;;  %v12076_v55 = vrot.slane %v4234_v46, 9  ;;  %v4449_v52 = vrot.slane %v16712_v2, 5 }
 0x422   : > { %13627 = vmatmul.mubr.bf16.gmra.mrb[36].mxu0 %v14570_v21  ;;  %v8889_v21 = vshll.u32 %v8747_v41, 16  ;;  %v8910_v41 = vshrl.u32 %v8750_v43, 16  ;;  %v17002_v43 = vrot.slane %v8868_v36, 4  ;;  %v17011_v63 = vrot.slane %v8881_v23, 5  ;;  %v4235_v23 = vld [vmem:[#allocation5 + $0x108] sm:$0xe] }
 0x423   : > { %13630 = vmatprep.mubr.bf16.mxu0 %v14572_v39  ;;  %v4442_v39 = vrot.slane %v16709_v49, 5  ;;  %v4463_v8 = vrot.slane %v16718_v5, 5  ;;  %v8753_v18 = vld [vmem:[#allocation5 + $0x48] sm:$0xf]  ;;  %v14748_v37 = vld [vmem:[#allocation5 + $0x11c] sm:$0x1] }
 0x424   : > { %v8891_v49 = vrot.slane %v8889_v21, 5  ;;  %v8912_v1 = vrot.slane %v8910_v41, 4  ;;  %v19928_v21 = vcombine.low %v16802_v33, %v16811_v6  ;;  %v8929_v41 = vshll.u32 %v8752_v19, 16  ;;  %v14746_v6 = vld [vmem:[#allocation5 + $0x104] sm:$0x1]  ;;  %v14589_v19 = vld [vmem:[#allocation11 + $0xe0] sm:$0xff]  }
 0x425   : > { %v4444_v38 = vrot.slane %v4442_v39, 4  ;;  %v4452_v46 = vrot.slane %v14746_v6, 5  ;;  %v4465_v2 = vrot.slane %v4463_v8, 4 }
 0x426   : > { %13271 = vmatmul.mubr.bf16.vlgmr.msra.gmra.mrb[0].mxu1 %v19926_v28  ;;  %v14575_v28 = vld [vmem:[#allocation5 + $0x138] sm:$0xff]   ;;  %v8892_v36 = vor.u32 %v8891_v49, %v8888_v9 }
 0x427   : > { %13335 = vmatpush3.bf16.msra.mxu1 %v16667_v45  ;;  %13274 = vmatprep.mubr.bf16.mxu1 %v19927_v51  ;;  %v4233_v45 = vld [vmem:[#allocation5 + $0xf0] sm:$0xe]  ;;  %v8877_v51 = vrot.slane %v8875_v13, 4  ;;  %v8915_v13 = vrot.slane %v8913_v11, 5  ;;  %v4236_v11 = vld [vmem:[#allocation5 + $0x114] sm:$0xe] }
 0x428   : > { %13336 = vmatprep.subr.bf16.mxu1 %v14571_v47  ;;  %v12075_v62 = vrot.slane %v4233_v45, 9  ;;  %v8902_v45 = vor.u32 %v8901_v57, %v17000_v34  ;;  %v4456_v57 = vrot.slane %v16715_v15, 5  ;;  %v4451_v15 = vrot.slane %v4449_v52, 4 }
 0x429   : > { %v8878_v29 = vor.u32 %v8877_v51, %v16998_v35  ;;  %v8893_v49 = vrot.slane %v8892_v36, 4  ;;  %v12078_v5 = vrot.slane %v4236_v11, 9  ;;  %v8937_v36 = vshll.u32 %v8753_v18, 16 }
 0x42a   : > { %13631 = vmatmul.mubr.bf16.gmra.mrb[40].mxu0 %v14574_v14  ;;  %v19929_v14 = vcombine.low %v16806_v56, %v16816_v7  ;;  %v17023_v33 = vsel %vm16149_vm13, %v12075_v62, %v4442_v39  ;;  %v17028_v56 = vsel %vm16149_vm13, %v4444_v38, %v4445_v26  ;;  %v8916_v7 = vor.u32 %v8915_v13, %v8912_v1  ;;  %v14576_v39 = vld [vmem:[#allocation5 + $0x144] sm:$0xff]   ;;  %v8754_v1 = vld [vmem:[#allocation5 + $0x4c] sm:$0xf]  ;;  %v14747_v13 = vld [vmem:[#allocation5 + $0x110] sm:$0x1] }
 0x42b   : > { %13337 = vmatpush3.bf16.msra.mxu1 %v14571_v47  ;;  %v8905_v47 = vshll.u32 %v8749_v3, 16  ;;  %13634 = vmatprep.mubr.bf16.mxu0 %v14575_v28  ;;  %v14578_v28 = vld [vmem:[#allocation5 + $0x150] sm:$0xff]   ;;  %v8879_v51 = vrot.slane %v8878_v29, 4  ;;  %v17034_v3 = vsel %vm16149_vm13, %v12076_v55, %v4449_v52  ;;  %v8903_v62 = vrot.slane %v8902_v45, 4 }
 0x42c   : > { %13338 = vmatprep.subr.bf16.mxu1 %v14577_v24  ;;  %v8931_v26 = vrot.slane %v8929_v41, 5  ;;  %v12077_v38 = vrot.slane %v4235_v23, 9  ;;  %v8917_v6 = vrot.slane %v8916_v7, 4  ;;  %v4466_v55 = vrot.slane %v14748_v37, 5 }
 0x42d   : > { %v8907_v9 = vrot.slane %v8905_v47, 5  ;;  %v17038_v52 = vsel %vm16149_vm13, %v4451_v15, %v4452_v46  ;;  %v8755_v47 = vld [vmem:[#allocation5 + $0x50] sm:$0x1]  ;;  %v8947_v45 = vshrl.u32 %v8754_v1, 16  ;;  %v19930_v41 = vor.u32 %v16737_v54, %v16735_v44  ;;  %v8756_v54 = vld [vmem:[#allocation5 + $0x54] sm:$0xf] }
 0x42e   : > { %13275 = vmatmul.mubr.bf16.gmra.mrb[4].mxu1 %v19928_v21  ;;  %v4459_v21 = vrot.slane %v14747_v13, 5  ;;  %v19932_v7 = vcombine.low %v16821_v27, %v16832_v48  ;;  %v8884_v37 = vsel %vm15564_vm2, %v8879_v51, %v17011_v63  ;;  %v8898_v46 = vsel %vm15564_vm2, %v8893_v49, %v17000_v34  ;;  %v8757_v15 = vld [vmem:[#allocation5 + $0x58] sm:$0xf]  ;;  %v14581_v49 = vld [vmem:[#allocation5 + $0x168] sm:$0xff]  }
 0x42f   : > { %13278 = vmatprep.mubr.bf16.mxu1 %v19929_v14  ;;  %13339 = vmatpush3.bf16.msra.mxu1 %v14577_v24  ;;  %v8926_v24 = vor.u32 %v8925_v31, %v17004_v53  ;;  %v4458_v31 = vrot.slane %v4456_v57, 4  ;;  %v8934_v14 = vshrl.u32 %v8753_v18, 16  ;;  %v17043_v23 = vrot.slane %v19930_v41, 4  ;;  %v8763_v41 = vld [vmem:[#allocation5 + $0x70] sm:$0xf]  ;;  %v19964_v44 = vld [vmem:[#allocation40_spill] sm:$0xff] }
 0x430   : > { %13340 = vmatprep.subr.bf16.mxu1 %v14583_v16  ;;  %v19933_v11 = vcombine.low %v16828_v60, %v16836_v22  ;;  %v8908_v27 = vsel %vm15564_vm2, %v8903_v62, %v8907_v9  ;;  %v17069_v34 = vsel %vm16149_vm13, %v12078_v5, %v4463_v8  ;;  %v8922_v18 = vsel %vm15564_vm2, %v8917_v6, %v17004_v53  ;;  %v8760_v5 = vld [vmem:[#allocation5 + $0x64] sm:$0xf]  ;;  %v14752_v6 = vld [vmem:[#allocation5 + $0x140] sm:$0x1] }
 0x431   : > { %v8927_v29 = vrot.slane %v8926_v24, 4  ;;  %19931 = vst [vmem:[#allocation43_spill] sm:$0xff] %v17043_v23  ;;  %v17056_v24 = vsel %vm16149_vm13, %v12077_v38, %v4456_v57  ;;  %v17065_v48 = vsel %vm16149_vm13, %v4458_v31, %v4459_v21  ;;  %v8936_v63 = vrot.slane %v8934_v14, 4  ;;  %v14580_v57 = vld [vmem:[#allocation5 + $0x15c] sm:$0xff]  }
 0x432   : > { %13635 = vmatmul.mubr.bf16.gmra.mrb[44].mxu0 %v14576_v39  ;;  %v17078_v22 = vsel %vm16149_vm13, %v4465_v2, %v4466_v55  ;;  %v14593_v39 = vld [vmem:[#allocation11 + $0xf0] sm:$0xff]   ;;  %v8949_v8 = vrot.slane %v8947_v45, 4  ;;  %v8958_v9 = vshrl.u32 %v8756_v54, 16  ;;  %v19934_v62 = vsel %vm15564_vm2, %v16976_v59, %v16968_v25  ;;  %v8758_v31 = vld [vmem:[#allocation5 + $0x5c] sm:$0x1] }
 0x433   : > { %13341 = vmatpush3.bf16.msra.mxu1 %v14583_v16  ;;  %v8943_v16 = vshll.u32 %v8754_v1, 16  ;;  %13638 = vmatprep.mubr.bf16.mxu0 %v14578_v28  ;;  %v8932_v60 = vsel %vm15564_vm2, %v8927_v29, %v8931_v26  ;;  %v8939_v28 = vrot.slane %v8937_v36, 5  ;;  %v19935_v2 = vsel %vm15564_vm2, %v16958_v4, %v16916_v61  ;;  %v8759_v21 = vld [vmem:[#allocation5 + $0x60] sm:$0xf]  ;;  %v8765_v61 = vld [vmem:[#allocation5 + $0x78] sm:$0xf] }
 0x434   : > { %13342 = vmatprep.subr.bf16.mxu1 %v14589_v19  ;;  %v17094_v26 = vcombine.low %v19935_v2, %v19934_v62  ;;  %v19936_v13 = vsel %vm15564_vm2, %v17002_v43, %v16998_v35  ;;  %v17107_v59 = vcombine.low %v8898_v46, %v8908_v27  ;;  %v8961_v4 = vshll.u32 %v8756_v54, 16  ;;  %v8762_v35 = vld [vmem:[#allocation5 + $0x6c] sm:$0xf]  ;;  %v4237_v45 = vld [vmem:[#allocation5 + $0x120] sm:$0xe]  ;;  %v19940_v2 = vld [vmem:[#allocation20_spill] sm:$0xff] }
 0x435   : > { %v17080_v51 = vrot.slane %v8943_v16, 5  ;;  %v17105_v25 = vcombine.low %v19936_v13, %v8884_v37  ;;  %v17111_v14 = vcombine.low %v8922_v18, %v8932_v60  ;;  %v8967_v55 = vshll.u32 %v8757_v15, 16  ;;  %v14595_v43 = vld [vmem:[#allocation11 + $0xf8] sm:$0xff]   ;;  %v19938_v27 = vld [vmem:[#allocation29_spill] sm:$0xff] }
 0x436   : > { %13279 = vmatmul.mubr.bf16.gmra.mrb[8].mxu1 %v19932_v7  ;;  %v17118_v16 = vrot.slane %v8958_v9, 4  ;;  %v19937_v7 = vcombine.low %v16840_v17, %v16845_v42  ;;  %v8982_v37 = vshrl.u32 %v8759_v21, 16  ;;  %v8985_v46 = vshll.u32 %v8759_v21, 16  ;;  %v17129_v21 = vld [vmem:[#allocation5 + $0x12c] sm:$0xe] }
 0x437   : > { %13282 = vmatprep.mubr.bf16.mxu1 %v19933_v11  ;;  %13343 = vmatpush3.bf16.msra.mxu1 %v14589_v19  ;;  %v8953_v19 = vshll.u32 %v8755_v47, 16  ;;  %v8940_v47 = vor.u32 %v8939_v28, %v8936_v63  ;;  %v8950_v36 = vor.u32 %v8949_v8, %v17080_v51  ;;  %v8991_v54 = vshll.u32 %v8760_v5, 16  ;;  %v14582_v28 = vld [vmem:[#allocation5 + $0x174] sm:$0xff]   ;;  %v14753_v1 = vld [vmem:[#allocation5 + $0x14c] sm:$0x1] }
 0x438   : > { %13344 = vmatprep.subr.bf16.mxu1 %v14591_v50  ;;  %v8995_v11 = vshrl.u32 %v8760_v5, 16  ;;  %v8963_v63 = vrot.slane %v8961_v4, 5  ;;  %v8977_v18 = vshll.u32 %v8758_v31, 16  ;;  %v9006_v60 = vshrl.u32 %v8762_v35, 16 }
 0x439   : > { %v17115_v29 = vrot.slane %v8953_v19, 5  ;;  %v9009_v19 = vshll.u32 %v8762_v35, 16  ;;  %v17126_v8 = vrot.slane %v8967_v55, 5  ;;  %v9015_v17 = vshll.u32 %v8763_v41, 16 }
 0x43a   : > { %13639 = vmatmul.mubr.bf16.gmra.mrb[48].mxu0 %v14580_v57  ;;  %v19939_v57 = vcombine.low %v16853_v20, %v19938_v27  ;;  %v9019_v42 = vshrl.u32 %v8763_v41, 16  ;;  %v8941_v9 = vrot.slane %v8940_v47, 4  ;;  %v4470_v13 = vrot.slane %v19940_v2, 5  ;;  %v14584_v20 = vld [vmem:[#allocation5 + $0x180] sm:$0xff]   ;;  %v14749_v47 = vld [vmem:[#allocation5 + $0x128] sm:$0x1] }
 0x43b   : > { %13345 = vmatpush3.bf16.msra.mxu1 %v14591_v50  ;;  %v8971_v50 = vshrl.u32 %v8757_v15, 16  ;;  %13642 = vmatprep.mubr.bf16.mxu0 %v14581_v49  ;;  %v12079_v15 = vrot.slane %v4237_v45, 9  ;;  %v8951_v49 = vrot.slane %v8950_v36, 4  ;;  %v8984_v4 = vrot.slane %v8982_v37, 4  ;;  %v8761_v45 = vld [vmem:[#allocation5 + $0x68] sm:$0x1] }
 0x43c   : > { %13346 = vmatprep.subr.bf16.mxu1 %v14593_v39  ;;  %v8987_v31 = vrot.slane %v8985_v46, 5  ;;  %v17131_v5 = vrot.slane %v8991_v54, 5  ;;  %v8964_v55 = vor.u32 %v8963_v63, %v17118_v16  ;;  %v17134_v35 = vrot.slane %v8977_v18, 5  ;;  %v8764_v27 = vld [vmem:[#allocation5 + $0x74] sm:$0x1]  ;;  %v19941_v63 = vld [vmem:[#allocation21_spill] sm:$0xff] }
 0x43d   : > { %v8973_v62 = vrot.slane %v8971_v50, 4  ;;  %v9008_v41 = vrot.slane %v9006_v60, 4  ;;  %v4473_v36 = vrot.slane %v14749_v47, 5  ;;  %v12080_v50 = vrot.slane %v17129_v21, 9  ;;  %v14750_v46 = vld [vmem:[#allocation11 + $0x100] sm:$0xff]   ;;  %v19942_v18 = vld [vmem:[#allocation30_spill] sm:$0xff] }
 0x43e   : > { %13283 = vmatmul.mubr.bf16.gmra.mrb[12].mxu1 %v19937_v7  ;;  %v9011_v7 = vrot.slane %v9009_v19, 5  ;;  %v9021_v37 = vrot.slane %v9019_v42, 4  ;;  %v8946_v16 = vsel %vm15564_vm2, %v8941_v9, %v17080_v51  ;;  %v19943_v60 = vld [vmem:[#allocation31_spill] sm:$0xff]  ;;  %v8988_v42 = vor.u32 %v8987_v31, %v8984_v4  ;;  %v19945_v21 = vld [vmem:[#allocation32_spill] sm:$0xff]  ;;  %v19946_v51 = vld [vmem:[#allocation33_spill] sm:$0xff] }
 0x43f   : > { %13286 = vmatprep.mubr.bf16.mxu1 %v19939_v57  ;;  %13347 = vmatpush3.bf16.msra.mxu1 %v14593_v39  ;;  %v8997_v39 = vrot.slane %v8995_v11, 4  ;;  %v17137_v57 = vrot.slane %v9015_v17, 5  ;;  %v8974_v54 = vor.u32 %v8973_v62, %v17126_v8  ;;  %v4472_v11 = vrot.slane %v4470_v13, 4  ;;  %v19949_v4 = vld [vmem:[#allocation24_spill] sm:$0xff] }
 0x440   : > { %13348 = vmatprep.subr.bf16.mxu1 %v14595_v43  ;;  %v19944_v19 = vcombine.low %v19942_v18, %v19943_v60  ;;  %v8956_v17 = vsel %vm15564_vm2, %v8951_v49, %v17115_v29  ;;  %v9001_v2 = vshll.u32 %v8761_v45, 16  ;;  %v19947_v9 = vcombine.low %v19945_v21, %v19946_v51 }
 0x441   : > { %v17156_v62 = vsel %vm16149_vm13, %v12079_v15, %v4470_v13  ;;  %v9012_v47 = vor.u32 %v9011_v7, %v9008_v41  ;;  %v8965_v60 = vrot.slane %v8964_v55, 4  ;;  %v9022_v49 = vor.u32 %v9021_v37, %v17137_v57  ;;  %v4240_v41 = vld [vmem:[#allocation5 + $0x144] sm:$0xe]  ;;  %v14587_v7 = vld [vmem:[#allocation5 + $0x198] sm:$0xff]  }
 0x442   : > { %13643 = vmatmul.mubr.bf16.gmra.mrb[52].mxu0 %v14582_v28  ;;  %v8998_v28 = vor.u32 %v8997_v39, %v17131_v5  ;;  %v4491_v31 = vrot.slane %v19949_v4, 5  ;;  %v14586_v39 = vld [vmem:[#allocation5 + $0x18c] sm:$0xff]   ;;  %v17161_v45 = vcombine.low %v8946_v16, %v8956_v17  ;;  %v8975_v21 = vrot.slane %v8974_v54, 4 }
 0x443   : > { %13349 = vmatpush3.bf16.msra.mxu1 %v14595_v43  ;;  %v4477_v43 = vrot.slane %v19941_v63, 5  ;;  %13646 = vmatprep.mubr.bf16.mxu0 %v14584_v20  ;;  %v4239_v63 = vld [vmem:[#allocation5 + $0x138] sm:$0xe]  ;;  %v19948_v20 = vld [vmem:[#allocation22_spill] sm:$0xff]  ;;  %v17165_v15 = vsel %vm16149_vm13, %v4472_v11, %v4473_v36  ;;  %v9003_v55 = vrot.slane %v9001_v2, 5  ;;  %v4487_v4 = vrot.slane %v14752_v6, 5 }
 0x444   : > { %13830 = vmatprep.subr.bf16.mxu1 %v14750_v46  ;;  %v9025_v46 = vshll.u32 %v8764_v27, 16  ;;  %v4484_v18 = vrot.slane %v19948_v20, 5  ;;  %v8989_v27 = vrot.slane %v8988_v42, 4  ;;  %v8999_v51 = vrot.slane %v8998_v28, 4  ;;  %v8766_v36 = vld [vmem:[#allocation5 + $0x7c] sm:$0xf] }
 0x445   : > { %v4479_v13 = vrot.slane %v4477_v43, 4  ;;  %v9013_v20 = vrot.slane %v9012_v47, 4  ;;  %v9023_v16 = vrot.slane %v9022_v49, 4  ;;  %v12082_v17 = vrot.slane %v4240_v41, 9  ;;  %v8769_v41 = vld [vmem:[#allocation5 + $0x88] sm:$0xf] }
 0x446   : > { %13287 = vmatmul.mubr.bf16.gmra.mrb[16].mxu1 %v19944_v19  ;;  %v14751_v19 = vld [vmem:[#allocation5 + $0x134] sm:$0x1]  ;;  %v4486_v37 = vrot.slane %v4484_v18, 4  ;;  %v4493_v54 = vrot.slane %v4491_v31, 4  ;;  %v4494_v38 = vrot.slane %v14753_v1, 5  ;;  %v8970_v11 = vsel %vm15564_vm2, %v8965_v60, %v17126_v8  ;;  %v19950_v1 = vld [vmem:[#allocation34_spill] sm:$0xff] }
 0x447   : > { %13290 = vmatprep.mubr.bf16.mxu1 %v19947_v9  ;;  %v4480_v29 = vrot.slane %v14751_v19, 5  ;;  %v12081_v9 = vrot.slane %v4239_v63, 9  ;;  %v9027_v19 = vrot.slane %v9025_v46, 5  ;;  %v8980_v42 = vsel %vm15564_vm2, %v8975_v21, %v17134_v35  ;;  %v8767_v63 = vld [vmem:[#allocation5 + $0x80] sm:$0x1] }
 0x448   : > { %v17175_v28 = vsel %vm16149_vm13, %v12080_v50, %v4477_v43  ;;  %v19951_v2 = vcombine.low %v16894_v30, %v19950_v1  ;;  %v8994_v8 = vsel %vm15564_vm2, %v8989_v27, %v17131_v5  ;;  %v9004_v35 = vsel %vm15564_vm2, %v8999_v51, %v9003_v55 }
 0x449   : > { %v17179_v6 = vsel %vm16149_vm13, %v4479_v13, %v4480_v29  ;;  %v9030_v47 = vshrl.u32 %v8765_v61, 16  ;;  %v9033_v46 = vshll.u32 %v8765_v61, 16  ;;  %v19952_v50 = vcombine.low %v16906_v58, %v16927_v40  ;;  %v8768_v29 = vld [vmem:[#allocation5 + $0x84] sm:$0xf] }
 0x44a   : > { %13647 = vmatmul.mubr.bf16.gmra.mrb[56].mxu0 %v14586_v39  ;;  %v9018_v43 = vsel %vm15564_vm2, %v9013_v20, %v17137_v57  ;;  %v17197_v30 = vsel %vm16149_vm13, %v12081_v9, %v4484_v18  ;;  %v17201_v5 = vsel %vm16149_vm13, %v4486_v37, %v4487_v4  ;;  %v9039_v60 = vshll.u32 %v8766_v36, 16  ;;  %v14588_v18 = vld [vmem:[#allocation5 + $0x1a4] sm:$0xff]   ;;  %v8770_v4 = vld [vmem:[#allocation5 + $0x8c] sm:$0x1] }
 0x44b   : > { %13650 = vmatprep.mubr.bf16.mxu0 %v14587_v7  ;;  %v9028_v61 = vsel %vm15564_vm2, %v9023_v16, %v9027_v19  ;;  %v17207_v58 = vsel %vm16149_vm13, %v12082_v17, %v4491_v31  ;;  %v17211_v40 = vsel %vm16149_vm13, %v4493_v54, %v4494_v38  ;;  %v9043_v57 = vshrl.u32 %v8766_v36, 16  ;;  %v8771_v7 = vld [vmem:[#allocation5 + $0x90] sm:$0xf]  ;;  %v8772_v38 = vld [vmem:[#allocation5 + $0x94] sm:$0xf] }
 0x44c   : > { %19953 = vst [vmem:[#allocation29_spill] sm:$0xff] %v17207_v58  ;;  %19954 = vst [vmem:[#allocation20_spill] sm:$0xff] %v17211_v40  ;;  %v17213_v49 = vcombine.low %v8970_v11, %v8980_v42  ;;  %v17219_v13 = vcombine.low %v8994_v8, %v9004_v35  ;;  %v9032_v31 = vrot.slane %v9030_v47, 4  ;;  %v9035_v27 = vrot.slane %v9033_v46, 5  ;;  %v8774_v16 = vld [vmem:[#allocation5 + $0x9c] sm:$0xf] }
 0x44d   : > { %v9049_v51 = vshll.u32 %v8767_v63, 16  ;;  %v9054_v55 = vshrl.u32 %v8768_v29, 16  ;;  %v17221_v9 = vcombine.low %v9018_v43, %v9028_v61  ;;  %v17227_v37 = vrot.slane %v9039_v60, 5  ;;  %v8775_v42 = vld [vmem:[#allocation5 + $0xa0] sm:$0xf]  ;;  %v19955_v47 = vld [vmem:[#allocation35_spill] sm:$0xff] }
 0x44e   : > { %13291 = vmatmul.mubr.bf16.gmra.mrb[20].mxu1 %v19951_v2  ;;  %v9045_v17 = vrot.slane %v9043_v57, 4  ;;  %v9057_v54 = vshll.u32 %v8768_v29, 16  ;;  %v9063_v36 = vshll.u32 %v8769_v41, 16  ;;  %v9067_v11 = vshrl.u32 %v8769_v41, 16  ;;  %v19956_v46 = vld [vmem:[#allocation36_spill] sm:$0xff]  ;;  %v19958_v29 = vld [vmem:[#allocation37_spill] sm:$0xff] }
 0x44f   : > { %13294 = vmatprep.mubr.bf16.mxu1 %v19952_v50  ;;  %v9078_v1 = vshrl.u32 %v8771_v7, 16  ;;  %v9081_v2 = vshll.u32 %v8771_v7, 16  ;;  %v9087_v8 = vshll.u32 %v8772_v38, 16  ;;  %v9091_v35 = vshrl.u32 %v8772_v38, 16  ;;  %v19959_v57 = vld [vmem:[#allocation38_spill] sm:$0xff] }
 0x450   : > { %v19957_v50 = vcombine.low %v19955_v47, %v19956_v46  ;;  %v9036_v43 = vor.u32 %v9035_v27, %v9032_v31  ;;  %v17233_v63 = vrot.slane %v9049_v51, 5  ;;  %v9056_v60 = vrot.slane %v9054_v55, 4 }
 0x451   : > { %v9073_v61 = vshll.u32 %v8770_v4, 16  ;;  %v19960_v41 = vcombine.low %v19958_v29, %v19959_v57  ;;  %v9102_v19 = vshrl.u32 %v8774_v16, 16  ;;  %v9105_v7 = vshll.u32 %v8774_v16, 16  ;;  %v19961_v57 = vld [vmem:[#allocation26_spill] sm:$0xff] }
 0x452   : > { %13651 = vmatmul.mubr.bf16.gmra.mrb[60].mxu0 %v14588_v18  ;;  %v4241_v18 = vld [vmem:[#allocation5 + $0x150] sm:$0xe]  ;;  %v9111_v20 = vshll.u32 %v8775_v42, 16  ;;  %v9115_v38 = vshrl.u32 %v8775_v42, 16  ;;  %v9046_v21 = vor.u32 %v9045_v17, %v17227_v37  ;;  %v9059_v47 = vrot.slane %v9057_v54, 5 }
 0x453   : > { %13670 = vmatprep.mubr.bf16.mxu0 %v17094_v26  ;;  %v17239_v46 = vrot.slane %v9063_v36, 5  ;;  %v9069_v26 = vrot.slane %v9067_v11, 4  ;;  %v9080_v31 = vrot.slane %v9078_v1, 4  ;;  %v9083_v27 = vrot.slane %v9081_v2, 5  ;;  %v4242_v42 = vld [vmem:[#allocation5 + $0x15c] sm:$0xe] }
 0x454   : > { %v17241_v51 = vrot.slane %v9087_v8, 5  ;;  %v9093_v55 = vrot.slane %v9091_v35, 4  ;;  %v17243_v4 = vrot.slane %v9036_v43, 4  ;;  %v12083_v29 = vrot.slane %v4241_v18, 9  ;;  %v14592_v11 = vld [vmem:[#allocation11 + $0x208] sm:$0xff]   ;;  %v19962_v35 = vld [vmem:[#allocation27_spill] sm:$0xff] }
 0x455   : > { %v4498_v16 = vrot.slane %v19961_v57, 5  ;;  %v9104_v39 = vrot.slane %v9102_v19, 4  ;;  %v9107_v17 = vrot.slane %v9105_v7, 5  ;;  %v17248_v54 = vrot.slane %v9111_v20, 5  ;;  %v14754_v18 = vld [vmem:[#allocation5 + $0x158] sm:$0x1] }
 0x456   : > { %13295 = vmatmul.mubr.bf16.gmra.mrb[24].mxu1 %v19957_v50  ;;  %v17245_v50 = vrot.slane %v9073_v61, 5  ;;  %v9117_v36 = vrot.slane %v9115_v38, 4  ;;  %v17250_v1 = vrot.slane %v9046_v21, 4  ;;  %v9060_v2 = vor.u32 %v9059_v47, %v9056_v60  ;;  %v8776_v61 = vld [vmem:[#allocation5 + $0xa4] sm:$0x1]  ;;  %v19963_v20 = vld [vmem:[#allocation39_spill] sm:$0xff] }
 0x457   : > { %13298 = vmatprep.mubr.bf16.mxu1 %v19960_v41  ;;  %v8773_v41 = vld [vmem:[#allocation5 + $0x98] sm:$0x1]  ;;  %v9070_v8 = vor.u32 %v9069_v26, %v17239_v46  ;;  %v4505_v43 = vrot.slane %v19962_v35, 5  ;;  %v4501_v57 = vrot.slane %v14754_v18, 5  ;;  %v9084_v53 = vor.u32 %v9083_v27, %v9080_v31  ;;  %v14755_v21 = vld [vmem:[#allocation11 + $0x200] sm:$0xff]   ;;  %v19967_v27 = vld [vmem:[#allocation41_spill] sm:$0xff] }
 0x458   : > { %v9094_v19 = vor.u32 %v9093_v55, %v17241_v51  ;;  %v9097_v7 = vshll.u32 %v8773_v41, 16  ;;  %v19965_v38 = vcombine.low %v19963_v20, %v19964_v44  ;;  %v9042_v60 = vsel %vm15564_vm2, %v17243_v4, %v17227_v37  ;;  %v19966_v26 = vld [vmem:[#allocation28_spill] sm:$0xff]  ;;  %v19968_v55 = vld [vmem:[#allocation42_spill] sm:$0xff]  ;;  %v14594_v44 = vld [vmem:[#allocation11 + $0x210] sm:$0xff]  }
 0x459   : > { %v12084_v47 = vrot.slane %v4242_v42, 9  ;;  %v4512_v31 = vrot.slane %v19966_v26, 5  ;;  %v19969_v41 = vcombine.low %v19967_v27, %v19968_v55  ;;  %v4500_v35 = vrot.slane %v4498_v16, 4  ;;  %v4243_v37 = vld [vmem:[#allocation5 + $0x168] sm:$0xe] }
 0x45a   : > { %13671 = vmatmul.mubr.bf16.vlgmr.msra.gmra.mrb[0].mxu0 %v17105_v25  ;;  %v17265_v25 = vsel %vm16149_vm13, %v12083_v29, %v4498_v16  ;;  %v9108_v18 = vor.u32 %v9107_v17, %v9104_v39  ;;  %v9118_v20 = vor.u32 %v9117_v36, %v17248_v54  ;;  %v9061_v4 = vrot.slane %v9060_v2, 4  ;;  %v14756_v42 = vld [vmem:[#allocation5 + $0x164] sm:$0x1]  ;;  %v8777_v16 = vld [vmem:[#allocation5 + $0xa8] sm:$0xf] }
 0x45b   : > { %13735 = vmatpush3.bf16.msra.mxu0 %v14755_v21  ;;  %13674 = vmatprep.mubr.bf16.mxu0 %v17107_v59  ;;  %v9071_v29 = vrot.slane %v9070_v8, 4  ;;  %v4507_v21 = vrot.slane %v4505_v43, 4  ;;  %v4508_v23 = vrot.slane %v14756_v42, 5  ;;  %v9052_v26 = vsel %vm15564_vm2, %v17250_v1, %v17233_v63  ;;  %v14757_v36 = vld [vmem:[#allocation5 + $0x170] sm:$0x1] }
 0x45c   : > { %13736 = vmatprep.subr.bf16.mxu0 %v14592_v11  ;;  %v9085_v27 = vrot.slane %v9084_v53, 4  ;;  %v9095_v59 = vrot.slane %v9094_v19, 4  ;;  %v9099_v55 = vrot.slane %v9097_v7, 5  ;;  %v12085_v39 = vrot.slane %v4243_v37, 9  ;;  %v14758_v2 = vld [vmem:[#allocation5 + $0x178] sm:$0xf] }
 0x45d   : > { %v4514_v17 = vrot.slane %v4512_v31, 4  ;;  %v4519_v8 = vrot.slane %v14758_v2, 5  ;;  %v17279_v42 = vsel %vm16149_vm13, %v4500_v35, %v4501_v57  ;;  %v9109_v40 = vrot.slane %v9108_v18, 4  ;;  %v14596_v57 = vld [vmem:[#allocation11 + $0x218] sm:$0xff]  }
 0x45e   : > { %13299 = vmatmul.mubr.bf16.gmra.mrb[28].mxu1 %v19965_v38  ;;  %v9121_v38 = vshll.u32 %v8776_v61, 16  ;;  %v4515_v61 = vrot.slane %v14757_v36, 5  ;;  %v9119_v58 = vrot.slane %v9118_v20, 4  ;;  %v9066_v53 = vsel %vm15564_vm2, %v9061_v4, %v17239_v46  ;;  %v8778_v20 = vld [vmem:[#allocation5 + $0xac] sm:$0xf] }
 0x45f   : > { %13302 = vmatprep.mubr.bf16.mxu1 %v19969_v41  ;;  %13737 = vmatpush3.bf16.msra.mxu0 %v14592_v11  ;;  %v4244_v41 = vld [vmem:[#allocation5 + $0x174] sm:$0xe]  ;;  %v9076_v11 = vsel %vm15564_vm2, %v9071_v29, %v17245_v50  ;;  %v17289_v1 = vsel %vm16149_vm13, %v12084_v47, %v4505_v43  ;;  %v17293_v19 = vsel %vm16149_vm13, %v4507_v21, %v4508_v23  ;;  %v9126_v50 = vshrl.u32 %v8777_v16, 16  ;;  %v14759_v47 = vld [vmem:[#allocation5 + $0x17c] sm:$0x1] }
 0x460   : > { %13738 = vmatprep.subr.bf16.mxu0 %v14594_v44  ;;  %v9123_v63 = vrot.slane %v9121_v38, 5  ;;  %v9090_v7 = vsel %vm15564_vm2, %v9085_v27, %v17241_v51  ;;  %v9100_v46 = vsel %vm15564_vm2, %v9095_v59, %v9099_v55  ;;  %v12086_v35 = vrot.slane %v4244_v41, 9  ;;  %v14599_v21 = vld [vmem:[#allocation11 + $0x220] sm:$0xff]   ;;  %v8783_v27 = vld [vmem:[#allocation5 + $0xc0] sm:$0xf] }
 0x461   : > { %v19970_v43 = vcombine.low %v16974_v0, %v16987_v10  ;;  %v17307_v23 = vsel %vm16149_vm13, %v12085_v39, %v4512_v31  ;;  %v4521_v51 = vrot.slane %v4519_v8, 4  ;;  %v4522_v18 = vrot.slane %v14759_v47, 5  ;;  %v8779_v31 = vld [vmem:[#allocation5 + $0xb0] sm:$0x1]  ;;  %v8784_v59 = vld [vmem:[#allocation5 + $0xc4] sm:$0xf] }
 0x462   : > { %13675 = vmatmul.mubr.bf16.gmra.mrb[4].mxu0 %v17111_v14  ;;  %v17311_v14 = vsel %vm16149_vm13, %v4514_v17, %v4515_v61  ;;  %v19971_v38 = vcombine.low %v17023_v33, %v17028_v56  ;;  %v17316_v0 = vcombine.low %v9042_v60, %v9052_v26  ;;  %v9114_v10 = vsel %vm15564_vm2, %v9109_v40, %v17248_v54  ;;  %v8780_v60 = vld [vmem:[#allocation5 + $0xb4] sm:$0xf]  ;;  %v8786_v36 = vld [vmem:[#allocation5 + $0xcc] sm:$0xf] }
 0x463   : > { %13678 = vmatprep.mubr.bf16.mxu0 %v17161_v45  ;;  %13739 = vmatpush3.bf16.msra.mxu0 %v14594_v44  ;;  %v9124_v45 = vsel %vm15564_vm2, %v9119_v58, %v9123_v63  ;;  %v9129_v37 = vshll.u32 %v8777_v16, 16  ;;  %v17323_v4 = vcombine.low %v9066_v53, %v9076_v11  ;;  %v12115_v29 = vcombine.low %v17265_v25, %v17279_v42  ;;  %v8781_v44 = vld [vmem:[#allocation5 + $0xb8] sm:$0xf] }
 0x464   : > { %v12116_v33 = vcombine.low %v17289_v1, %v17293_v19  ;;  %v17329_v56 = vcombine.low %v9090_v7, %v9100_v46  ;;  %13740 = vmatprep.subr.bf16.mxu0 %v14596_v57  ;;  %v12117_v40 = vcombine.low %v17307_v23, %v17311_v14  ;;  %v17335_v58 = vsel %vm16149_vm13, %v12086_v35, %v4519_v8  ;;  %v8787_v8 = vld [vmem:[#allocation5 + $0xd0] sm:$0xf]  ;;  %v14604_v35 = vld [vmem:[#allocation11 + $0x228] sm:$0xff]  }
 0x465   : > { %v9128_v54 = vrot.slane %v9126_v50, 4  ;;  %v9135_v26 = vshll.u32 %v8778_v20, 16  ;;  %v17337_v55 = vcombine.low %v9114_v10, %v9124_v45  ;;  %v17341_v16 = vsel %vm16149_vm13, %v4521_v51, %v4522_v18 }
 0x466   : > { %13303 = vmatmul.mubr.bf16.gmra.mrb[32].mxu1 %v19970_v43  ;;  %v9139_v39 = vshrl.u32 %v8778_v20, 16  ;;  %v9145_v17 = vshll.u32 %v8779_v31, 16  ;;  %v9131_v61 = vrot.slane %v9129_v37, 5  ;;  %v9150_v41 = vshrl.u32 %v8780_v60, 16  ;;  %v8782_v43 = vld [vmem:[#allocation5 + $0xbc] sm:$0x1] }
 0x467   : > { %13306 = vmatprep.mubr.bf16.mxu1 %v19971_v38  ;;  %v9153_v2 = vshll.u32 %v8780_v60, 16  ;;  %v9159_v63 = vshll.u32 %v8781_v44, 16  ;;  %13741 = vmatpush3.bf16.msra.mxu0 %v14596_v57  ;;  %v9163_v53 = vshrl.u32 %v8781_v44, 16  ;;  %v9174_v11 = vshrl.u32 %v8783_v27, 16  ;;  %v8789_v31 = vld [vmem:[#allocation5 + $0xf0] sm:$0xf] }
 0x468   : > { %v9177_v7 = vshll.u32 %v8783_v27, 16  ;;  %v9183_v46 = vshll.u32 %v8784_v59, 16  ;;  %13742 = vmatprep.subr.bf16.mxu0 %v14599_v21  ;;  %v17344_v50 = vrot.slane %v9135_v26, 5  ;;  %v9187_v51 = vshrl.u32 %v8784_v59, 16  ;;  %v17357_v27 = vld [vmem:[#allocation5 + $0x180] sm:$0xe] }
 0x469   : > { %v9198_v47 = vshrl.u32 %v8786_v36, 16  ;;  %v9201_v18 = vshll.u32 %v8786_v36, 16  ;;  %v19972_v20 = vcombine.low %v17034_v3, %v17038_v52  ;;  %v9141_v57 = vrot.slane %v9139_v39, 4  ;;  %v14609_v39 = vld [vmem:[#allocation11 + $0x230] sm:$0xff]  }
 0x46a   : > { %13679 = vmatmul.mubr.bf16.gmra.mrb[8].mxu0 %v17213_v49  ;;  %v17350_v38 = vrot.slane %v9145_v17, 5  ;;  %v9207_v10 = vshll.u32 %v8787_v8, 16  ;;  %v9211_v45 = vshrl.u32 %v8787_v8, 16  ;;  %v19973_v49 = vcombine.low %v17056_v24, %v17065_v48  ;;  %v8785_v17 = vld [vmem:[#allocation5 + $0xc8] sm:$0x1] }
 0x46b   : > { %13682 = vmatprep.mubr.bf16.mxu0 %v17219_v13  ;;  %v9132_v37 = vor.u32 %v9131_v61, %v9128_v54  ;;  %v9152_v60 = vrot.slane %v9150_v41, 4  ;;  %v9155_v44 = vrot.slane %v9153_v2, 5  ;;  %v17355_v26 = vrot.slane %v9159_v63, 5  ;;  %13743 = vmatpush3.bf16.msra.mxu0 %v14599_v21  ;;  %v8788_v61 = vld [vmem:[#allocation5 + $0xd4] sm:$0x1] }
 0x46c   : > { %v9165_v3 = vrot.slane %v9163_v53, 4  ;;  %v9176_v52 = vrot.slane %v9174_v11, 4  ;;  %v9179_v13 = vrot.slane %v9177_v7, 5  ;;  %v17359_v59 = vrot.slane %v9183_v46, 5  ;;  %13744 = vmatprep.subr.bf16.mxu0 %v14604_v35  ;;  %v14760_v11 = vld [vmem:[#allocation5 + $0x184] sm:$0xf] }
 0x46d   : > { %v9189_v36 = vrot.slane %v9187_v51, 4  ;;  %v9200_v8 = vrot.slane %v9198_v47, 4  ;;  %v9203_v24 = vrot.slane %v9201_v18, 5  ;;  %v9222_v48 = vshrl.u32 %v8789_v31, 16  ;;  %v8790_v46 = vld [vmem:[#allocation5 + $0xf4] sm:$0xf] }
 0x46e   : > { %13307 = vmatmul.mubr.bf16.gmra.mrb[36].mxu1 %v19972_v20  ;;  %v9169_v54 = vshll.u32 %v8782_v43, 16  ;;  %v17361_v41 = vrot.slane %v9207_v10, 5  ;;  %v9213_v2 = vrot.slane %v9211_v45, 4  ;;  %v9225_v63 = vshll.u32 %v8789_v31, 16  ;;  %v17368_v18 = vld [vmem:[#allocation5 + $0x18c] sm:$0xe] }
 0x46f   : > { %13310 = vmatprep.mubr.bf16.mxu1 %v19973_v49  ;;  %v17363_v20 = vrot.slane %v9132_v37, 4  ;;  %v9142_v21 = vor.u32 %v9141_v57, %v17344_v50  ;;  %v12087_v53 = vrot.slane %v17357_v27, 9  ;;  %v4526_v7 = vrot.slane %v14760_v11, 5  ;;  %13745 = vmatpush3.bf16.msra.mxu0 %v14604_v35  ;;  %v14614_v45 = vld [vmem:[#allocation11 + $0x238] sm:$0xff]   ;;  %v8792_v11 = vld [vmem:[#allocation5 + $0xfc] sm:$0xf] }
 0x470   : > { %v9156_v51 = vor.u32 %v9155_v44, %v9152_v60  ;;  %v9166_v47 = vor.u32 %v9165_v3, %v17355_v26  ;;  %v9180_v43 = vor.u32 %v9179_v13, %v9176_v52  ;;  %v9193_v10 = vshll.u32 %v8785_v17, 16  ;;  %13746 = vmatprep.subr.bf16.mxu0 %v14609_v39  ;;  %v14761_v17 = vld [vmem:[#allocation5 + $0x188] sm:$0x1] }
 0x471   : > { %v9190_v31 = vor.u32 %v9189_v36, %v17359_v59  ;;  %v9204_v57 = vor.u32 %v9203_v24, %v9200_v8  ;;  %v9217_v49 = vshll.u32 %v8788_v61, 16  ;;  %v9224_v37 = vrot.slane %v9222_v48, 4 }
 0x472   : > { %13683 = vmatmul.mubr.bf16.gmra.mrb[12].mxu0 %v17221_v9  ;;  %v19974_v27 = vcombine.low %v17069_v34, %v17078_v22  ;;  %v9214_v35 = vor.u32 %v9213_v2, %v17361_v41  ;;  %v9227_v60 = vrot.slane %v9225_v63, 5  ;;  %v9231_v44 = vshll.u32 %v8790_v46, 16 }
 0x473   : > { %13686 = vmatprep.mubr.bf16.mxu0 %v17316_v0  ;;  %v9235_v3 = vshrl.u32 %v8790_v46, 16  ;;  %v19975_v52 = vcombine.low %v17156_v62, %v17165_v15  ;;  %v9143_v9 = vrot.slane %v9142_v21, 4  ;;  %v9171_v13 = vrot.slane %v9169_v54, 5  ;;  %13747 = vmatpush3.bf16.msra.mxu0 %v14609_v39  ;;  %v8791_v62 = vld [vmem:[#allocation5 + $0xf8] sm:$0x1] }
 0x474   : > { %v4529_v36 = vrot.slane %v14761_v17, 5  ;;  %v12088_v8 = vrot.slane %v17368_v18, 9  ;;  %v9157_v34 = vrot.slane %v9156_v51, 4  ;;  %v9167_v22 = vrot.slane %v9166_v47, 4  ;;  %13748 = vmatprep.subr.bf16.mxu0 %v14614_v45  ;;  %v14762_v18 = vld [vmem:[#allocation5 + $0x190] sm:$0xf] }
 0x475   : > { %v4528_v24 = vrot.slane %v4526_v7, 4  ;;  %v9181_v0 = vrot.slane %v9180_v43, 4  ;;  %v9191_v48 = vrot.slane %v9190_v31, 4  ;;  %v9195_v61 = vrot.slane %v9193_v10, 5 }
 0x476   : > { %13311 = vmatmul.mubr.bf16.gmra.mrb[40].mxu1 %v19974_v27  ;;  %v9205_v2 = vrot.slane %v9204_v57, 4  ;;  %v9219_v63 = vrot.slane %v9217_v49, 5  ;;  %v9215_v46 = vrot.slane %v9214_v35, 4  ;;  %v9228_v15 = vor.u32 %v9227_v60, %v9224_v37 }
 0x477   : > { %13314 = vmatprep.mubr.bf16.mxu1 %v19975_v52  ;;  %v17381_v21 = vrot.slane %v9231_v44, 5  ;;  %v9237_v54 = vrot.slane %v9235_v3, 4  ;;  %v9138_v39 = vsel %vm15564_vm2, %v17363_v20, %v17344_v50  ;;  %v9148_v51 = vsel %vm15564_vm2, %v9143_v9, %v17350_v38  ;;  %13749 = vmatpush3.bf16.msra.mxu0 %v14614_v45  ;;  %v8793_v20 = vld [vmem:[#allocation5 + $0x100] sm:$0xf]  ;;  %v8796_v9 = vld [vmem:[#allocation5 + $0x10c] sm:$0xf] }
 0x478   : > { %v17392_v47 = vsel %vm16149_vm13, %v12087_v53, %v4526_v7  ;;  %v4533_v43 = vrot.slane %v14762_v18, 5  ;;  %v9162_v10 = vsel %vm15564_vm2, %v9157_v34, %v17355_v26  ;;  %v9172_v31 = vsel %vm15564_vm2, %v9167_v22, %v9171_v13  ;;  %v8798_v22 = vld [vmem:[#allocation5 + $0x114] sm:$0xf] }
 0x479   : > { %v17401_v50 = vsel %vm16149_vm13, %v4528_v24, %v4529_v36  ;;  %v9186_v38 = vsel %vm15564_vm2, %v9181_v0, %v17359_v59  ;;  %v9196_v53 = vsel %vm15564_vm2, %v9191_v48, %v9195_v61  ;;  %v9210_v26 = vsel %vm15564_vm2, %v9205_v2, %v17361_v41  ;;  %v8799_v24 = vld [vmem:[#allocation5 + $0x118] sm:$0xf]  ;;  %v8801_v2 = vld [vmem:[#allocation5 + $0x120] sm:$0xf] }
 0x47a   : > { %13687 = vmatmul.mubr.bf16.gmra.mrb[16].mxu0 %v17323_v4  ;;  %v9241_v7 = vshll.u32 %v8791_v62, 16  ;;  %v9246_v45 = vshrl.u32 %v8792_v11, 16  ;;  %v19976_v57 = vcombine.low %v17175_v28, %v17179_v6  ;;  %v9220_v59 = vsel %vm15564_vm2, %v9215_v46, %v9219_v63  ;;  %v17426_v28 = vld [vmem:[#allocation5 + $0x194] sm:$0x1] }
 0x47b   : > { %13690 = vmatprep.mubr.bf16.mxu0 %v17329_v56  ;;  %v17418_v49 = vrot.slane %v9228_v15, 4  ;;  %v9238_v4 = vor.u32 %v9237_v54, %v17381_v21  ;;  %v9249_v37 = vshll.u32 %v8792_v11, 16  ;;  %v19977_v27 = vcombine.low %v17197_v30, %v17201_v5  ;;  %v8794_v56 = vld [vmem:[#allocation5 + $0x104] sm:$0x1]  ;;  %v8795_v5 = vld [vmem:[#allocation5 + $0x108] sm:$0xf] }
 0x47c   : > { %v12118_v41 = vcombine.low %v17335_v58, %v17341_v16  ;;  %v12333_v35 = vcombine.low %v9138_v39, %v9148_v51  ;;  %v4536_v6 = vrot.slane %v17426_v28, 5  ;;  %v9255_v60 = vshll.u32 %v8793_v20, 16  ;;  %v8802_v15 = vld [vmem:[#allocation5 + $0x124] sm:$0xf] }
 0x47d   : > { %v17429_v44 = vcombine.low %v9162_v10, %v9172_v31  ;;  %v12119_v3 = vcombine.low %v17392_v47, %v17401_v50  ;;  %v17435_v52 = vsel %vm16149_vm13, %v12088_v8, %v4533_v43  ;;  %v17437_v30 = vrot.slane %v4533_v43, 4  ;;  %v8812_v47 = vld [vmem:[#allocation5 + $0x14c] sm:$0x1]  ;;  %v8814_v50 = vld [vmem:[#allocation5 + $0x154] sm:$0xf] }
 0x47e   : > { %13315 = vmatmul.mubr.bf16.gmra.mrb[44].mxu1 %v19976_v57  ;;  %v17439_v13 = vcombine.low %v9186_v38, %v9196_v53  ;;  %v17441_v17 = vcombine.low %v9210_v26, %v9220_v59  ;;  %v9243_v36 = vrot.slane %v9241_v7, 5  ;;  %v9248_v34 = vrot.slane %v9246_v45, 4  ;;  %v19978_v38 = vld [vmem:[#allocation29_spill] sm:$0xff]  ;;  %v19979_v53 = vld [vmem:[#allocation20_spill] sm:$0xff]  ;;  %v8797_v45 = vld [vmem:[#allocation5 + $0x110] sm:$0x1] }
 0x47f   : > { %13318 = vmatprep.mubr.bf16.mxu1 %v19977_v27  ;;  %v9234_v0 = vsel %vm15564_vm2, %v17418_v49, %v17381_v21  ;;  %v9239_v48 = vrot.slane %v9238_v4, 4  ;;  %v9251_v8 = vrot.slane %v9249_v37, 5  ;;  %v9259_v61 = vshrl.u32 %v8793_v20, 16  ;;  %v8804_v27 = vld [vmem:[#allocation5 + $0x12c] sm:$0xf] }
 0x480   : > { %v17447_v63 = vrot.slane %v9255_v60, 5  ;;  %v9265_v11 = vshll.u32 %v8794_v56, 16  ;;  %v9270_v46 = vshrl.u32 %v8795_v5, 16  ;;  %v9273_v62 = vshll.u32 %v8795_v5, 16 }
 0x481   : > { %v9279_v54 = vshll.u32 %v8796_v9, 16  ;;  %v9283_v39 = vshrl.u32 %v8796_v9, 16  ;;  %v9294_v51 = vshrl.u32 %v8798_v22, 16  ;;  %v9297_v18 = vshll.u32 %v8798_v22, 16  ;;  %v8805_v9 = vld [vmem:[#allocation5 + $0x130] sm:$0xf] }
 0x482   : > { %13691 = vmatmul.mubr.bf16.gmra.mrb[20].mxu0 %v17337_v55  ;;  %v9303_v43 = vshll.u32 %v8799_v24, 16  ;;  %v9307_v10 = vshrl.u32 %v8799_v24, 16  ;;  %v9318_v31 = vshrl.u32 %v8801_v2, 16  ;;  %v9321_v21 = vshll.u32 %v8801_v2, 16 }
 0x483   : > { %v19980_v20 = vcombine.low %v19978_v38, %v19979_v53  ;;  %13694 = vmatprep.mubr.bf16.mxu0 %v12333_v35  ;;  %v9252_v26 = vor.u32 %v9251_v8, %v9248_v34  ;;  %v9261_v7 = vrot.slane %v9259_v61, 4  ;;  %v9327_v57 = vshll.u32 %v8802_v15, 16  ;;  %v8800_v34 = vld [vmem:[#allocation5 + $0x11c] sm:$0x1] }
 0x484   : > { %v9331_v59 = vshrl.u32 %v8802_v15, 16  ;;  %v9244_v55 = vsel %vm15564_vm2, %v9239_v48, %v9243_v36  ;;  %v17458_v49 = vrot.slane %v9265_v11, 5  ;;  %v9272_v4 = vrot.slane %v9270_v46, 4 }
 0x485   : > { %v9275_v37 = vrot.slane %v9273_v62, 5  ;;  %v17460_v56 = vrot.slane %v9279_v54, 5  ;;  %v9285_v35 = vrot.slane %v9283_v39, 4  ;;  %v9296_v60 = vrot.slane %v9294_v51, 4 }
 0x486   : > { %13319 = vmatmul.mubr.bf16.gmra.mrb[48].mxu1 %v19980_v20  ;;  %v9299_v5 = vrot.slane %v9297_v18, 5  ;;  %v17462_v22 = vrot.slane %v9303_v43, 5  ;;  %v9309_v24 = vrot.slane %v9307_v10, 4  ;;  %v9320_v25 = vrot.slane %v9318_v31, 4 }
 0x487   : > { %13322 = vmatprep.mubr.bf16.mxu1 %v12115_v29  ;;  %v9323_v42 = vrot.slane %v9321_v21, 5  ;;  %v8803_v29 = vld [vmem:[#allocation5 + $0x128] sm:$0x1]  ;;  %v17464_v8 = vrot.slane %v9327_v57, 5  ;;  %v9333_v36 = vrot.slane %v9331_v59, 4  ;;  %v9342_v48 = vshrl.u32 %v8804_v27, 16 }
 0x488   : > { %v9345_v61 = vshll.u32 %v8804_v27, 16  ;;  %v9262_v2 = vor.u32 %v9261_v7, %v17447_v63  ;;  %v9289_v11 = vshll.u32 %v8797_v45, 16  ;;  %v9351_v46 = vshll.u32 %v8805_v9, 16  ;;  %v8807_v7 = vld [vmem:[#allocation5 + $0x138] sm:$0xf] }
 0x489   : > { %v9355_v62 = vshrl.u32 %v8805_v9, 16  ;;  %v9276_v15 = vor.u32 %v9275_v37, %v9272_v4  ;;  %v9286_v54 = vor.u32 %v9285_v35, %v17460_v56  ;;  %v9300_v39 = vor.u32 %v9299_v5, %v9296_v60  ;;  %v8808_v59 = vld [vmem:[#allocation5 + $0x13c] sm:$0xf] }
 0x48a   : > { %v9313_v51 = vshll.u32 %v8800_v34, 16  ;;  %13695 = vmatmul.mubr.bf16.gmra.mrb[24].mxu0 %v17429_v44  ;;  %v12337_v18 = vcombine.low %v9234_v0, %v9244_v55  ;;  %v17469_v43 = vrot.slane %v9252_v26, 4  ;;  %v9310_v10 = vor.u32 %v9309_v24, %v17462_v22  ;;  %v8806_v26 = vld [vmem:[#allocation5 + $0x134] sm:$0x1] }
 0x48b   : > { %v9337_v31 = vshll.u32 %v8803_v29, 16  ;;  %13698 = vmatprep.mubr.bf16.mxu0 %v17439_v13  ;;  %v9324_v21 = vor.u32 %v9323_v42, %v9320_v25  ;;  %v9334_v38 = vor.u32 %v9333_v36, %v17464_v8  ;;  %v9344_v53 = vrot.slane %v9342_v48, 4  ;;  %v8811_v48 = vld [vmem:[#allocation5 + $0x148] sm:$0xf] }
 0x48c   : > { %v9347_v20 = vrot.slane %v9345_v61, 5  ;;  %v9263_v44 = vrot.slane %v9262_v2, 4  ;;  %v9291_v0 = vrot.slane %v9289_v11, 5  ;;  %v17480_v45 = vrot.slane %v9351_v46, 5  ;;  %v8813_v11 = vld [vmem:[#allocation5 + $0x150] sm:$0xf] }
 0x48d   : > { %v9357_v57 = vrot.slane %v9355_v62, 4  ;;  %v9277_v1 = vrot.slane %v9276_v15, 4  ;;  %v9287_v19 = vrot.slane %v9286_v54, 4  ;;  %v9315_v13 = vrot.slane %v9313_v51, 5 }
 0x48e   : > { %13323 = vmatmul.mubr.bf16.gmra.mrb[52].mxu1 %v12116_v33  ;;  %v9301_v33 = vrot.slane %v9300_v39, 4  ;;  %v9311_v55 = vrot.slane %v9310_v10, 4  ;;  %v9339_v4 = vrot.slane %v9337_v31, 5  ;;  %v9366_v37 = vshrl.u32 %v8807_v7, 16 }
 0x48f   : > { %13326 = vmatprep.mubr.bf16.mxu1 %v12117_v40  ;;  %v9369_v27 = vshll.u32 %v8807_v7, 16  ;;  %v9325_v35 = vrot.slane %v9324_v21, 4  ;;  %v9335_v60 = vrot.slane %v9334_v38, 4  ;;  %v9348_v5 = vor.u32 %v9347_v20, %v9344_v53  ;;  %v14597_v21 = vld [vmem:[#allocation5 + $0xc] sm:$0xff]   ;;  %v8816_v7 = vld [vmem:[#allocation5 + $0x15c] sm:$0xf] }
 0x490   : > { %v9361_v23 = vshll.u32 %v8806_v26, 16  ;;  %v4537_v14 = vsel %vm16149_vm13, %v17437_v30, %v4536_v6  ;;  %v9358_v40 = vor.u32 %v9357_v57, %v17480_v45  ;;  %v9375_v9 = vshll.u32 %v8808_v59, 16  ;;  %v8809_v30 = vld [vmem:[#allocation5 + $0x140] sm:$0x1] }
 0x491   : > { %v9379_v34 = vshrl.u32 %v8808_v59, 16  ;;  %v9258_v24 = vsel %vm15564_vm2, %v17469_v43, %v17447_v63  ;;  %v9268_v25 = vsel %vm15564_vm2, %v9263_v44, %v17458_v49  ;;  %v9282_v28 = vsel %vm15564_vm2, %v9277_v1, %v17460_v56  ;;  %v8810_v49 = vld [vmem:[#allocation5 + $0x144] sm:$0xf]  ;;  %v8817_v44 = vld [vmem:[#allocation5 + $0x160] sm:$0xf] }
 0x492   : > { %v9292_v6 = vsel %vm15564_vm2, %v9287_v19, %v9291_v0  ;;  %13699 = vmatmul.mubr.bf16.gmra.mrb[28].mxu0 %v17441_v17  ;;  %v9306_v42 = vsel %vm15564_vm2, %v9301_v33, %v17462_v22  ;;  %v9316_v63 = vsel %vm15564_vm2, %v9311_v55, %v9315_v13  ;;  %v9368_v29 = vrot.slane %v9366_v37, 4  ;;  %v5809_v19 = vld [vmem:[#allocation5 + $0xf0] sm:$0xf] }
 0x493   : > { %v9371_v36 = vrot.slane %v9369_v27, 5  ;;  %13702 = vmatprep.mubr.bf16.mxu0 %v12337_v18  ;;  %v9330_v17 = vsel %vm15564_vm2, %v9325_v35, %v17464_v8  ;;  %v9340_v56 = vsel %vm15564_vm2, %v9335_v60, %v9339_v4  ;;  %v17514_v22 = vrot.slane %v9348_v5, 4 }
 0x494   : > { %v17516_v61 = vrot.slane %v9361_v23, 5  ;;  %v17521_v2 = vrot.slane %v9358_v40, 4  ;;  %v17523_v58 = vrot.slane %v9375_v9, 5  ;;  %v9381_v16 = vrot.slane %v9379_v34, 4  ;;  %v19981_v34 = vld [vmem:[#allocation25_spill] sm:$0xff] }
 0x495   : > { %v9390_v46 = vshrl.u32 %v8810_v49, 16  ;;  %v9393_v8 = vshll.u32 %v8810_v49, 16  ;;  %v9399_v62 = vshll.u32 %v8811_v48, 16  ;;  %v9403_v15 = vshrl.u32 %v8811_v48, 16 }
 0x496   : > { %13327 = vmatmul.mubr.bf16.gmra.mrb[56].mxu1 %v12118_v41  ;;  %v9385_v41 = vshll.u32 %v8809_v30, 16  ;;  %v12120_v54 = vcombine.low %v17435_v52, %v4537_v14  ;;  %v12338_v39 = vcombine.low %v9258_v24, %v9268_v25  ;;  %v12339_v51 = vcombine.low %v9282_v28, %v9292_v6  ;;  %v19982_v24 = vld [vmem:[#allocation43_spill] sm:$0xff]  ;;  %v8815_v28 = vld [vmem:[#allocation5 + $0x158] sm:$0x1] }
 0x497   : > { %13330 = vmatprep.mubr.bf16.mxu1 %v12119_v3  ;;  %v9372_v18 = vor.u32 %v9371_v36, %v9368_v29  ;;  %v12340_v43 = vcombine.low %v9306_v42, %v9316_v63  ;;  %v17526_v10 = vcombine.low %v9330_v17, %v9340_v56  ;;  %v9414_v3 = vshrl.u32 %v8813_v11, 16  ;;  %v14598_v29 = vld [vmem:[#allocation5 + $0x18] sm:$0xff]   ;;  %v8819_v56 = vld [vmem:[#allocation5 + $0x168] sm:$0xf] }
 0x498   : > { %v9417_v31 = vshll.u32 %v8813_v11, 16  ;;  %v9354_v38 = vsel %vm15564_vm2, %v17514_v22, %v17480_v45  ;;  %v9364_v52 = vsel %vm15564_vm2, %v17521_v2, %v17516_v61  ;;  %v9382_v53 = vor.u32 %v9381_v16, %v17523_v58  ;;  %v14600_v22 = vld [vmem:[#allocation5 + $0x24] sm:$0xff]  }
 0x499   : > { %v17537_v20 = vrot.slane %v9385_v41, 5  ;;  %v9392_v0 = vrot.slane %v9390_v46, 4  ;;  %v9395_v26 = vrot.slane %v9393_v8, 5  ;;  %v17539_v57 = vrot.slane %v9399_v62, 5  ;;  %v8820_v41 = vld [vmem:[#allocation5 + $0x16c] sm:$0xf] }
 0x49a   : > { %v9405_v1 = vrot.slane %v9403_v15, 4  ;;  %13703 = vmatmul.mubr.bf16.gmra.mrb[32].mxu0 %v12338_v39  ;;  %v17541_v33 = vrot.slane %v9372_v18, 4  ;;  %v9409_v45 = vshll.u32 %v8812_v47, 16  ;;  %v9423_v13 = vshll.u32 %v8814_v50, 16  ;;  %v8818_v15 = vld [vmem:[#allocation5 + $0x164] sm:$0x1] }
 0x49b   : > { %v9427_v59 = vshrl.u32 %v8814_v50, 16  ;;  %13706 = vmatprep.mubr.bf16.mxu0 %v12339_v51  ;;  %v9416_v55 = vrot.slane %v9414_v3, 4  ;;  %v9419_v4 = vrot.slane %v9417_v31, 5  ;;  %v9438_v37 = vshrl.u32 %v8816_v7, 16 }
 0x49c   : > { %v9441_v27 = vshll.u32 %v8816_v7, 16  ;;  %v9447_v35 = vshll.u32 %v8817_v44, 16  ;;  %v9451_v60 = vshrl.u32 %v8817_v44, 16  ;;  %v6263_v5 = vshrl.u32 %v5809_v19, 16  ;;  %v8822_v7 = vld [vmem:[#allocation5 + $0x174] sm:$0xf] }
 0x49d   : > { %v6266_v23 = vshll.u32 %v5809_v19, 16  ;;  %v9383_v14 = vrot.slane %v9382_v53, 4  ;;  %v9396_v40 = vor.u32 %v9395_v26, %v9392_v0  ;;  %v9406_v9 = vor.u32 %v9405_v1, %v17539_v57  ;;  %v19983_v44 = vld [vmem:[#allocation23_spill] sm:$0xff]  ;;  %v14765_v26 = vld [vmem:[#allocation11 + $0x108] sm:$0xff]  }
 0x49e   : > { %13331 = vmatmul.mubr.bf16.gmra.mrb[60].mxu1 %v12120_v54  ;;  %v6285_v25 = vsel %vm15564_vm2, %v19982_v24, %v19981_v34  ;;  %v17548_v6 = vrot.slane %v9423_v13, 5  ;;  %v9429_v30 = vrot.slane %v9427_v59, 4  ;;  %v6265_v42 = vrot.slane %v6263_v5, 4  ;;  %v8821_v1 = vld [vmem:[#allocation5 + $0x170] sm:$0x1]  ;;  %v14766_v24 = vld [vmem:[#allocation11 + $0x110] sm:$0xff]  }
 0x49f   : > { %13350 = vmatprep.mubr.bf16.mxu1 %v14597_v21  ;;  %v6268_v63 = vrot.slane %v6266_v23, 5  ;;  %v9378_v36 = vsel %vm15564_vm2, %v17541_v33, %v17523_v58  ;;  %v17554_v49 = vrot.slane %v9409_v45, 5  ;;  %v9420_v48 = vor.u32 %v9419_v4, %v9416_v55  ;;  %v14764_v21 = vld [vmem:[#allocation11 + $0x100] sm:$0xff]   ;;  %v8823_v19 = vld [vmem:[#allocation5 + $0x178] sm:$0xf]  ;;  %v14602_v23 = vld [vmem:[#allocation5 + $0x3c] sm:$0xff]  }
 0x4a0   : > { %v9440_v17 = vrot.slane %v9438_v37, 4  ;;  %v9443_v61 = vrot.slane %v9441_v27, 5  ;;  %v17556_v2 = vrot.slane %v9447_v35, 5  ;;  %v9453_v16 = vrot.slane %v9451_v60, 4  ;;  %v14601_v45 = vld [vmem:[#allocation5 + $0x30] sm:$0xff]  }
 0x4a1   : > { %v6269_v11 = vor.u32 %v6268_v63, %v6265_v42  ;;  %v9388_v46 = vsel %vm15564_vm2, %v9383_v14, %v17537_v20  ;;  %v17561_v8 = vrot.slane %v9396_v40, 4  ;;  %v17563_v62 = vrot.slane %v9406_v9, 4  ;;  %v8825_v37 = vld [vmem:[#allocation5 + $0x180] sm:$0xf]  ;;  %v8826_v5 = vld [vmem:[#allocation5 + $0x184] sm:$0xf] }
 0x4a2   : > { %v9433_v58 = vshll.u32 %v8815_v28, 16  ;;  %13707 = vmatmul.mubr.bf16.gmra.mrb[36].mxu0 %v12340_v43  ;;  %v9430_v54 = vor.u32 %v9429_v30, %v17548_v6  ;;  %v9462_v39 = vshrl.u32 %v8819_v56, 16  ;;  %v9465_v51 = vshll.u32 %v8819_v56, 16 }
 0x4a3   : > { %v6270_v18 = vrot.slane %v6269_v11, 4  ;;  %13710 = vmatprep.mubr.bf16.mxu0 %v17526_v10  ;;  %v12342_v47 = vcombine.low %v9354_v38, %v9364_v52  ;;  %v17567_v50 = vrot.slane %v9420_v48, 4  ;;  %v9471_v3 = vshll.u32 %v8820_v41, 16 }
 0x4a4   : > { %v9475_v31 = vshrl.u32 %v8820_v41, 16  ;;  %v9444_v53 = vor.u32 %v9443_v61, %v9440_v17  ;;  %v9454_v20 = vor.u32 %v9453_v16, %v17556_v2  ;;  %v9457_v43 = vshll.u32 %v8818_v15, 16  ;;  %v8824_v41 = vld [vmem:[#allocation5 + $0x17c] sm:$0x1]  ;;  %v8828_v15 = vld [vmem:[#allocation5 + $0x18c] sm:$0xf] }
 0x4a5   : > { %v6275_v0 = vsel %vm15564_vm2, %v6270_v18, %v19983_v44  ;;  %v12343_v10 = vcombine.low %v9378_v36, %v9388_v46  ;;  %v9402_v38 = vsel %vm15564_vm2, %v17561_v8, %v17539_v57  ;;  %v9435_v52 = vrot.slane %v9433_v58, 5  ;;  %v14767_v8 = vld [vmem:[#allocation11 + $0x118] sm:$0xff]  }
 0x4a6   : > { %13351 = vmatmul.mubr.bf16.vlgmr.msra.gmra.mrb[0].mxu1 %v14598_v29  ;;  %v17577_v33 = vcombine.low %v6275_v0, %v6285_v25  ;;  %v9412_v13 = vsel %vm15564_vm2, %v17563_v62, %v17554_v49  ;;  %v9431_v59 = vrot.slane %v9430_v54, 4  ;;  %v9464_v55 = vrot.slane %v9462_v39, 4 }
 0x4a7   : > { %13838 = vmatpush3.bf16.msra.mxu1 %v14764_v21  ;;  %13354 = vmatprep.mubr.bf16.mxu1 %v14600_v22  ;;  %v9467_v4 = vrot.slane %v9465_v51, 5  ;;  %v17583_v27 = vrot.slane %v9471_v3, 5  ;;  %v9477_v35 = vrot.slane %v9475_v31, 4  ;;  %v9486_v60 = vshrl.u32 %v8822_v7, 16  ;;  %v8827_v51 = vld [vmem:[#allocation5 + $0x188] sm:$0x1] }
 0x4a8   : > { %13831 = vmatprep.subr.bf16.mxu1 %v14765_v26  ;;  %v9489_v57 = vshll.u32 %v8822_v7, 16  ;;  %v9426_v14 = vsel %vm15564_vm2, %v17567_v50, %v17548_v6  ;;  %v9445_v40 = vrot.slane %v9444_v53, 4  ;;  %v9455_v9 = vrot.slane %v9454_v20, 4  ;;  %v14603_v50 = vld [vmem:[#allocation5 + $0x48] sm:$0xff]   ;;  %v8829_v53 = vld [vmem:[#allocation5 + $0x190] sm:$0xf] }
 0x4a9   : > { %v9459_v34 = vrot.slane %v9457_v43, 5  ;;  %v9495_v25 = vshll.u32 %v8823_v19, 16  ;;  %v9499_v28 = vshrl.u32 %v8823_v19, 16  ;;  %v9510_v30 = vshrl.u32 %v8825_v37, 16  ;;  %v14605_v20 = vld [vmem:[#allocation5 + $0x54] sm:$0xff]  }
 0x4aa   : > { %v9513_v42 = vshll.u32 %v8825_v37, 16  ;;  %13711 = vmatmul.mubr.bf16.gmra.mrb[40].mxu0 %v12342_v47  ;;  %v9436_v63 = vsel %vm15564_vm2, %v9431_v59, %v9435_v52  ;;  %v9481_v29 = vshll.u32 %v8821_v1, 16  ;;  %v9519_v36 = vshll.u32 %v8826_v5, 16  ;;  %v14768_v52 = vld [vmem:[#allocation11 + $0x120] sm:$0xff]  }
 0x4ab   : > { %13839 = vmatpush3.bf16.msra.mxu1 %v14765_v26  ;;  %v9523_v49 = vshrl.u32 %v8826_v5, 16  ;;  %13714 = vmatprep.mubr.bf16.mxu0 %v12343_v10  ;;  %v9468_v48 = vor.u32 %v9467_v4, %v9464_v55  ;;  %v9478_v6 = vor.u32 %v9477_v35, %v17583_v27  ;;  %v9488_v17 = vrot.slane %v9486_v60, 4  ;;  %v8831_v10 = vld [vmem:[#allocation5 + $0x198] sm:$0xf] }
 0x4ac   : > { %13832 = vmatprep.subr.bf16.mxu1 %v14766_v24  ;;  %v9491_v56 = vrot.slane %v9489_v57, 5  ;;  %v12344_v22 = vcombine.low %v9402_v38, %v9412_v13  ;;  %v9450_v61 = vsel %vm15564_vm2, %v9445_v40, %v17556_v2  ;;  %v9460_v16 = vsel %vm15564_vm2, %v9455_v9, %v9459_v34  ;;  %v8832_v38 = vld [vmem:[#allocation5 + $0x19c] sm:$0xf] }
 0x4ad   : > { %v17597_v11 = vrot.slane %v9495_v25, 5  ;;  %v9501_v46 = vrot.slane %v9499_v28, 4  ;;  %v9512_v62 = vrot.slane %v9510_v30, 4  ;;  %v9515_v58 = vrot.slane %v9513_v42, 5  ;;  %v14769_v34 = vld [vmem:[#allocation11 + $0x128] sm:$0xff]   ;;  %v14606_v42 = vld [vmem:[#allocation5 + $0x60] sm:$0xff]  }
 0x4ae   : > { %13355 = vmatmul.mubr.bf16.gmra.mrb[4].mxu1 %v14601_v45  ;;  %v12345_v54 = vcombine.low %v9426_v14, %v9436_v63  ;;  %v9483_v39 = vrot.slane %v9481_v29, 5  ;;  %v17599_v18 = vrot.slane %v9519_v36, 5  ;;  %v9525_v47 = vrot.slane %v9523_v49, 4  ;;  %v8830_v25 = vld [vmem:[#allocation5 + $0x194] sm:$0x1]  ;;  %v14607_v63 = vld [vmem:[#allocation5 + $0x6c] sm:$0xff]  }
 0x4af   : > { %13358 = vmatprep.mubr.bf16.mxu1 %v14602_v23  ;;  %13840 = vmatpush3.bf16.msra.mxu1 %v14766_v24  ;;  %v9469_v2 = vrot.slane %v9468_v48, 4  ;;  %v9479_v3 = vrot.slane %v9478_v6, 4  ;;  %v9492_v31 = vor.u32 %v9491_v56, %v9488_v17  ;;  %v9505_v21 = vshll.u32 %v8824_v41, 16  ;;  %v8834_v36 = vld [vmem:[#allocation5 + $0x1a4] sm:$0xf] }
 0x4b0   : > { %13833 = vmatprep.subr.bf16.mxu1 %v14767_v8  ;;  %v12346_v43 = vcombine.low %v9450_v61, %v9460_v16  ;;  %v9502_v7 = vor.u32 %v9501_v46, %v17597_v11  ;;  %v9516_v44 = vor.u32 %v9515_v58, %v9512_v62  ;;  %v9529_v0 = vshll.u32 %v8827_v51, 16  ;;  %v8835_v56 = vld [vmem:[#allocation5 + $0x1a8] sm:$0xf]  ;;  %v8833_v41 = vld [vmem:[#allocation5 + $0x1a0] sm:$0x1] }
 0x4b1   : > { %v9534_v26 = vshrl.u32 %v8828_v15, 16  ;;  %v9526_v1 = vor.u32 %v9525_v47, %v17599_v18  ;;  %v9537_v19 = vshll.u32 %v8828_v15, 16  ;;  %v9543_v45 = vshll.u32 %v8829_v53, 16  ;;  %v14770_v46 = vld [vmem:[#allocation11 + $0x130] sm:$0xff]  }
 0x4b2   : > { %13715 = vmatmul.mubr.bf16.gmra.mrb[44].mxu0 %v12344_v22  ;;  %v9547_v13 = vshrl.u32 %v8829_v53, 16  ;;  %v9474_v59 = vsel %vm15564_vm2, %v9469_v2, %v17583_v27  ;;  %v9484_v55 = vsel %vm15564_vm2, %v9479_v3, %v9483_v39  ;;  %v9493_v4 = vrot.slane %v9492_v31, 4  ;;  %v14771_v31 = vld [vmem:[#allocation11 + $0x138] sm:$0xff]  }
 0x4b3   : > { %13841 = vmatpush3.bf16.msra.mxu1 %v14767_v8  ;;  %13718 = vmatprep.mubr.bf16.mxu0 %v12345_v54  ;;  %v9507_v37 = vrot.slane %v9505_v21, 5  ;;  %v9558_v35 = vshrl.u32 %v8831_v10, 16  ;;  %v9561_v60 = vshll.u32 %v8831_v10, 16  ;;  %v9567_v57 = vshll.u32 %v8832_v38, 16  ;;  %v14610_v10 = vld [vmem:[#allocation5 + $0x84] sm:$0xff]  }
 0x4b4   : > { %13834 = vmatprep.subr.bf16.mxu1 %v14768_v52  ;;  %v9571_v5 = vshrl.u32 %v8832_v38, 16  ;;  %v9503_v23 = vrot.slane %v9502_v7, 4  ;;  %v9517_v14 = vrot.slane %v9516_v44, 4  ;;  %v9531_v40 = vrot.slane %v9529_v0, 5 }
 0x4b5   : > { %v9536_v9 = vrot.slane %v9534_v26, 4  ;;  %v9527_v24 = vrot.slane %v9526_v1, 4  ;;  %v9539_v27 = vrot.slane %v9537_v19, 5  ;;  %v17608_v28 = vrot.slane %v9543_v45, 5  ;;  %v8836_v19 = vld [vmem:[#allocation5 + $0x1ac] sm:$0x1] }
 0x4b6   : > { %13359 = vmatmul.mubr.bf16.gmra.mrb[8].mxu1 %v14603_v50  ;;  %v9549_v30 = vrot.slane %v9547_v13, 4  ;;  %v12347_v29 = vcombine.low %v9474_v59, %v9484_v55  ;;  %v9560_v49 = vrot.slane %v9558_v35, 4  ;;  %v9563_v48 = vrot.slane %v9561_v60, 5  ;;  %v14772_v60 = vld [vmem:[#allocation5 + $0x1c] sm:$0xf] }
 0x4b7   : > { %13362 = vmatprep.mubr.bf16.mxu1 %v14605_v20  ;;  %13842 = vmatpush3.bf16.msra.mxu1 %v14768_v52  ;;  %v9569_v6 = vrot.slane %v9567_v57, 5  ;;  %v9573_v17 = vrot.slane %v9571_v5, 4  ;;  %v9498_v22 = vsel %vm15564_vm2, %v9493_v4, %v17597_v11  ;;  %v9508_v61 = vsel %vm15564_vm2, %v9503_v23, %v9507_v37  ;;  %v10151_v5 = vld [vmem:[#allocation5 + $0x18] sm:$0xe] }
 0x4b8   : > { %13835 = vmatprep.subr.bf16.mxu1 %v14769_v34  ;;  %v9553_v16 = vshll.u32 %v8830_v25, 16  ;;  %v9522_v8 = vsel %vm15564_vm2, %v9517_v14, %v17599_v18  ;;  %v9532_v62 = vsel %vm15564_vm2, %v9527_v24, %v9531_v40  ;;  %v9540_v58 = vor.u32 %v9539_v27, %v9536_v9  ;;  %v14611_v14 = vld [vmem:[#allocation5 + $0x90] sm:$0xff]   ;;  %v14612_v25 = vld [vmem:[#allocation5 + $0x9c] sm:$0xff]  }
 0x4b9   : > { %v9550_v15 = vor.u32 %v9549_v30, %v17608_v28  ;;  %v9582_v11 = vshrl.u32 %v8834_v36, 16  ;;  %v9585_v54 = vshll.u32 %v8834_v36, 16  ;;  %v9591_v39 = vshll.u32 %v8835_v56, 16  ;;  %v14773_v30 = vld [vmem:[#allocation5 + $0x20] sm:$0x1] }
 0x4ba   : > { %13719 = vmatmul.mubr.bf16.gmra.mrb[48].mxu0 %v12346_v43  ;;  %v9595_v51 = vshrl.u32 %v8835_v56, 16  ;;  %v9564_v47 = vor.u32 %v9563_v48, %v9560_v49  ;;  %v9574_v50 = vor.u32 %v9573_v17, %v9569_v6  ;;  %v9577_v2 = vshll.u32 %v8833_v41, 16  ;;  %v14608_v43 = vld [vmem:[#allocation5 + $0x78] sm:$0xff]   ;;  %v14774_v36 = vld [vmem:[#allocation5 + $0x28] sm:$0xf] }
 0x4bb   : > { %13843 = vmatpush3.bf16.msra.mxu1 %v14769_v34  ;;  %13722 = vmatprep.mubr.bf16.mxu0 %v12347_v29  ;;  %v12348_v3 = vcombine.low %v9498_v22, %v9508_v61  ;;  %v12349_v18 = vcombine.low %v9522_v8, %v9532_v62  ;;  %v9541_v21 = vrot.slane %v9540_v58, 4  ;;  %v9551_v53 = vrot.slane %v9550_v15, 4  ;;  %v10152_v17 = vld [vmem:[#allocation5 + $0x24] sm:$0xe]  ;;  %v14775_v56 = vld [vmem:[#allocation5 + $0x34] sm:$0xf] }
 0x4bc   : > { %13836 = vmatprep.subr.bf16.mxu1 %v14770_v46  ;;  %v9555_v20 = vrot.slane %v9553_v16, 5  ;;  %v9584_v7 = vrot.slane %v9582_v11, 4  ;;  %v9587_v44 = vrot.slane %v9585_v54, 5  ;;  %v9593_v0 = vrot.slane %v9591_v39, 5  ;;  %v10153_v61 = vld [vmem:[#allocation5 + $0x30] sm:$0xe] }
 0x4bd   : > { %v9597_v26 = vrot.slane %v9595_v51, 4  ;;  %v9565_v38 = vrot.slane %v9564_v47, 4  ;;  %v9575_v52 = vrot.slane %v9574_v50, 4  ;;  %v9579_v1 = vrot.slane %v9577_v2, 5  ;;  %v14613_v41 = vld [vmem:[#allocation5 + $0xa8] sm:$0xff]   ;;  %v14615_v11 = vld [vmem:[#allocation5 + $0xb4] sm:$0xff]  }
 0x4be   : > { %13363 = vmatmul.mubr.bf16.gmra.mrb[12].mxu1 %v14606_v42  ;;  %v9546_v45 = vsel %vm15564_vm2, %v9541_v21, %v17608_v28  ;;  %v9556_v13 = vsel %vm15564_vm2, %v9551_v53, %v9555_v20  ;;  %v9588_v59 = vor.u32 %v9587_v44, %v9584_v7  ;;  %v9601_v4 = vshll.u32 %v8836_v19, 16  ;;  %v14776_v58 = vld [vmem:[#allocation5 + $0x2c] sm:$0x1]  ;;  %v14777_v51 = vld [vmem:[#allocation5 + $0x38] sm:$0x1]  ;;  %v14617_v19 = vld [vmem:[#allocation5 + $0xe4] sm:$0xff]  }
 0x4bf   : > { %13366 = vmatprep.mubr.bf16.mxu1 %v14607_v63  ;;  %13844 = vmatpush3.bf16.msra.mxu1 %v14770_v46  ;;  %v9598_v55 = vor.u32 %v9597_v26, %v9593_v0  ;;  %v9570_v37 = vsel %vm15564_vm2, %v9565_v38, %v9569_v6  ;;  %v9580_v35 = vsel %vm15564_vm2, %v9575_v52, %v9579_v1  ;;  %v10281_v57 = vrot.slane %v14772_v60, 5  ;;  %v10154_v53 = vld [vmem:[#allocation5 + $0x3c] sm:$0xe]  ;;  %v14779_v20 = vld [vmem:[#allocation5 + $0x4c] sm:$0xf] }
 0x4c0   : > { %13837 = vmatprep.subr.bf16.mxu1 %v14771_v31  ;;  %v12350_v23 = vcombine.low %v9546_v45, %v9556_v13  ;;  %v12351_v40 = vcombine.low %v9570_v37, %v9580_v35  ;;  %v9589_v9 = vrot.slane %v9588_v59, 4  ;;  %v9603_v24 = vrot.slane %v9601_v4, 5  ;;  %v10155_v7 = vld [vmem:[#allocation5 + $0x48] sm:$0xe]  ;;  %v14780_v52 = vld [vmem:[#allocation5 + $0x44] sm:$0x1] }
 0x4c1   : > { %v9599_v34 = vrot.slane %v9598_v55, 4  ;;  %v12361_v27 = vrot.slane %v10151_v5, 9  ;;  %v10283_v28 = vrot.slane %v10281_v57, 4  ;;  %v10284_v42 = vrot.slane %v14773_v30, 5  ;;  %v14781_v59 = vld [vmem:[#allocation5 + $0x50] sm:$0x1] }
 0x4c2   : > { %13723 = vmatmul.mubr.bf16.gmra.mrb[52].mxu0 %v12348_v3  ;;  %v9594_v63 = vsel %vm15564_vm2, %v9589_v9, %v9593_v0  ;;  %v10288_v49 = vrot.slane %v14774_v36, 5  ;;  %v10295_v22 = vrot.slane %v14775_v56, 5  ;;  %v12362_v8 = vrot.slane %v10152_v17, 9  ;;  %v14778_v3 = vld [vmem:[#allocation5 + $0x40] sm:$0xf] }
 0x4c3   : > { %13845 = vmatpush3.bf16.msra.mxu1 %v14771_v31  ;;  %13726 = vmatprep.mubr.bf16.mxu0 %v12349_v18  ;;  %v9604_v29 = vsel %vm15564_vm2, %v9599_v34, %v9603_v24  ;;  %v10282_v48 = vsel %vm16149_vm13, %v12361_v27, %v10281_v57  ;;  %v10285_v6 = vsel %vm16149_vm13, %v10283_v28, %v10284_v42  ;;  %v10291_v15 = vrot.slane %v14776_v58, 5  ;;  %v14616_v0 = vld [vmem:[#allocation5 + $0xc0] sm:$0xff]   ;;  %v14782_v4 = vld [vmem:[#allocation5 + $0x58] sm:$0xf]  ;;  %v10156_v35 = vld [vmem:[#allocation5 + $0x54] sm:$0xe] }
 0x4c4   : > { %v12352_v16 = vcombine.low %v9594_v63, %v9604_v29  ;;  %v12393_v46 = vcombine.low %v10282_v48, %v10285_v6  ;;  %v10290_v62 = vrot.slane %v10288_v49, 4  ;;  %v12363_v54 = vrot.slane %v10153_v61, 9  ;;  %v14783_v60 = vld [vmem:[#allocation5 + $0x64] sm:$0xf]  ;;  %v14784_v34 = vld [vmem:[#allocation5 + $0x70] sm:$0xf] }
 0x4c5   : > { %v10297_v39 = vrot.slane %v10295_v22, 4  ;;  %v10298_v47 = vrot.slane %v14777_v51, 5  ;;  %v10289_v50 = vsel %vm16149_vm13, %v12362_v8, %v10288_v49  ;;  %v10302_v31 = vrot.slane %v14778_v3, 5  ;;  %v14785_v28 = vld [vmem:[#allocation5 + $0x5c] sm:$0x1]  ;;  %v14618_v6 = vld [vmem:[#allocation5 + $0xf0] sm:$0xff]  }
 0x4c6   : > { %13367 = vmatmul.mubr.bf16.gmra.mrb[16].mxu1 %v14608_v43  ;;  %v10292_v2 = vsel %vm16149_vm13, %v10290_v62, %v10291_v15  ;;  %v10296_v18 = vsel %vm16149_vm13, %v12363_v54, %v10295_v22  ;;  %v10309_v43 = vrot.slane %v14779_v20, 5  ;;  %v10305_v1 = vrot.slane %v14780_v52, 5  ;;  %v10158_v42 = vld [vmem:[#allocation5 + $0x6c] sm:$0xe]  ;;  %v14786_v49 = vld [vmem:[#allocation5 + $0x68] sm:$0x1] }
 0x4c7   : > { %13370 = vmatprep.mubr.bf16.mxu1 %v14610_v10  ;;  %v10299_v21 = vsel %vm16149_vm13, %v10297_v39, %v10298_v47  ;;  %v12394_v44 = vcombine.low %v10289_v50, %v10292_v2  ;;  %v12364_v10 = vrot.slane %v10154_v53, 9  ;;  %v10304_v38 = vrot.slane %v10302_v31, 4  ;;  %v14619_v56 = vld [vmem:[#allocation5 + $0xfc] sm:$0xff]   ;;  %v10160_v39 = vld [vmem:[#allocation5 + $0x84] sm:$0xe] }
 0x4c8   : > { %v12395_v26 = vcombine.low %v10296_v18, %v10299_v21  ;;  %v12365_v45 = vrot.slane %v10155_v7, 9  ;;  %v10311_v13 = vrot.slane %v10309_v43, 4  ;;  %v10312_v55 = vrot.slane %v14781_v59, 5  ;;  %v14788_v58 = vld [vmem:[#allocation5 + $0x7c] sm:$0xf] }
 0x4c9   : > { %v10316_v37 = vrot.slane %v14782_v4, 5  ;;  %v10323_v57 = vrot.slane %v14783_v60, 5  ;;  %v10303_v5 = vsel %vm16149_vm13, %v12364_v10, %v10302_v31  ;;  %v10330_v24 = vrot.slane %v14784_v34, 5  ;;  %v14789_v47 = vld [vmem:[#allocation5 + $0x88] sm:$0xf] }
 0x4ca   : > { %13727 = vmatmul.mubr.bf16.gmra.mrb[56].mxu0 %v12350_v23  ;;  %v10306_v23 = vsel %vm16149_vm13, %v10304_v38, %v10305_v1  ;;  %v10313_v9 = vsel %vm16149_vm13, %v10311_v13, %v10312_v55  ;;  %v10319_v30 = vrot.slane %v14785_v28, 5  ;;  %v10326_v48 = vrot.slane %v14786_v49, 5  ;;  %v10161_v2 = vld [vmem:[#allocation5 + $0x90] sm:$0xe]  ;;  %v14790_v3 = vld [vmem:[#allocation5 + $0x94] sm:$0xf] }
 0x4cb   : > { %13730 = vmatprep.mubr.bf16.mxu0 %v12351_v40  ;;  %v10310_v40 = vsel %vm16149_vm13, %v12365_v45, %v10309_v43  ;;  %v10318_v27 = vrot.slane %v10316_v37, 4  ;;  %v12396_v63 = vcombine.low %v10303_v5, %v10306_v23  ;;  %v10325_v36 = vrot.slane %v10323_v57, 4  ;;  %v14791_v20 = vld [vmem:[#allocation5 + $0xa0] sm:$0xf]  ;;  %v10162_v10 = vld [vmem:[#allocation5 + $0x9c] sm:$0xe] }
 0x4cc   : > { %v12397_v17 = vcombine.low %v10310_v40, %v10313_v9  ;;  %v12368_v22 = vrot.slane %v10158_v42, 9  ;;  %v10332_v61 = vrot.slane %v10330_v24, 4  ;;  %v10337_v15 = vrot.slane %v14788_v58, 5  ;;  %v14793_v38 = vld [vmem:[#allocation5 + $0xac] sm:$0xf] }
 0x4cd   : > { %v10320_v62 = vsel %vm16149_vm13, %v10318_v27, %v10319_v30  ;;  %v10327_v54 = vsel %vm16149_vm13, %v10325_v36, %v10326_v48  ;;  %v10344_v50 = vrot.slane %v14789_v47, 5  ;;  %v10351_v31 = vrot.slane %v14790_v3, 5  ;;  %v10163_v59 = vld [vmem:[#allocation5 + $0xa8] sm:$0xe]  ;;  %v14795_v55 = vld [vmem:[#allocation5 + $0xb8] sm:$0xf] }
 0x4ce   : > { %13371 = vmatmul.mubr.bf16.gmra.mrb[20].mxu1 %v14611_v14  ;;  %v10157_v14 = vld [vmem:[#allocation5 + $0x60] sm:$0xe]  ;;  %v17664_v21 = vsel %vm16149_vm13, %v12368_v22, %v10330_v24  ;;  %v10358_v43 = vrot.slane %v14791_v20, 5  ;;  %v10365_v52 = vrot.slane %v14793_v38, 5  ;;  %v12370_v1 = vrot.slane %v10160_v39, 9 }
 0x4cf   : > { %13374 = vmatprep.mubr.bf16.mxu1 %v14612_v25  ;;  %v12366_v25 = vrot.slane %v10156_v35, 9  ;;  %v12367_v29 = vrot.slane %v10157_v14, 9  ;;  %v12371_v13 = vrot.slane %v10161_v2, 9  ;;  %v10372_v4 = vrot.slane %v14795_v55, 5  ;;  %v14621_v35 = vld [vmem:[#allocation5 + $0x114] sm:$0xff]  }
 0x4d0   : > { %v10346_v5 = vrot.slane %v10344_v50, 4  ;;  %v10353_v23 = vrot.slane %v10351_v31, 4  ;;  %v10164_v14 = vld [vmem:[#allocation5 + $0xb4] sm:$0xe]  ;;  %v14796_v40 = vld [vmem:[#allocation5 + $0x98] sm:$0x1]  ;;  %v17680_v49 = vsel %vm16149_vm13, %v12370_v1, %v10344_v50 }
 0x4d1   : > { %v10317_v8 = vsel %vm16149_vm13, %v12366_v25, %v10316_v37  ;;  %v14620_v37 = vld [vmem:[#allocation5 + $0x108] sm:$0xff]   ;;  %v10354_v9 = vrot.slane %v14796_v40, 5  ;;  %v12372_v34 = vrot.slane %v10162_v10, 9  ;;  %v10360_v24 = vrot.slane %v10358_v43, 4  ;;  %v14797_v25 = vld [vmem:[#allocation5 + $0xa4] sm:$0x1] }
 0x4d2   : > { %13731 = vmatmul.mubr.bf16.gmra.mrb[60].mxu0 %v12352_v16  ;;  %v14787_v16 = vld [vmem:[#allocation5 + $0x74] sm:$0x1]  ;;  %v12398_v18 = vcombine.low %v10317_v8, %v10320_v62  ;;  %v10361_v27 = vrot.slane %v14797_v25, 5  ;;  %v5806_v28 = vld [vmem:[#allocation5 + $0xe4] sm:$0xf]  ;;  %v12373_v42 = vrot.slane %v10163_v59, 9 }
 0x4d3   : > { %13750 = vmatprep.mubr.bf16.mxu0 %v12393_v46  ;;  %v10159_v46 = vld [vmem:[#allocation5 + $0x78] sm:$0xe]  ;;  %v12374_v48 = vrot.slane %v10164_v14, 9  ;;  %v10165_v22 = vld [vmem:[#allocation5 + $0xc0] sm:$0xe]  ;;  %v17693_v62 = vsel %vm16149_vm13, %v10353_v23, %v10354_v9  ;;  %v17697_v58 = vsel %vm16149_vm13, %v12372_v34, %v10358_v43 }
 0x4d4   : > { %v12369_v51 = vrot.slane %v10159_v46, 9  ;;  %v6242_v46 = vshll.u32 %v5806_v28, 16  ;;  %v12375_v39 = vrot.slane %v10165_v22, 9  ;;  %v14622_v50 = vld [vmem:[#allocation5 + $0x120] sm:$0xff]   ;;  %v14801_v20 = vld [vmem:[#allocation5 + $0xd0] sm:$0xf] }
 0x4d5   : > { %v17715_v3 = vsel %vm16149_vm13, %v12374_v48, %v10372_v4  ;;  %v10386_v43 = vrot.slane %v14801_v20, 5  ;;  %v5812_v38 = vld [vmem:[#allocation5 + $0xfc] sm:$0xf]  ;;  %v14804_v14 = vld [vmem:[#allocation5 + $0x100] sm:$0xf] }
 0x4d6   : > { %13375 = vmatmul.mubr.bf16.gmra.mrb[24].mxu1 %v14613_v41  ;;  %v10333_v41 = vrot.slane %v14787_v16, 5  ;;  %v17688_v16 = vsel %vm16149_vm13, %v12371_v13, %v10351_v31  ;;  %v14803_v13 = vld [vmem:[#allocation5 + $0xc8] sm:$0x1]  ;;  %v6290_v23 = vshll.u32 %v5812_v38, 16  ;;  %v6296_v40 = vshll.u32 %v14804_v14, 16 }
 0x4d7   : > { %13378 = vmatprep.mubr.bf16.mxu1 %v14615_v11  ;;  %v10324_v11 = vsel %vm16149_vm13, %v12367_v29, %v10323_v57  ;;  %v17674_v57 = vsel %vm16149_vm13, %v12369_v51, %v10337_v15  ;;  %v14798_v29 = vld [vmem:[#allocation5 + $0xb0] sm:$0x1]  ;;  %v14800_v51 = vld [vmem:[#allocation5 + $0xc4] sm:$0xf]  ;;  %v12403_v1 = vcombine.low %v17688_v16, %v17693_v62  ;;  %v10382_v59 = vrot.slane %v14803_v13, 5 }
 0x4d8   : > { %v17668_v53 = vsel %vm16149_vm13, %v10332_v61, %v10333_v41  ;;  %v12399_v7 = vcombine.low %v10324_v11, %v10327_v54  ;;  %v10368_v36 = vrot.slane %v14798_v29, 5  ;;  %v6239_v41 = vshrl.u32 %v5806_v28, 16  ;;  %v10167_v28 = vld [vmem:[#allocation5 + $0xf0] sm:$0xe]  ;;  %v14807_v48 = vld [vmem:[#allocation5 + $0xec] sm:$0x1] }
 0x4d9   : > { %v12400_v60 = vcombine.low %v17664_v21, %v17668_v53  ;;  %v17705_v11 = vsel %vm16149_vm13, %v12373_v42, %v10365_v52  ;;  %v10379_v47 = vrot.slane %v14800_v51, 5  ;;  %v6300_v9 = vshrl.u32 %v14804_v14, 16  ;;  %v14625_v51 = vld [vmem:[#allocation5 + $0x144] sm:$0xff]   ;;  %v14809_v13 = vld [vmem:[#allocation5 + $0xf8] sm:$0x1] }
 0x4da   : > { %13751 = vmatmul.mubr.bf16.vlgmr.msra.gmra.mrb[0].mxu0 %v12394_v44  ;;  %v10339_v44 = vrot.slane %v10337_v15, 4  ;;  %v17701_v15 = vsel %vm16149_vm13, %v10360_v24, %v10361_v27  ;;  %v10388_v34 = vrot.slane %v10386_v43, 4  ;;  %v12377_v20 = vrot.slane %v10167_v28, 9  ;;  %v14813_v62 = vld [vmem:[#allocation5 + $0x10c] sm:$0xf] }
 0x4db   : > { %13754 = vmatprep.mubr.bf16.mxu0 %v12395_v26  ;;  %v5818_v28 = vld [vmem:[#allocation5 + $0x114] sm:$0xf] }
 0x4de   : > { %13379 = vmatmul.mubr.bf16.gmra.mrb[28].mxu1 %v14616_v0  ;;  %v14792_v0 = vld [vmem:[#allocation5 + $0x80] sm:$0x1] }
 0x4df   : > { %13382 = vmatprep.mubr.bf16.mxu1 %v14617_v19  ;;  %v10340_v26 = vrot.slane %v14792_v0, 5  ;;  %v14794_v19 = vld [vmem:[#allocation5 + $0x8c] sm:$0x1]  ;;  %v14802_v0 = vld [vmem:[#allocation5 + $0xe8] sm:$0xf] }
 0x4e0   : > { %v10347_v45 = vrot.slane %v14794_v19, 5  ;;  %v6252_v10 = vshrl.u32 %v14802_v0, 16  ;;  %v12404_v19 = vcombine.low %v17697_v58, %v17701_v15 }
 0x4e1   : > { %v10341_v30 = vsel %vm16149_vm13, %v10339_v44, %v10340_v26  ;;  %v6244_v44 = vrot.slane %v6242_v46, 5  ;;  %v6248_v26 = vshll.u32 %v14802_v0, 16  ;;  %v17742_v46 = vrot.slane %v6296_v40, 5 }
 0x4e2   : > { %13755 = vmatmul.mubr.bf16.gmra.mrb[4].mxu0 %v12396_v63  ;;  %v10367_v63 = vrot.slane %v10365_v52, 4  ;;  %v17684_v61 = vsel %vm16149_vm13, %v10346_v5, %v10347_v45  ;;  %v12401_v8 = vcombine.low %v17674_v57, %v10341_v30  ;;  %v14623_v52 = vld [vmem:[#allocation5 + $0x12c] sm:$0xff]   ;;  %v5815_v57 = vld [vmem:[#allocation5 + $0x108] sm:$0xf]  ;;  %v6287_v5 = vshrl.u32 %v5812_v38, 16 }
 0x4e3   : > { %13758 = vmatprep.mubr.bf16.mxu0 %v12397_v17  ;;  %v14799_v17 = vld [vmem:[#allocation5 + $0xbc] sm:$0x1]  ;;  %v12402_v2 = vcombine.low %v17680_v49, %v17684_v61  ;;  %v17736_v25 = vrot.slane %v6248_v26, 5  ;;  %v6254_v27 = vrot.slane %v6252_v10, 4  ;;  %v6311_v30 = vshrl.u32 %v5815_v57, 16 }
 0x4e4   : > { %v17709_v54 = vsel %vm16149_vm13, %v10367_v63, %v10368_v36  ;;  %v6314_v42 = vshll.u32 %v5815_v57, 16  ;;  %v14805_v63 = vld [vmem:[#allocation5 + $0x10c] sm:$0xf]  ;;  %v6289_v22 = vrot.slane %v6287_v5, 4  ;;  %v14812_v61 = vld [vmem:[#allocation5 + $0x110] sm:$0x1] }
 0x4e5   : > { %v12405_v45 = vcombine.low %v17705_v11, %v17709_v54  ;;  %v6320_v29 = vshll.u32 %v14805_v63, 16  ;;  %v6324_v21 = vshrl.u32 %v14805_v63, 16  ;;  %v14814_v63 = vld [vmem:[#allocation5 + $0x104] sm:$0x1] }
 0x4e6   : > { %13383 = vmatmul.mubr.bf16.gmra.mrb[32].mxu1 %v14618_v6  ;;  %v10374_v6 = vrot.slane %v10372_v4, 4  ;;  %v17731_v4 = vsel %vm16149_vm13, %v12375_v39, %v10379_v47  ;;  %v14624_v39 = vld [vmem:[#allocation5 + $0x138] sm:$0xff]   ;;  %v6316_v0 = vrot.slane %v6314_v42, 5 }
 0x4e7   : > { %13386 = vmatprep.mubr.bf16.mxu1 %v14619_v56  ;;  %v10375_v56 = vrot.slane %v14799_v17, 5  ;;  %v14808_v17 = vld [vmem:[#allocation5 + $0xf4] sm:$0xf]  ;;  %v17753_v26 = vrot.slane %v6320_v29, 5  ;;  %v6326_v10 = vrot.slane %v6324_v21, 4  ;;  %v10403_v29 = vrot.slane %v14814_v63, 5 }
 0x4e8   : > { %v10170_v21 = vld [vmem:[#allocation5 + $0x114] sm:$0xe]  ;;  %v14628_v63 = vld [vmem:[#allocation5 + $0x168] sm:$0xff]  }
 0x4e9   : > { %v17719_v31 = vsel %vm16149_vm13, %v10374_v6, %v10375_v56  ;;  %v6258_v6 = vshll.u32 %v14807_v48, 16  ;;  %v10393_v56 = vrot.slane %v14808_v17, 5  ;;  %v6327_v16 = vor.u32 %v6326_v10, %v17753_v26 }
 0x4ea   : > { %13759 = vmatmul.mubr.bf16.gmra.mrb[8].mxu0 %v12398_v18  ;;  %v10166_v18 = vld [vmem:[#allocation5 + $0xcc] sm:$0xe]  ;;  %v12406_v55 = vcombine.low %v17715_v3, %v17719_v31  ;;  %v12380_v10 = vrot.slane %v10170_v21, 9 }
 0x4eb   : > { %13762 = vmatprep.mubr.bf16.mxu0 %v12399_v7  ;;  %v6241_v7 = vrot.slane %v6239_v41, 4  ;;  %v6292_v41 = vrot.slane %v6290_v23, 5  ;;  %v14811_v23 = vld [vmem:[#allocation5 + $0x104] sm:$0x1] }
 0x4ec   : > { %v6306_v14 = vshll.u32 %v14811_v23, 16 }
 0x4ed   : > { %v6245_v24 = vor.u32 %v6244_v44, %v6241_v7  ;;  %v17751_v7 = vld [vmem:[#allocation5 + $0xfc] sm:$0xe]  ;;  %v6313_v44 = vrot.slane %v6311_v30, 4  ;;  %v6293_v57 = vor.u32 %v6292_v41, %v6289_v22  ;;  %v14626_v22 = vld [vmem:[#allocation5 + $0x150] sm:$0xff]  }
 0x4ee   : > { %13387 = vmatmul.mubr.bf16.gmra.mrb[36].mxu1 %v14620_v37  ;;  %v10381_v37 = vrot.slane %v10379_v47, 4  ;;  %v12378_v49 = vrot.slane %v17751_v7, 9  ;;  %v6308_v17 = vrot.slane %v6306_v14, 5 }
 0x4ef   : > { %13390 = vmatprep.mubr.bf16.mxu1 %v14621_v35  ;;  %v12376_v35 = vrot.slane %v10166_v18, 9  ;;  %v6255_v18 = vor.u32 %v6254_v27, %v17736_v25  ;;  %v6317_v27 = vor.u32 %v6316_v0, %v6313_v44  ;;  %v6294_v48 = vrot.slane %v6293_v57, 4 }
 0x4f0   : > { %v17740_v53 = vsel %vm16149_vm13, %v10381_v37, %v10382_v59  ;;  %v14810_v59 = vld [vmem:[#allocation5 + $0x100] sm:$0xf]  ;;  %v6328_v44 = vrot.slane %v6327_v16, 4 }
 0x4f1   : > { %v17746_v47 = vsel %vm16149_vm13, %v12376_v35, %v10386_v43  ;;  %v10396_v43 = vrot.slane %v14809_v13, 5  ;;  %v10400_v37 = vrot.slane %v14810_v59, 5  ;;  %v17762_v35 = vrot.slane %v6258_v6, 5  ;;  %v14817_v13 = vld [vmem:[#allocation5 + $0x11c] sm:$0x1] }
 0x4f2   : > { %13763 = vmatmul.mubr.bf16.gmra.mrb[12].mxu0 %v12400_v60  ;;  %v14806_v60 = vld [vmem:[#allocation5 + $0xd4] sm:$0x1]  ;;  %v17768_v40 = vrot.slane %v6255_v18, 4  ;;  %v6338_v18 = vshll.u32 %v5818_v28, 16  ;;  %v6318_v7 = vrot.slane %v6317_v27, 4 }
 0x4f3   : > { %13766 = vmatprep.mubr.bf16.mxu0 %v12401_v8  ;;  %v10389_v36 = vrot.slane %v14806_v60, 5  ;;  %v6302_v8 = vrot.slane %v6300_v9, 4  ;;  %v17772_v9 = vsel %vm16149_vm13, %v12377_v20, %v10393_v56  ;;  %v10402_v42 = vrot.slane %v10400_v37, 4  ;;  %v14815_v60 = vld [vmem:[#allocation5 + $0x118] sm:$0xf]  ;;  %v14627_v20 = vld [vmem:[#allocation5 + $0x15c] sm:$0xff]  }
 0x4f4   : > { %v14818_v59 = vld [vmem:[#allocation5 + $0x118] sm:$0xf]  ;;  %v17793_v14 = vsel %vm16149_vm13, %v12378_v49, %v10400_v37  ;;  %v6340_v37 = vrot.slane %v6338_v18, 5  ;;  %v14819_v27 = vld [vmem:[#allocation5 + $0x11c] sm:$0x1] }
 0x4f5   : > { %v17757_v38 = vsel %vm16149_vm13, %v10388_v34, %v10389_v36  ;;  %v6303_v5 = vor.u32 %v6302_v8, %v17742_v46  ;;  %v10169_v34 = vld [vmem:[#allocation5 + $0x108] sm:$0xe]  ;;  %v10414_v36 = vrot.slane %v14815_v60, 5  ;;  %v14816_v8 = vld [vmem:[#allocation5 + $0x110] sm:$0x1]  ;;  %v6344_v23 = vshll.u32 %v14818_v59, 16 }
 0x4f6   : > { %13391 = vmatmul.mubr.bf16.gmra.mrb[40].mxu1 %v14622_v50  ;;  %v17748_v50 = vrot.slane %v6245_v24, 4  ;;  %v6348_v57 = vshrl.u32 %v14818_v59, 16  ;;  %v12408_v21 = vcombine.low %v17746_v47, %v17757_v38  ;;  %v14821_v18 = vld [vmem:[#allocation5 + $0x128] sm:$0x1]  ;;  %v14823_v59 = vld [vmem:[#allocation5 + $0x124] sm:$0xf] }
 0x4f7   : > { %13394 = vmatprep.mubr.bf16.mxu1 %v14623_v52  ;;  %v10395_v52 = vrot.slane %v10393_v56, 4  ;;  %v6304_v6 = vrot.slane %v6303_v5, 4  ;;  %v12379_v56 = vrot.slane %v10169_v34, 9  ;;  %v6261_v5 = vsel %vm15564_vm2, %v17768_v40, %v17762_v35  ;;  %v5821_v35 = vld [vmem:[#allocation5 + $0x120] sm:$0xf] }
 0x4f8   : > { %v6251_v24 = vsel %vm15564_vm2, %v17748_v50, %v17736_v25  ;;  %v17822_v54 = vsel %vm16149_vm13, %v12380_v10, %v10414_v36  ;;  %v17828_v49 = vrot.slane %v6344_v23, 5  ;;  %v6350_v34 = vrot.slane %v6348_v57, 4  ;;  %v5827_v25 = vld [vmem:[#allocation5 + $0x138] sm:$0xf]  ;;  %v10172_v10 = vld [vmem:[#allocation5 + $0x12c] sm:$0xe] }
 0x4f9   : > { %v17782_v30 = vsel %vm16149_vm13, %v10395_v52, %v10396_v43  ;;  %v10416_v52 = vrot.slane %v10414_v36, 4  ;;  %v10417_v43 = vrot.slane %v14817_v13, 5  ;;  %v6309_v58 = vsel %vm15564_vm2, %v6304_v6, %v6308_v17  ;;  %v14824_v57 = vld [vmem:[#allocation5 + $0x13c] sm:$0xf] }
 0x4fa   : > { %13767 = vmatmul.mubr.bf16.gmra.mrb[16].mxu0 %v12402_v2  ;;  %v6330_v2 = vshll.u32 %v14812_v61, 16  ;;  %v17797_v61 = vsel %vm16149_vm13, %v10402_v42, %v10403_v29  ;;  %v6359_v16 = vshrl.u32 %v5821_v35, 16  ;;  %v12407_v29 = vcombine.low %v17731_v4, %v17740_v53  ;;  %v5824_v53 = vld [vmem:[#allocation5 + $0x12c] sm:$0xf] }
 0x4fb   : > { %13770 = vmatprep.mubr.bf16.mxu0 %v12403_v1  ;;  %v10407_v1 = vrot.slane %v14813_v62, 5  ;;  %v6362_v62 = vshll.u32 %v5821_v35, 16  ;;  %v12409_v60 = vcombine.low %v17772_v9, %v17782_v30  ;;  %v17841_v6 = vcombine.low %v6251_v24, %v6261_v5  ;;  %v14825_v35 = vld [vmem:[#allocation5 + $0x128] sm:$0x1] }
 0x4fc   : > { %v6332_v41 = vrot.slane %v6330_v2, 5  ;;  %v6299_v2 = vsel %vm15564_vm2, %v6294_v48, %v17742_v46  ;;  %v6323_v46 = vsel %vm15564_vm2, %v6318_v7, %v17753_v26  ;;  %v6354_v26 = vshll.u32 %v14819_v27, 16  ;;  %v14629_v48 = vld [vmem:[#allocation5 + $0x174] sm:$0xff]   ;;  %v10171_v7 = vld [vmem:[#allocation5 + $0x120] sm:$0xe] }
 0x4fd   : > { %v10409_v0 = vrot.slane %v10407_v1, 4  ;;  %v17809_v15 = vsel %vm16149_vm13, %v12379_v56, %v10407_v1  ;;  %v14820_v1 = vld [vmem:[#allocation5 + $0x124] sm:$0xf]  ;;  %v12410_v17 = vcombine.low %v17793_v14, %v17797_v61  ;;  %v17845_v56 = vcombine.low %v6299_v2, %v6309_v58 }
 0x4fe   : > { %13395 = vmatmul.mubr.bf16.gmra.mrb[44].mxu1 %v14624_v39  ;;  %v10410_v39 = vrot.slane %v14816_v8, 5  ;;  %v6333_v40 = vsel %vm15564_vm2, %v6328_v44, %v6332_v41  ;;  %v6372_v42 = vshrl.u32 %v14820_v1, 16  ;;  %v17854_v41 = vrot.slane %v6354_v26, 5 }
 0x4ff   : > { %13398 = vmatprep.mubr.bf16.mxu1 %v14625_v51  ;;  %v6335_v51 = vshrl.u32 %v5818_v28, 16  ;;  %v6368_v28 = vshll.u32 %v14820_v1, 16  ;;  %v17849_v47 = vcombine.low %v6323_v46, %v6333_v40  ;;  %v6361_v50 = vrot.slane %v6359_v16, 4  ;;  %v14630_v40 = vld [vmem:[#allocation5 + $0x180] sm:$0xff]  }
 0x500   : > { %v17818_v11 = vsel %vm16149_vm13, %v10409_v0, %v10410_v39  ;;  %v6364_v24 = vrot.slane %v6362_v62, 5  ;;  %v6374_v39 = vrot.slane %v6372_v42, 4  ;;  %v6383_v44 = vshrl.u32 %v5824_v53, 16  ;;  %v14631_v62 = vld [vmem:[#allocation5 + $0x18c] sm:$0xff]  }
 0x501   : > { %v12411_v4 = vcombine.low %v17809_v15, %v17818_v11  ;;  %v17859_v8 = vrot.slane %v6368_v28, 5  ;;  %v6386_v0 = vshll.u32 %v5824_v53, 16  ;;  %v6407_v3 = vshrl.u32 %v5827_v25, 16 }
 0x502   : > { %13771 = vmatmul.mubr.bf16.gmra.mrb[20].mxu0 %v12404_v19  ;;  %v6337_v19 = vrot.slane %v6335_v51, 4  ;;  %v6410_v31 = vshll.u32 %v5827_v25, 16  ;;  %v10421_v23 = vrot.slane %v14823_v59, 5  ;;  %v6416_v5 = vshll.u32 %v14824_v57, 16 }
 0x503   : > { %13774 = vmatprep.mubr.bf16.mxu0 %v12405_v45  ;;  %v17826_v45 = vsel %vm16149_vm13, %v10416_v52, %v10417_v43  ;;  %v14822_v52 = vld [vmem:[#allocation5 + $0x130] sm:$0xf]  ;;  %v6420_v2 = vshrl.u32 %v14824_v57, 16  ;;  %v6365_v58 = vor.u32 %v6364_v24, %v6361_v50  ;;  %v10424_v46 = vrot.slane %v14825_v35, 5  ;;  %v14831_v57 = vld [vmem:[#allocation5 + $0x148] sm:$0xf] }
 0x504   : > { %v6341_v36 = vor.u32 %v6340_v37, %v6337_v19  ;;  %v12412_v38 = vcombine.low %v17822_v54, %v17826_v45  ;;  %v6392_v13 = vshll.u32 %v14822_v52, 16  ;;  %v6396_v43 = vshrl.u32 %v14822_v52, 16  ;;  %v14826_v50 = vld [vmem:[#allocation5 + $0x130] sm:$0xf]  ;;  %v14829_v52 = vld [vmem:[#allocation5 + $0x13c] sm:$0xf] }
 0x505   : > { %v6375_v19 = vor.u32 %v6374_v39, %v17859_v8  ;;  %v12381_v37 = vrot.slane %v10171_v7, 9  ;;  %v12382_v27 = vrot.slane %v10172_v10, 9  ;;  %v6385_v26 = vrot.slane %v6383_v44, 4  ;;  %v10173_v10 = vld [vmem:[#allocation5 + $0x138] sm:$0xe] }
 0x506   : > { %13399 = vmatmul.mubr.bf16.gmra.mrb[48].mxu1 %v14626_v22  ;;  %v6351_v22 = vor.u32 %v6350_v34, %v17828_v49  ;;  %v6342_v51 = vrot.slane %v6341_v36, 4  ;;  %v6388_v16 = vrot.slane %v6386_v0, 5  ;;  %v17865_v1 = vrot.slane %v6392_v13, 5  ;;  %v14839_v45 = vld [vmem:[#allocation5 + $0x160] sm:$0xf] }
 0x507   : > { %13402 = vmatprep.mubr.bf16.mxu1 %v14627_v20  ;;  %v6378_v20 = vshll.u32 %v14821_v18, 16  ;;  %v6398_v28 = vrot.slane %v6396_v43, 4  ;;  %v6409_v42 = vrot.slane %v6407_v3, 4  ;;  %v10423_v36 = vrot.slane %v10421_v23, 4  ;;  %v14828_v18 = vld [vmem:[#allocation5 + $0x140] sm:$0x1] }
 0x508   : > { %v6347_v34 = vsel %vm15564_vm2, %v6342_v51, %v17828_v49  ;;  %v6422_v53 = vrot.slane %v6420_v2, 4  ;;  %v17874_v49 = vrot.slane %v6375_v19, 4  ;;  %v10428_v24 = vrot.slane %v14826_v50, 5  ;;  %v14827_v51 = vld [vmem:[#allocation5 + $0x134] sm:$0x1] }
 0x509   : > { %v17876_v25 = vrot.slane %v6378_v20, 5  ;;  %v6389_v39 = vor.u32 %v6388_v16, %v6385_v26  ;;  %v6426_v7 = vshll.u32 %v14828_v18, 16  ;;  %v6399_v20 = vor.u32 %v6398_v28, %v17865_v1  ;;  %v5830_v2 = vld [vmem:[#allocation5 + $0x144] sm:$0xf]  ;;  %v14832_v26 = vld [vmem:[#allocation5 + $0x140] sm:$0x1] }
 0x50a   : > { %13775 = vmatmul.mubr.bf16.gmra.mrb[24].mxu0 %v12406_v55  ;;  %v6352_v55 = vrot.slane %v6351_v22, 4  ;;  %v17872_v22 = vrot.slane %v6365_v58, 4  ;;  %v10435_v13 = vrot.slane %v14829_v52, 5  ;;  %v17890_v9 = vsel %vm16149_vm13, %v10423_v36, %v10424_v46  ;;  %v14632_v58 = vld [vmem:[#allocation5 + $0x198] sm:$0xff]   ;;  %v5833_v16 = vld [vmem:[#allocation5 + $0x150] sm:$0xf] }
 0x50b   : > { %13778 = vmatprep.mubr.bf16.mxu0 %v12407_v29  ;;  %v17894_v30 = vsel %vm16149_vm13, %v12382_v27, %v10428_v24  ;;  %v10430_v59 = vrot.slane %v10428_v24, 4  ;;  %v6390_v19 = vrot.slane %v6389_v39, 4  ;;  %v6428_v35 = vrot.slane %v6426_v7, 5  ;;  %v14833_v36 = vld [vmem:[#allocation5 + $0x14c] sm:$0x1] }
 0x50c   : > { %v6357_v29 = vsel %vm15564_vm2, %v6352_v55, %v17854_v41  ;;  %v17883_v41 = vsel %vm16149_vm13, %v12381_v37, %v10421_v23  ;;  %v6381_v55 = vsel %vm15564_vm2, %v17874_v49, %v17876_v25  ;;  %v10174_v23 = vld [vmem:[#allocation5 + $0x144] sm:$0xe]  ;;  %v12383_v46 = vrot.slane %v10173_v10, 9 }
 0x50d   : > { %v17885_v44 = vcombine.low %v6347_v34, %v6357_v29  ;;  %v10437_v27 = vrot.slane %v10435_v13, 4  ;;  %v12384_v28 = vrot.slane %v10174_v23, 9  ;;  %v6395_v14 = vsel %vm15564_vm2, %v6390_v19, %v17865_v1  ;;  %v5839_v19 = vld [vmem:[#allocation5 + $0x168] sm:$0xf] }
 0x50e   : > { %13403 = vmatmul.mubr.bf16.gmra.mrb[52].mxu1 %v14628_v63  ;;  %v6412_v63 = vrot.slane %v6410_v31, 5  ;;  %v6371_v31 = vsel %vm15564_vm2, %v17872_v22, %v17859_v8  ;;  %v10438_v8 = vrot.slane %v14832_v26, 5  ;;  %v14834_v22 = vld [vmem:[#allocation5 + $0x148] sm:$0xf]  ;;  %v6455_v61 = vshrl.u32 %v5833_v16, 16 }
 0x50f   : > { %13406 = vmatprep.mubr.bf16.mxu1 %v14629_v48  ;;  %v17870_v48 = vrot.slane %v6416_v5, 5  ;;  %v10442_v5 = vrot.slane %v14831_v57, 5  ;;  %v6440_v49 = vshll.u32 %v14834_v22, 16  ;;  %v6444_v25 = vshrl.u32 %v14834_v22, 16 }
 0x510   : > { %v6413_v0 = vor.u32 %v6412_v63, %v6409_v42  ;;  %v6431_v42 = vshrl.u32 %v5830_v2, 16  ;;  %v6434_v63 = vshll.u32 %v5830_v2, 16  ;;  %v17926_v11 = vsel %vm16149_vm13, %v12383_v46, %v10435_v13  ;;  %v14836_v13 = vld [vmem:[#allocation5 + $0x154] sm:$0xf] }
 0x511   : > { %v6423_v3 = vor.u32 %v6422_v53, %v17870_v48  ;;  %v10444_v29 = vrot.slane %v10442_v5, 4  ;;  %v10445_v53 = vrot.slane %v14833_v36, 5  ;;  %v17934_v1 = vsel %vm16149_vm13, %v12384_v28, %v10442_v5  ;;  %v5836_v5 = vld [vmem:[#allocation5 + $0x15c] sm:$0xf] }
 0x512   : > { %13779 = vmatmul.mubr.bf16.gmra.mrb[28].mxu0 %v12408_v21  ;;  %v6402_v21 = vshll.u32 %v14827_v51, 16  ;;  %v6414_v34 = vrot.slane %v6413_v0, 4  ;;  %v6436_v39 = vrot.slane %v6434_v63, 5  ;;  %v14835_v51 = vld [vmem:[#allocation5 + $0x14c] sm:$0x1]  ;;  %v17942_v7 = vrot.slane %v6440_v49, 5 }
 0x513   : > { %13782 = vmatprep.mubr.bf16.mxu0 %v12409_v60  ;;  %v14830_v60 = vld [vmem:[#allocation5 + $0x134] sm:$0x1]  ;;  %v12413_v0 = vcombine.low %v17883_v41, %v17890_v9  ;;  %v17946_v10 = vrot.slane %v6455_v61, 4  ;;  %v6479_v26 = vshrl.u32 %v5836_v5, 16  ;;  %v6482_v54 = vshll.u32 %v5836_v5, 16 }
 0x514   : > { %v10431_v43 = vrot.slane %v14830_v60, 5  ;;  %v6404_v37 = vrot.slane %v6402_v21, 5  ;;  %v6419_v15 = vsel %vm15564_vm2, %v6414_v34, %v17870_v48  ;;  %v6450_v21 = vshll.u32 %v14835_v51, 16  ;;  %v14838_v34 = vld [vmem:[#allocation5 + $0x154] sm:$0xf] }
 0x515   : > { %v17940_v48 = vsel %vm16149_vm13, %v10444_v29, %v10445_v53  ;;  %v6464_v60 = vshll.u32 %v14836_v13, 16  ;;  %v6506_v28 = vshll.u32 %v5839_v19, 16 }
 0x516   : > { %13407 = vmatmul.mubr.bf16.gmra.mrb[56].mxu1 %v14630_v40  ;;  %v6400_v40 = vrot.slane %v6399_v20, 4  ;;  %v17913_v50 = vsel %vm16149_vm13, %v10430_v59, %v10431_v43  ;;  %v6446_v20 = vrot.slane %v6444_v25, 4  ;;  %v10175_v43 = vld [vmem:[#allocation5 + $0x150] sm:$0xe]  ;;  %v12416_v41 = vcombine.low %v17934_v1, %v17940_v48 }
 0x517   : > { %13410 = vmatprep.mubr.bf16.mxu1 %v14631_v62  ;;  %v6424_v62 = vrot.slane %v6423_v3, 4  ;;  %v17950_v3 = vcombine.low %v6371_v31, %v6381_v55  ;;  %v12414_v59 = vcombine.low %v17894_v30, %v17913_v50  ;;  %v6468_v31 = vshrl.u32 %v14836_v13, 16  ;;  %v14837_v55 = vld [vmem:[#allocation5 + $0x158] sm:$0x1]  ;;  %v10176_v50 = vld [vmem:[#allocation5 + $0x15c] sm:$0xe] }
 0x518   : > { %v6405_v24 = vsel %vm15564_vm2, %v6400_v40, %v6404_v37  ;;  %v6447_v30 = vor.u32 %v6446_v20, %v17942_v7  ;;  %v6474_v37 = vshll.u32 %v14837_v55, 16  ;;  %v17971_v40 = vrot.slane %v6464_v60, 5 }
 0x519   : > { %v6429_v18 = vsel %vm15564_vm2, %v6424_v62, %v6428_v35  ;;  %v17954_v23 = vcombine.low %v6395_v14, %v6405_v24  ;;  %v12385_v35 = vrot.slane %v10175_v43, 9  ;;  %v6470_v36 = vrot.slane %v6468_v31, 4  ;;  %v14842_v14 = vld [vmem:[#allocation5 + $0x160] sm:$0xf] }
 0x51a   : > { %13783 = vmatmul.mubr.bf16.gmra.mrb[32].mxu0 %v12410_v17  ;;  %v6458_v17 = vshll.u32 %v5833_v16, 16  ;;  %v17958_v2 = vcombine.low %v6419_v15, %v6429_v18  ;;  %v6503_v16 = vshrl.u32 %v5839_v19, 16  ;;  %v6448_v29 = vrot.slane %v6447_v30, 4  ;;  %v14843_v18 = vld [vmem:[#allocation5 + $0x16c] sm:$0xf] }
 0x51b   : > { %13786 = vmatprep.mubr.bf16.mxu0 %v12411_v4  ;;  %v17930_v4 = vsel %vm16149_vm13, %v10437_v27, %v10438_v8  ;;  %v10449_v27 = vrot.slane %v14838_v34, 5  ;;  %v6492_v8 = vshrl.u32 %v14839_v45, 16  ;;  %v17974_v53 = vrot.slane %v6474_v37, 5  ;;  %v14844_v19 = vld [vmem:[#allocation5 + $0x164] sm:$0x1] }
 0x51c   : > { %v17948_v52 = vrot.slane %v6458_v17, 5  ;;  %v12415_v57 = vcombine.low %v17926_v11, %v17930_v4  ;;  %v10456_v61 = vrot.slane %v14842_v14, 5  ;;  %v6481_v17 = vrot.slane %v6479_v26, 4  ;;  %v14845_v30 = vld [vmem:[#allocation5 + $0x164] sm:$0x1] }
 0x51d   : > { %v17978_v22 = vsel %vm16149_vm13, %v12385_v35, %v10449_v27  ;;  %v10451_v49 = vrot.slane %v10449_v27, 4  ;;  %v6484_v24 = vrot.slane %v6482_v54, 5  ;;  %v6494_v11 = vrot.slane %v6492_v8, 4  ;;  %v14847_v27 = vld [vmem:[#allocation5 + $0x170] sm:$0x1] }
 0x51e   : > { %13411 = vmatmul.mubr.bf16.gmra.mrb[60].mxu1 %v14632_v58  ;;  %v17962_v58 = vrot.slane %v6450_v21, 5  ;;  %v6461_v46 = vor.u32 %v17948_v52, %v17946_v10  ;;  %v6505_v4 = vrot.slane %v6503_v16, 4  ;;  %v10177_v21 = vld [vmem:[#allocation5 + $0x168] sm:$0xe]  ;;  %v10463_v20 = vrot.slane %v14843_v18, 5 }
 0x51f   : > { %13462 = vmatprep.mubr.bf16.mxu1 %v17841_v6  ;;  %v6433_v6 = vrot.slane %v6431_v42, 4  ;;  %v14840_v42 = vld [vmem:[#allocation5 + $0x16c] sm:$0xf]  ;;  %v6471_v60 = vor.u32 %v6470_v36, %v17971_v40  ;;  %v12386_v43 = vrot.slane %v10176_v50, 9  ;;  %v6498_v31 = vshll.u32 %v14845_v30, 16 }
 0x520   : > { %v6516_v63 = vshrl.u32 %v14840_v42, 16  ;;  %v6453_v13 = vsel %vm15564_vm2, %v6448_v29, %v17962_v58  ;;  %v14846_v58 = vld [vmem:[#allocation5 + $0x170] sm:$0x1]  ;;  %v12387_v35 = vrot.slane %v10177_v21, 9  ;;  %v10466_v26 = vrot.slane %v14847_v27, 5 }
 0x521   : > { %v6437_v9 = vor.u32 %v6436_v39, %v6433_v6  ;;  %v6508_v6 = vrot.slane %v6506_v28, 5  ;;  %v6522_v37 = vshll.u32 %v14846_v58, 16  ;;  %v10178_v54 = vld [vmem:[#allocation5 + $0x174] sm:$0xe]  ;;  %v10457_v16 = vsel %vm16149_vm13, %v12386_v43, %v10456_v61  ;;  %v14849_v14 = vld [vmem:[#allocation5 + $0x178] sm:$0xf] }
 0x522   : > { %13787 = vmatmul.mubr.bf16.gmra.mrb[36].mxu0 %v12412_v38  ;;  %v6488_v38 = vshll.u32 %v14839_v45, 16  ;;  %v6518_v51 = vrot.slane %v6516_v63, 4  ;;  %v6500_v28 = vrot.slane %v6498_v31, 5  ;;  %v5842_v63 = vld [vmem:[#allocation5 + $0x174] sm:$0xf]  ;;  %v10464_v52 = vsel %vm16149_vm13, %v12387_v35, %v10463_v20 }
 0x523   : > { %13790 = vmatprep.mubr.bf16.mxu0 %v12413_v0  ;;  %v6438_v62 = vrot.slane %v6437_v9, 4  ;;  %v10458_v9 = vrot.slane %v10456_v61, 4  ;;  %v6509_v34 = vor.u32 %v6508_v6, %v6505_v4  ;;  %v6530_v50 = vshll.u32 %v5842_v63, 16  ;;  %v14850_v6 = vld [vmem:[#allocation5 + $0x17c] sm:$0x1] }
 0x524   : > { %v17980_v15 = vrot.slane %v6488_v38, 5  ;;  %v6462_v38 = vrot.slane %v6461_v46, 4  ;;  %v6536_v61 = vshll.u32 %v14849_v14, 16  ;;  %v10473_v1 = vrot.slane %v14850_v6, 5  ;;  %v14853_v30 = vld [vmem:[#allocation5 + $0x184] sm:$0xf] }
 0x525   : > { %v6443_v0 = vsel %vm15564_vm2, %v6438_v62, %v17942_v7  ;;  %v6485_v7 = vor.u32 %v6484_v24, %v6481_v17  ;;  %v6540_v17 = vshrl.u32 %v14849_v14, 16  ;;  %v6560_v31 = vshll.u32 %v14853_v30, 16  ;;  %v14854_v58 = vld [vmem:[#allocation5 + $0x188] sm:$0x1] }
 0x526   : > { %13463 = vmatmul.mubr.bf16.vlgmr.msra.gmra.mrb[32].mxu1 %v17577_v33  ;;  %v6512_v33 = vshll.u32 %v14840_v42, 16  ;;  %v6495_v55 = vor.u32 %v6494_v11, %v17980_v15  ;;  %v17997_v45 = vcombine.low %v6443_v0, %v6453_v13  ;;  %v14848_v42 = vld [vmem:[#allocation5 + $0x178] sm:$0xf]  ;;  %v6467_v24 = vsel %vm15564_vm2, %v6462_v38, %v17971_v40  ;;  %v14851_v40 = vld [vmem:[#allocation5 + $0x184] sm:$0xf] }
 0x527   : > { %13466 = vmatprep.mubr.bf16.mxu1 %v17845_v56  ;;  %v14841_v56 = vld [vmem:[#allocation5 + $0x158] sm:$0x1]  ;;  %v6486_v29 = vrot.slane %v6485_v7, 4  ;;  %v10477_v21 = vrot.slane %v14851_v40, 5  ;;  %v10179_v0 = vld [vmem:[#allocation5 + $0x180] sm:$0xe] }
 0x528   : > { %v10452_v25 = vrot.slane %v14841_v56, 5  ;;  %v17982_v39 = vrot.slane %v6512_v33, 5  ;;  %v10470_v33 = vrot.slane %v14848_v42, 5  ;;  %v6496_v36 = vrot.slane %v6495_v55, 4  ;;  %v5848_v38 = vld [vmem:[#allocation5 + $0x18c] sm:$0xf] }
 0x529   : > { %v12388_v56 = vrot.slane %v10178_v54, 9  ;;  %v6532_v13 = vrot.slane %v6530_v50, 5  ;;  %v6542_v43 = vrot.slane %v6540_v17, 4  ;;  %v12389_v7 = vrot.slane %v10179_v0, 9 }
 0x52a   : > { %13791 = vmatmul.mubr.bf16.gmra.mrb[40].mxu0 %v12414_v59  ;;  %v10453_v5 = vsel %vm16149_vm13, %v10451_v49, %v10452_v25  ;;  %v10459_v59 = vrot.slane %v14844_v19, 5  ;;  %v6524_v49 = vrot.slane %v6522_v37, 5  ;;  %v6510_v25 = vrot.slane %v6509_v34, 4 }
 0x52b   : > { %13794 = vmatprep.mubr.bf16.mxu0 %v12415_v57  ;;  %v10465_v57 = vrot.slane %v10463_v20, 4  ;;  %v12417_v8 = vcombine.low %v17978_v22, %v10453_v5  ;;  %v6527_v22 = vshrl.u32 %v5842_v63, 16  ;;  %v10472_v4 = vrot.slane %v10470_v33, 4 }
 0x52c   : > { %v10460_v62 = vsel %vm16149_vm13, %v10458_v9, %v10459_v59  ;;  %v14852_v9 = vld [vmem:[#allocation5 + $0x17c] sm:$0x1]  ;;  %v10479_v55 = vrot.slane %v10477_v21, 4  ;;  %v10480_v37 = vrot.slane %v14854_v58, 5  ;;  %v6564_v54 = vshrl.u32 %v14853_v30, 16 }
 0x52d   : > { %v10467_v46 = vsel %vm16149_vm13, %v10465_v57, %v10466_v26  ;;  %v12418_v48 = vcombine.low %v10457_v16, %v10460_v62  ;;  %v10474_v5 = vsel %vm16149_vm13, %v10472_v4, %v10473_v1  ;;  %v6546_v19 = vshll.u32 %v14852_v9, 16  ;;  %v10180_v62 = vld [vmem:[#allocation5 + $0x18c] sm:$0xe]  ;;  %v14859_v4 = vld [vmem:[#allocation5 + $0x194] sm:$0x1] }
 0x52e   : > { %13467 = vmatmul.mubr.bf16.gmra.mrb[36].mxu1 %v17849_v47  ;;  %v6519_v47 = vor.u32 %v6518_v51, %v17982_v39  ;;  %v5845_v51 = vld [vmem:[#allocation5 + $0x180] sm:$0xf]  ;;  %v12419_v20 = vcombine.low %v10464_v52, %v10467_v46  ;;  %v10478_v63 = vsel %vm16149_vm13, %v12389_v7, %v10477_v21  ;;  %v10181_v46 = vld [vmem:[#allocation5 + $0x198] sm:$0xe]  ;;  %v6566_v14 = vrot.slane %v6564_v54, 4 }
 0x52f   : > { %13470 = vmatprep.mubr.bf16.mxu1 %v17885_v44  ;;  %v6472_v44 = vrot.slane %v6471_v60, 4  ;;  %v18036_v60 = vrot.slane %v6536_v61, 5  ;;  %v6554_v59 = vshll.u32 %v5845_v51, 16  ;;  %v14858_v61 = vld [vmem:[#allocation5 + $0x188] sm:$0x1]  ;;  %v10487_v6 = vrot.slane %v14859_v4, 5 }
 0x530   : > { %v6520_v10 = vrot.slane %v6519_v47, 4  ;;  %v6570_v17 = vshll.u32 %v14858_v61, 16 }
 0x531   : > { %v6477_v11 = vsel %vm15564_vm2, %v6472_v44, %v17974_v53  ;;  %v6515_v53 = vsel %vm15564_vm2, %v6510_v25, %v17982_v39  ;;  %v6551_v39 = vshrl.u32 %v5845_v51, 16  ;;  %v6543_v26 = vor.u32 %v6542_v43, %v18036_v60  ;;  %v14857_v25 = vld [vmem:[#allocation5 + $0x190] sm:$0xf]  ;;  %v14860_v51 = vld [vmem:[#allocation5 + $0x1a0] sm:$0x1] }
 0x532   : > { %13795 = vmatmul.mubr.bf16.gmra.mrb[44].mxu0 %v12416_v41  ;;  %v6491_v41 = vsel %vm15564_vm2, %v6486_v29, %v17980_v15  ;;  %v6525_v18 = vsel %vm15564_vm2, %v6520_v10, %v6524_v49  ;;  %v6529_v15 = vrot.slane %v6527_v22, 4  ;;  %v12194_v35 = vcombine.low %v6467_v24, %v6477_v11 }
 0x533   : > { %13798 = vmatprep.mubr.bf16.mxu0 %v12417_v8  ;;  %v18040_v47 = vcombine.low %v6515_v53, %v6525_v18  ;;  %v18045_v44 = vrot.slane %v6546_v19, 5  ;;  %v6553_v8 = vrot.slane %v6551_v39, 4  ;;  %v6556_v16 = vrot.slane %v6554_v59, 5  ;;  %v14861_v19 = vld [vmem:[#allocation5 + $0x1a8] sm:$0xf] }
 0x534   : > { %v6533_v27 = vor.u32 %v6532_v13, %v6529_v15  ;;  %v10481_v29 = vsel %vm16149_vm13, %v10479_v55, %v10480_v37  ;;  %v6575_v49 = vshrl.u32 %v5848_v38, 16  ;;  %v6584_v10 = vshll.u32 %v14857_v25, 16  ;;  %v10182_v55 = vld [vmem:[#allocation5 + $0x1a4] sm:$0xe] }
 0x535   : > { %v6588_v52 = vshrl.u32 %v14857_v25, 16  ;;  %v6544_v50 = vrot.slane %v6543_v26, 4  ;;  %v12421_v24 = vcombine.low %v10478_v63, %v10481_v29  ;;  %v6557_v1 = vor.u32 %v6556_v16, %v6553_v8 }
 0x536   : > { %13471 = vmatmul.mubr.bf16.gmra.mrb[40].mxu1 %v17950_v3  ;;  %v6501_v3 = vsel %vm15564_vm2, %v6496_v36, %v6500_v28  ;;  %v14855_v28 = vld [vmem:[#allocation5 + $0x190] sm:$0xf]  ;;  %v14856_v36 = vld [vmem:[#allocation5 + $0x19c] sm:$0xf]  ;;  %v6534_v22 = vrot.slane %v6533_v27, 4  ;;  %v10494_v40 = vrot.slane %v14860_v51, 5 }
 0x537   : > { %13474 = vmatprep.mubr.bf16.mxu1 %v17954_v23  ;;  %v18034_v23 = vsel %vm16149_vm13, %v12388_v56, %v10470_v33  ;;  %v12195_v34 = vcombine.low %v6491_v41, %v6501_v3  ;;  %v10484_v42 = vrot.slane %v14855_v28, 5  ;;  %v18048_v33 = vrot.slane %v6560_v31, 5 }
 0x538   : > { %v12420_v57 = vcombine.low %v18034_v23, %v10474_v5  ;;  %v6578_v56 = vshll.u32 %v5848_v38, 16  ;;  %v12391_v41 = vrot.slane %v10181_v46, 9  ;;  %v6577_v21 = vrot.slane %v6575_v49, 4 }
 0x539   : > { %v10486_v11 = vrot.slane %v10484_v42, 4  ;;  %v6586_v18 = vrot.slane %v6584_v10, 5  ;;  %v6539_v23 = vsel %vm15564_vm2, %v6534_v22, %v18036_v60  ;;  %v6549_v0 = vsel %vm15564_vm2, %v6544_v50, %v18045_v44  ;;  %v14862_v60 = vld [vmem:[#allocation5 + $0x19c] sm:$0xf] }
 0x53a   : > { %13799 = vmatmul.mubr.bf16.gmra.mrb[48].mxu0 %v12418_v48  ;;  %v5851_v48 = vld [vmem:[#allocation5 + $0x198] sm:$0xf]  ;;  %v6580_v53 = vrot.slane %v6578_v56, 5  ;;  %v6567_v15 = vor.u32 %v6566_v14, %v18048_v33  ;;  %v10498_v39 = vrot.slane %v14861_v19, 5  ;;  %v6608_v59 = vshll.u32 %v14862_v60, 16 }
 0x53b   : > { %13802 = vmatprep.mubr.bf16.mxu0 %v12419_v20  ;;  %v6590_v20 = vrot.slane %v6588_v52, 4  ;;  %v10488_v43 = vsel %vm16149_vm13, %v10486_v11, %v10487_v6  ;;  %v6599_v5 = vshrl.u32 %v5851_v48, 16  ;;  %v6602_v9 = vshll.u32 %v5851_v48, 16  ;;  %v14865_v14 = vld [vmem:[#allocation5 + $0x1a0] sm:$0x1] }
 0x53c   : > { %v6612_v30 = vshrl.u32 %v14862_v60, 16  ;;  %v6572_v58 = vrot.slane %v6570_v17, 5  ;;  %v6581_v37 = vor.u32 %v6580_v53, %v6577_v21  ;;  %v12197_v26 = vcombine.low %v6539_v23, %v6549_v0 }
 0x53d   : > { %v6558_v54 = vrot.slane %v6557_v1, 4  ;;  %v6568_v38 = vrot.slane %v6567_v15, 4  ;;  %v12392_v8 = vrot.slane %v10182_v55, 9  ;;  %v10500_v16 = vrot.slane %v10498_v39, 4 }
 0x53e   : > { %13475 = vmatmul.mubr.bf16.gmra.mrb[44].mxu1 %v17958_v2  ;;  %v10491_v2 = vrot.slane %v14856_v36, 5  ;;  %v6604_v63 = vrot.slane %v6602_v9, 5  ;;  %v6610_v29 = vrot.slane %v6608_v59, 5  ;;  %v6614_v36 = vrot.slane %v6612_v30, 4 }
 0x53f   : > { %13478 = vmatprep.mubr.bf16.mxu1 %v17997_v45  ;;  %v12390_v45 = vrot.slane %v10180_v62, 9  ;;  %v14864_v62 = vld [vmem:[#allocation5 + $0x1ac] sm:$0x1]  ;;  %v6563_v25 = vsel %vm15564_vm2, %v6558_v54, %v18048_v33  ;;  %v10499_v10 = vsel %vm16149_vm13, %v12392_v8, %v10498_v39  ;;  %v6573_v46 = vsel %vm15564_vm2, %v6568_v38, %v6572_v58 }
 0x540   : > { %v10493_v3 = vrot.slane %v10491_v2, 4  ;;  %v10492_v31 = vsel %vm16149_vm13, %v12391_v41, %v10491_v2  ;;  %v10501_v28 = vrot.slane %v14864_v62, 5  ;;  %v6582_v2 = vrot.slane %v6581_v37, 4 }
 0x541   : > { %v10485_v13 = vsel %vm16149_vm13, %v12390_v45, %v10484_v42  ;;  %v6601_v42 = vrot.slane %v6599_v5, 4  ;;  %v6615_v50 = vor.u32 %v6614_v36, %v6610_v29  ;;  %v6618_v45 = vshll.u32 %v14865_v14, 16 }
 0x542   : > { %13803 = vmatmul.mubr.bf16.gmra.mrb[52].mxu0 %v12420_v57  ;;  %v10495_v7 = vsel %vm16149_vm13, %v10493_v3, %v10494_v40  ;;  %v14863_v57 = vld [vmem:[#allocation5 + $0x194] sm:$0x1]  ;;  %v12422_v44 = vcombine.low %v10485_v13, %v10488_v43  ;;  %v10502_v52 = vsel %vm16149_vm13, %v10500_v16, %v10501_v28  ;;  %v12198_v17 = vcombine.low %v6563_v25, %v6573_v46 }
 0x543   : > { %13806 = vmatprep.mubr.bf16.mxu0 %v12421_v24  ;;  %v6594_v27 = vshll.u32 %v14863_v57, 16  ;;  %v6605_v22 = vor.u32 %v6604_v63, %v6601_v42  ;;  %v12424_v61 = vcombine.low %v10499_v10, %v10502_v52  ;;  %v6616_v32 = vrot.slane %v6615_v50, 4 }
 0x544   : > { %v6620_v4 = vrot.slane %v6618_v45, 5 }
 0x545   : > { %v6596_v56 = vrot.slane %v6594_v27, 5  ;;  %v6606_v11 = vrot.slane %v6605_v22, 4 }
 0x546   : > { %13479 = vmatmul.mubr.bf16.gmra.mrb[48].mxu1 %v12194_v35  ;;  %v6591_v35 = vor.u32 %v6590_v20, %v6586_v18  ;;  %v6621_v1 = vsel %vm15564_vm2, %v6616_v32, %v6620_v4 }
 0x547   : > { %13482 = vmatprep.mubr.bf16.mxu1 %v12195_v34  ;;  %v12423_v34 = vcombine.low %v10492_v31, %v10495_v7  ;;  %v6611_v6 = vsel %vm15564_vm2, %v6606_v11, %v6610_v29 }
 0x548   : > { %v6592_v49 = vrot.slane %v6591_v35, 4  ;;  %v12200_v48 = vcombine.low %v6611_v6, %v6621_v1 }
 0x54a   : > { %13807 = vmatmul.mubr.bf16.gmra.mrb[56].mxu0 %v12422_v44  ;;  %v6597_v33 = vsel %vm15564_vm2, %v6592_v49, %v6596_v56 }
 0x54b   : > { %13810 = vmatprep.mubr.bf16.mxu0 %v12423_v34 }
 0x54e   : > { %13483 = vmatmul.mubr.bf16.gmra.mrb[52].mxu1 %v18040_v47  ;;  %v6587_v47 = vsel %vm15564_vm2, %v6582_v2, %v6586_v18 }
 0x54f   : > { %13486 = vmatprep.mubr.bf16.mxu1 %v12197_v26  ;;  %v12199_v24 = vcombine.low %v6587_v47, %v6597_v33 }
 0x552   : > { %13811 = vmatmul.mubr.bf16.gmra.mrb[60].mxu0 %v12424_v61 }
 0x556   : > { %13487 = vmatmul.mubr.bf16.gmra.mrb[56].mxu1 %v12198_v17 }
 0x557   : > { %13490 = vmatprep.mubr.bf16.mxu1 %v12199_v24 }
 0x55e   : > { %13491 = vmatmul.mubr.bf16.gmra.mrb[60].mxu1 %v12200_v48 }
 0x579   : > { %v13352_v41 = vpop.f32.mrb[0].mxu1 }
 0x57a   : > { %v5439_v3 = vpop.f32.mrb[1].mxu1 }
 0x57b   : > { %v13353_v51 = vpop.f32.mrb[2].mxu1 }
 0x57c   : > { %v5442_v40 = vpop.f32.mrb[3].mxu1 }
 0x581   : > { %v13356_v21 = vpop.f32.mrb[4].mxu1 }
 0x582   : > { %v5455_v53 = vpop.f32.mrb[5].mxu1 }
 0x583   : > { %v13357_v18 = vpop.f32.mrb[6].mxu1 }
 0x584   : > { %v5458_v20 = vpop.f32.mrb[7].mxu1 }
 0x589   : > { %v13360_v23 = vpop.f32.mrb[8].mxu1 }
 0x58a   : > { %v5471_v0 = vpop.f32.mrb[9].mxu1 }
 0x58b   : > { %v13361_v15 = vpop.f32.mrb[10].mxu1 }
 0x58c   : > { %v5474_v13 = vpop.f32.mrb[11].mxu1 }
 0x591   : > { %v13364_v43 = vpop.f32.mrb[12].mxu1 }
 0x592   : > { %v5487_v5 = vpop.f32.mrb[13].mxu1 }
 0x593   : > { %v13365_v9 = vpop.f32.mrb[14].mxu1 }
 0x594   : > { %v5490_v19 = vpop.f32.mrb[15].mxu1 }
 0x599   : > { %v18087_v12 = vpop.f32.mrb[16].mxu1 }
 0x59a   : > { %v18089_v39 = vpop.f32.mrb[17].mxu1 }
 0x59b   : > { %v18091_v60 = vpop.f32.mrb[18].mxu1 }
 0x59c   : > { %v18093_v59 = vpop.f32.mrb[19].mxu1 }
 0x5a1   : > { %v18095_v30 = vpop.f32.mrb[20].mxu1 }
 0x5a2   : > { %v18097_v31 = vpop.f32.mrb[21].mxu1 }
 0x5a3   : > { %v18099_v7 = vpop.f32.mrb[22].mxu1 }
 0x5a4   : > { %v18101_v55 = vpop.f32.mrb[23].mxu1 }
 0x5a9   : > { %v18103_v58 = vpop.f32.mrb[24].mxu1 }
 0x5aa   : > { %v18105_v37 = vpop.f32.mrb[25].mxu1 }
 0x5ab   : > { %v18107_v35 = vpop.f32.mrb[26].mxu1 }
 0x5ac   : > { %v18109_v57 = vpop.f32.mrb[27].mxu1 }
 0x5ad   : > { %v13752_v27 = vpop.f32.mrb[0].mxu0 }
 0x5ae   : > { %v18113_v54 = vadd.f32 %v13752_v27, %v13352_v41  ;;  %v10730_v38 = vpop.f32.mrb[1].mxu0 }
 0x5af   : > { %v18117_v34 = vadd.f32 %v10730_v38, %v5439_v3  ;;  %v13753_v8 = vpop.f32.mrb[2].mxu0 }
 0x5b0   : > { %v18121_v62 = vadd.f32 %v13753_v8, %v13353_v51  ;;  %v10733_v28 = vpop.f32.mrb[3].mxu0 }
 0x5b1   : > { %v18111_v26 = vpop.f32.mrb[28].mxu1  ;;  %v18125_v63 = vadd.f32 %v10733_v28, %v5442_v40 }
 0x5b2   : > { %v18115_v44 = vpop.f32.mrb[29].mxu1 }
 0x5b3   : > { %v18119_v16 = vpop.f32.mrb[30].mxu1  ;;  %v11049_v29 = vadd.f32 %v18125_v63, %v18117_v34 }
 0x5b4   : > { %v18123_v42 = vpop.f32.mrb[31].mxu1 }
 0x5b5   : > { %v11050_v36 = vadd.f32 %v18113_v54, %v11049_v29  ;;  %v13756_v2 = vpop.f32.mrb[4].mxu0 }
 0x5b6   : > { %v18130_v49 = vadd.f32 %v13756_v2, %v13356_v21  ;;  %v10746_v56 = vpop.f32.mrb[5].mxu0 }
 0x5b7   : > { %v18132_v25 = vadd.f32 %v10746_v56, %v5455_v53  ;;  %v11051_v10 = vadd.f32 %v18121_v62, %v11050_v36  ;;  %v13757_v52 = vpop.f32.mrb[6].mxu0 }
 0x5b8   : > { %v18135_v46 = vadd.f32 %v13757_v52, %v13357_v18  ;;  %v10749_v22 = vpop.f32.mrb[7].mxu0 }
 0x5b9   : > { %v11052_v50 = vadd.f32 %v18132_v25, %v11051_v10  ;;  %v18138_v14 = vadd.f32 %v10749_v22, %v5458_v20 }
 0x5bb   : > { %v11053_v45 = vadd.f32 %v18138_v14, %v11052_v50 }
 0x5bd   : > { %v11054_v47 = vadd.f32 %v18130_v49, %v11053_v45  ;;  %v13760_v33 = vpop.f32.mrb[8].mxu0 }
 0x5be   : > { %v18142_v61 = vadd.f32 %v13760_v33, %v13360_v23  ;;  %v10762_v17 = vpop.f32.mrb[9].mxu0 }
 0x5bf   : > { %v18144_v24 = vadd.f32 %v10762_v17, %v5471_v0  ;;  %v11055_v11 = vadd.f32 %v18135_v46, %v11054_v47  ;;  %v13761_v32 = vpop.f32.mrb[10].mxu0 }
 0x5c0   : > { %v18147_v4 = vadd.f32 %v13761_v32, %v13361_v15  ;;  %v10765_v6 = vpop.f32.mrb[11].mxu0 }
 0x5c1   : > { %v11056_v1 = vadd.f32 %v18144_v24, %v11055_v11  ;;  %v18150_v48 = vadd.f32 %v10765_v6, %v5474_v13 }
 0x5c3   : > { %v11057_v41 = vadd.f32 %v18150_v48, %v11056_v1 }
 0x5c5   : > { %v11058_v3 = vadd.f32 %v18142_v61, %v11057_v41  ;;  %v13764_v51 = vpop.f32.mrb[12].mxu0 }
 0x5c6   : > { %v18154_v40 = vadd.f32 %v13764_v51, %v13364_v43  ;;  %v10778_v21 = vpop.f32.mrb[13].mxu0 }
 0x5c7   : > { %v18156_v53 = vadd.f32 %v10778_v21, %v5487_v5  ;;  %v11059_v18 = vadd.f32 %v18147_v4, %v11058_v3  ;;  %v13765_v20 = vpop.f32.mrb[14].mxu0 }
 0x5c8   : > { %v18159_v23 = vadd.f32 %v13765_v20, %v13365_v9  ;;  %v10781_v0 = vpop.f32.mrb[15].mxu0 }
 0x5c9   : > { %v11060_v15 = vadd.f32 %v18156_v53, %v11059_v18  ;;  %v18162_v13 = vadd.f32 %v10781_v0, %v5490_v19 }
 0x5cb   : > { %v11061_v27 = vadd.f32 %v18162_v13, %v11060_v15 }
 0x5cd   : > { %v11062_v38 = vadd.f32 %v18154_v40, %v11061_v27  ;;  %v13768_v8 = vpop.f32.mrb[16].mxu0 }
 0x5ce   : > { %v18167_v43 = vadd.f32 %v13768_v8, %v18087_v12  ;;  %v10794_v5 = vpop.f32.mrb[17].mxu0 }
 0x5cf   : > { %v18170_v28 = vadd.f32 %v10794_v5, %v18089_v39  ;;  %v11063_v9 = vadd.f32 %v18159_v23, %v11062_v38  ;;  %v13769_v29 = vpop.f32.mrb[18].mxu0 }
 0x5d0   : > { %v18174_v36 = vadd.f32 %v13769_v29, %v18091_v60  ;;  %v10797_v19 = vpop.f32.mrb[19].mxu0 }
 0x5d1   : > { %v11064_v2 = vadd.f32 %v18170_v28, %v11063_v9  ;;  %v18178_v56 = vadd.f32 %v10797_v19, %v18093_v59 }
 0x5d3   : > { %v11065_v10 = vadd.f32 %v18178_v56, %v11064_v2 }
 0x5d5   : > { %v11066_v12 = vadd.f32 %v18167_v43, %v11065_v10  ;;  %v13772_v52 = vpop.f32.mrb[20].mxu0 }
 0x5d6   : > { %v18183_v39 = vadd.f32 %v13772_v52, %v18095_v30  ;;  %v10810_v22 = vpop.f32.mrb[21].mxu0 }
 0x5d7   : > { %v18186_v50 = vadd.f32 %v10810_v22, %v18097_v31  ;;  %v11067_v60 = vadd.f32 %v18174_v36, %v11066_v12  ;;  %v13773_v45 = vpop.f32.mrb[22].mxu0 }
 0x5d8   : > { %19984 = vst [vmem:[#allocation21_spill] sm:$0xff] %v18183_v39  ;;  %v18190_v47 = vadd.f32 %v13773_v45, %v18099_v7  ;;  %v10813_v59 = vpop.f32.mrb[23].mxu0 }
 0x5d9   : > { %v11068_v33 = vadd.f32 %v18186_v50, %v11067_v60  ;;  %v18194_v17 = vadd.f32 %v10813_v59, %v18101_v55 }
 0x5da   : > { %19985 = vst [vmem:[#allocation30_spill] sm:$0xff] %v18190_v47 }
 0x5db   : > { %v11069_v11 = vadd.f32 %v18194_v17, %v11068_v33 }
 0x5dd   : > { %v11070_v30 = vadd.f32 %v18183_v39, %v11069_v11  ;;  %v13776_v32 = vpop.f32.mrb[24].mxu0 }
 0x5de   : > { %v18199_v31 = vadd.f32 %v13776_v32, %v18103_v58  ;;  %v10826_v6 = vpop.f32.mrb[25].mxu0 }
 0x5df   : > { %v18202_v1 = vadd.f32 %v10826_v6, %v18105_v37  ;;  %v11071_v7 = vadd.f32 %v18190_v47, %v11070_v30  ;;  %v13777_v41 = vpop.f32.mrb[26].mxu0 }
 0x5e0   : > { %19986 = vst [vmem:[#allocation31_spill] sm:$0xff] %v18199_v31  ;;  %v18206_v3 = vadd.f32 %v13777_v41, %v18107_v35  ;;  %v10829_v55 = vpop.f32.mrb[27].mxu0 }
 0x5e1   : > { %19987 = vst [vmem:[#allocation32_spill] sm:$0xff] %v18202_v1  ;;  %v11072_v51 = vadd.f32 %v18202_v1, %v11071_v7  ;;  %v18210_v21 = vadd.f32 %v10829_v55, %v18109_v57 }
 0x5e2   : > { %19988 = vst [vmem:[#allocation33_spill] sm:$0xff] %v18206_v3 }
 0x5e3   : > { %19989 = vst [vmem:[#allocation22_spill] sm:$0xff] %v18210_v21  ;;  %v11073_v18 = vadd.f32 %v18210_v21, %v11072_v51 }
 0x5e5   : > { %v11074_v58 = vadd.f32 %v18199_v31, %v11073_v18  ;;  %v13780_v20 = vpop.f32.mrb[28].mxu0 }
 0x5e6   : > { %v18215_v37 = vadd.f32 %v13780_v20, %v18111_v26  ;;  %v10842_v0 = vpop.f32.mrb[29].mxu0 }
 0x5e7   : > { %v18218_v15 = vadd.f32 %v10842_v0, %v18115_v44  ;;  %v11075_v35 = vadd.f32 %v18206_v3, %v11074_v58  ;;  %v13781_v27 = vpop.f32.mrb[30].mxu0 }
 0x5e8   : > { %19990 = vst [vmem:[#allocation24_spill] sm:$0xff] %v18215_v37  ;;  %v18222_v38 = vadd.f32 %v13781_v27, %v18119_v16  ;;  %v10845_v57 = vpop.f32.mrb[31].mxu0 }
 0x5e9   : > { %19991 = vst [vmem:[#allocation34_spill] sm:$0xff] %v18218_v15  ;;  %v18225_v8 = vadd.f32 %v10845_v57, %v18123_v42  ;;  %v11076_v5 = vadd.f32 %v18218_v15, %v11075_v35 }
 0x5ea   : > { %19992 = vst [vmem:[#allocation35_spill] sm:$0xff] %v18222_v38 }
 0x5eb   : > { %19993 = vst [vmem:[#allocation36_spill] sm:$0xff] %v18225_v8  ;;  %v11077_v26 = vadd.f32 %v18225_v8, %v11076_v5 }
 0x5ed   : > { %v13784_v9 = vpop.f32.mrb[32].mxu0  ;;  %v11078_v44 = vadd.f32 %v18215_v37, %v11077_v26 }
 0x5ee   : > { %v10858_v29 = vpop.f32.mrb[33].mxu0 }
 0x5ef   : > { %v13785_v19 = vpop.f32.mrb[34].mxu0  ;;  %v11079_v52 = vadd.f32 %v18222_v38, %v11078_v44 }
 0x5f0   : > { %v10861_v2 = vpop.f32.mrb[35].mxu0 }
 0x5f5   : > { %v13788_v10 = vpop.f32.mrb[36].mxu0 }
 0x5f6   : > { %v10874_v16 = vpop.f32.mrb[37].mxu0 }
 0x5f7   : > { %v13789_v42 = vpop.f32.mrb[38].mxu0 }
 0x5f8   : > { %v10877_v33 = vpop.f32.mrb[39].mxu0 }
 0x5f9   : > { %v13464_v12 = vpop.f32.mrb[32].mxu1 }
 0x5fa   : > { %v6977_v22 = vpop.f32.mrb[33].mxu1  ;;  %v18231_v60 = vadd.f32 %v13784_v9, %v13464_v12 }
 0x5fb   : > { %v13465_v45 = vpop.f32.mrb[34].mxu1  ;;  %v18233_v59 = vadd.f32 %v10858_v29, %v6977_v22 }
 0x5fc   : > { %19994 = vst [vmem:[#allocation37_spill] sm:$0xff] %v18231_v60  ;;  %v6980_v11 = vpop.f32.mrb[35].mxu1  ;;  %v18235_v30 = vadd.f32 %v13785_v19, %v13465_v45 }
 0x5fd   : > { %19995 = vst [vmem:[#allocation38_spill] sm:$0xff] %v18233_v59  ;;  %v11080_v32 = vadd.f32 %v18233_v59, %v11079_v52  ;;  %v18238_v6 = vadd.f32 %v10861_v2, %v6980_v11  ;;  %v13792_v41 = vpop.f32.mrb[40].mxu0 }
 0x5fe   : > { %19996 = vst [vmem:[#allocation26_spill] sm:$0xff] %v18235_v30  ;;  %v10890_v18 = vpop.f32.mrb[41].mxu0 }
 0x5ff   : > { %19997 = vst [vmem:[#allocation27_spill] sm:$0xff] %v18238_v6  ;;  %v11081_v7 = vadd.f32 %v18238_v6, %v11080_v32  ;;  %v13793_v0 = vpop.f32.mrb[42].mxu0 }
 0x600   : > { %v10893_v5 = vpop.f32.mrb[43].mxu0 }
 0x601   : > { %v11082_v55 = vadd.f32 %v18231_v60, %v11081_v7  ;;  %v13468_v51 = vpop.f32.mrb[36].mxu1 }
 0x602   : > { %v6993_v58 = vpop.f32.mrb[37].mxu1  ;;  %v18242_v20 = vadd.f32 %v13788_v10, %v13468_v51 }
 0x603   : > { %v13469_v35 = vpop.f32.mrb[38].mxu1  ;;  %v18244_v27 = vadd.f32 %v10874_v16, %v6993_v58  ;;  %v11083_v57 = vadd.f32 %v18235_v30, %v11082_v55 }
 0x604   : > { %19998 = vst [vmem:[#allocation39_spill] sm:$0xff] %v18242_v20  ;;  %v6996_v9 = vpop.f32.mrb[39].mxu1  ;;  %v18247_v26 = vadd.f32 %v13789_v42, %v13469_v35 }
 0x605   : > { %19999 = vst [vmem:[#allocation40_spill] sm:$0xff] %v18244_v27  ;;  %v11084_v29 = vadd.f32 %v18244_v27, %v11083_v57  ;;  %v18250_v19 = vadd.f32 %v10877_v33, %v6996_v9  ;;  %v13796_v44 = vpop.f32.mrb[44].mxu0 }
 0x606   : > { %20000 = vst [vmem:[#allocation28_spill] sm:$0xff] %v18247_v26  ;;  %v10906_v52 = vpop.f32.mrb[45].mxu0 }
 0x607   : > { %20001 = vst [vmem:[#allocation41_spill] sm:$0xff] %v18250_v19  ;;  %v11085_v2 = vadd.f32 %v18250_v19, %v11084_v29  ;;  %v13797_v45 = vpop.f32.mrb[46].mxu0 }
 0x608   : > { %v10909_v7 = vpop.f32.mrb[47].mxu0 }
 0x609   : > { %v11086_v10 = vadd.f32 %v18242_v20, %v11085_v2  ;;  %v13472_v12 = vpop.f32.mrb[40].mxu1 }
 0x60a   : > { %v7009_v22 = vpop.f32.mrb[41].mxu1  ;;  %v18254_v16 = vadd.f32 %v13792_v41, %v13472_v12 }
 0x60b   : > { %v13473_v11 = vpop.f32.mrb[42].mxu1  ;;  %v18256_v32 = vadd.f32 %v10890_v18, %v7009_v22  ;;  %v11087_v42 = vadd.f32 %v18247_v26, %v11086_v10 }
 0x60c   : > { %20002 = vst [vmem:[#allocation42_spill] sm:$0xff] %v18254_v16  ;;  %v7012_v55 = vpop.f32.mrb[43].mxu1  ;;  %v18259_v33 = vadd.f32 %v13793_v0, %v13473_v11 }
 0x60d   : > { %20003 = vst [vmem:[#allocation29_spill] sm:$0xff] %v18256_v32  ;;  %v11088_v51 = vadd.f32 %v18256_v32, %v11087_v42  ;;  %v18262_v58 = vadd.f32 %v10893_v5, %v7012_v55  ;;  %v13800_v57 = vpop.f32.mrb[48].mxu0 }
 0x60e   : > { %20004 = vst [vmem:[#allocation20_spill] sm:$0xff] %v18259_v33  ;;  %v10922_v29 = vpop.f32.mrb[49].mxu0 }
 0x60f   : > { %20005 = vst [vmem:[#allocation25_spill] sm:$0xff] %v18262_v58  ;;  %v11089_v35 = vadd.f32 %v18262_v58, %v11088_v51  ;;  %v13801_v12 = vpop.f32.mrb[50].mxu0 }
 0x610   : > { %v10925_v11 = vpop.f32.mrb[51].mxu0 }
 0x611   : > { %v11090_v41 = vadd.f32 %v18254_v16, %v11089_v35  ;;  %v13476_v9 = vpop.f32.mrb[44].mxu1 }
 0x612   : > { %v7025_v2 = vpop.f32.mrb[45].mxu1  ;;  %v18266_v18 = vadd.f32 %v13796_v44, %v13476_v9 }
 0x613   : > { %v13477_v10 = vpop.f32.mrb[46].mxu1  ;;  %v18268_v22 = vadd.f32 %v10906_v52, %v7025_v2  ;;  %v11091_v0 = vadd.f32 %v18259_v33, %v11090_v41 }
 0x614   : > { %v7028_v42 = vpop.f32.mrb[47].mxu1  ;;  %v18271_v5 = vadd.f32 %v13797_v45, %v13477_v10 }
 0x615   : > { %20006 = vst [vmem:[#allocation43_spill] sm:$0xff] %v18268_v22  ;;  %v11092_v55 = vadd.f32 %v18268_v22, %v11091_v0  ;;  %v18274_v51 = vadd.f32 %v10909_v7, %v7028_v42  ;;  %v13804_v16 = vpop.f32.mrb[52].mxu0 }
 0x616   : > { %v10938_v58 = vpop.f32.mrb[53].mxu0 }
 0x617   : > { %v11093_v35 = vadd.f32 %v18274_v51, %v11092_v55  ;;  %v13805_v2 = vpop.f32.mrb[54].mxu0 }
 0x618   : > { %v10941_v10 = vpop.f32.mrb[55].mxu0 }
 0x619   : > { %v11094_v44 = vadd.f32 %v18266_v18, %v11093_v35  ;;  %v13480_v9 = vpop.f32.mrb[48].mxu1 }
 0x61a   : > { %v7041_v32 = vpop.f32.mrb[49].mxu1  ;;  %v18278_v52 = vadd.f32 %v13800_v57, %v13480_v9 }
 0x61b   : > { %v13481_v41 = vpop.f32.mrb[50].mxu1  ;;  %v18280_v33 = vadd.f32 %v10922_v29, %v7041_v32  ;;  %v11095_v45 = vadd.f32 %v18271_v5, %v11094_v44 }
 0x61c   : > { %v7044_v0 = vpop.f32.mrb[51].mxu1  ;;  %v18283_v7 = vadd.f32 %v13801_v12, %v13481_v41 }
 0x61d   : > { %v11096_v42 = vadd.f32 %v18280_v33, %v11095_v45  ;;  %v13897_v55 = vadd.f32 %v10925_v11, %v7044_v0  ;;  %v13808_v35 = vpop.f32.mrb[56].mxu0 }
 0x61e   : > { %v10954_v57 = vpop.f32.mrb[57].mxu0 }
 0x61f   : > { %v11097_v22 = vadd.f32 %v13897_v55, %v11096_v42  ;;  %v13809_v27 = vpop.f32.mrb[58].mxu0 }
 0x620   : > { %v10957_v30 = vpop.f32.mrb[59].mxu0 }
 0x621   : > { %v11098_v26 = vadd.f32 %v18278_v52, %v11097_v22  ;;  %v13484_v20 = vpop.f32.mrb[52].mxu1 }
 0x622   : > { %v7057_v9 = vpop.f32.mrb[53].mxu1  ;;  %v13898_v19 = vadd.f32 %v13804_v16, %v13484_v20 }
 0x623   : > { %v13485_v32 = vpop.f32.mrb[54].mxu1  ;;  %v13899_v29 = vadd.f32 %v10938_v58, %v7057_v9  ;;  %v11099_v44 = vadd.f32 %v18283_v7, %v11098_v26 }
 0x624   : > { %v7060_v60 = vpop.f32.mrb[55].mxu1  ;;  %v13900_v12 = vadd.f32 %v13805_v2, %v13485_v32 }
 0x625   : > { %v11100_v41 = vadd.f32 %v13899_v29, %v11099_v44  ;;  %v13901_v6 = vadd.f32 %v10941_v10, %v7060_v60  ;;  %v13812_v11 = vpop.f32.mrb[60].mxu0 }
 0x626   : > { %v10970_v59 = vpop.f32.mrb[61].mxu0 }
 0x627   : > { %v11101_v45 = vadd.f32 %v13901_v6, %v11100_v41  ;;  %v13813_v37 = vpop.f32.mrb[62].mxu0 }
 0x628   : > { %v10973_v15 = vpop.f32.mrb[63].mxu0 }
 0x629   : > { %v11102_v0 = vadd.f32 %v13898_v19, %v11101_v45  ;;  %v13488_v42 = vpop.f32.mrb[56].mxu1 }
 0x62a   : > { %v7073_v22 = vpop.f32.mrb[57].mxu1  ;;  %v13902_v38 = vadd.f32 %v13808_v35, %v13488_v42 }
 0x62b   : > { %v13489_v8 = vpop.f32.mrb[58].mxu1  ;;  %v13903_v20 = vadd.f32 %v10954_v57, %v7073_v22  ;;  %v11103_v16 = vadd.f32 %v13900_v12, %v11102_v0 }
 0x62c   : > { %v7076_v58 = vpop.f32.mrb[59].mxu1  ;;  %v13904_v9 = vadd.f32 %v13809_v27, %v13489_v8 }
 0x62d   : > { %v11104_v26 = vadd.f32 %v13903_v20, %v11103_v16  ;;  %v13905_v3 = vadd.f32 %v10957_v30, %v7076_v58 }
 0x62f   : > { %v11105_v31 = vadd.f32 %v13905_v3, %v11104_v26 }
 0x631   : > { %v11106_v2 = vadd.f32 %v13902_v38, %v11105_v31  ;;  %v13492_v32 = vpop.f32.mrb[60].mxu1 }
 0x632   : > { %v7089_v60 = vpop.f32.mrb[61].mxu1  ;;  %v13906_v10 = vadd.f32 %v13812_v11, %v13492_v32 }
 0x633   : > { %v13493_v44 = vpop.f32.mrb[62].mxu1  ;;  %v13907_v41 = vadd.f32 %v10970_v59, %v7089_v60  ;;  %v11107_v45 = vadd.f32 %v13904_v9, %v11106_v2 }
 0x634   : > { %v7092_v21 = vpop.f32.mrb[63].mxu1  ;;  %v13908_v1 = vadd.f32 %v13813_v37, %v13493_v44 }
 0x635   : > { %v11108_v35 = vadd.f32 %v13907_v41, %v11107_v45  ;;  %v13909_v42 = vadd.f32 %v10973_v15, %v7092_v21 }
 0x637   : > { %v11109_v47 = vadd.f32 %v13909_v42, %v11108_v35 }
 0x639   : > { %v11110_v57 = vadd.f32 %v13906_v10, %v11109_v47 }
 0x63b   : > { %v11111_v0 = vadd.f32 %v13908_v1, %v11110_v57 }
 0x63d   : > { %v11112_v22 = vrot.slane %v11111_v0, 4 }
 0x63f   : > { %v11113_v39 = vadd.f32 %v11112_v22, %v11111_v0 }
 0x641   : > { %v11114_v8 = vrot.slane %v11113_v39, 2 }
 0x643   : > { %v11115_v27 = vadd.f32 %v11114_v8, %v11113_v39 }
 0x645   : > { %v11116_v30 = vrot.slane %v11115_v27, 1 }
 0x647   : > { %v11117_v16 = vadd.f32 %v11116_v30, %v11115_v27 }
 0x649   : > { %v18288_v31 = vmul.f32 0.001953125, %v11117_v16 }
 0x64b   : > { %v18292_v11 = vsub.f32 %v18274_v51, %v18288_v31  ;;  %v18296_v37 = vsub.f32 %v18266_v18, %v18288_v31  ;;  %v18300_v47 = vsub.f32 %v18271_v5, %v18288_v31  ;;  %v18304_v21 = vsub.f32 %v18280_v33, %v18288_v31 }
 0x64c   : > { %v18307_v39 = vsub.f32 %v13897_v55, %v18288_v31  ;;  %v18311_v15 = vsub.f32 %v18278_v52, %v18288_v31  ;;  %v18315_v59 = vsub.f32 %v18283_v7, %v18288_v31  ;;  %v18318_v18 = vsub.f32 %v13899_v29, %v18288_v31 }
 0x64d   : > { %v18321_v5 = vsub.f32 %v13901_v6, %v18288_v31  ;;  %v18324_v33 = vsub.f32 %v13898_v19, %v18288_v31  ;;  %v18327_v51 = vsub.f32 %v13900_v12, %v18288_v31  ;;  %v18330_v55 = vsub.f32 %v13903_v20, %v18288_v31 }
 0x64e   : > { %v18333_v52 = vsub.f32 %v13905_v3, %v18288_v31  ;;  %v18336_v7 = vsub.f32 %v13902_v38, %v18288_v31  ;;  %v18339_v29 = vsub.f32 %v13904_v9, %v18288_v31  ;;  %v18342_v6 = vsub.f32 %v13907_v41, %v18288_v31 }
 0x64f   : > { %v18345_v19 = vsub.f32 %v13909_v42, %v18288_v31  ;;  %v18348_v12 = vsub.f32 %v13906_v10, %v18288_v31  ;;  %v18351_v20 = vsub.f32 %v13908_v1, %v18288_v31  ;;  %v18355_v3 = vsub.f32 %v18117_v34, %v18288_v31 }
 0x650   : > { %20007 = vst [vmem:[#allocation23_spill] sm:$0xff] %v18333_v52  ;;  %20008 = vst [vmem:[#allocation44_spill] sm:$0xff] %v18336_v7  ;;  %v18359_v38 = vsub.f32 %v18125_v63, %v18288_v31  ;;  %v18363_v58 = vsub.f32 %v18113_v54, %v18288_v31  ;;  %v18371_v1 = vsub.f32 %v18121_v62, %v18288_v31 }
 0x651   : > { %20009 = vst [vmem:[#allocation45_spill] sm:$0xff] %v18339_v29  ;;  %20010 = vst [vmem:[#allocation46_spill] sm:$0xff] %v18342_v6  ;;  %v11183_v9 = vmul.f32 %v18355_v3, %v18355_v3  ;;  %v18375_v34 = vsub.f32 %v18132_v25, %v18288_v31  ;;  %v18381_v54 = vsub.f32 %v18138_v14, %v18288_v31 }
 0x652   : > { %20011 = vst [vmem:[#allocation47_spill] sm:$0xff] %v18348_v12  ;;  %20012 = vst [vmem:[#allocation48_spill] sm:$0xff] %v18351_v20  ;;  %v11184_v26 = vmul.f32 %v18359_v38, %v18359_v38  ;;  %v11185_v63 = vmul.f32 %v18363_v58, %v18363_v58  ;;  %v11186_v32 = vmul.f32 %v18371_v1, %v18371_v1 }
 0x653   : > { %v18387_v62 = vsub.f32 %v18130_v49, %v18288_v31  ;;  %v11187_v25 = vmul.f32 %v18375_v34, %v18375_v34  ;;  %v18393_v44 = vsub.f32 %v18135_v46, %v18288_v31  ;;  %v11188_v14 = vmul.f32 %v18381_v54, %v18381_v54 }
 0x654   : > { %v11247_v2 = vadd.f32 %v11184_v26, %v11183_v9  ;;  %v18399_v45 = vsub.f32 %v18144_v24, %v18288_v31  ;;  %v18405_v42 = vsub.f32 %v18150_v48, %v18288_v31  ;;  %v18411_v0 = vsub.f32 %v18142_v61, %v18288_v31 }
 0x655   : > { %v11189_v49 = vmul.f32 %v18387_v62, %v18387_v62  ;;  %v11190_v46 = vmul.f32 %v18393_v44, %v18393_v44  ;;  %v18417_v8 = vsub.f32 %v18147_v4, %v18288_v31  ;;  %v18423_v30 = vsub.f32 %v18156_v53, %v18288_v31 }
 0x656   : > { %v11248_v60 = vadd.f32 %v11247_v2, %v11185_v63  ;;  %v11191_v24 = vmul.f32 %v18399_v45, %v18399_v45  ;;  %v11192_v48 = vmul.f32 %v18405_v42, %v18405_v42  ;;  %v11193_v61 = vmul.f32 %v18411_v0, %v18411_v0 }
 0x657   : > { %v18429_v9 = vsub.f32 %v18162_v13, %v18288_v31  ;;  %v11194_v4 = vmul.f32 %v18417_v8, %v18417_v8  ;;  %v18435_v63 = vsub.f32 %v18154_v40, %v18288_v31  ;;  %v11195_v53 = vmul.f32 %v18423_v30, %v18423_v30 }
 0x658   : > { %v11249_v10 = vadd.f32 %v11248_v60, %v11186_v32  ;;  %v18441_v32 = vsub.f32 %v18159_v23, %v18288_v31 }
 0x659   : > { %v11196_v13 = vmul.f32 %v18429_v9, %v18429_v9  ;;  %v11197_v40 = vmul.f32 %v18435_v63, %v18435_v63 }
 0x65a   : > { %v11250_v41 = vadd.f32 %v11249_v10, %v11187_v25  ;;  %v18447_v25 = vsub.f32 %v18170_v28, %v18288_v31  ;;  %v11198_v23 = vmul.f32 %v18441_v32, %v18441_v32 }
 0x65c   : > { %v11251_v35 = vadd.f32 %v11250_v41, %v11188_v14  ;;  %v18453_v14 = vsub.f32 %v18178_v56, %v18288_v31  ;;  %v11199_v28 = vmul.f32 %v18447_v25, %v18447_v25 }
 0x65e   : > { %v11252_v57 = vadd.f32 %v11251_v35, %v11189_v49  ;;  %v18459_v49 = vsub.f32 %v18167_v43, %v18288_v31  ;;  %v11200_v56 = vmul.f32 %v18453_v14, %v18453_v14 }
 0x660   : > { %v11253_v22 = vadd.f32 %v11252_v57, %v11190_v46  ;;  %v18465_v46 = vsub.f32 %v18174_v36, %v18288_v31  ;;  %v11201_v43 = vmul.f32 %v18459_v49, %v18459_v49 }
 0x662   : > { %v11254_v27 = vadd.f32 %v11253_v22, %v11191_v24  ;;  %v18471_v24 = vsub.f32 %v18186_v50, %v18288_v31  ;;  %v11202_v36 = vmul.f32 %v18465_v46, %v18465_v46 }
 0x664   : > { %v11255_v16 = vadd.f32 %v11254_v27, %v11192_v48  ;;  %v18477_v48 = vsub.f32 %v18194_v17, %v18288_v31  ;;  %v11203_v50 = vmul.f32 %v18471_v24, %v18471_v24 }
 0x666   : > { %v11256_v26 = vadd.f32 %v11255_v16, %v11193_v61  ;;  %v20013_v61 = vld [vmem:[#allocation21_spill] sm:$0xff]  ;;  %v11204_v17 = vmul.f32 %v18477_v48, %v18477_v48 }
 0x667   : > { %v18483_v16 = vsub.f32 %v20013_v61, %v18288_v31 }
 0x668   : > { %v11257_v2 = vadd.f32 %v11256_v26, %v11194_v4  ;;  %v20014_v26 = vld [vmem:[#allocation30_spill] sm:$0xff] }
 0x66a   : > { %v11258_v60 = vadd.f32 %v11257_v2, %v11195_v53  ;;  %v18489_v53 = vsub.f32 %v20014_v26, %v18288_v31 }
 0x66c   : > { %v11259_v10 = vadd.f32 %v11258_v60, %v11196_v13  ;;  %v20015_v13 = vld [vmem:[#allocation32_spill] sm:$0xff] }
 0x66d   : > { %v18495_v60 = vsub.f32 %v20015_v13, %v18288_v31  ;;  %v20021_v13 = vld [vmem:[#allocation36_spill] sm:$0xff] }
 0x66e   : > { %v11260_v41 = vadd.f32 %v11259_v10, %v11197_v40  ;;  %v11205_v40 = vmul.f32 %v18483_v16, %v18483_v16 }
 0x670   : > { %v11261_v35 = vadd.f32 %v11260_v41, %v11198_v23  ;;  %v20016_v23 = vld [vmem:[#allocation22_spill] sm:$0xff] }
 0x671   : > { %v18501_v41 = vsub.f32 %v20016_v23, %v18288_v31 }
 0x672   : > { %v11262_v57 = vadd.f32 %v11261_v35, %v11199_v28  ;;  %v11206_v28 = vmul.f32 %v18489_v53, %v18489_v53 }
 0x673   : > { %v11208_v61 = vmul.f32 %v18501_v41, %v18501_v41 }
 0x674   : > { %v11263_v22 = vadd.f32 %v11262_v57, %v11200_v56  ;;  %v20017_v56 = vld [vmem:[#allocation31_spill] sm:$0xff] }
 0x675   : > { %v18507_v57 = vsub.f32 %v20017_v56, %v18288_v31 }
 0x676   : > { %v11264_v27 = vadd.f32 %v11263_v22, %v11201_v43  ;;  %v11207_v43 = vmul.f32 %v18495_v60, %v18495_v60 }
 0x678   : > { %v11265_v4 = vadd.f32 %v11264_v27, %v11202_v36  ;;  %v20018_v36 = vld [vmem:[#allocation33_spill] sm:$0xff] }
 0x679   : > { %v18513_v27 = vsub.f32 %v20018_v36, %v18288_v31 }
 0x67a   : > { %v11266_v2 = vadd.f32 %v11265_v4, %v11203_v50  ;;  %v20019_v4 = vld [vmem:[#allocation34_spill] sm:$0xff] }
 0x67b   : > { %v18519_v26 = vsub.f32 %v20019_v4, %v18288_v31  ;;  %v20027_v4 = vld [vmem:[#allocation38_spill] sm:$0xff] }
 0x67c   : > { %v11267_v10 = vadd.f32 %v11266_v2, %v11204_v17  ;;  %v11209_v17 = vmul.f32 %v18507_v57, %v18507_v57 }
 0x67d   : > { %20020 = vst [vmem:[#allocation21_spill] sm:$0xff] %v18519_v26  ;;  %v11211_v56 = vmul.f32 %v18519_v26, %v18519_v26 }
 0x67e   : > { %v11268_v35 = vadd.f32 %v11267_v10, %v11205_v40  ;;  %v18525_v40 = vsub.f32 %v20021_v13, %v18288_v31  ;;  %v11210_v10 = vmul.f32 %v18513_v27, %v18513_v27  ;;  %v18543_v13 = vsub.f32 %v20027_v4, %v18288_v31  ;;  %v20033_v4 = vld [vmem:[#allocation26_spill] sm:$0xff] }
 0x680   : > { %v11269_v22 = vadd.f32 %v11268_v35, %v11206_v28  ;;  %20022 = vst [vmem:[#allocation30_spill] sm:$0xff] %v18525_v40  ;;  %v20023_v28 = vld [vmem:[#allocation24_spill] sm:$0xff]  ;;  %20028 = vst [vmem:[#allocation31_spill] sm:$0xff] %v18543_v13 }
 0x681   : > { %v18531_v35 = vsub.f32 %v20023_v28, %v18288_v31  ;;  %v20029_v28 = vld [vmem:[#allocation27_spill] sm:$0xff] }
 0x682   : > { %v11270_v50 = vadd.f32 %v11269_v22, %v11207_v43  ;;  %v20025_v22 = vld [vmem:[#allocation35_spill] sm:$0xff]  ;;  %v18549_v26 = vsub.f32 %v20029_v28, %v18288_v31  ;;  %v20035_v28 = vld [vmem:[#allocation40_spill] sm:$0xff] }
 0x683   : > { %20024 = vst [vmem:[#allocation32_spill] sm:$0xff] %v18531_v35  ;;  %v18537_v36 = vsub.f32 %v20025_v22, %v18288_v31  ;;  %v20031_v22 = vld [vmem:[#allocation37_spill] sm:$0xff] }
 0x684   : > { %v11271_v2 = vadd.f32 %v11270_v50, %v11208_v61  ;;  %v11212_v61 = vmul.f32 %v18525_v40, %v18525_v40  ;;  %20030 = vst [vmem:[#allocation33_spill] sm:$0xff] %v18549_v26  ;;  %v18555_v40 = vsub.f32 %v20031_v22, %v18288_v31  ;;  %v20037_v22 = vld [vmem:[#allocation41_spill] sm:$0xff] }
 0x685   : > { %20026 = vst [vmem:[#allocation22_spill] sm:$0xff] %v18537_v36 }
 0x686   : > { %v11272_v23 = vadd.f32 %v11271_v2, %v11209_v17  ;;  %v11213_v17 = vmul.f32 %v18531_v35, %v18531_v35  ;;  %20032 = vst [vmem:[#allocation34_spill] sm:$0xff] %v18555_v40  ;;  %v18561_v35 = vsub.f32 %v20033_v4, %v18288_v31  ;;  %v20039_v4 = vld [vmem:[#allocation39_spill] sm:$0xff] }
 0x688   : > { %v11273_v43 = vadd.f32 %v11272_v23, %v11210_v10  ;;  %v11214_v10 = vmul.f32 %v18537_v36, %v18537_v36  ;;  %20034 = vst [vmem:[#allocation36_spill] sm:$0xff] %v18561_v35  ;;  %v18567_v36 = vsub.f32 %v20035_v28, %v18288_v31  ;;  %v20041_v28 = vld [vmem:[#allocation28_spill] sm:$0xff] }
 0x68a   : > { %v11274_v50 = vadd.f32 %v11273_v43, %v11211_v56  ;;  %v11215_v56 = vmul.f32 %v18543_v13, %v18543_v13  ;;  %20036 = vst [vmem:[#allocation24_spill] sm:$0xff] %v18567_v36  ;;  %v18573_v13 = vsub.f32 %v20037_v22, %v18288_v31  ;;  %v20043_v22 = vld [vmem:[#allocation29_spill] sm:$0xff] }
 0x68c   : > { %v11275_v2 = vadd.f32 %v11274_v50, %v11212_v61  ;;  %v11216_v61 = vmul.f32 %v18549_v26, %v18549_v26  ;;  %20038 = vst [vmem:[#allocation35_spill] sm:$0xff] %v18573_v13  ;;  %v18579_v26 = vsub.f32 %v20039_v4, %v18288_v31  ;;  %v20044_v4 = vld [vmem:[#allocation25_spill] sm:$0xff] }
 0x68e   : > { %v11276_v23 = vadd.f32 %v11275_v2, %v11213_v17  ;;  %v11217_v17 = vmul.f32 %v18555_v40, %v18555_v40  ;;  %20040 = vst [vmem:[#allocation38_spill] sm:$0xff] %v18579_v26  ;;  %v18585_v40 = vsub.f32 %v20041_v28, %v18288_v31  ;;  %v20046_v28 = vld [vmem:[#allocation42_spill] sm:$0xff] }
 0x690   : > { %v11277_v43 = vadd.f32 %v11276_v23, %v11214_v10  ;;  %v11218_v10 = vmul.f32 %v18561_v35, %v18561_v35  ;;  %20042 = vst [vmem:[#allocation27_spill] sm:$0xff] %v18585_v40  ;;  %v18591_v35 = vsub.f32 %v20043_v22, %v18288_v31  ;;  %v20047_v22 = vld [vmem:[#allocation20_spill] sm:$0xff] }
 0x692   : > { %v11278_v50 = vadd.f32 %v11277_v43, %v11215_v56  ;;  %v11219_v56 = vmul.f32 %v18567_v36, %v18567_v36  ;;  %v18597_v36 = vsub.f32 %v20044_v4, %v18288_v31  ;;  %v20048_v4 = vld [vmem:[#allocation43_spill] sm:$0xff] }
 0x694   : > { %v11279_v2 = vadd.f32 %v11278_v50, %v11216_v61  ;;  %v11220_v61 = vmul.f32 %v18573_v13, %v18573_v13  ;;  %20045 = vst [vmem:[#allocation37_spill] sm:$0xff] %v18597_v36  ;;  %v18603_v13 = vsub.f32 %v20046_v28, %v18288_v31 }
 0x696   : > { %v11280_v23 = vadd.f32 %v11279_v2, %v11217_v17  ;;  %v11221_v17 = vmul.f32 %v18579_v26, %v18579_v26  ;;  %v18609_v26 = vsub.f32 %v20047_v22, %v18288_v31 }
 0x698   : > { %v11281_v43 = vadd.f32 %v11280_v23, %v11218_v10  ;;  %v11222_v10 = vmul.f32 %v18585_v40, %v18585_v40  ;;  %v18615_v40 = vsub.f32 %v20048_v4, %v18288_v31  ;;  %v11226_v28 = vmul.f32 %v18609_v26, %v18609_v26 }
 0x699   : > { %v11229_v31 = vmul.f32 %v18296_v37, %v18296_v37  ;;  %v11230_v4 = vmul.f32 %v18300_v47, %v18300_v47 }
 0x69a   : > { %v11282_v50 = vadd.f32 %v11281_v43, %v11219_v56  ;;  %v11223_v56 = vmul.f32 %v18591_v35, %v18591_v35 }
 0x69c   : > { %v11283_v2 = vadd.f32 %v11282_v50, %v11220_v61  ;;  %v11224_v61 = vmul.f32 %v18597_v36, %v18597_v36  ;;  %v11228_v36 = vmul.f32 %v18292_v11, %v18292_v11 }
 0x69e   : > { %v11284_v23 = vadd.f32 %v11283_v2, %v11221_v17  ;;  %v11225_v17 = vmul.f32 %v18603_v13, %v18603_v13 }
 0x6a0   : > { %v11285_v43 = vadd.f32 %v11284_v23, %v11222_v10  ;;  %v11227_v23 = vmul.f32 %v18615_v40, %v18615_v40 }
 0x6a2   : > { %v11286_v50 = vadd.f32 %v11285_v43, %v11223_v56 }
 0x6a4   : > { %v11287_v2 = vadd.f32 %v11286_v50, %v11224_v61  ;;  %v11231_v50 = vmul.f32 %v18304_v21, %v18304_v21 }
 0x6a6   : > { %v11288_v10 = vadd.f32 %v11287_v2, %v11225_v17  ;;  %v11232_v2 = vmul.f32 %v18307_v39, %v18307_v39 }
 0x6a8   : > { %v11289_v22 = vadd.f32 %v11288_v10, %v11226_v28  ;;  %v11233_v10 = vmul.f32 %v18311_v15, %v18311_v15 }
 0x6aa   : > { %v11290_v56 = vadd.f32 %v11289_v22, %v11227_v23  ;;  %v11234_v22 = vmul.f32 %v18315_v59, %v18315_v59 }
 0x6ac   : > { %v11291_v43 = vadd.f32 %v11290_v56, %v11228_v36  ;;  %v11235_v56 = vmul.f32 %v18318_v18, %v18318_v18 }
 0x6ae   : > { %v11292_v61 = vadd.f32 %v11291_v43, %v11229_v31  ;;  %v11236_v43 = vmul.f32 %v18321_v5, %v18321_v5 }
 0x6b0   : > { %v11293_v17 = vadd.f32 %v11292_v61, %v11230_v4  ;;  %v11237_v61 = vmul.f32 %v18324_v33, %v18324_v33 }
 0x6b2   : > { %v11294_v28 = vadd.f32 %v11293_v17, %v11231_v50  ;;  %v11238_v17 = vmul.f32 %v18327_v51, %v18327_v51 }
 0x6b4   : > { %v11295_v23 = vadd.f32 %v11294_v28, %v11232_v2  ;;  %v11239_v28 = vmul.f32 %v18330_v55, %v18330_v55 }
 0x6b6   : > { %v11296_v36 = vadd.f32 %v11295_v23, %v11233_v10  ;;  %v11240_v23 = vmul.f32 %v18333_v52, %v18333_v52 }
 0x6b8   : > { %v11297_v31 = vadd.f32 %v11296_v36, %v11234_v22  ;;  %v11241_v36 = vmul.f32 %v18336_v7, %v18336_v7 }
 0x6ba   : > { %v11298_v4 = vadd.f32 %v11297_v31, %v11235_v56  ;;  %v11242_v31 = vmul.f32 %v18339_v29, %v18339_v29 }
 0x6bc   : > { %v11299_v50 = vadd.f32 %v11298_v4, %v11236_v43  ;;  %v11243_v4 = vmul.f32 %v18342_v6, %v18342_v6 }
 0x6be   : > { %v11300_v2 = vadd.f32 %v11299_v50, %v11237_v61  ;;  %v11244_v50 = vmul.f32 %v18345_v19, %v18345_v19 }
 0x6c0   : > { %v11301_v10 = vadd.f32 %v11300_v2, %v11238_v17  ;;  %v11245_v2 = vmul.f32 %v18348_v12, %v18348_v12  ;;  %v18667_v12 = vld [vmem:[#allocation12 + $0x18] sm:$0xff]  }
 0x6c1   : > { %20052 = vst [vmem:[#allocation39_spill] sm:$0xff] %v18667_v12  ;;  %v18705_v12 = vld [vmem:[#allocation12 + $0x68] sm:$0xff]  }
 0x6c2   : > { %v11302_v22 = vadd.f32 %v11301_v10, %v11239_v28  ;;  %v11246_v10 = vmul.f32 %v18351_v20, %v18351_v20  ;;  %20062 = vst [vmem:[#allocation52_spill] sm:$0xff] %v18705_v12  ;;  %v18745_v12 = vld [vmem:[#allocation12 + $0xb8] sm:$0xff]  }
 0x6c3   : > { %20072 = vst [vmem:[#allocation62_spill] sm:$0xff] %v18745_v12  ;;  %v18779_v20 = vld [vmem:[#allocation12 + $0xf8] sm:$0xff]   ;;  %v20094_v12 = vld [vmem:[#allocation37_spill] sm:$0xff] }
 0x6c4   : > { %v11303_v56 = vadd.f32 %v11302_v22, %v11240_v23  ;;  %20080 = vst [vmem:[#allocation70_spill] sm:$0xff] %v18779_v20  ;;  %v20088_v20 = vld [vmem:[#allocation34_spill] sm:$0xff] }
 0x6c6   : > { %v11304_v43 = vadd.f32 %v11303_v56, %v11241_v36 }
 0x6c8   : > { %v11305_v61 = vadd.f32 %v11304_v43, %v11242_v31  ;;  %v18661_v31 = vld [vmem:[#allocation12] sm:$0xff]   ;;  %v18663_v43 = vld [vmem:[#allocation12 + $0x8] sm:$0xff]  }
 0x6c9   : > { %20049 = vst [vmem:[#allocation26_spill] sm:$0xff] %v18661_v31  ;;  %20050 = vst [vmem:[#allocation40_spill] sm:$0xff] %v18663_v43  ;;  %v18697_v43 = vld [vmem:[#allocation12 + $0x58] sm:$0xff]  }
 0x6ca   : > { %v11306_v17 = vadd.f32 %v11305_v61, %v11243_v4  ;;  %v18665_v61 = vld [vmem:[#allocation12 + $0x10] sm:$0xff]   ;;  %20060 = vst [vmem:[#allocation50_spill] sm:$0xff] %v18697_v43  ;;  %v18737_v43 = vld [vmem:[#allocation12 + $0xa8] sm:$0xff]   ;;  %v18764_v31 = vld [vmem:[#allocation12 + $0xd8] sm:$0xff]  }
 0x6cb   : > { %20051 = vst [vmem:[#allocation41_spill] sm:$0xff] %v18665_v61  ;;  %20070 = vst [vmem:[#allocation60_spill] sm:$0xff] %v18737_v43  ;;  %v18777_v43 = vld [vmem:[#allocation12 + $0xf0] sm:$0xff]  }
 0x6cc   : > { %v11307_v28 = vadd.f32 %v11306_v17, %v11244_v50  ;;  %v18669_v50 = vld [vmem:[#allocation12 + $0x20] sm:$0xff]   ;;  %20076 = vst [vmem:[#allocation66_spill] sm:$0xff] %v18764_v31  ;;  %20079 = vst [vmem:[#allocation69_spill] sm:$0xff] %v18777_v43  ;;  %v20089_v43 = vld [vmem:[#allocation36_spill] sm:$0xff] }
 0x6cd   : > { %20053 = vst [vmem:[#allocation28_spill] sm:$0xff] %v18669_v50  ;;  %v18766_v50 = vld [vmem:[#allocation12 + $0xe0] sm:$0xff]   ;;  %v20092_v31 = vld [vmem:[#allocation38_spill] sm:$0xff] }
 0x6ce   : > { %v11308_v23 = vadd.f32 %v11307_v28, %v11245_v2  ;;  %v18674_v28 = vld [vmem:[#allocation12 + $0x28] sm:$0xff]   ;;  %20077 = vst [vmem:[#allocation67_spill] sm:$0xff] %v18766_v50  ;;  %v20091_v50 = vld [vmem:[#allocation35_spill] sm:$0xff] }
 0x6cf   : > { %20054 = vst [vmem:[#allocation29_spill] sm:$0xff] %v18674_v28  ;;  %v18689_v2 = vld [vmem:[#allocation12 + $0x48] sm:$0xff]   ;;  %v18713_v28 = vld [vmem:[#allocation12 + $0x78] sm:$0xff]  }
 0x6d0   : > { %v11309_v22 = vadd.f32 %v11308_v23, %v11246_v10  ;;  %20058 = vst [vmem:[#allocation43_spill] sm:$0xff] %v18689_v2  ;;  %v18691_v10 = vld [vmem:[#allocation12 + $0x50] sm:$0xff]   ;;  %20064 = vst [vmem:[#allocation54_spill] sm:$0xff] %v18713_v28  ;;  %v18729_v2 = vld [vmem:[#allocation12 + $0x98] sm:$0xff]  }
 0x6d1   : > { %20059 = vst [vmem:[#allocation49_spill] sm:$0xff] %v18691_v10  ;;  %20068 = vst [vmem:[#allocation58_spill] sm:$0xff] %v18729_v2  ;;  %v18739_v23 = vld [vmem:[#allocation12 + $0xb0] sm:$0xff]   ;;  %v20085_v28 = vld [vmem:[#allocation22_spill] sm:$0xff] }
 0x6d2   : > { %v11310_v7 = vrot.slane %v11309_v22, 4  ;;  %20071 = vst [vmem:[#allocation61_spill] sm:$0xff] %v18739_v23  ;;  %v20082_v10 = vld [vmem:[#allocation21_spill] sm:$0xff]  ;;  %v20084_v23 = vld [vmem:[#allocation32_spill] sm:$0xff] }
 0x6d4   : > { %v11311_v29 = vadd.f32 %v11310_v7, %v11309_v22  ;;  %v18723_v22 = vld [vmem:[#allocation12 + $0x90] sm:$0xff]   ;;  %v18747_v7 = vld [vmem:[#allocation12 + $0xc0] sm:$0xff]  }
 0x6d5   : > { %20067 = vst [vmem:[#allocation57_spill] sm:$0xff] %v18723_v22  ;;  %20073 = vst [vmem:[#allocation63_spill] sm:$0xff] %v18747_v7  ;;  %v20081_v7 = vld [vmem:[#allocation19_spill] sm:$0xff] }
 0x6d6   : > { %v11312_v36 = vrot.slane %v11311_v29, 2 }
 0x6d8   : > { %v11313_v56 = vadd.f32 %v11312_v36, %v11311_v29  ;;  %v18682_v36 = vld [vmem:[#allocation12 + $0x38] sm:$0xff]   ;;  %v18715_v29 = vld [vmem:[#allocation12 + $0x80] sm:$0xff]  }
 0x6d9   : > { %20056 = vst [vmem:[#allocation42_spill] sm:$0xff] %v18682_v36  ;;  %20065 = vst [vmem:[#allocation55_spill] sm:$0xff] %v18715_v29  ;;  %v18721_v36 = vld [vmem:[#allocation12 + $0x88] sm:$0xff]  }
 0x6da   : > { %v11314_v52 = vrot.slane %v11313_v56, 1  ;;  %20066 = vst [vmem:[#allocation56_spill] sm:$0xff] %v18721_v36  ;;  %v18756_v36 = vld [vmem:[#allocation12 + $0xc8] sm:$0xff]  }
 0x6db   : > { %20074 = vst [vmem:[#allocation64_spill] sm:$0xff] %v18756_v36  ;;  %v20083_v36 = vld [vmem:[#allocation30_spill] sm:$0xff] }
 0x6dc   : > { %v11315_v6 = vadd.f32 %v11314_v52, %v11313_v56  ;;  %v18676_v52 = vld [vmem:[#allocation12 + $0x30] sm:$0xff]   ;;  %v18684_v56 = vld [vmem:[#allocation12 + $0x40] sm:$0xff]  }
 0x6dd   : > { %20055 = vst [vmem:[#allocation25_spill] sm:$0xff] %v18676_v52  ;;  %20057 = vst [vmem:[#allocation20_spill] sm:$0xff] %v18684_v56  ;;  %v18758_v52 = vld [vmem:[#allocation12 + $0xd0] sm:$0xff]  }
 0x6de   : > { %v11316_v4 = vmul.f32 0.001953125, %v11315_v6  ;;  %v18707_v6 = vld [vmem:[#allocation12 + $0x70] sm:$0xff]   ;;  %20075 = vst [vmem:[#allocation65_spill] sm:$0xff] %v18758_v52  ;;  %v20093_v52 = vld [vmem:[#allocation27_spill] sm:$0xff] }
 0x6df   : > { %20063 = vst [vmem:[#allocation53_spill] sm:$0xff] %v18707_v6  ;;  %v18772_v6 = vld [vmem:[#allocation12 + $0xe8] sm:$0xff]  }
 0x6e0   : > { %v11318_v17 = vadd.f32 1e-05, %v11316_v4  ;;  %v18731_v4 = vld [vmem:[#allocation12 + $0xa0] sm:$0xff]   ;;  %20078 = vst [vmem:[#allocation68_spill] sm:$0xff] %v18772_v6  ;;  %v20090_v6 = vld [vmem:[#allocation24_spill] sm:$0xff] }
 0x6e1   : > { %20069 = vst [vmem:[#allocation59_spill] sm:$0xff] %v18731_v4  ;;  %v20087_v4 = vld [vmem:[#allocation33_spill] sm:$0xff] }
 0x6e2   : > { %14635 = vrsqrt.f32 %v11318_v17  ;;  %v18699_v17 = vld [vmem:[#allocation12 + $0x60] sm:$0xff]  }
 0x6e3   : > { %20061 = vst [vmem:[#allocation51_spill] sm:$0xff] %v18699_v17  ;;  %v11317_v17 = vld [vmem:[%s19737_s5] sm:$0x1] }
 0x6ec   : > { %v14636_v56 = vpop.eup %14635 }
 0x6ed   : > { %v11320_v22 = vmul.f32 %v14636_v56, %v11317_v17  ;;  %v20086_v17 = vld [vmem:[#allocation31_spill] sm:$0xff] }
 0x6ef   : > { %v18786_v56 = vrot.slane %v11320_v22, %v20081_v7 }
 0x6f1   : > { %v18797_v2 = vmul.f32 %v18786_v56, %v18355_v3  ;;  %v18801_v7 = vmul.f32 %v18786_v56, %v18359_v38  ;;  %v18805_v22 = vmul.f32 %v18786_v56, %v18363_v58  ;;  %v18809_v29 = vmul.f32 %v18786_v56, %v18371_v1 }
 0x6f2   : > { %v18813_v61 = vmul.f32 %v18786_v56, %v18375_v34  ;;  %v18817_v3 = vmul.f32 %v18786_v56, %v18381_v54  ;;  %v18821_v38 = vmul.f32 %v18786_v56, %v18387_v62  ;;  %v18825_v58 = vmul.f32 %v18786_v56, %v18393_v44 }
 0x6f3   : > { %v18829_v1 = vmul.f32 %v18786_v56, %v18399_v45  ;;  %v18833_v34 = vmul.f32 %v18786_v56, %v18405_v42  ;;  %v18837_v54 = vmul.f32 %v18786_v56, %v18411_v0  ;;  %v18841_v62 = vmul.f32 %v18786_v56, %v18417_v8 }
 0x6f4   : > { %v18845_v44 = vmul.f32 %v18786_v56, %v18423_v30  ;;  %v18849_v45 = vmul.f32 %v18786_v56, %v18429_v9  ;;  %v18853_v42 = vmul.f32 %v18786_v56, %v18435_v63  ;;  %v18857_v0 = vmul.f32 %v18786_v56, %v18441_v32 }
 0x6f5   : > { %v18861_v8 = vmul.f32 %v18786_v56, %v18447_v25  ;;  %v18865_v30 = vmul.f32 %v18786_v56, %v18453_v14  ;;  %v18869_v9 = vmul.f32 %v18786_v56, %v18459_v49  ;;  %v18873_v63 = vmul.f32 %v18786_v56, %v18465_v46 }
 0x6f6   : > { %v18877_v32 = vmul.f32 %v18786_v56, %v18471_v24  ;;  %v18881_v25 = vmul.f32 %v18786_v56, %v18477_v48  ;;  %v18885_v14 = vmul.f32 %v18786_v56, %v18483_v16  ;;  %v18889_v49 = vmul.f32 %v18786_v56, %v18489_v53 }
 0x6f7   : > { %v18893_v46 = vmul.f32 %v18786_v56, %v18495_v60  ;;  %v18897_v24 = vmul.f32 %v18786_v56, %v18501_v41  ;;  %v18901_v48 = vmul.f32 %v18786_v56, %v18507_v57  ;;  %v18905_v16 = vmul.f32 %v18786_v56, %v18513_v27 }
 0x6f8   : > { %v18909_v53 = vmul.f32 %v18786_v56, %v20082_v10  ;;  %v18913_v60 = vmul.f32 %v18786_v56, %v20083_v36  ;;  %v18917_v41 = vmul.f32 %v18786_v56, %v20084_v23  ;;  %v18921_v57 = vmul.f32 %v18786_v56, %v20085_v28 }
 0x6f9   : > { %v18925_v27 = vmul.f32 %v18786_v56, %v20086_v17  ;;  %v18929_v10 = vmul.f32 %v18786_v56, %v20087_v4  ;;  %v18933_v36 = vmul.f32 %v18786_v56, %v20088_v20  ;;  %v18937_v23 = vmul.f32 %v18786_v56, %v20089_v43 }
 0x6fa   : > { %v18941_v28 = vmul.f32 %v18786_v56, %v20090_v6  ;;  %v18945_v17 = vmul.f32 %v18786_v56, %v20091_v50  ;;  %v18949_v4 = vmul.f32 %v18786_v56, %v20092_v31  ;;  %v18953_v20 = vmul.f32 %v18786_v56, %v20093_v52 }
 0x6fb   : > { %v18957_v43 = vmul.f32 %v18786_v56, %v18591_v35  ;;  %v18961_v6 = vmul.f32 %v18786_v56, %v20094_v12  ;;  %v18965_v50 = vmul.f32 %v18786_v56, %v18603_v13  ;;  %v18969_v31 = vmul.f32 %v18786_v56, %v18609_v26 }
 0x6fc   : > { %v18973_v52 = vmul.f32 %v18786_v56, %v18615_v40  ;;  %v18977_v35 = vmul.f32 %v18786_v56, %v18292_v11  ;;  %v18981_v12 = vmul.f32 %v18786_v56, %v18296_v37  ;;  %v18985_v13 = vmul.f32 %v18786_v56, %v18300_v47 }
 0x6fd   : > { %v18989_v26 = vmul.f32 %v18786_v56, %v18304_v21  ;;  %v18993_v40 = vmul.f32 %v18786_v56, %v18307_v39  ;;  %v18997_v11 = vmul.f32 %v18786_v56, %v18311_v15  ;;  %v19001_v37 = vmul.f32 %v18786_v56, %v18315_v59  ;;  %v19022_v59 = vld [vmem:[%s19738_s6] ss:$0 sm:$0xff] }
 0x6fe   : > { %v19005_v47 = vmul.f32 %v18786_v56, %v18318_v18  ;;  %v19009_v21 = vmul.f32 %v18786_v56, %v18321_v5  ;;  %v19013_v39 = vmul.f32 %v18786_v56, %v18324_v33  ;;  %v19017_v15 = vmul.f32 %v18786_v56, %v18327_v51 }
 0x6ff   : > { %20095 = vst [vmem:[#allocation19_spill] sm:$0xff] %v19001_v37  ;;  %v19026_v18 = vmul.f32 %v18786_v56, %v18330_v55  ;;  %v19046_v55 = vmul.f32 %v18786_v56, %v18345_v19  ;;  %v19066_v19 = vadd.f32 %v19022_v59, %v18805_v22  ;;  %v19086_v22 = vadd.f32 %v19022_v59, %v18825_v58 }
 0x700   : > { %20096 = vst [vmem:[#allocation21_spill] sm:$0xff] %v19005_v47  ;;  %20097 = vst [vmem:[#allocation30_spill] sm:$0xff] %v19009_v21  ;;  %v20101_v47 = vld [vmem:[#allocation23_spill] sm:$0xff]  ;;  %v20103_v21 = vld [vmem:[#allocation44_spill] sm:$0xff]  ;;  %v19106_v58 = vadd.f32 %v19022_v59, %v18845_v44  ;;  %v19126_v44 = vadd.f32 %v19022_v59, %v18865_v30  ;;  %v19146_v30 = vadd.f32 %v19022_v59, %v18885_v14 }
 0x701   : > { %20098 = vst [vmem:[#allocation32_spill] sm:$0xff] %v19013_v39  ;;  %20099 = vst [vmem:[#allocation22_spill] sm:$0xff] %v19017_v15  ;;  %v19030_v5 = vmul.f32 %v18786_v56, %v20101_v47  ;;  %v19034_v33 = vmul.f32 %v18786_v56, %v20103_v21  ;;  %v20104_v39 = vld [vmem:[#allocation45_spill] sm:$0xff]  ;;  %v20105_v15 = vld [vmem:[#allocation46_spill] sm:$0xff]  ;;  %v19166_v14 = vadd.f32 %v19022_v59, %v18905_v16 }
 0x702   : > { %20100 = vst [vmem:[#allocation31_spill] sm:$0xff] %v19026_v18  ;;  %v19038_v51 = vmul.f32 %v18786_v56, %v20104_v39  ;;  %v19042_v37 = vmul.f32 %v18786_v56, %v20105_v15  ;;  %v20106_v18 = vld [vmem:[#allocation47_spill] sm:$0xff]  ;;  %v19058_v39 = vadd.f32 %v19022_v59, %v18797_v2  ;;  %v19062_v15 = vadd.f32 %v19022_v59, %v18801_v7 }
 0x703   : > { %20102 = vst [vmem:[#allocation33_spill] sm:$0xff] %v19030_v5  ;;  %v19050_v47 = vmul.f32 %v18786_v56, %v20106_v18  ;;  %v20107_v5 = vld [vmem:[#allocation48_spill] sm:$0xff]  ;;  %v19070_v18 = vadd.f32 %v19022_v59, %v18809_v29  ;;  %v19078_v2 = vadd.f32 %v19022_v59, %v18817_v3  ;;  %v19082_v7 = vadd.f32 %v19022_v59, %v18821_v38 }
 0x704   : > { %v19054_v21 = vmul.f32 %v18786_v56, %v20107_v5  ;;  %v19074_v56 = vadd.f32 %v19022_v59, %v18813_v61  ;;  %v19090_v29 = vadd.f32 %v19022_v59, %v18829_v1  ;;  %v19094_v61 = vadd.f32 %v19022_v59, %v18833_v34 }
 0x705   : > { %v19098_v3 = vadd.f32 %v19022_v59, %v18837_v54  ;;  %v19102_v38 = vadd.f32 %v19022_v59, %v18841_v62  ;;  %v19110_v1 = vadd.f32 %v19022_v59, %v18849_v45  ;;  %v19114_v34 = vadd.f32 %v19022_v59, %v18853_v42 }
 0x706   : > { %v19118_v54 = vadd.f32 %v19022_v59, %v18857_v0  ;;  %v19122_v62 = vadd.f32 %v19022_v59, %v18861_v8  ;;  %v19130_v45 = vadd.f32 %v19022_v59, %v18869_v9  ;;  %v19134_v42 = vadd.f32 %v19022_v59, %v18873_v63  ;;  %v20113_v5 = vld [vmem:[#allocation19_spill] sm:$0xff] }
 0x707   : > { %v19138_v0 = vadd.f32 %v19022_v59, %v18877_v32  ;;  %v19142_v8 = vadd.f32 %v19022_v59, %v18881_v25  ;;  %v19150_v9 = vadd.f32 %v19022_v59, %v18889_v49  ;;  %v19154_v63 = vadd.f32 %v19022_v59, %v18893_v46 }
 0x708   : > { %v19158_v32 = vadd.f32 %v19022_v59, %v18897_v24  ;;  %v19162_v25 = vadd.f32 %v19022_v59, %v18901_v48  ;;  %v19170_v49 = vadd.f32 %v19022_v59, %v18909_v53  ;;  %v19174_v46 = vadd.f32 %v19022_v59, %v18913_v60 }
 0x709   : > { %v19178_v24 = vadd.f32 %v19022_v59, %v18917_v41  ;;  %v19182_v48 = vadd.f32 %v19022_v59, %v18921_v57  ;;  %v19186_v16 = vadd.f32 %v19022_v59, %v18925_v27  ;;  %v19190_v53 = vadd.f32 %v19022_v59, %v18929_v10 }
 0x70a   : > { %v19194_v60 = vadd.f32 %v19022_v59, %v18933_v36  ;;  %v19198_v41 = vadd.f32 %v19022_v59, %v18937_v23  ;;  %v19202_v57 = vadd.f32 %v19022_v59, %v18941_v28  ;;  %v19206_v27 = vadd.f32 %v19022_v59, %v18945_v17 }
 0x70b   : > { %v19210_v10 = vadd.f32 %v19022_v59, %v18949_v4  ;;  %v19214_v36 = vadd.f32 %v19022_v59, %v18953_v20  ;;  %v19218_v23 = vadd.f32 %v19022_v59, %v18957_v43  ;;  %v19222_v28 = vadd.f32 %v19022_v59, %v18961_v6 }
 0x70c   : > { %v19226_v17 = vadd.f32 %v19022_v59, %v18965_v50  ;;  %v19230_v4 = vadd.f32 %v19022_v59, %v18969_v31  ;;  %v19234_v20 = vadd.f32 %v19022_v59, %v18973_v52  ;;  %v19238_v43 = vadd.f32 %v19022_v59, %v18977_v35 }
 0x70d   : > { %v19242_v6 = vadd.f32 %v19022_v59, %v18981_v12  ;;  %v19246_v50 = vadd.f32 %v19022_v59, %v18985_v13  ;;  %v19250_v31 = vadd.f32 %v19022_v59, %v18989_v26  ;;  %v19254_v52 = vadd.f32 %v19022_v59, %v18993_v40 }
 0x70e   : > { %v19258_v35 = vadd.f32 %v19022_v59, %v18997_v11  ;;  %v19262_v12 = vadd.f32 %v19022_v59, %v20113_v5 }
 0x70f   : > { %20108 = vst [vmem:[#allocation34_spill] sm:$0xff] %v19242_v6  ;;  %20109 = vst [vmem:[#allocation36_spill] sm:$0xff] %v19246_v50  ;;  %v20115_v6 = vld [vmem:[#allocation21_spill] sm:$0xff]  ;;  %v20116_v50 = vld [vmem:[#allocation30_spill] sm:$0xff] }
 0x710   : > { %20110 = vst [vmem:[#allocation24_spill] sm:$0xff] %v19250_v31  ;;  %20111 = vst [vmem:[#allocation35_spill] sm:$0xff] %v19254_v52  ;;  %v19266_v13 = vadd.f32 %v19022_v59, %v20115_v6  ;;  %v19270_v26 = vadd.f32 %v19022_v59, %v20116_v50  ;;  %v20117_v31 = vld [vmem:[#allocation32_spill] sm:$0xff]  ;;  %v20118_v52 = vld [vmem:[#allocation22_spill] sm:$0xff]  ;;  %v19290_v50 = vadd.f32 %v19022_v59, %v19034_v33 }
 0x711   : > { %20112 = vst [vmem:[#allocation38_spill] sm:$0xff] %v19258_v35  ;;  %20114 = vst [vmem:[#allocation27_spill] sm:$0xff] %v19262_v12  ;;  %v19274_v40 = vadd.f32 %v19022_v59, %v20117_v31  ;;  %v19278_v11 = vadd.f32 %v19022_v59, %v20118_v52  ;;  %v20119_v35 = vld [vmem:[#allocation31_spill] sm:$0xff]  ;;  %v20120_v12 = vld [vmem:[#allocation33_spill] sm:$0xff]  ;;  %v19294_v31 = vadd.f32 %v19022_v59, %v19038_v51 }
 0x712   : > { %v19282_v5 = vadd.f32 %v19022_v59, %v20119_v35  ;;  %v19286_v6 = vadd.f32 %v19022_v59, %v20120_v12  ;;  %20122 = vst [vmem:[#allocation23_spill] sm:$0xff] %v19290_v50  ;;  %v19298_v52 = vadd.f32 %v19022_v59, %v19042_v37  ;;  %v19302_v35 = vadd.f32 %v19022_v59, %v19046_v55  ;;  %v20127_v50 = vld [vmem:[#allocation26_spill] sm:$0xff]  ;;  %v20130_v55 = vld [vmem:[#allocation40_spill] sm:$0xff] }
 0x713   : > { %20123 = vst [vmem:[#allocation44_spill] sm:$0xff] %v19294_v31  ;;  %v19306_v12 = vadd.f32 %v19022_v59, %v19050_v47  ;;  %v19310_v33 = vadd.f32 %v19022_v59, %v19054_v21  ;;  %v20128_v51 = vunpack.c.l.bf16 %v20127_v50  ;;  %v20129_v37 = vunpack.c.h.bf16 %v20127_v50  ;;  %v20133_v21 = vld [vmem:[#allocation41_spill] sm:$0xff] }
 0x714   : > { %20121 = vst [vmem:[#allocation37_spill] sm:$0xff] %v19286_v6  ;;  %20124 = vst [vmem:[#allocation45_spill] sm:$0xff] %v19298_v52  ;;  %v20132_v47 = vunpack.c.h.bf16 %v20130_v55  ;;  %v20135_v50 = vunpack.c.h.bf16 %v20133_v21 }
 0x715   : > { %20125 = vst [vmem:[#allocation46_spill] sm:$0xff] %v19302_v35  ;;  %20126 = vst [vmem:[#allocation47_spill] sm:$0xff] %v19310_v33  ;;  %v19315_v31 = vadd.f32 %v20128_v51, %v19058_v39  ;;  %v19320_v52 = vadd.f32 %v20129_v37, %v19062_v15  ;;  %v20131_v35 = vunpack.c.l.bf16 %v20130_v55  ;;  %v20134_v33 = vunpack.c.l.bf16 %v20133_v21  ;;  %v20136_v51 = vld [vmem:[#allocation39_spill] sm:$0xff]  ;;  %v20139_v55 = vld [vmem:[#allocation28_spill] sm:$0xff] }
 0x716   : > { %v19330_v59 = vadd.f32 %v20132_v47, %v19070_v18  ;;  %v19340_v15 = vadd.f32 %v20135_v50, %v19078_v2  ;;  %v20137_v37 = vunpack.c.l.bf16 %v20136_v51  ;;  %v20140_v47 = vunpack.c.l.bf16 %v20139_v55  ;;  %v20142_v21 = vld [vmem:[#allocation29_spill] sm:$0xff] }
 0x717   : > { %v19325_v6 = vadd.f32 %v20131_v35, %v19066_v19  ;;  %v19335_v39 = vadd.f32 %v20134_v33, %v19074_v56  ;;  %v20138_v35 = vunpack.c.h.bf16 %v20136_v51  ;;  %v20141_v33 = vunpack.c.h.bf16 %v20139_v55 }
 0x718   : > { %v19345_v19 = vadd.f32 %v20137_v37, %v19082_v7  ;;  %v19355_v56 = vadd.f32 %v20140_v47, %v19090_v29  ;;  %v20143_v50 = vunpack.c.l.bf16 %v20142_v21  ;;  %v20144_v51 = vunpack.c.h.bf16 %v20142_v21  ;;  %v20145_v37 = vld [vmem:[#allocation25_spill] sm:$0xff]  ;;  %v20148_v47 = vld [vmem:[#allocation42_spill] sm:$0xff] }
 0x719   : > { %v19350_v18 = vadd.f32 %v20138_v35, %v19086_v22  ;;  %v19360_v2 = vadd.f32 %v20141_v33, %v19094_v61  ;;  %v20146_v35 = vunpack.c.l.bf16 %v20145_v37  ;;  %v20147_v55 = vunpack.c.h.bf16 %v20145_v37 }
 0x71a   : > { %v19365_v7 = vadd.f32 %v20143_v50, %v19098_v3  ;;  %v19370_v22 = vadd.f32 %v20144_v51, %v19102_v38  ;;  %v20149_v33 = vunpack.c.l.bf16 %v20148_v47  ;;  %v20150_v21 = vunpack.c.h.bf16 %v20148_v47  ;;  %v20151_v50 = vld [vmem:[#allocation20_spill] sm:$0xff] }
 0x71b   : > { %v19375_v29 = vadd.f32 %v20146_v35, %v19106_v58  ;;  %v19380_v61 = vadd.f32 %v20147_v55, %v19110_v1  ;;  %v20152_v51 = vunpack.c.l.bf16 %v20151_v50  ;;  %v20153_v37 = vunpack.c.h.bf16 %v20151_v50  ;;  %v20154_v35 = vld [vmem:[#allocation43_spill] sm:$0xff] }
 0x71c   : > { %v19385_v3 = vadd.f32 %v20149_v33, %v19114_v34  ;;  %v19390_v38 = vadd.f32 %v20150_v21, %v19118_v54  ;;  %v20155_v55 = vunpack.c.l.bf16 %v20154_v35  ;;  %v20156_v47 = vunpack.c.h.bf16 %v20154_v35  ;;  %v20157_v33 = vld [vmem:[#allocation49_spill] sm:$0xff] }
 0x71d   : > { %v19395_v58 = vadd.f32 %v20152_v51, %v19122_v62  ;;  %v19400_v1 = vadd.f32 %v20153_v37, %v19126_v44  ;;  %v20158_v21 = vunpack.c.l.bf16 %v20157_v33  ;;  %v20159_v50 = vunpack.c.h.bf16 %v20157_v33  ;;  %v20160_v51 = vld [vmem:[#allocation50_spill] sm:$0xff] }
 0x71e   : > { %v19405_v34 = vadd.f32 %v20155_v55, %v19130_v45  ;;  %v19410_v54 = vadd.f32 %v20156_v47, %v19134_v42  ;;  %v20161_v37 = vunpack.c.l.bf16 %v20160_v51  ;;  %v20162_v35 = vunpack.c.h.bf16 %v20160_v51  ;;  %v20163_v55 = vld [vmem:[#allocation51_spill] sm:$0xff] }
 0x71f   : > { %v19415_v62 = vadd.f32 %v20158_v21, %v19138_v0  ;;  %v19420_v44 = vadd.f32 %v20159_v50, %v19142_v8  ;;  %v20164_v47 = vunpack.c.l.bf16 %v20163_v55  ;;  %v20165_v33 = vunpack.c.h.bf16 %v20163_v55  ;;  %v20166_v21 = vld [vmem:[#allocation52_spill] sm:$0xff] }
 0x720   : > { %v19425_v45 = vadd.f32 %v20161_v37, %v19146_v30  ;;  %v19430_v42 = vadd.f32 %v20162_v35, %v19150_v9  ;;  %v20167_v50 = vunpack.c.l.bf16 %v20166_v21  ;;  %v20168_v51 = vunpack.c.h.bf16 %v20166_v21  ;;  %v20169_v37 = vld [vmem:[#allocation53_spill] sm:$0xff] }
 0x721   : > { %v19435_v0 = vadd.f32 %v20164_v47, %v19154_v63  ;;  %v19440_v8 = vadd.f32 %v20165_v33, %v19158_v32  ;;  %v20170_v35 = vunpack.c.l.bf16 %v20169_v37  ;;  %v20171_v55 = vunpack.c.h.bf16 %v20169_v37  ;;  %v20172_v47 = vld [vmem:[#allocation54_spill] sm:$0xff] }
 0x722   : > { %v19445_v30 = vadd.f32 %v20167_v50, %v19162_v25  ;;  %v19450_v9 = vadd.f32 %v20168_v51, %v19166_v14  ;;  %v20173_v33 = vunpack.c.l.bf16 %v20172_v47  ;;  %v20174_v21 = vunpack.c.h.bf16 %v20172_v47  ;;  %v20175_v50 = vld [vmem:[#allocation55_spill] sm:$0xff] }
 0x723   : > { %v19455_v63 = vadd.f32 %v20170_v35, %v19170_v49  ;;  %v19460_v32 = vadd.f32 %v20171_v55, %v19174_v46  ;;  %v20176_v51 = vunpack.c.l.bf16 %v20175_v50  ;;  %v20177_v37 = vunpack.c.h.bf16 %v20175_v50  ;;  %v20178_v35 = vld [vmem:[#allocation56_spill] sm:$0xff] }
 0x724   : > { %v19465_v25 = vadd.f32 %v20173_v33, %v19178_v24  ;;  %v19470_v14 = vadd.f32 %v20174_v21, %v19182_v48  ;;  %v20179_v55 = vunpack.c.l.bf16 %v20178_v35  ;;  %v20180_v47 = vunpack.c.h.bf16 %v20178_v35  ;;  %v20181_v33 = vld [vmem:[#allocation57_spill] sm:$0xff] }
 0x725   : > { %v19475_v49 = vadd.f32 %v20176_v51, %v19186_v16  ;;  %v19480_v46 = vadd.f32 %v20177_v37, %v19190_v53  ;;  %v20182_v21 = vunpack.c.l.bf16 %v20181_v33  ;;  %v20183_v50 = vunpack.c.h.bf16 %v20181_v33  ;;  %v20184_v51 = vld [vmem:[#allocation58_spill] sm:$0xff] }
 0x726   : > { %v19485_v24 = vadd.f32 %v20179_v55, %v19194_v60  ;;  %v19490_v48 = vadd.f32 %v20180_v47, %v19198_v41  ;;  %v20185_v37 = vunpack.c.l.bf16 %v20184_v51  ;;  %v20186_v35 = vunpack.c.h.bf16 %v20184_v51  ;;  %v20187_v55 = vld [vmem:[#allocation59_spill] sm:$0xff] }
 0x727   : > { %v19495_v16 = vadd.f32 %v20182_v21, %v19202_v57  ;;  %v19500_v53 = vadd.f32 %v20183_v50, %v19206_v27  ;;  %v20188_v47 = vunpack.c.l.bf16 %v20187_v55  ;;  %v20189_v33 = vunpack.c.h.bf16 %v20187_v55  ;;  %v20191_v21 = vld [vmem:[#allocation60_spill] sm:$0xff] }
 0x728   : > { %v19505_v60 = vadd.f32 %v20185_v37, %v19210_v10  ;;  %v19510_v41 = vadd.f32 %v20186_v35, %v19214_v36  ;;  %v20192_v50 = vunpack.c.l.bf16 %v20191_v21  ;;  %v20194_v51 = vunpack.c.h.bf16 %v20191_v21  ;;  %v20196_v37 = vld [vmem:[#allocation61_spill] sm:$0xff] }
 0x729   : > { %v19515_v57 = vadd.f32 %v20188_v47, %v19218_v23  ;;  %v19520_v27 = vadd.f32 %v20189_v33, %v19222_v28  ;;  %v20197_v35 = vunpack.c.l.bf16 %v20196_v37  ;;  %v20199_v55 = vunpack.c.h.bf16 %v20196_v37  ;;  %v20201_v47 = vld [vmem:[#allocation34_spill] sm:$0xff] }
 0x72a   : > { %v19525_v10 = vadd.f32 %v20192_v50, %v19226_v17  ;;  %v19530_v36 = vadd.f32 %v20194_v51, %v19230_v4  ;;  %v20202_v33 = vld [vmem:[#allocation62_spill] sm:$0xff]  ;;  %v20204_v50 = vld [vmem:[#allocation36_spill] sm:$0xff] }
 0x72b   : > { %20190 = vst [vmem:[#allocation48_spill] sm:$0xff] %v19520_v27  ;;  %v19535_v23 = vadd.f32 %v20197_v35, %v19234_v20  ;;  %v19540_v28 = vadd.f32 %v20199_v55, %v19238_v43  ;;  %v20203_v27 = vunpack.c.l.bf16 %v20202_v33  ;;  %v20205_v21 = vunpack.c.h.bf16 %v20202_v33  ;;  %v20207_v51 = vld [vmem:[#allocation24_spill] sm:$0xff]  ;;  %v20210_v35 = vld [vmem:[#allocation35_spill] sm:$0xff]  ;;  %v20212_v55 = vld [vmem:[#allocation38_spill] sm:$0xff] }
 0x72c   : > { %20193 = vst [vmem:[#allocation19_spill] sm:$0xff] %v19525_v10  ;;  %20195 = vst [vmem:[#allocation21_spill] sm:$0xff] %v19530_v36  ;;  %v20208_v36 = vld [vmem:[#allocation63_spill] sm:$0xff] }
 0x72d   : > { %20198 = vst [vmem:[#allocation30_spill] sm:$0xff] %v19535_v23  ;;  %20200 = vst [vmem:[#allocation32_spill] sm:$0xff] %v19540_v28  ;;  %v19545_v17 = vadd.f32 %v20203_v27, %v20201_v47  ;;  %v19550_v4 = vadd.f32 %v20205_v21, %v20204_v50  ;;  %v20209_v10 = vunpack.c.l.bf16 %v20208_v36  ;;  %v20211_v37 = vunpack.c.h.bf16 %v20208_v36  ;;  %v20213_v28 = vld [vmem:[#allocation64_spill] sm:$0xff]  ;;  %v20215_v47 = vld [vmem:[#allocation27_spill] sm:$0xff] }
 0x72e   : > { %v20214_v23 = vunpack.c.l.bf16 %v20213_v28  ;;  %v20216_v33 = vunpack.c.h.bf16 %v20213_v28  ;;  %v20217_v21 = vld [vmem:[#allocation65_spill] sm:$0xff] }
 0x72f   : > { %20206 = vst [vmem:[#allocation22_spill] sm:$0xff] %v19550_v4  ;;  %v19555_v20 = vadd.f32 %v20209_v10, %v20207_v51  ;;  %v19560_v43 = vadd.f32 %v20211_v37, %v20210_v35  ;;  %v20218_v4 = vunpack.c.l.bf16 %v20217_v21  ;;  %v20220_v36 = vunpack.c.h.bf16 %v20217_v21  ;;  %v20222_v35 = vld [vmem:[#allocation66_spill] sm:$0xff] }
 0x730   : > { %v19565_v27 = vadd.f32 %v20214_v23, %v20212_v55  ;;  %v19570_v50 = vadd.f32 %v20216_v33, %v20215_v47  ;;  %v20223_v37 = vunpack.c.l.bf16 %v20222_v35  ;;  %v20225_v28 = vunpack.c.h.bf16 %v20222_v35  ;;  %v20227_v47 = vld [vmem:[#allocation67_spill] sm:$0xff] }
 0x731   : > { %v19575_v10 = vadd.f32 %v20218_v4, %v19266_v13  ;;  %v19580_v51 = vadd.f32 %v20220_v36, %v19270_v26  ;;  %v20228_v33 = vunpack.c.l.bf16 %v20227_v47  ;;  %v20229_v4 = vld [vmem:[#allocation37_spill] sm:$0xff]  ;;  %v20230_v21 = vunpack.c.h.bf16 %v20227_v47  ;;  %v20232_v36 = vld [vmem:[#allocation23_spill] sm:$0xff] }
 0x732   : > { %v19585_v23 = vadd.f32 %v20223_v37, %v19274_v40  ;;  %v19590_v55 = vadd.f32 %v20225_v28, %v19278_v11  ;;  %v20235_v37 = vld [vmem:[#allocation44_spill] sm:$0xff]  ;;  %v20237_v28 = vld [vmem:[#allocation45_spill] sm:$0xff] }
 0x733   : > { %20219 = vst [vmem:[#allocation31_spill] sm:$0xff] %v19575_v10  ;;  %20221 = vst [vmem:[#allocation33_spill] sm:$0xff] %v19580_v51  ;;  %v19595_v13 = vadd.f32 %v20228_v33, %v19282_v5  ;;  %v19600_v26 = vadd.f32 %v20230_v21, %v20229_v4  ;;  %v20233_v51 = vld [vmem:[#allocation68_spill] sm:$0xff]  ;;  %v20240_v33 = vld [vmem:[#allocation46_spill] sm:$0xff] }
 0x734   : > { %20224 = vst [vmem:[#allocation26_spill] sm:$0xff] %v19585_v23  ;;  %20226 = vst [vmem:[#allocation40_spill] sm:$0xff] %v19590_v55  ;;  %v20234_v10 = vunpack.c.l.bf16 %v20233_v51  ;;  %v20236_v35 = vunpack.c.h.bf16 %v20233_v51  ;;  %v20238_v55 = vld [vmem:[#allocation69_spill] sm:$0xff]  ;;  %v20242_v21 = vld [vmem:[#allocation70_spill] sm:$0xff] }
 0x735   : > { %20231 = vst [vmem:[#allocation41_spill] sm:$0xff] %v19600_v26  ;;  %v20239_v23 = vunpack.c.l.bf16 %v20238_v55  ;;  %v20241_v47 = vunpack.c.h.bf16 %v20238_v55  ;;  %v20243_v26 = vunpack.c.l.bf16 %v20242_v21  ;;  %v20245_v51 = vunpack.c.h.bf16 %v20242_v21 }
 0x736   : > { %v19605_v40 = vadd.f32 %v20234_v10, %v20232_v36  ;;  %v19610_v11 = vadd.f32 %v20236_v35, %v20235_v37  ;;  %v20244_v36 = vld [vmem:[#allocation47_spill] sm:$0xff]  ;;  %v11654_v35 = vmax.f32 %v19315_v31, 0.0  ;;  %v11657_v55 = vmax.f32 %v19330_v59, 0.0 }
 0x737   : > { %v19615_v5 = vadd.f32 %v20239_v23, %v20237_v28  ;;  %v19620_v4 = vadd.f32 %v20241_v47, %v20240_v33  ;;  %v19625_v10 = vadd.f32 %v20243_v26, %v19306_v12  ;;  %v19630_v37 = vadd.f32 %v20245_v51, %v20244_v36 }
 0x738   : > { %v11655_v23 = vmax.f32 %v19320_v52, 0.0  ;;  %v11656_v28 = vmax.f32 %v19325_v6, 0.0  ;;  %v11658_v33 = vmax.f32 %v19335_v39, 0.0  ;;  %v11659_v47 = vmax.f32 %v19340_v15, 0.0  ;;  %11718 = vst [vmem:[#allocation14] sm:$0xff] %v11654_v35  ;;  %11721 = vst [vmem:[#allocation14 + $0x18] sm:$0xff] %v11657_v55 }
 0x739   : > { %v11660_v12 = vmax.f32 %v19345_v19, 0.0  ;;  %v11661_v26 = vmax.f32 %v19350_v18, 0.0  ;;  %v11662_v21 = vmax.f32 %v19355_v56, 0.0  ;;  %v11663_v36 = vmax.f32 %v19360_v2, 0.0 }
 0x73a   : > { %v11664_v31 = vmax.f32 %v19365_v7, 0.0  ;;  %v11665_v52 = vmax.f32 %v19370_v22, 0.0  ;;  %11719 = vst [vmem:[#allocation14 + $0x8] sm:$0xff] %v11655_v23  ;;  %11720 = vst [vmem:[#allocation14 + $0x10] sm:$0xff] %v11656_v28  ;;  %v11666_v6 = vmax.f32 %v19375_v29, 0.0  ;;  %v11667_v59 = vmax.f32 %v19380_v61, 0.0 }
 0x73b   : > { %v11668_v39 = vmax.f32 %v19385_v3, 0.0  ;;  %v11669_v15 = vmax.f32 %v19390_v38, 0.0  ;;  %11722 = vst [vmem:[#allocation14 + $0x20] sm:$0xff] %v11658_v33  ;;  %11723 = vst [vmem:[#allocation14 + $0x28] sm:$0xff] %v11659_v47  ;;  %v11670_v19 = vmax.f32 %v19395_v58, 0.0  ;;  %v11671_v18 = vmax.f32 %v19400_v1, 0.0 }
 0x73c   : > { %11724 = vst [vmem:[#allocation14 + $0x30] sm:$0xff] %v11660_v12  ;;  %11725 = vst [vmem:[#allocation14 + $0x38] sm:$0xff] %v11661_v26  ;;  %v11672_v56 = vmax.f32 %v19405_v34, 0.0  ;;  %v11673_v2 = vmax.f32 %v19410_v54, 0.0  ;;  %v11674_v7 = vmax.f32 %v19415_v62, 0.0  ;;  %v11675_v22 = vmax.f32 %v19420_v44, 0.0 }
 0x73d   : > { %11726 = vst [vmem:[#allocation14 + $0x40] sm:$0xff] %v11662_v21  ;;  %11727 = vst [vmem:[#allocation14 + $0x48] sm:$0xff] %v11663_v36  ;;  %v11676_v29 = vmax.f32 %v19425_v45, 0.0  ;;  %v11677_v61 = vmax.f32 %v19430_v42, 0.0  ;;  %v11678_v3 = vmax.f32 %v19435_v0, 0.0  ;;  %v11679_v38 = vmax.f32 %v19440_v8, 0.0 }
 0x73e   : > { %11728 = vst [vmem:[#allocation14 + $0x50] sm:$0xff] %v11664_v31  ;;  %11729 = vst [vmem:[#allocation14 + $0x58] sm:$0xff] %v11665_v52  ;;  %v11680_v58 = vmax.f32 %v19445_v30, 0.0  ;;  %v11681_v1 = vmax.f32 %v19450_v9, 0.0  ;;  %v11682_v34 = vmax.f32 %v19455_v63, 0.0  ;;  %v11683_v54 = vmax.f32 %v19460_v32, 0.0 }
 0x73f   : > { %11730 = vst [vmem:[#allocation14 + $0x60] sm:$0xff] %v11666_v6  ;;  %11731 = vst [vmem:[#allocation14 + $0x68] sm:$0xff] %v11667_v59  ;;  %v11684_v62 = vmax.f32 %v19465_v25, 0.0  ;;  %v11685_v44 = vmax.f32 %v19470_v14, 0.0  ;;  %v11686_v45 = vmax.f32 %v19475_v49, 0.0  ;;  %v11687_v42 = vmax.f32 %v19480_v46, 0.0 }
 0x740   : > { %11732 = vst [vmem:[#allocation14 + $0x70] sm:$0xff] %v11668_v39  ;;  %11733 = vst [vmem:[#allocation14 + $0x78] sm:$0xff] %v11669_v15  ;;  %v11688_v0 = vmax.f32 %v19485_v24, 0.0  ;;  %v11689_v8 = vmax.f32 %v19490_v48, 0.0  ;;  %v11690_v30 = vmax.f32 %v19495_v16, 0.0  ;;  %v11691_v9 = vmax.f32 %v19500_v53, 0.0 }
 0x741   : > { %11734 = vst [vmem:[#allocation14 + $0x80] sm:$0xff] %v11670_v19  ;;  %11735 = vst [vmem:[#allocation14 + $0x88] sm:$0xff] %v11671_v18  ;;  %v11692_v63 = vmax.f32 %v19505_v60, 0.0  ;;  %v11693_v32 = vmax.f32 %v19510_v41, 0.0  ;;  %v11694_v25 = vmax.f32 %v19515_v57, 0.0  ;;  %v20246_v14 = vld [vmem:[#allocation48_spill] sm:$0xff] }
 0x742   : > { %11736 = vst [vmem:[#allocation14 + $0x90] sm:$0xff] %v11672_v56  ;;  %11737 = vst [vmem:[#allocation14 + $0x98] sm:$0xff] %v11673_v2  ;;  %v11695_v49 = vmax.f32 %v20246_v14, 0.0  ;;  %v20247_v46 = vld [vmem:[#allocation19_spill] sm:$0xff]  ;;  %v20248_v48 = vld [vmem:[#allocation21_spill] sm:$0xff]  ;;  %v11700_v35 = vmax.f32 %v19545_v17, 0.0 }
 0x743   : > { %11738 = vst [vmem:[#allocation14 + $0xa0] sm:$0xff] %v11674_v7  ;;  %11739 = vst [vmem:[#allocation14 + $0xa8] sm:$0xff] %v11675_v22  ;;  %v11696_v24 = vmax.f32 %v20247_v46, 0.0  ;;  %v11697_v51 = vmax.f32 %v20248_v48, 0.0  ;;  %v20249_v16 = vld [vmem:[#allocation30_spill] sm:$0xff]  ;;  %v20250_v60 = vld [vmem:[#allocation32_spill] sm:$0xff] }
 0x744   : > { %11740 = vst [vmem:[#allocation14 + $0xb0] sm:$0xff] %v11676_v29  ;;  %11741 = vst [vmem:[#allocation14 + $0xb8] sm:$0xff] %v11677_v61  ;;  %v11698_v53 = vmax.f32 %v20249_v16, 0.0  ;;  %v11699_v41 = vmax.f32 %v20250_v60, 0.0  ;;  %v20251_v23 = vld [vmem:[#allocation22_spill] sm:$0xff]  ;;  %v11702_v57 = vmax.f32 %v19555_v20, 0.0 }
 0x745   : > { %11742 = vst [vmem:[#allocation14 + $0xc0] sm:$0xff] %v11678_v3  ;;  %11743 = vst [vmem:[#allocation14 + $0xc8] sm:$0xff] %v11679_v38  ;;  %v11701_v28 = vmax.f32 %v20251_v23, 0.0  ;;  %v11703_v55 = vmax.f32 %v19560_v43, 0.0  ;;  %v11704_v33 = vmax.f32 %v19565_v27, 0.0  ;;  %v11705_v47 = vmax.f32 %v19570_v50, 0.0 }
 0x746   : > { %11744 = vst [vmem:[#allocation14 + $0xd0] sm:$0xff] %v11680_v58  ;;  %11745 = vst [vmem:[#allocation14 + $0xd8] sm:$0xff] %v11681_v1  ;;  %v20252_v12 = vld [vmem:[#allocation31_spill] sm:$0xff]  ;;  %v20253_v26 = vld [vmem:[#allocation33_spill] sm:$0xff]  ;;  %v11710_v20 = vmax.f32 %v19595_v13, 0.0  ;;  %v11712_v50 = vmax.f32 %v19605_v40, 0.0 }
 0x747   : > { %11746 = vst [vmem:[#allocation14 + $0xe0] sm:$0xff] %v11682_v34  ;;  %11747 = vst [vmem:[#allocation14 + $0xe8] sm:$0xff] %v11683_v54  ;;  %v11706_v17 = vmax.f32 %v20252_v12, 0.0  ;;  %v11707_v21 = vmax.f32 %v20253_v26, 0.0  ;;  %v20254_v36 = vld [vmem:[#allocation26_spill] sm:$0xff]  ;;  %v20255_v52 = vld [vmem:[#allocation40_spill] sm:$0xff] }
 0x748   : > { %11748 = vst [vmem:[#allocation14 + $0xf0] sm:$0xff] %v11684_v62  ;;  %11749 = vst [vmem:[#allocation14 + $0xf8] sm:$0xff] %v11685_v44  ;;  %v11708_v31 = vmax.f32 %v20254_v36, 0.0  ;;  %v11709_v6 = vmax.f32 %v20255_v52, 0.0  ;;  %v20256_v43 = vld [vmem:[#allocation41_spill] sm:$0xff]  ;;  %v11713_v59 = vmax.f32 %v19610_v11, 0.0 }
 0x749   : > { %11750 = vst [vmem:[#allocation14 + $0x100] sm:$0xff] %v11686_v45  ;;  %11751 = vst [vmem:[#allocation14 + $0x108] sm:$0xff] %v11687_v42  ;;  %v11711_v27 = vmax.f32 %v20256_v43, 0.0  ;;  %v11714_v39 = vmax.f32 %v19615_v5, 0.0  ;;  %v11715_v15 = vmax.f32 %v19620_v4, 0.0  ;;  %v11716_v19 = vmax.f32 %v19625_v10, 0.0 }
 0x74a   : > { %11752 = vst [vmem:[#allocation14 + $0x110] sm:$0xff] %v11688_v0  ;;  %11753 = vst [vmem:[#allocation14 + $0x118] sm:$0xff] %v11689_v8  ;;  %v11717_v18 = vmax.f32 %v19630_v37, 0.0 }
 0x74b   : > { %11754 = vst [vmem:[#allocation14 + $0x120] sm:$0xff] %v11690_v30  ;;  %11755 = vst [vmem:[#allocation14 + $0x128] sm:$0xff] %v11691_v9 }
 0x74c   : > { %11756 = vst [vmem:[#allocation14 + $0x130] sm:$0xff] %v11692_v63  ;;  %11757 = vst [vmem:[#allocation14 + $0x138] sm:$0xff] %v11693_v32 }
 0x74d   : > { %11758 = vst [vmem:[#allocation14 + $0x140] sm:$0xff] %v11694_v25  ;;  %11759 = vst [vmem:[#allocation14 + $0x148] sm:$0xff] %v11695_v49 }
 0x74e   : > { %11760 = vst [vmem:[#allocation14 + $0x150] sm:$0xff] %v11696_v24  ;;  %11761 = vst [vmem:[#allocation14 + $0x158] sm:$0xff] %v11697_v51 }
 0x74f   : > { %11762 = vst [vmem:[#allocation14 + $0x160] sm:$0xff] %v11698_v53  ;;  %11763 = vst [vmem:[#allocation14 + $0x168] sm:$0xff] %v11699_v41 }
 0x750   : > { %11764 = vst [vmem:[#allocation14 + $0x170] sm:$0xff] %v11700_v35  ;;  %11765 = vst [vmem:[#allocation14 + $0x178] sm:$0xff] %v11701_v28 }
 0x751   : > { %11766 = vst [vmem:[#allocation14 + $0x180] sm:$0xff] %v11702_v57  ;;  %11767 = vst [vmem:[#allocation14 + $0x188] sm:$0xff] %v11703_v55 }
 0x752   : > { %11768 = vst [vmem:[#allocation14 + $0x190] sm:$0xff] %v11704_v33  ;;  %11769 = vst [vmem:[#allocation14 + $0x198] sm:$0xff] %v11705_v47 }
 0x753   : > { %11770 = vst [vmem:[#allocation14 + $0x1a0] sm:$0xff] %v11706_v17  ;;  %11771 = vst [vmem:[#allocation14 + $0x1a8] sm:$0xff] %v11707_v21 }
 0x754   : > { %11772 = vst [vmem:[#allocation14 + $0x1b0] sm:$0xff] %v11708_v31  ;;  %11773 = vst [vmem:[#allocation14 + $0x1b8] sm:$0xff] %v11709_v6 }
 0x755   : > { %11774 = vst [vmem:[#allocation14 + $0x1c0] sm:$0xff] %v11710_v20  ;;  %11775 = vst [vmem:[#allocation14 + $0x1c8] sm:$0xff] %v11711_v27 }
 0x756   : > { %11776 = vst [vmem:[#allocation14 + $0x1d0] sm:$0xff] %v11712_v50  ;;  %11777 = vst [vmem:[#allocation14 + $0x1d8] sm:$0xff] %v11713_v59 }
 0x757   : > { %11778 = vst [vmem:[#allocation14 + $0x1e0] sm:$0xff] %v11714_v39  ;;  %11779 = vst [vmem:[#allocation14 + $0x1e8] sm:$0xff] %v11715_v15 }
 0x758   : > { %11780 = vst [vmem:[#allocation14 + $0x1f0] sm:$0xff] %v11716_v19  ;;  %11781 = vst [vmem:[#allocation14 + $0x1f8] sm:$0xff] %v11717_v18 }
 0x759 PF: > { %p14397_p12 = scmp.eq.s32.totalorder %s15129_s9, 1  ;;  %s15062_s26 = smov [#allocation14]  }
 0x75a   : > { %s11788_s18 = sshll.u32 %s15062_s26, 4  ;;  %s11789_s18 = int_to_ptr.vmem [resolvable:$true] %s11788_s18 }
 0x75b   : > { %s14980_s14 = scalar_lea.vmem %s11789_s18, 8192  ;;  %p14987_p9 = scmp.lt.s32.totalorder %s11789_s18, %s11789_s18 }
 0x75c   : > { %p14981_p13 = scmp.ne.s32.totalorder %s11789_s18, %s14980_s14  ;;  %p14988_p11 = scmp.lt.s32.totalorder %s14980_s14, %s14980_s14 }
 0x75e   : > { %p14982_p0 = pnand %p14981_p13, %p14397_p12  ;;  %p14989_p2 = por %p14988_p11, %p14987_p9 }
 0x760   : > { %p14983_p3 = pneg %p14982_p0 }
 0x762   : > { %p14990_p7 = pnand %p14989_p2, %p14983_p3 }
 0x764   : > { %14993 = shalt.err (!%p14990_p7)
}
 0x765   : > { %s14994_s22 = scalar_lea.hbm %s19740_s8, 8192 }
 0x766   : > { %p14995_p1 = scmp.ne.s32.totalorder %s19740_s8, %s14994_s22  ;;  %p15000_p5 = scmp.lt.u32.totalorder %s14994_s22, %s19740_s8 }
 0x768   : > { %p14996_p8 = pnand %p14995_p1, %p14397_p12 }
 0x76a   : > { %p14997_p4 = pneg %p14996_p8 }
 0x76c   : > { %p15002_p6 = pnand %p15000_p5, %p14997_p4 }
 0x76e   : > { %15005 = shalt.err (!%p15002_p6)
}
 0x76f   : > { %s15063_s15 = smov 128   ;;  %s15064_s27 = smov 8  }
 0x770   : > { %14373 = dma.vmem_to_hbm [thread:$0]  (%p14397_p12), %s11789_s18, 8192, %s19740_s8, [#allocation8], %s15063_s15, %s15063_s15, %s15064_s27  }
 0x771   : > { %15035 = dma.done.wait (%p14397_p12), [#allocation8], 8192  }
 0x772   : > { %15037 = vsyncadd (%p14397_p12), [#allocation8], 4294959104 }
 0x773 PF: > { %p21_p10 = scmp.ge.s32.totalorder %s15241_s24, 4   ;;  %s20257_s27 = smov %s15044_s28 }
 0x774   : > { %s20258_s28 = smov %s15048_s29  ;;  %s20259_s29 = smov %s15251_s20 }
 0x775   : > { %s20260_s30 = smov %s15241_s24  ;;  %23 = sbr.rel (!%p21_p10) target bundleno = 6 (0x6), region = 120 }
 0x77c   :  { %11804 = vsyncpa [#allocation7], 1 }
 0x77d   :  { %11806 = vsyncpa [#allocation7 + $0x1], 1 }
 0x77e   :  { %11807 = vsyncpa [#allocation10], 1 }
 0x77f   :  { %11808 = vsyncpa [#allocation13], 1 }
 0x780   :  { %11809 = vsyncpa [#allocation8], 1 }
 0x781   :  { %11811 = vsyncpa [#allocation8 + $0x1], 1 }

</bundles_post_ra>
